<compile_context>
chip_gen: v7x
topology: tpu7x:2x2x1
jax: 0.10.0
libtpu: 0.0.40
codegen_flags: <defaults>
</compile_context>

<pallas_src>
import functools
import numpy as np
import jax
import jax.numpy as jnp
from jax.experimental import pallas as pl
from jax.experimental.pallas import tpu as pltpu

BN_EPS = 1e-5
LANE = 128


def _pad_to_lane(c):
    return ((c + LANE - 1) // LANE) * LANE


_VMEM_LIMIT = None


def _vmem_limit_bytes():
    # Generation-aware VMEM budget: ~3/4 of physical capacity, floor 32 MiB, cap 100 MiB.
    global _VMEM_LIMIT
    if _VMEM_LIMIT is None:
        cap = 64 * 1024 * 1024
        try:
            info = pltpu.get_tpu_info()
            cap = int(getattr(info, "vmem_capacity_bytes", cap) or cap)
        except Exception:
            pass
        _VMEM_LIMIT = max(32 * 1024 * 1024, min((cap * 3) // 4, 100 * 1024 * 1024))
    return _VMEM_LIMIT


def _cparams(dims):
    return pltpu.CompilerParams(dimension_semantics=dims,
                                vmem_limit_bytes=_vmem_limit_bytes())


# --------------------------------------------------------------------------------------
# RegNet configuration math (ported from the PyTorch module)
# --------------------------------------------------------------------------------------

def quantize_float(f, q):
    return int(round(f / q) * q)


def adjust_widths_groups_comp(widths, bottle_ratios, groups):
    bottleneck_widths = [int(w * b) for w, b in zip(widths, bottle_ratios)]
    groups = [min(g, w_bot) for g, w_bot in zip(groups, bottleneck_widths)]
    bottleneck_widths = [quantize_float(w_bot, g) for w_bot, g in zip(bottleneck_widths, groups)]
    widths = [int(w_bot / b) for w_bot, b in zip(bottleneck_widths, bottle_ratios)]
    return widths, groups


def generate_regnet(width_slope, width_initial, width_mult, depth, q=8):
    assert width_slope >= 0 and width_initial > 0 and width_mult > 1 and width_initial % q == 0
    widths_cont = np.arange(depth) * width_slope + width_initial
    width_exps = np.round(np.log(widths_cont / width_initial) / np.log(width_mult))
    widths = width_initial * np.power(width_mult, width_exps)
    widths = np.round(np.divide(widths, q)) * q
    num_stages = len(np.unique(widths))
    widths = widths.astype(int).tolist()
    return widths, num_stages


def get_stage_params(cfg, default_stride=2, output_stride=32):
    widths, num_stages = generate_regnet(cfg['wa'], cfg['w0'], cfg['wm'], cfg['depth'])
    stage_widths, stage_depths = np.unique(widths, return_counts=True)
    stage_groups = [cfg['group_w']] * num_stages
    stage_br = [cfg['bottle_ratio']] * num_stages
    stage_strides, stage_dilations = [], []
    net_stride, dilation = 2, 1
    for _ in range(num_stages):
        if net_stride >= output_stride:
            dilation *= default_stride
            stride = 1
        else:
            stride = default_stride
            net_stride *= stride
        stage_strides.append(stride)
        stage_dilations.append(dilation)
    stage_widths, stage_groups = adjust_widths_groups_comp(
        [int(w) for w in stage_widths], stage_br, stage_groups)
    params = []
    for w, s, dil, d, br, gw in zip(stage_widths, stage_strides, stage_dilations,
                                    stage_depths.tolist(), stage_br, stage_groups):
        params.append(dict(out_chs=w, stride=s, dilation=dil, depth=int(d),
                           bottle_ratio=br, group_width=gw))
    return params


# --------------------------------------------------------------------------------------
# Stem: im2col (27 lanes, tiny) + one fused matmul + BN + ReLU kernel
# --------------------------------------------------------------------------------------

def _mm_bn_act_kernel(x_ref, w_ref, s_ref, b_ref, o_ref, *, act):
    y = jnp.dot(x_ref[...], w_ref[...], preferred_element_type=jnp.float32)
    y = y * s_ref[...] + b_ref[...]
    if act == 'relu':
        y = jnp.maximum(y, 0.0)
    o_ref[...] = y.astype(o_ref.dtype)


def matmul_bn_act(x, w, scale, bias, act='none'):
    M, K = x.shape
    _, N = w.shape
    tm = M
    for t in (256, 128, 64, 32, 16, 8):
        if M % t == 0:
            tm = t
            break
    return pl.pallas_call(
        functools.partial(_mm_bn_act_kernel, act=act),
        out_shape=jax.ShapeDtypeStruct((M, N), jnp.bfloat16),
        grid=(M // tm,),
        in_specs=[pl.BlockSpec((tm, K), lambda i: (i, 0)),
                  pl.BlockSpec((K, N), lambda i: (0, 0)),
                  pl.BlockSpec((1, N), lambda i: (0, 0)),
                  pl.BlockSpec((1, N), lambda i: (0, 0))],
        out_specs=pl.BlockSpec((tm, N), lambda i: (i, 0)),
        compiler_params=_cparams(("parallel",)),
    )(x, w, scale.reshape(1, N), bias.reshape(1, N))


def stem_forward(x, p):
    """3x3 stride-2 pad-1 conv + BN + ReLU.  The 9-tap im2col is only 9*Cin=27 lanes of the
    raw image, so the gather stays in XLA (one-time, negligible) and the conv is one kernel."""
    N, H, W, Cin = x.shape
    Ho, Wo = H // 2, W // 2
    xp = jnp.pad(x, ((0, 0), (1, 1), (1, 1), (0, 0)))
    taps = [xp[:, di:di + 2 * (Ho - 1) + 1:2, dj:dj + 2 * (Wo - 1) + 1:2, :]
            for di in range(3) for dj in range(3)]
    patches = jnp.concatenate(taps, axis=-1).reshape(N * Ho * Wo, 9 * Cin)
    y = matmul_bn_act(patches, p['w'], p['scale'], p['bias'], act='relu')
    return y.reshape(N, Ho, Wo, p['w'].shape[1])


# --------------------------------------------------------------------------------------
# Bottleneck kernel 1: convA (1x1+BN+ReLU) -> grouped convB (3x3+BN[+ReLU]) -> SE pool
# --------------------------------------------------------------------------------------

def _conv3x3_chunks(read_tap, wb_ref, sb_ref, bb_ref, m, n_chunks, ck, act):
    """9 tap matmuls + BN (+ReLU) per 128-lane chunk of the grouped conv."""
    outs = []
    for c in range(n_chunks):
        lo = c * ck
        acc = jnp.zeros((m, ck), jnp.float32)
        for di in range(3):
            for dj in range(3):
                patch = read_tap(di, dj, lo, ck)                     # (m, ck) bf16
                acc = acc + jnp.dot(patch, wb_ref[c, di * 3 + dj],
                                    preferred_element_type=jnp.float32)
        yc = acc * sb_ref[:, lo:lo + ck] + bb_ref[:, lo:lo + ck]
        if act == 'relu':
            yc = jnp.maximum(yc, 0.0)
        outs.append(yc)
    return outs


def _block_ab_s1_kernel(x_ref, wa_ref, sa_ref, ba_ref, wb_ref, sb_ref, bb_ref,
                        y_ref, pool_ref, pad_ref, *, h, w, n_chunks, ck, act_b):
    cin = x_ref.shape[-1]
    cb = wa_ref.shape[1]
    # convA (never written to HBM)
    a = jnp.dot(x_ref[0].reshape(h * w, cin), wa_ref[...],
                preferred_element_type=jnp.float32)
    a = jnp.maximum(a * sa_ref[...] + ba_ref[...], 0.0)
    # zero-padded convA output lives in a VMEM scratch (f32 -> clean masked stores)
    pad_ref[...] = jnp.zeros(pad_ref.shape, pad_ref.dtype)
    pad_ref[1:h + 1, 1:w + 1, :] = a.reshape(h, w, cb)
    inv_hw = 1.0 / float(h * w)

    def read_tap(di, dj, lo, ckk):
        win = pad_ref[di:di + h, dj:dj + w, lo:lo + ckk]
        return win.astype(jnp.bfloat16).reshape(h * w, ckk)

    outs = _conv3x3_chunks(read_tap, wb_ref, sb_ref, bb_ref, h * w, n_chunks, ck, act_b)
    for c, yc in enumerate(outs):
        lo = c * ck
        y_ref[0, :, lo:lo + ck] = yc.astype(y_ref.dtype)
        pool_ref[0, :, lo:lo + ck] = jnp.sum(yc, axis=0, keepdims=True) * inv_hw


def _block_ab_s2_kernel(xe_ref, xo_ref, wa_ref, sa_ref, ba_ref, wb_ref, sb_ref, bb_ref,
                        y_ref, pool_ref, pe_ref, po_ref, *, h, ho, wo, n_chunks, ck, act_b):
    cin = xe_ref.shape[-1]
    cb = wa_ref.shape[1]

    def conva(v):                                        # v: (h, wo, cin) bf16
        a = jnp.dot(v.reshape(h * wo, cin), wa_ref[...],
                    preferred_element_type=jnp.float32)
        a = jnp.maximum(a * sa_ref[...] + ba_ref[...], 0.0)
        return a.reshape(h, wo, cb)

    a_even = conva(xe_ref[0])        # convA on even input columns
    a_odd = conva(xo_ref[0])         # convA on odd input columns
    # Column-deinterleaved zero-padded planes of the convA output:
    #   pe[h', k] = padded[h', 2k]   (left pad column + odd convA columns)
    #   po[h', k] = padded[h', 2k+1] (even convA columns)
    pe_ref[...] = jnp.zeros(pe_ref.shape, pe_ref.dtype)
    po_ref[...] = jnp.zeros(po_ref.shape, po_ref.dtype)
    pe_ref[1:h + 1, 1:wo + 1, :] = a_odd
    po_ref[1:h + 1, :, :] = a_even
    inv_hw = 1.0 / float(ho * wo)

    def read_tap(di, dj, lo, ckk):
        if dj == 1:
            raw = po_ref[di:di + 2 * ho, 0:wo, lo:lo + ckk]
        else:
            wlo = 0 if dj == 0 else 1
            raw = pe_ref[di:di + 2 * ho, wlo:wlo + wo, lo:lo + ckk]
        win = raw.reshape(ho, 2, wo, ckk)[:, 0]          # stride-2 row decimation
        return win.astype(jnp.bfloat16).reshape(ho * wo, ckk)

    outs = _conv3x3_chunks(read_tap, wb_ref, sb_ref, bb_ref, ho * wo, n_chunks, ck, act_b)
    for c, yc in enumerate(outs):
        lo = c * ck
        y_ref[0, :, lo:lo + ck] = yc.astype(y_ref.dtype)
        pool_ref[0, :, lo:lo + ck] = jnp.sum(yc, axis=0, keepdims=True) * inv_hw


def block_convA_convB(x, blk):
    N, H, W, Cin = x.shape
    stride = blk['stride']
    cb = blk['convA']['w'].shape[1]
    n_chunks, ck = blk['convB']['n_chunks'], blk['convB']['ck']
    # Reference quirk: convB is built after cargs['act_layer'] = None when a projection
    # shortcut exists, so it has NO ReLU in that case (matches the PyTorch module).
    act_b = 'none' if blk['has_downsample'] else 'relu'
    sa = blk['convA']['scale'].reshape(1, cb)
    ba = blk['convA']['bias'].reshape(1, cb)
    sb = blk['convB']['scale'].reshape(1, cb)
    bb = blk['convB']['bias'].reshape(1, cb)
    w_specs = [
        pl.BlockSpec((Cin, cb), lambda n: (0, 0)),
        pl.BlockSpec((1, cb), lambda n: (0, 0)),
        pl.BlockSpec((1, cb), lambda n: (0, 0)),
        pl.BlockSpec((n_chunks, 9, ck, ck), lambda n: (0, 0, 0, 0)),
        pl.BlockSpec((1, cb), lambda n: (0, 0)),
        pl.BlockSpec((1, cb), lambda n: (0, 0)),
    ]
    if stride == 1:
        Ho, Wo = H, W
        kern = functools.partial(_block_ab_s1_kernel, h=H, w=W,
                                 n_chunks=n_chunks, ck=ck, act_b=act_b)
        in_specs = [pl.BlockSpec((1, H, W, Cin), lambda n: (n, 0, 0, 0))] + w_specs
        scratch = [pltpu.VMEM((H + 2, W + 2, cb), jnp.float32)]
        inputs = (x,)
    else:
        assert stride == 2 and H % 2 == 0 and W % 2 == 0
        Ho, Wo = H // 2, W // 2
        kern = functools.partial(_block_ab_s2_kernel, h=H, ho=Ho, wo=Wo,
                                 n_chunks=n_chunks, ck=ck, act_b=act_b)
        in_specs = ([pl.BlockSpec((1, H, Wo, Cin), lambda n: (n, 0, 0, 0)),
                     pl.BlockSpec((1, H, Wo, Cin), lambda n: (n, 0, 0, 0))] + w_specs)
        scratch = [pltpu.VMEM((H + 2, Wo + 1, cb), jnp.float32),
                   pltpu.VMEM((H + 2, Wo, cb), jnp.float32)]
        inputs = (x[:, :, 0::2, :], x[:, :, 1::2, :])    # same total bytes as x
    y, pool = pl.pallas_call(
        kern,
        out_shape=(jax.ShapeDtypeStruct((N, Ho * Wo, cb), jnp.bfloat16),
                   jax.ShapeDtypeStruct((N, 1, cb), jnp.float32)),
        grid=(N,),
        in_specs=in_specs,
        out_specs=(pl.BlockSpec((1, Ho * Wo, cb), lambda n: (n, 0, 0)),
                   pl.BlockSpec((1, 1, cb), lambda n: (n, 0, 0))),
        scratch_shapes=scratch,
        compiler_params=_cparams(("parallel",)),
    )(*inputs, blk['convA']['w'], sa, ba, blk['convB']['w'], sb, bb)
    return y, pool, Ho, Wo


# --------------------------------------------------------------------------------------
# Bottleneck kernel 2: SE FCs + bf16 gating + convC (1x1+BN) + residual (+downsample) + ReLU
# --------------------------------------------------------------------------------------

def _se_gate(pool_ref, w1_ref, b1_ref, w2_ref, b2_ref):
    p = pool_ref[0]                                                  # (1, Cb) f32
    hv = jnp.maximum(jnp.dot(p, w1_ref[...],
                             preferred_element_type=jnp.float32) + b1_ref[...], 0.0)
    z = jnp.dot(hv, w2_ref[...], preferred_element_type=jnp.float32) + b2_ref[...]
    return (1.0 / (1.0 + jnp.exp(-z))).astype(jnp.bfloat16)         # (1, Cb) bf16


def _convc_se_res_kernel(y_ref, pool_ref, w1_ref, b1_ref, w2_ref, b2_ref,
                         wc_ref, sc_ref, bc_ref, res_ref, o_ref):
    gate = _se_gate(pool_ref, w1_ref, b1_ref, w2_ref, b2_ref)
    xg = y_ref[0] * gate                                             # bf16 gating
    acc = jnp.dot(xg, wc_ref[...], preferred_element_type=jnp.float32)
    out = acc * sc_ref[...] + bc_ref[...] + res_ref[0].astype(jnp.float32)
    o_ref[0] = jnp.maximum(out, 0.0).astype(o_ref.dtype)


def _convc_se_res_ds_kernel(y_ref, pool_ref, w1_ref, b1_ref, w2_ref, b2_ref,
                            wc_ref, sc_ref, bc_ref, res_ref, wd_ref, sd_ref, bd_ref, o_ref):
    gate = _se_gate(pool_ref, w1_ref, b1_ref, w2_ref, b2_ref)
    xg = y_ref[0] * gate
    acc = jnp.dot(xg, wc_ref[...], preferred_element_type=jnp.float32)
    out = acc * sc_ref[...] + bc_ref[...]
    short = jnp.dot(res_ref[0], wd_ref[...], preferred_element_type=jnp.float32)
    short = short * sd_ref[...] + bd_ref[...]
    o_ref[0] = jnp.maximum(out + short, 0.0).astype(o_ref.dtype)


def block_convC(y, pool, res, blk):
    N, HW, cb = y.shape
    cout = blk['convC']['w'].shape[1]
    se = blk['se']
    r = se['w1'].shape[1]
    cres = res.shape[-1]
    args = [y, pool,
            se['w1'], se['b1'].reshape(1, r), se['w2'], se['b2'].reshape(1, cb),
            blk['convC']['w'], blk['convC']['scale'].reshape(1, cout),
            blk['convC']['bias'].reshape(1, cout), res]
    in_specs = [
        pl.BlockSpec((1, HW, cb), lambda n: (n, 0, 0)),
        pl.BlockSpec((1, 1, cb), lambda n: (n, 0, 0)),
        pl.BlockSpec((cb, r), lambda n: (0, 0)),
        pl.BlockSpec((1, r), lambda n: (0, 0)),
        pl.BlockSpec((r, cb), lambda n: (0, 0)),
        pl.BlockSpec((1, cb), lambda n: (0, 0)),
        pl.BlockSpec((cb, cout), lambda n: (0, 0)),
        pl.BlockSpec((1, cout), lambda n: (0, 0)),
        pl.BlockSpec((1, cout), lambda n: (0, 0)),
        pl.BlockSpec((1, HW, cres), lambda n: (n, 0, 0)),
    ]
    if blk['has_downsample']:
        ds = blk['downsample']
        args += [ds['w'], ds['scale'].reshape(1, cout), ds['bias'].reshape(1, cout)]
        in_specs += [pl.BlockSpec((cres, cout), lambda n: (0, 0)),
                     pl.BlockSpec((1, cout), lambda n: (0, 0)),
                     pl.BlockSpec((1, cout), lambda n: (0, 0))]
        kern = _convc_se_res_ds_kernel
    else:
        kern = _convc_se_res_kernel
    return pl.pallas_call(
        kern,
        out_shape=jax.ShapeDtypeStruct((N, HW, cout), jnp.bfloat16),
        grid=(N,),
        in_specs=in_specs,
        out_specs=pl.BlockSpec((1, HW, cout), lambda n: (n, 0, 0)),
        compiler_params=_cparams(("parallel",)),
    )(*args)


# --------------------------------------------------------------------------------------
# Head: global average pool fused into the classifier matmul (grid over batch)
# --------------------------------------------------------------------------------------

def _gap_head_kernel(x_ref, w_ref, b_ref, o_ref):
    pooled = jnp.mean(x_ref[0].astype(jnp.float32), axis=0, keepdims=True)
    o_ref[0] = jnp.dot(pooled.astype(jnp.bfloat16), w_ref[...],
                       preferred_element_type=jnp.float32) + b_ref[...]


def gap_head(x, head):
    N, H, W, C = x.shape
    ncp = head['w'].shape[1]
    out = pl.pallas_call(
        _gap_head_kernel,
        out_shape=jax.ShapeDtypeStruct((N, 1, ncp), jnp.float32),
        grid=(N,),
        in_specs=[pl.BlockSpec((1, H * W, C), lambda n: (n, 0, 0)),
                  pl.BlockSpec((C, ncp), lambda n: (0, 0)),
                  pl.BlockSpec((1, ncp), lambda n: (0, 0))],
        out_specs=pl.BlockSpec((1, 1, ncp), lambda n: (n, 0, 0)),
        compiler_params=_cparams(("parallel",)),
    )(x.reshape(N, H * W, C), head['w'], head['b'].reshape(1, ncp))
    return out.reshape(N, ncp)


# --------------------------------------------------------------------------------------
# Parameter construction (deterministic, in-script, lane-padded; padded entries are zero)
# --------------------------------------------------------------------------------------

def kaiming_conv(key, cout, cin_per_group, k):
    fan_out = cout * k * k
    std = float(np.sqrt(2.0 / fan_out))
    return jax.random.normal(key, (cout, cin_per_group, k, k), jnp.float32) * std


def _bn_affine(cout_p):
    # Inference-mode BN folded as affine (gamma=1, beta=0, running mean=0, var=1).
    gamma = jnp.ones((cout_p,), jnp.float32)
    beta = jnp.zeros((cout_p,), jnp.float32)
    mean = jnp.zeros((cout_p,), jnp.float32)
    var = jnp.ones((cout_p,), jnp.float32)
    scale = gamma / jnp.sqrt(var + BN_EPS)
    bias = beta - mean * scale
    return scale, bias


def make_conv1x1(key, cin, cout):
    cin_p, cout_p = _pad_to_lane(cin), _pad_to_lane(cout)
    w = kaiming_conv(key, cout, cin, 1).reshape(cout, cin)
    wm = jnp.zeros((cin_p, cout_p), jnp.float32).at[:cin, :cout].set(w.T)
    scale, bias = _bn_affine(cout_p)
    return dict(w=wm.astype(jnp.bfloat16), scale=scale, bias=bias)


def make_stem3x3(key, cin, cout):
    cout_p = _pad_to_lane(cout)
    w = kaiming_conv(key, cout, cin, 3)                       # (cout, cin, 3, 3)
    wt = jnp.transpose(w, (2, 3, 1, 0)).reshape(9 * cin, cout)  # K = (di*3+dj)*cin + ci
    wp = jnp.zeros((9 * cin, cout_p), jnp.float32).at[:, :cout].set(wt)
    scale, bias = _bn_affine(cout_p)
    return dict(w=wp.astype(jnp.bfloat16), scale=scale, bias=bias)


def make_grouped_conv3x3(key, chs, groups):
    """Grouped 3x3 stored per 128-lane chunk as dense block-diagonal (chunk, 9, ck, ck):
    group_width divides 128 so groups never straddle a chunk -> each 128-lane output span
    only reads its matching 128-lane input span (k chunks cost k, not k^2, tap matmuls)."""
    chs_p = _pad_to_lane(chs)
    cg = chs // groups
    ck = LANE if (LANE % cg == 0) else chs_p
    n_chunks = chs_p // ck
    w = np.asarray(kaiming_conv(key, chs, cg, 3))             # (chs, cg, 3, 3)
    wfull = np.zeros((n_chunks, 9, ck, ck), np.float32)
    for co in range(chs):
        g = co // cg
        cnk = co // ck
        for t in range(cg):
            ci = g * cg + t
            assert ci // ck == cnk
            wfull[cnk, :, ci - cnk * ck, co - cnk * ck] = w[co, t].reshape(9)
    scale, bias = _bn_affine(chs_p)
    return dict(w=jnp.asarray(wfull, jnp.bfloat16), scale=scale, bias=bias,
                n_chunks=n_chunks, ck=ck)


def make_se(key, chs, se_chs):
    # SE reduction width padded to one lane span so both FCs are lane-dense MXU dots.
    # Padded gates evaluate to sigmoid(0)=0.5 but multiply identically-zero padded lanes,
    # so nothing leaks (gated activations are never emitted to HBM on their own).
    chs_p = _pad_to_lane(chs)
    r_p = _pad_to_lane(se_chs)
    k1, k2, k3, k4 = jax.random.split(key, 4)
    w1 = kaiming_conv(k1, se_chs, chs, 1).reshape(se_chs, chs)
    w2 = kaiming_conv(k2, chs, se_chs, 1).reshape(chs, se_chs)
    w1p = jnp.zeros((chs_p, r_p), jnp.float32).at[:chs, :se_chs].set(w1.T)
    w2p = jnp.zeros((r_p, chs_p), jnp.float32).at[:se_chs, :chs].set(w2.T)
    b1 = jnp.zeros((r_p,), jnp.float32).at[:se_chs].set(
        jax.random.uniform(k3, (se_chs,), jnp.float32, minval=-0.1, maxval=0.1))
    b2 = jnp.zeros((chs_p,), jnp.float32).at[:chs].set(
        jax.random.uniform(k4, (chs,), jnp.float32, minval=-0.1, maxval=0.1))
    return dict(w1=w1p, b1=b1, w2=w2p, b2=b2)


def make_head(key, cin, num_classes):
    cin_p, nc_p = _pad_to_lane(cin), _pad_to_lane(num_classes)
    w = jax.random.normal(key, (cin, num_classes), jnp.float32) * 0.01
    wp = jnp.zeros((cin_p, nc_p), jnp.float32).at[:cin, :num_classes].set(w)
    return dict(w=wp.astype(jnp.bfloat16), b=jnp.zeros((nc_p,), jnp.float32))


def build_params(key, cfg, in_chans, num_classes, output_stride=32):
    keys = iter(jax.random.split(key, 256))
    params = {'num_classes': num_classes}
    stem_w = cfg['stem_width']
    params['stem'] = make_stem3x3(next(keys), in_chans, stem_w)

    stage_params = get_stage_params(cfg, output_stride=output_stride)
    prev = stem_w
    stages = []
    for sp in stage_params:
        out_chs, stride, dilation = sp['out_chs'], sp['stride'], sp['dilation']
        depth, br, gw = sp['depth'], sp['bottle_ratio'], sp['group_width']
        first_dilation = 1 if dilation in (1, 2) else 2
        blocks = []
        for i in range(depth):
            b_stride = stride if i == 0 else 1
            b_in = prev if i == 0 else out_chs
            b_dil = first_dilation if i == 0 else dilation
            assert b_dil == 1  # TODO(synk): dilation > 1 never occurs for output_stride=32
            bott = int(round(out_chs * br))
            groups = bott // gw
            has_ds = (b_in != out_chs) or (b_stride != 1)
            se_chs = int(round(b_in * cfg['se_ratio']))
            blk = dict(
                stride=b_stride, has_downsample=has_ds,
                convA=make_conv1x1(next(keys), b_in, bott),
                convB=make_grouped_conv3x3(next(keys), bott, groups),
                convC=make_conv1x1(next(keys), bott, out_chs),
                se=make_se(next(keys), bott, se_chs),
            )
            if has_ds:
                blk['downsample'] = make_conv1x1(next(keys), b_in, out_chs)
            blocks.append(blk)
        stages.append(blocks)
        prev = out_chs
    params['stages'] = stages
    params['head'] = make_head(next(keys), prev, num_classes)
    return params


# --------------------------------------------------------------------------------------
# Forward pass
# --------------------------------------------------------------------------------------

def bottleneck_forward(x, blk):
    N, H, W, Cin = x.shape
    s = blk['stride']
    y, pool, Ho, Wo = block_convA_convB(x, blk)          # K1: convA + convB + SE pool
    if blk['has_downsample']:
        res = x[:, ::s, ::s, :].reshape(N, Ho * Wo, Cin)
    else:
        res = x.reshape(N, Ho * Wo, Cin)                 # Cin == Cout here
    out = block_convC(y, pool, res, blk)                 # K2: SE FCs + gate + convC + res + ReLU
    return out.reshape(N, Ho, Wo, out.shape[-1])


def regnet_forward(params, x_nchw):
    # PyTorch NCHW input -> NHWC bf16 internally
    x = jnp.transpose(x_nchw, (0, 2, 3, 1)).astype(jnp.bfloat16)
    x = stem_forward(x, params['stem'])
    for blocks in params['stages']:
        for blk in blocks:
            x = bottleneck_forward(x, blk)
    logits = gap_head(x, params['head'])
    return logits[:, :params['num_classes']]


# --------------------------------------------------------------------------------------

if __name__ == "__main__":
    cfg = dict(stem_width=16, wa=24.0, w0=24, wm=2.5, depth=4,
               group_w=8, bottle_ratio=1.0, se_ratio=0.25)
    key = jax.random.PRNGKey(0)
    kp, kx = jax.random.split(key)
    params = build_params(kp, cfg, in_chans=3, num_classes=10)

    x = jax.random.normal(kx, (2, 3, 32, 32), jnp.float32)   # NCHW, like the PyTorch module

    run = jax.jit(lambda inp: regnet_forward(params, inp))
    logits = run(x)
    jax.block_until_ready(logits)
    assert logits.shape == (2, 10), logits.shape
    assert bool(jnp.all(jnp.isfinite(logits)))
    print("KERNEL_OK")
</pallas_src>

<mosaic_0001>
module attributes {stable_mosaic.version = 11 : i64} {
  func.func @_mm_bn_act_kernel(%arg0: i32, %arg1: memref<256x27xbf16, #tpu.memory_space<vmem>>, %arg2: memref<27x128xbf16, #tpu.memory_space<vmem>>, %arg3: memref<1x128xf32, #tpu.memory_space<vmem>>, %arg4: memref<1x128xf32, #tpu.memory_space<vmem>>, %arg5: memref<256x128xbf16, #tpu.memory_space<vmem>>) attributes {dimension_semantics = [#tpu.dimension_semantics<parallel>], iteration_bounds = array<i64: 2>, scalar_prefetch = 0 : i64, scratch_operands = 0 : i64, tpu.core_type = #tpu.core_type<tc>, window_params = [{transform_indices = @transform_0, window_bounds = array<i64: 256, 27>}, {pipeline_mode = #tpu.pipeline_mode<synchronous>, transform_indices = @transform_1, window_bounds = array<i64: 27, 128>}, {pipeline_mode = #tpu.pipeline_mode<synchronous>, transform_indices = @transform_2, window_bounds = array<i64: 1, 128>}, {pipeline_mode = #tpu.pipeline_mode<synchronous>, transform_indices = @transform_3, window_bounds = array<i64: 1, 128>}, {transform_indices = @transform_4, window_bounds = array<i64: 256, 128>}]} {
    %c0 = arith.constant 0 : index
    %c0_0 = arith.constant 0 : index
    %0 = vector.load %arg1[%c0, %c0_0] : memref<256x27xbf16, #tpu.memory_space<vmem>>, vector<256x27xbf16>
    %c0_1 = arith.constant 0 : index
    %c0_2 = arith.constant 0 : index
    %1 = vector.load %arg2[%c0_1, %c0_2] : memref<27x128xbf16, #tpu.memory_space<vmem>>, vector<27x128xbf16>
    %cst = arith.constant dense<0.000000e+00> : vector<256x128xf32>
    %2 = tpu.matmul %0, %1, %cst {dimension_numbers = #tpu.dot_dimension_numbers<[1], [0], [0], [1], [0, 0, 1, 1], [], []>} : vector<256x27xbf16>, vector<27x128xbf16>, vector<256x128xf32> -> vector<256x128xf32>
    %c0_3 = arith.constant 0 : index
    %c0_4 = arith.constant 0 : index
    %3 = vector.load %arg3[%c0_3, %c0_4] : memref<1x128xf32, #tpu.memory_space<vmem>>, vector<1x128xf32>
    %4 = vector.broadcast %3 : vector<1x128xf32> to vector<256x128xf32>
    %5 = arith.mulf %2, %4 : vector<256x128xf32>
    %c0_5 = arith.constant 0 : index
    %c0_6 = arith.constant 0 : index
    %6 = vector.load %arg4[%c0_5, %c0_6] : memref<1x128xf32, #tpu.memory_space<vmem>>, vector<1x128xf32>
    %7 = vector.broadcast %6 : vector<1x128xf32> to vector<256x128xf32>
    %8 = arith.addf %5, %7 : vector<256x128xf32>
    %cst_7 = arith.constant 0.000000e+00 : f32
    %9 = vector.broadcast %cst_7 : f32 to vector<256x128xf32>
    %10 = arith.maximumf %8, %9 : vector<256x128xf32>
    %11 = arith.truncf %10 : vector<256x128xf32> to vector<256x128xbf16>
    %c0_8 = arith.constant 0 : index
    %c0_9 = arith.constant 0 : index
    %12 = vector.load %arg5[%c0_8, %c0_9] : memref<256x128xbf16, #tpu.memory_space<vmem>>, vector<256x128xbf16>
    tpu.vector_store %arg5[%c0_8, %c0_9], %11 {strides = array<i32>} : memref<256x128xbf16, #tpu.memory_space<vmem>>, vector<256x128xbf16>,
    return
  }
  func.func @transform_0(%arg0: i32) -> (i32, i32) {
    %c0_i32 = arith.constant 0 : i32
    %c0_i32_0 = arith.constant 0 : i32
    return %arg0, %c0_i32 : i32, i32
  }
  func.func @transform_1(%arg0: i32) -> (i32, i32) {
    %c0_i32 = arith.constant 0 : i32
    %c0_i32_0 = arith.constant 0 : i32
    %c0_i32_1 = arith.constant 0 : i32
    return %c0_i32, %c0_i32_0 : i32, i32
  }
  func.func @transform_2(%arg0: i32) -> (i32, i32) {
    %c0_i32 = arith.constant 0 : i32
    %c0_i32_0 = arith.constant 0 : i32
    %c0_i32_1 = arith.constant 0 : i32
    return %c0_i32, %c0_i32_0 : i32, i32
  }
  func.func @transform_3(%arg0: i32) -> (i32, i32) {
    %c0_i32 = arith.constant 0 : i32
    %c0_i32_0 = arith.constant 0 : i32
    %c0_i32_1 = arith.constant 0 : i32
    return %c0_i32, %c0_i32_0 : i32, i32
  }
  func.func @transform_4(%arg0: i32) -> (i32, i32) {
    %c0_i32 = arith.constant 0 : i32
    %c0_i32_0 = arith.constant 0 : i32
    return %arg0, %c0_i32 : i32, i32
  }
}

module attributes {stable_mosaic.version = 11 : i64} {
  func.func @_block_ab_s2_kernel(%arg0: i32, %arg1: memref<1x16x8x128xbf16, #tpu.memory_space<vmem>>, %arg2: memref<1x16x8x128xbf16, #tpu.memory_space<vmem>>, %arg3: memref<128x128xbf16, #tpu.memory_space<vmem>>, %arg4: memref<1x128xf32, #tpu.memory_space<vmem>>, %arg5: memref<1x128xf32, #tpu.memory_space<vmem>>, %arg6: memref<1x9x128x128xbf16, #tpu.memory_space<vmem>>, %arg7: memref<1x128xf32, #tpu.memory_space<vmem>>, %arg8: memref<1x128xf32, #tpu.memory_space<vmem>>, %arg9: memref<1x64x128xbf16, #tpu.memory_space<vmem>>, %arg10: memref<1x1x128xf32, #tpu.memory_space<vmem>>, %arg11: memref<18x9x128xf32, #tpu.memory_space<vmem>>, %arg12: memref<18x8x128xf32, #tpu.memory_space<vmem>>) attributes {dimension_semantics = [#tpu.dimension_semantics<parallel>], iteration_bounds = array<i64: 2>, scalar_prefetch = 0 : i64, scratch_operands = 2 : i64, tpu.core_type = #tpu.core_type<tc>, window_params = [{transform_indices = @transform_0, window_bounds = array<i64: 1, 16, 8, 128>}, {transform_indices = @transform_1, window_bounds = array<i64: 1, 16, 8, 128>}, {pipeline_mode = #tpu.pipeline_mode<synchronous>, transform_indices = @transform_2, window_bounds = array<i64: 128, 128>}, {pipeline_mode = #tpu.pipeline_mode<synchronous>, transform_indices = @transform_3, window_bounds = array<i64: 1, 128>}, {pipeline_mode = #tpu.pipeline_mode<synchronous>, transform_indices = @transform_4, window_bounds = array<i64: 1, 128>}, {pipeline_mode = #tpu.pipeline_mode<synchronous>, transform_indices = @transform_5, window_bounds = array<i64: 1, 9, 128, 128>}, {pipeline_mode = #tpu.pipeline_mode<synchronous>, transform_indices = @transform_6, window_bounds = array<i64: 1, 128>}, {pipeline_mode = #tpu.pipeline_mode<synchronous>, transform_indices = @transform_7, window_bounds = array<i64: 1, 128>}, {transform_indices = @transform_8, window_bounds = array<i64: 1, 64, 128>}, {transform_indices = @transform_9, window_bounds = array<i64: 1, 1, 128>}]} {
    %c0 = arith.constant 0 : index
    %c0_0 = arith.constant 0 : index
    %c0_1 = arith.constant 0 : index
    %c0_2 = arith.constant 0 : index
    %0 = vector.load %arg1[%c0, %c0_0, %c0_1, %c0_2] : memref<1x16x8x128xbf16, #tpu.memory_space<vmem>>, vector<1x16x8x128xbf16>
    %1 = vector.shape_cast %0 : vector<1x16x8x128xbf16> to vector<16x8x128xbf16>
    %2 = vector.shape_cast %1 : vector<16x8x128xbf16> to vector<128x128xbf16>
    %c0_3 = arith.constant 0 : index
    %c0_4 = arith.constant 0 : index
    %3 = vector.load %arg3[%c0_3, %c0_4] : memref<128x128xbf16, #tpu.memory_space<vmem>>, vector<128x128xbf16>
    %cst = arith.constant dense<0.000000e+00> : vector<128x128xf32>
    %4 = tpu.matmul %2, %3, %cst {dimension_numbers = #tpu.dot_dimension_numbers<[1], [0], [0], [1], [0, 0, 1, 1], [], []>} : vector<128x128xbf16>, vector<128x128xbf16>, vector<128x128xf32> -> vector<128x128xf32>
    %c0_5 = arith.constant 0 : index
    %c0_6 = arith.constant 0 : index
    %5 = vector.load %arg4[%c0_5, %c0_6] : memref<1x128xf32, #tpu.memory_space<vmem>>, vector<1x128xf32>
    %6 = vector.broadcast %5 : vector<1x128xf32> to vector<128x128xf32>
    %7 = arith.mulf %4, %6 : vector<128x128xf32>
    %c0_7 = arith.constant 0 : index
    %c0_8 = arith.constant 0 : index
    %8 = vector.load %arg5[%c0_7, %c0_8] : memref<1x128xf32, #tpu.memory_space<vmem>>, vector<1x128xf32>
    %9 = vector.broadcast %8 : vector<1x128xf32> to vector<128x128xf32>
    %10 = arith.addf %7, %9 : vector<128x128xf32>
    %cst_9 = arith.constant 0.000000e+00 : f32
    %11 = vector.broadcast %cst_9 : f32 to vector<128x128xf32>
    %12 = arith.maximumf %10, %11 : vector<128x128xf32>
    %13 = vector.shape_cast %12 : vector<128x128xf32> to vector<16x8x128xf32>
    %c0_10 = arith.constant 0 : index
    %c0_11 = arith.constant 0 : index
    %c0_12 = arith.constant 0 : index
    %c0_13 = arith.constant 0 : index
    %14 = vector.load %arg2[%c0_10, %c0_11, %c0_12, %c0_13] : memref<1x16x8x128xbf16, #tpu.memory_space<vmem>>, vector<1x16x8x128xbf16>
    %15 = vector.shape_cast %14 : vector<1x16x8x128xbf16> to vector<16x8x128xbf16>
    %16 = vector.shape_cast %15 : vector<16x8x128xbf16> to vector<128x128xbf16>
    %c0_14 = arith.constant 0 : index
    %c0_15 = arith.constant 0 : index
    %17 = vector.load %arg3[%c0_14, %c0_15] : memref<128x128xbf16, #tpu.memory_space<vmem>>, vector<128x128xbf16>
    %cst_16 = arith.constant dense<0.000000e+00> : vector<128x128xf32>
    %18 = tpu.matmul %16, %17, %cst_16 {dimension_numbers = #tpu.dot_dimension_numbers<[1], [0], [0], [1], [0, 0, 1, 1], [], []>} : vector<128x128xbf16>, vector<128x128xbf16>, vector<128x128xf32> -> vector<128x128xf32>
    %c0_17 = arith.constant 0 : index
    %c0_18 = arith.constant 0 : index
    %19 = vector.load %arg4[%c0_17, %c0_18] : memref<1x128xf32, #tpu.memory_space<vmem>>, vector<1x128xf32>
    %20 = vector.broadcast %19 : vector<1x128xf32> to vector<128x128xf32>
    %21 = arith.mulf %18, %20 : vector<128x128xf32>
    %c0_19 = arith.constant 0 : index
    %c0_20 = arith.constant 0 : index
    %22 = vector.load %arg5[%c0_19, %c0_20] : memref<1x128xf32, #tpu.memory_space<vmem>>, vector<1x128xf32>
    %23 = vector.broadcast %22 : vector<1x128xf32> to vector<128x128xf32>
    %24 = arith.addf %21, %23 : vector<128x128xf32>
    %cst_21 = arith.constant 0.000000e+00 : f32
    %25 = vector.broadcast %cst_21 : f32 to vector<128x128xf32>
    %26 = arith.maximumf %24, %25 : vector<128x128xf32>
    %27 = vector.shape_cast %26 : vector<128x128xf32> to vector<16x8x128xf32>
    %cst_22 = arith.constant 0.000000e+00 : f32
    %28 = vector.broadcast %cst_22 : f32 to vector<18x9x128xf32>
    %c0_23 = arith.constant 0 : index
    %c0_24 = arith.constant 0 : index
    %c0_25 = arith.constant 0 : index
    %29 = vector.load %arg11[%c0_23, %c0_24, %c0_25] : memref<18x9x128xf32, #tpu.memory_space<vmem>>, vector<18x9x128xf32>
    tpu.vector_store %arg11[%c0_23, %c0_24, %c0_25], %28 {strides = array<i32>} : memref<18x9x128xf32, #tpu.memory_space<vmem>>, vector<18x9x128xf32>,
    %cst_26 = arith.constant 0.000000e+00 : f32
    %30 = vector.broadcast %cst_26 : f32 to vector<18x8x128xf32>
    %c0_27 = arith.constant 0 : index
    %c0_28 = arith.constant 0 : index
    %c0_29 = arith.constant 0 : index
    %31 = vector.load %arg12[%c0_27, %c0_28, %c0_29] : memref<18x8x128xf32, #tpu.memory_space<vmem>>, vector<18x8x128xf32>
    tpu.vector_store %arg12[%c0_27, %c0_28, %c0_29], %30 {strides = array<i32>} : memref<18x8x128xf32, #tpu.memory_space<vmem>>, vector<18x8x128xf32>,
    %c1 = arith.constant 1 : index
    %c1_30 = arith.constant 1 : index
    %c0_31 = arith.constant 0 : index
    %32 = vector.load %arg11[%c1, %c1_30, %c0_31] : memref<18x9x128xf32, #tpu.memory_space<vmem>>, vector<16x8x128xf32>
    tpu.vector_store %arg11[%c1, %c1_30, %c0_31], %27 {strides = array<i32>} : memref<18x9x128xf32, #tpu.memory_space<vmem>>, vector<16x8x128xf32>,
    %c1_32 = arith.constant 1 : index
    %c0_33 = arith.constant 0 : index
    %c0_34 = arith.constant 0 : index
    %33 = vector.load %arg12[%c1_32, %c0_33, %c0_34] : memref<18x8x128xf32, #tpu.memory_space<vmem>>, vector<16x8x128xf32>
    tpu.vector_store %arg12[%c1_32, %c0_33, %c0_34], %13 {strides = array<i32>} : memref<18x8x128xf32, #tpu.memory_space<vmem>>, vector<16x8x128xf32>,
    %cst_35 = arith.constant 0.000000e+00 : f32
    %34 = vector.broadcast %cst_35 : f32 to vector<64x128xf32>
    %c0_36 = arith.constant 0 : index
    %c0_37 = arith.constant 0 : index
    %c0_38 = arith.constant 0 : index
    %35 = vector.load %arg11[%c0_36, %c0_37, %c0_38] : memref<18x9x128xf32, #tpu.memory_space<vmem>>, vector<16x8x128xf32>
    %36 = vector.shape_cast %35 : vector<16x8x128xf32> to vector<8x2x8x128xf32>
    %37 = vector.extract_strided_slice %36 {offsets = [0, 0, 0, 0], sizes = [8, 1, 8, 128], strides = [1, 1, 1, 1]} : vector<8x2x8x128xf32> to vector<8x1x8x128xf32>
    %38 = vector.shape_cast %37 : vector<8x1x8x128xf32> to vector<8x8x128xf32>
    %39 = arith.truncf %38 : vector<8x8x128xf32> to vector<8x8x128xbf16>
    %40 = vector.shape_cast %39 : vector<8x8x128xbf16> to vector<64x128xbf16>
    %c0_39 = arith.constant 0 : index
    %c0_40 = arith.constant 0 : index
    %c0_41 = arith.constant 0 : index
    %c0_42 = arith.constant 0 : index
    %41 = vector.load %arg6[%c0_39, %c0_40, %c0_41, %c0_42] : memref<1x9x128x128xbf16, #tpu.memory_space<vmem>>, vector<1x1x128x128xbf16>
    %42 = vector.shape_cast %41 : vector<1x1x128x128xbf16> to vector<128x128xbf16>
    %cst_43 = arith.constant dense<0.000000e+00> : vector<64x128xf32>
    %43 = tpu.matmul %40, %42, %cst_43 {dimension_numbers = #tpu.dot_dimension_numbers<[1], [0], [0], [1], [0, 0, 1, 1], [], []>} : vector<64x128xbf16>, vector<128x128xbf16>, vector<64x128xf32> -> vector<64x128xf32>
    %44 = arith.addf %34, %43 : vector<64x128xf32>
    %c0_44 = arith.constant 0 : index
    %c0_45 = arith.constant 0 : index
    %c0_46 = arith.constant 0 : index
    %45 = vector.load %arg12[%c0_44, %c0_45, %c0_46] : memref<18x8x128xf32, #tpu.memory_space<vmem>>, vector<16x8x128xf32>
    %46 = vector.shape_cast %45 : vector<16x8x128xf32> to vector<8x2x8x128xf32>
    %47 = vector.extract_strided_slice %46 {offsets = [0, 0, 0, 0], sizes = [8, 1, 8, 128], strides = [1, 1, 1, 1]} : vector<8x2x8x128xf32> to vector<8x1x8x128xf32>
    %48 = vector.shape_cast %47 : vector<8x1x8x128xf32> to vector<8x8x128xf32>
    %49 = arith.truncf %48 : vector<8x8x128xf32> to vector<8x8x128xbf16>
    %50 = vector.shape_cast %49 : vector<8x8x128xbf16> to vector<64x128xbf16>
    %c0_47 = arith.constant 0 : index
    %c1_48 = arith.constant 1 : index
    %c0_49 = arith.constant 0 : index
    %c0_50 = arith.constant 0 : index
    %51 = vector.load %arg6[%c0_47, %c1_48, %c0_49, %c0_50] : memref<1x9x128x128xbf16, #tpu.memory_space<vmem>>, vector<1x1x128x128xbf16>
    %52 = vector.shape_cast %51 : vector<1x1x128x128xbf16> to vector<128x128xbf16>
    %cst_51 = arith.constant dense<0.000000e+00> : vector<64x128xf32>
    %53 = tpu.matmul %50, %52, %cst_51 {dimension_numbers = #tpu.dot_dimension_numbers<[1], [0], [0], [1], [0, 0, 1, 1], [], []>} : vector<64x128xbf16>, vector<128x128xbf16>, vector<64x128xf32> -> vector<64x128xf32>
    %54 = arith.addf %44, %53 : vector<64x128xf32>
    %c0_52 = arith.constant 0 : index
    %c1_53 = arith.constant 1 : index
    %c0_54 = arith.constant 0 : index
    %55 = vector.load %arg11[%c0_52, %c1_53, %c0_54] : memref<18x9x128xf32, #tpu.memory_space<vmem>>, vector<16x8x128xf32>
    %56 = vector.shape_cast %55 : vector<16x8x128xf32> to vector<8x2x8x128xf32>
    %57 = vector.extract_strided_slice %56 {offsets = [0, 0, 0, 0], sizes = [8, 1, 8, 128], strides = [1, 1, 1, 1]} : vector<8x2x8x128xf32> to vector<8x1x8x128xf32>
    %58 = vector.shape_cast %57 : vector<8x1x8x128xf32> to vector<8x8x128xf32>
    %59 = arith.truncf %58 : vector<8x8x128xf32> to vector<8x8x128xbf16>
    %60 = vector.shape_cast %59 : vector<8x8x128xbf16> to vector<64x128xbf16>
    %c0_55 = arith.constant 0 : index
    %c2 = arith.constant 2 : index
    %c0_56 = arith.constant 0 : index
    %c0_57 = arith.constant 0 : index
    %61 = vector.load %arg6[%c0_55, %c2, %c0_56, %c0_57] : memref<1x9x128x128xbf16, #tpu.memory_space<vmem>>, vector<1x1x128x128xbf16>
    %62 = vector.shape_cast %61 : vector<1x1x128x128xbf16> to vector<128x128xbf16>
    %cst_58 = arith.constant dense<0.000000e+00> : vector<64x128xf32>
    %63 = tpu.matmul %60, %62, %cst_58 {dimension_numbers = #tpu.dot_dimension_numbers<[1], [0], [0], [1], [0, 0, 1, 1], [], []>} : vector<64x128xbf16>, vector<128x128xbf16>, vector<64x128xf32> -> vector<64x128xf32>
    %64 = arith.addf %54, %63 : vector<64x128xf32>
    %c1_59 = arith.constant 1 : index
    %c0_60 = arith.constant 0 : index
    %c0_61 = arith.constant 0 : index
    %65 = vector.load %arg11[%c1_59, %c0_60, %c0_61] : memref<18x9x128xf32, #tpu.memory_space<vmem>>, vector<16x8x128xf32>
    %66 = vector.shape_cast %65 : vector<16x8x128xf32> to vector<8x2x8x128xf32>
    %67 = vector.extract_strided_slice %66 {offsets = [0, 0, 0, 0], sizes = [8, 1, 8, 128], strides = [1, 1, 1, 1]} : vector<8x2x8x128xf32> to vector<8x1x8x128xf32>
    %68 = vector.shape_cast %67 : vector<8x1x8x128xf32> to vector<8x8x128xf32>
    %69 = arith.truncf %68 : vector<8x8x128xf32> to vector<8x8x128xbf16>
    %70 = vector.shape_cast %69 : vector<8x8x128xbf16> to vector<64x128xbf16>
    %c0_62 = arith.constant 0 : index
    %c3 = arith.constant 3 : index
    %c0_63 = arith.constant 0 : index
    %c0_64 = arith.constant 0 : index
    %71 = vector.load %arg6[%c0_62, %c3, %c0_63, %c0_64] : memref<1x9x128x128xbf16, #tpu.memory_space<vmem>>, vector<1x1x128x128xbf16>
    %72 = vector.shape_cast %71 : vector<1x1x128x128xbf16> to vector<128x128xbf16>
    %cst_65 = arith.constant dense<0.000000e+00> : vector<64x128xf32>
    %73 = tpu.matmul %70, %72, %cst_65 {dimension_numbers = #tpu.dot_dimension_numbers<[1], [0], [0], [1], [0, 0, 1, 1], [], []>} : vector<64x128xbf16>, vector<128x128xbf16>, vector<64x128xf32> -> vector<64x128xf32>
    %74 = arith.addf %64, %73 : vector<64x128xf32>
    %c1_66 = arith.constant 1 : index
    %c0_67 = arith.constant 0 : index
    %c0_68 = arith.constant 0 : index
    %75 = vector.load %arg12[%c1_66, %c0_67, %c0_68] : memref<18x8x128xf32, #tpu.memory_space<vmem>>, vector<16x8x128xf32>
    %76 = vector.shape_cast %75 : vector<16x8x128xf32> to vector<8x2x8x128xf32>
    %77 = vector.extract_strided_slice %76 {offsets = [0, 0, 0, 0], sizes = [8, 1, 8, 128], strides = [1, 1, 1, 1]} : vector<8x2x8x128xf32> to vector<8x1x8x128xf32>
    %78 = vector.shape_cast %77 : vector<8x1x8x128xf32> to vector<8x8x128xf32>
    %79 = arith.truncf %78 : vector<8x8x128xf32> to vector<8x8x128xbf16>
    %80 = vector.shape_cast %79 : vector<8x8x128xbf16> to vector<64x128xbf16>
    %c0_69 = arith.constant 0 : index
    %c4 = arith.constant 4 : index
    %c0_70 = arith.constant 0 : index
    %c0_71 = arith.constant 0 : index
    %81 = vector.load %arg6[%c0_69, %c4, %c0_70, %c0_71] : memref<1x9x128x128xbf16, #tpu.memory_space<vmem>>, vector<1x1x128x128xbf16>
    %82 = vector.shape_cast %81 : vector<1x1x128x128xbf16> to vector<128x128xbf16>
    %cst_72 = arith.constant dense<0.000000e+00> : vector<64x128xf32>
    %83 = tpu.matmul %80, %82, %cst_72 {dimension_numbers = #tpu.dot_dimension_numbers<[1], [0], [0], [1], [0, 0, 1, 1], [], []>} : vector<64x128xbf16>, vector<128x128xbf16>, vector<64x128xf32> -> vector<64x128xf32>
    %84 = arith.addf %74, %83 : vector<64x128xf32>
    %c1_73 = arith.constant 1 : index
    %c1_74 = arith.constant 1 : index
    %c0_75 = arith.constant 0 : index
    %85 = vector.load %arg11[%c1_73, %c1_74, %c0_75] : memref<18x9x128xf32, #tpu.memory_space<vmem>>, vector<16x8x128xf32>
    %86 = vector.shape_cast %85 : vector<16x8x128xf32> to vector<8x2x8x128xf32>
    %87 = vector.extract_strided_slice %86 {offsets = [0, 0, 0, 0], sizes = [8, 1, 8, 128], strides = [1, 1, 1, 1]} : vector<8x2x8x128xf32> to vector<8x1x8x128xf32>
    %88 = vector.shape_cast %87 : vector<8x1x8x128xf32> to vector<8x8x128xf32>
    %89 = arith.truncf %88 : vector<8x8x128xf32> to vector<8x8x128xbf16>
    %90 = vector.shape_cast %89 : vector<8x8x128xbf16> to vector<64x128xbf16>
    %c0_76 = arith.constant 0 : index
    %c5 = arith.constant 5 : index
    %c0_77 = arith.constant 0 : index
    %c0_78 = arith.constant 0 : index
    %91 = vector.load %arg6[%c0_76, %c5, %c0_77, %c0_78] : memref<1x9x128x128xbf16, #tpu.memory_space<vmem>>, vector<1x1x128x128xbf16>
    %92 = vector.shape_cast %91 : vector<1x1x128x128xbf16> to vector<128x128xbf16>
    %cst_79 = arith.constant dense<0.000000e+00> : vector<64x128xf32>
    %93 = tpu.matmul %90, %92, %cst_79 {dimension_numbers = #tpu.dot_dimension_numbers<[1], [0], [0], [1], [0, 0, 1, 1], [], []>} : vector<64x128xbf16>, vector<128x128xbf16>, vector<64x128xf32> -> vector<64x128xf32>
    %94 = arith.addf %84, %93 : vector<64x128xf32>
    %c2_80 = arith.constant 2 : index
    %c0_81 = arith.constant 0 : index
    %c0_82 = arith.constant 0 : index
    %95 = vector.load %arg11[%c2_80, %c0_81, %c0_82] : memref<18x9x128xf32, #tpu.memory_space<vmem>>, vector<16x8x128xf32>
    %96 = vector.shape_cast %95 : vector<16x8x128xf32> to vector<8x2x8x128xf32>
    %97 = vector.extract_strided_slice %96 {offsets = [0, 0, 0, 0], sizes = [8, 1, 8, 128], strides = [1, 1, 1, 1]} : vector<8x2x8x128xf32> to vector<8x1x8x128xf32>
    %98 = vector.shape_cast %97 : vector<8x1x8x128xf32> to vector<8x8x128xf32>
    %99 = arith.truncf %98 : vector<8x8x128xf32> to vector<8x8x128xbf16>
    %100 = vector.shape_cast %99 : vector<8x8x128xbf16> to vector<64x128xbf16>
    %c0_83 = arith.constant 0 : index
    %c6 = arith.constant 6 : index
    %c0_84 = arith.constant 0 : index
    %c0_85 = arith.constant 0 : index
    %101 = vector.load %arg6[%c0_83, %c6, %c0_84, %c0_85] : memref<1x9x128x128xbf16, #tpu.memory_space<vmem>>, vector<1x1x128x128xbf16>
    %102 = vector.shape_cast %101 : vector<1x1x128x128xbf16> to vector<128x128xbf16>
    %cst_86 = arith.constant dense<0.000000e+00> : vector<64x128xf32>
    %103 = tpu.matmul %100, %102, %cst_86 {dimension_numbers = #tpu.dot_dimension_numbers<[1], [0], [0], [1], [0, 0, 1, 1], [], []>} : vector<64x128xbf16>, vector<128x128xbf16>, vector<64x128xf32> -> vector<64x128xf32>
    %104 = arith.addf %94, %103 : vector<64x128xf32>
    %c2_87 = arith.constant 2 : index
    %c0_88 = arith.constant 0 : index
    %c0_89 = arith.constant 0 : index
    %105 = vector.load %arg12[%c2_87, %c0_88, %c0_89] : memref<18x8x128xf32, #tpu.memory_space<vmem>>, vector<16x8x128xf32>
    %106 = vector.shape_cast %105 : vector<16x8x128xf32> to vector<8x2x8x128xf32>
    %107 = vector.extract_strided_slice %106 {offsets = [0, 0, 0, 0], sizes = [8, 1, 8, 128], strides = [1, 1, 1, 1]} : vector<8x2x8x128xf32> to vector<8x1x8x128xf32>
    %108 = vector.shape_cast %107 : vector<8x1x8x128xf32> to vector<8x8x128xf32>
    %109 = arith.truncf %108 : vector<8x8x128xf32> to vector<8x8x128xbf16>
    %110 = vector.shape_cast %109 : vector<8x8x128xbf16> to vector<64x128xbf16>
    %c0_90 = arith.constant 0 : index
    %c7 = arith.constant 7 : index
    %c0_91 = arith.constant 0 : index
    %c0_92 = arith.constant 0 : index
    %111 = vector.load %arg6[%c0_90, %c7, %c0_91, %c0_92] : memref<1x9x128x128xbf16, #tpu.memory_space<vmem>>, vector<1x1x128x128xbf16>
    %112 = vector.shape_cast %111 : vector<1x1x128x128xbf16> to vector<128x128xbf16>
    %cst_93 = arith.constant dense<0.000000e+00> : vector<64x128xf32>
    %113 = tpu.matmul %110, %112, %cst_93 {dimension_numbers = #tpu.dot_dimension_numbers<[1], [0], [0], [1], [0, 0, 1, 1], [], []>} : vector<64x128xbf16>, vector<128x128xbf16>, vector<64x128xf32> -> vector<64x128xf32>
    %114 = arith.addf %104, %113 : vector<64x128xf32>
    %c2_94 = arith.constant 2 : index
    %c1_95 = arith.constant 1 : index
    %c0_96 = arith.constant 0 : index
    %115 = vector.load %arg11[%c2_94, %c1_95, %c0_96] : memref<18x9x128xf32, #tpu.memory_space<vmem>>, vector<16x8x128xf32>
    %116 = vector.shape_cast %115 : vector<16x8x128xf32> to vector<8x2x8x128xf32>
    %117 = vector.extract_strided_slice %116 {offsets = [0, 0, 0, 0], sizes = [8, 1, 8, 128], strides = [1, 1, 1, 1]} : vector<8x2x8x128xf32> to vector<8x1x8x128xf32>
    %118 = vector.shape_cast %117 : vector<8x1x8x128xf32> to vector<8x8x128xf32>
    %119 = arith.truncf %118 : vector<8x8x128xf32> to vector<8x8x128xbf16>
    %120 = vector.shape_cast %119 : vector<8x8x128xbf16> to vector<64x128xbf16>
    %c0_97 = arith.constant 0 : index
    %c8 = arith.constant 8 : index
    %c0_98 = arith.constant 0 : index
    %c0_99 = arith.constant 0 : index
    %121 = vector.load %arg6[%c0_97, %c8, %c0_98, %c0_99] : memref<1x9x128x128xbf16, #tpu.memory_space<vmem>>, vector<1x1x128x128xbf16>
    %122 = vector.shape_cast %121 : vector<1x1x128x128xbf16> to vector<128x128xbf16>
    %cst_100 = arith.constant dense<0.000000e+00> : vector<64x128xf32>
    %123 = tpu.matmul %120, %122, %cst_100 {dimension_numbers = #tpu.dot_dimension_numbers<[1], [0], [0], [1], [0, 0, 1, 1], [], []>} : vector<64x128xbf16>, vector<128x128xbf16>, vector<64x128xf32> -> vector<64x128xf32>
    %124 = arith.addf %114, %123 : vector<64x128xf32>
    %c0_101 = arith.constant 0 : index
    %c0_102 = arith.constant 0 : index
    %125 = vector.load %arg7[%c0_101, %c0_102] : memref<1x128xf32, #tpu.memory_space<vmem>>, vector<1x128xf32>
    %126 = vector.broadcast %125 : vector<1x128xf32> to vector<64x128xf32>
    %127 = arith.mulf %124, %126 : vector<64x128xf32>
    %c0_103 = arith.constant 0 : index
    %c0_104 = arith.constant 0 : index
    %128 = vector.load %arg8[%c0_103, %c0_104] : memref<1x128xf32, #tpu.memory_space<vmem>>, vector<1x128xf32>
    %129 = vector.broadcast %128 : vector<1x128xf32> to vector<64x128xf32>
    %130 = arith.addf %127, %129 : vector<64x128xf32>
    %131 = arith.truncf %130 : vector<64x128xf32> to vector<64x128xbf16>
    %c0_105 = arith.constant 0 : index
    %c0_106 = arith.constant 0 : index
    %c0_107 = arith.constant 0 : index
    %132 = vector.load %arg9[%c0_105, %c0_106, %c0_107] : memref<1x64x128xbf16, #tpu.memory_space<vmem>>, vector<1x64x128xbf16>
    %133 = vector.shape_cast %132 : vector<1x64x128xbf16> to vector<64x128xbf16>
    %134 = vector.shape_cast %131 : vector<64x128xbf16> to vector<1x64x128xbf16>
    tpu.vector_store %arg9[%c0_105, %c0_106, %c0_107], %134 {strides = array<i32>} : memref<1x64x128xbf16, #tpu.memory_space<vmem>>, vector<1x64x128xbf16>,
    %cst_108 = arith.constant dense<0.000000e+00> : vector<128xf32>
    %135 = vector.multi_reduction <add>, %130, %cst_108 [0] : vector<64x128xf32> to vector<128xf32>
    %136 = vector.shape_cast %135 : vector<128xf32> to vector<1x128xf32>
    %cst_109 = arith.constant 1.562500e-02 : f32
    %137 = vector.broadcast %cst_109 : f32 to vector<1x128xf32>
    %138 = arith.mulf %136, %137 : vector<1x128xf32>
    %c0_110 = arith.constant 0 : index
    %c0_111 = arith.constant 0 : index
    %c0_112 = arith.constant 0 : index
    %139 = vector.load %arg10[%c0_110, %c0_111, %c0_112] : memref<1x1x128xf32, #tpu.memory_space<vmem>>, vector<1x1x128xf32>
    %140 = vector.shape_cast %139 : vector<1x1x128xf32> to vector<1x128xf32>
    %141 = vector.shape_cast %138 : vector<1x128xf32> to vector<1x1x128xf32>
    tpu.vector_store %arg10[%c0_110, %c0_111, %c0_112], %141 {strides = array<i32>} : memref<1x1x128xf32, #tpu.memory_space<vmem>>, vector<1x1x128xf32>,
    return
  }
  func.func @transform_0(%arg0: i32) -> (i32, i32, i32, i32) {
    %c0_i32 = arith.constant 0 : i32
    %c0_i32_0 = arith.constant 0 : i32
    %c0_i32_1 = arith.constant 0 : i32
    %c0_i32_2 = arith.constant 0 : i32
    return %arg0, %c0_i32, %c0_i32_0, %c0_i32_1 : i32, i32, i32, i32
  }
  func.func @transform_1(%arg0: i32) -> (i32, i32, i32, i32) {
    %c0_i32 = arith.constant 0 : i32
    %c0_i32_0 = arith.constant 0 : i32
    %c0_i32_1 = arith.constant 0 : i32
    %c0_i32_2 = arith.constant 0 : i32
    return %arg0, %c0_i32, %c0_i32_0, %c0_i32_1 : i32, i32, i32, i32
  }
  func.func @transform_2(%arg0: i32) -> (i32, i32) {
    %c0_i32 = arith.constant 0 : i32
    %c0_i32_0 = arith.constant 0 : i32
    %c0_i32_1 = arith.constant 0 : i32
    return %c0_i32, %c0_i32_0 : i32, i32
  }
  func.func @transform_3(%arg0: i32) -> (i32, i32) {
    %c0_i32 = arith.constant 0 : i32
    %c0_i32_0 = arith.constant 0 : i32
    %c0_i32_1 = arith.constant 0 : i32
    return %c0_i32, %c0_i32_0 : i32, i32
  }
  func.func @transform_4(%arg0: i32) -> (i32, i32) {
    %c0_i32 = arith.constant 0 : i32
    %c0_i32_0 = arith.constant 0 : i32
    %c0_i32_1 = arith.constant 0 : i32
    return %c0_i32, %c0_i32_0 : i32, i32
  }
  func.func @transform_5(%arg0: i32) -> (i32, i32, i32, i32) {
    %c0_i32 = arith.constant 0 : i32
    %c0_i32_0 = arith.constant 0 : i32
    %c0_i32_1 = arith.constant 0 : i32
    %c0_i32_2 = arith.constant 0 : i32
    %c0_i32_3 = arith.constant 0 : i32
    return %c0_i32, %c0_i32_0, %c0_i32_1, %c0_i32_2 : i32, i32, i32, i32
  }
  func.func @transform_6(%arg0: i32) -> (i32, i32) {
    %c0_i32 = arith.constant 0 : i32
    %c0_i32_0 = arith.constant 0 : i32
    %c0_i32_1 = arith.constant 0 : i32
    return %c0_i32, %c0_i32_0 : i32, i32
  }
  func.func @transform_7(%arg0: i32) -> (i32, i32) {
    %c0_i32 = arith.constant 0 : i32
    %c0_i32_0 = arith.constant 0 : i32
    %c0_i32_1 = arith.constant 0 : i32
    return %c0_i32, %c0_i32_0 : i32, i32
  }
  func.func @transform_8(%arg0: i32) -> (i32, i32, i32) {
    %c0_i32 = arith.constant 0 : i32
    %c0_i32_0 = arith.constant 0 : i32
    %c0_i32_1 = arith.constant 0 : i32
    return %arg0, %c0_i32, %c0_i32_0 : i32, i32, i32
  }
  func.func @transform_9(%arg0: i32) -> (i32, i32, i32) {
    %c0_i32 = arith.constant 0 : i32
    %c0_i32_0 = arith.constant 0 : i32
    %c0_i32_1 = arith.constant 0 : i32
    return %arg0, %c0_i32, %c0_i32_0 : i32, i32, i32
  }
}

module attributes {stable_mosaic.version = 11 : i64} {
  func.func @_convc_se_res_ds_kernel(%arg0: i32, %arg1: memref<1x64x128xbf16, #tpu.memory_space<vmem>>, %arg2: memref<1x1x128xf32, #tpu.memory_space<vmem>>, %arg3: memref<128x128xf32, #tpu.memory_space<vmem>>, %arg4: memref<1x128xf32, #tpu.memory_space<vmem>>, %arg5: memref<128x128xf32, #tpu.memory_space<vmem>>, %arg6: memref<1x128xf32, #tpu.memory_space<vmem>>, %arg7: memref<128x128xbf16, #tpu.memory_space<vmem>>, %arg8: memref<1x128xf32, #tpu.memory_space<vmem>>, %arg9: memref<1x128xf32, #tpu.memory_space<vmem>>, %arg10: memref<1x64x128xbf16, #tpu.memory_space<vmem>>, %arg11: memref<128x128xbf16, #tpu.memory_space<vmem>>, %arg12: memref<1x128xf32, #tpu.memory_space<vmem>>, %arg13: memref<1x128xf32, #tpu.memory_space<vmem>>, %arg14: memref<1x64x128xbf16, #tpu.memory_space<vmem>>) attributes {dimension_semantics = [#tpu.dimension_semantics<parallel>], iteration_bounds = array<i64: 2>, scalar_prefetch = 0 : i64, scratch_operands = 0 : i64, tpu.core_type = #tpu.core_type<tc>, window_params = [{transform_indices = @transform_0, window_bounds = array<i64: 1, 64, 128>}, {transform_indices = @transform_1, window_bounds = array<i64: 1, 1, 128>}, {pipeline_mode = #tpu.pipeline_mode<synchronous>, transform_indices = @transform_2, window_bounds = array<i64: 128, 128>}, {pipeline_mode = #tpu.pipeline_mode<synchronous>, transform_indices = @transform_3, window_bounds = array<i64: 1, 128>}, {pipeline_mode = #tpu.pipeline_mode<synchronous>, transform_indices = @transform_4, window_bounds = array<i64: 128, 128>}, {pipeline_mode = #tpu.pipeline_mode<synchronous>, transform_indices = @transform_5, window_bounds = array<i64: 1, 128>}, {pipeline_mode = #tpu.pipeline_mode<synchronous>, transform_indices = @transform_6, window_bounds = array<i64: 128, 128>}, {pipeline_mode = #tpu.pipeline_mode<synchronous>, transform_indices = @transform_7, window_bounds = array<i64: 1, 128>}, {pipeline_mode = #tpu.pipeline_mode<synchronous>, transform_indices = @transform_8, window_bounds = array<i64: 1, 128>}, {transform_indices = @transform_9, window_bounds = array<i64: 1, 64, 128>}, {pipeline_mode = #tpu.pipeline_mode<synchronous>, transform_indices = @transform_10, window_bounds = array<i64: 128, 128>}, {pipeline_mode = #tpu.pipeline_mode<synchronous>, transform_indices = @transform_11, window_bounds = array<i64: 1, 128>}, {pipeline_mode = #tpu.pipeline_mode<synchronous>, transform_indices = @transform_12, window_bounds = array<i64: 1, 128>}, {transform_indices = @transform_13, window_bounds = array<i64: 1, 64, 128>}]} {
    %c0 = arith.constant 0 : index
    %c0_0 = arith.constant 0 : index
    %c0_1 = arith.constant 0 : index
    %0 = vector.load %arg2[%c0, %c0_0, %c0_1] : memref<1x1x128xf32, #tpu.memory_space<vmem>>, vector<1x1x128xf32>
    %1 = vector.shape_cast %0 : vector<1x1x128xf32> to vector<1x128xf32>
    %c0_2 = arith.constant 0 : index
    %c0_3 = arith.constant 0 : index
    %2 = vector.load %arg3[%c0_2, %c0_3] : memref<128x128xf32, #tpu.memory_space<vmem>>, vector<128x128xf32>
    %cst = arith.constant dense<0.000000e+00> : vector<1x128xf32>
    %3 = tpu.matmul %1, %2, %cst {dimension_numbers = #tpu.dot_dimension_numbers<[1], [0], [0], [1], [0, 0, 1, 1], [], []>} : vector<1x128xf32>, vector<128x128xf32>, vector<1x128xf32> -> vector<1x128xf32>
    %c0_4 = arith.constant 0 : index
    %c0_5 = arith.constant 0 : index
    %4 = vector.load %arg4[%c0_4, %c0_5] : memref<1x128xf32, #tpu.memory_space<vmem>>, vector<1x128xf32>
    %5 = arith.addf %3, %4 : vector<1x128xf32>
    %cst_6 = arith.constant 0.000000e+00 : f32
    %6 = vector.broadcast %cst_6 : f32 to vector<1x128xf32>
    %7 = arith.maximumf %5, %6 : vector<1x128xf32>
    %c0_7 = arith.constant 0 : index
    %c0_8 = arith.constant 0 : index
    %8 = vector.load %arg5[%c0_7, %c0_8] : memref<128x128xf32, #tpu.memory_space<vmem>>, vector<128x128xf32>
    %cst_9 = arith.constant dense<0.000000e+00> : vector<1x128xf32>
    %9 = tpu.matmul %7, %8, %cst_9 {dimension_numbers = #tpu.dot_dimension_numbers<[1], [0], [0], [1], [0, 0, 1, 1], [], []>} : vector<1x128xf32>, vector<128x128xf32>, vector<1x128xf32> -> vector<1x128xf32>
    %c0_10 = arith.constant 0 : index
    %c0_11 = arith.constant 0 : index
    %10 = vector.load %arg6[%c0_10, %c0_11] : memref<1x128xf32, #tpu.memory_space<vmem>>, vector<1x128xf32>
    %11 = arith.addf %9, %10 : vector<1x128xf32>
    %cst_12 = arith.constant 0.000000e+00 : f32
    %12 = vector.broadcast %cst_12 : f32 to vector<1x128xf32>
    %13 = arith.subf %12, %11 : vector<1x128xf32>
    %14 = math.exp %13 : vector<1x128xf32>
    %cst_13 = arith.constant 1.000000e+00 : f32
    %15 = vector.broadcast %cst_13 : f32 to vector<1x128xf32>
    %16 = arith.addf %15, %14 : vector<1x128xf32>
    %cst_14 = arith.constant 1.000000e+00 : f32
    %17 = vector.broadcast %cst_14 : f32 to vector<1x128xf32>
    %18 = arith.divf %17, %16 : vector<1x128xf32>
    %19 = arith.truncf %18 : vector<1x128xf32> to vector<1x128xbf16>
    %c0_15 = arith.constant 0 : index
    %c0_16 = arith.constant 0 : index
    %c0_17 = arith.constant 0 : index
    %20 = vector.load %arg1[%c0_15, %c0_16, %c0_17] : memref<1x64x128xbf16, #tpu.memory_space<vmem>>, vector<1x64x128xbf16>
    %21 = vector.shape_cast %20 : vector<1x64x128xbf16> to vector<64x128xbf16>
    %22 = vector.broadcast %19 : vector<1x128xbf16> to vector<64x128xbf16>
    %23 = arith.mulf %21, %22 : vector<64x128xbf16>
    %c0_18 = arith.constant 0 : index
    %c0_19 = arith.constant 0 : index
    %24 = vector.load %arg7[%c0_18, %c0_19] : memref<128x128xbf16, #tpu.memory_space<vmem>>, vector<128x128xbf16>
    %cst_20 = arith.constant dense<0.000000e+00> : vector<64x128xf32>
    %25 = tpu.matmul %23, %24, %cst_20 {dimension_numbers = #tpu.dot_dimension_numbers<[1], [0], [0], [1], [0, 0, 1, 1], [], []>} : vector<64x128xbf16>, vector<128x128xbf16>, vector<64x128xf32> -> vector<64x128xf32>
    %c0_21 = arith.constant 0 : index
    %c0_22 = arith.constant 0 : index
    %26 = vector.load %arg8[%c0_21, %c0_22] : memref<1x128xf32, #tpu.memory_space<vmem>>, vector<1x128xf32>
    %27 = vector.broadcast %26 : vector<1x128xf32> to vector<64x128xf32>
    %28 = arith.mulf %25, %27 : vector<64x128xf32>
    %c0_23 = arith.constant 0 : index
    %c0_24 = arith.constant 0 : index
    %29 = vector.load %arg9[%c0_23, %c0_24] : memref<1x128xf32, #tpu.memory_space<vmem>>, vector<1x128xf32>
    %30 = vector.broadcast %29 : vector<1x128xf32> to vector<64x128xf32>
    %31 = arith.addf %28, %30 : vector<64x128xf32>
    %c0_25 = arith.constant 0 : index
    %c0_26 = arith.constant 0 : index
    %c0_27 = arith.constant 0 : index
    %32 = vector.load %arg10[%c0_25, %c0_26, %c0_27] : memref<1x64x128xbf16, #tpu.memory_space<vmem>>, vector<1x64x128xbf16>
    %33 = vector.shape_cast %32 : vector<1x64x128xbf16> to vector<64x128xbf16>
    %c0_28 = arith.constant 0 : index
    %c0_29 = arith.constant 0 : index
    %34 = vector.load %arg11[%c0_28, %c0_29] : memref<128x128xbf16, #tpu.memory_space<vmem>>, vector<128x128xbf16>
    %cst_30 = arith.constant dense<0.000000e+00> : vector<64x128xf32>
    %35 = tpu.matmul %33, %34, %cst_30 {dimension_numbers = #tpu.dot_dimension_numbers<[1], [0], [0], [1], [0, 0, 1, 1], [], []>} : vector<64x128xbf16>, vector<128x128xbf16>, vector<64x128xf32> -> vector<64x128xf32>
    %c0_31 = arith.constant 0 : index
    %c0_32 = arith.constant 0 : index
    %36 = vector.load %arg12[%c0_31, %c0_32] : memref<1x128xf32, #tpu.memory_space<vmem>>, vector<1x128xf32>
    %37 = vector.broadcast %36 : vector<1x128xf32> to vector<64x128xf32>
    %38 = arith.mulf %35, %37 : vector<64x128xf32>
    %c0_33 = arith.constant 0 : index
    %c0_34 = arith.constant 0 : index
    %39 = vector.load %arg13[%c0_33, %c0_34] : memref<1x128xf32, #tpu.memory_space<vmem>>, vector<1x128xf32>
    %40 = vector.broadcast %39 : vector<1x128xf32> to vector<64x128xf32>
    %41 = arith.addf %38, %40 : vector<64x128xf32>
    %42 = arith.addf %31, %41 : vector<64x128xf32>
    %cst_35 = arith.constant 0.000000e+00 : f32
    %43 = vector.broadcast %cst_35 : f32 to vector<64x128xf32>
    %44 = arith.maximumf %42, %43 : vector<64x128xf32>
    %45 = arith.truncf %44 : vector<64x128xf32> to vector<64x128xbf16>
    %c0_36 = arith.constant 0 : index
    %c0_37 = arith.constant 0 : index
    %c0_38 = arith.constant 0 : index
    %46 = vector.load %arg14[%c0_36, %c0_37, %c0_38] : memref<1x64x128xbf16, #tpu.memory_space<vmem>>, vector<1x64x128xbf16>
    %47 = vector.shape_cast %46 : vector<1x64x128xbf16> to vector<64x128xbf16>
    %48 = vector.shape_cast %45 : vector<64x128xbf16> to vector<1x64x128xbf16>
    tpu.vector_store %arg14[%c0_36, %c0_37, %c0_38], %48 {strides = array<i32>} : memref<1x64x128xbf16, #tpu.memory_space<vmem>>, vector<1x64x128xbf16>,
    return
  }
  func.func @transform_0(%arg0: i32) -> (i32, i32, i32) {
    %c0_i32 = arith.constant 0 : i32
    %c0_i32_0 = arith.constant 0 : i32
    %c0_i32_1 = arith.constant 0 : i32
    return %arg0, %c0_i32, %c0_i32_0 : i32, i32, i32
  }
  func.func @transform_1(%arg0: i32) -> (i32, i32, i32) {
    %c0_i32 = arith.constant 0 : i32
    %c0_i32_0 = arith.constant 0 : i32
    %c0_i32_1 = arith.constant 0 : i32
    return %arg0, %c0_i32, %c0_i32_0 : i32, i32, i32
  }
  func.func @transform_2(%arg0: i32) -> (i32, i32) {
    %c0_i32 = arith.constant 0 : i32
    %c0_i32_0 = arith.constant 0 : i32
    %c0_i32_1 = arith.constant 0 : i32
    return %c0_i32, %c0_i32_0 : i32, i32
  }
  func.func @transform_3(%arg0: i32) -> (i32, i32) {
    %c0_i32 = arith.constant 0 : i32
    %c0_i32_0 = arith.constant 0 : i32
    %c0_i32_1 = arith.constant 0 : i32
    return %c0_i32, %c0_i32_0 : i32, i32
  }
  func.func @transform_4(%arg0: i32) -> (i32, i32) {
    %c0_i32 = arith.constant 0 : i32
    %c0_i32_0 = arith.constant 0 : i32
    %c0_i32_1 = arith.constant 0 : i32
    return %c0_i32, %c0_i32_0 : i32, i32
  }
  func.func @transform_5(%arg0: i32) -> (i32, i32) {
    %c0_i32 = arith.constant 0 : i32
    %c0_i32_0 = arith.constant 0 : i32
    %c0_i32_1 = arith.constant 0 : i32
    return %c0_i32, %c0_i32_0 : i32, i32
  }
  func.func @transform_6(%arg0: i32) -> (i32, i32) {
    %c0_i32 = arith.constant 0 : i32
    %c0_i32_0 = arith.constant 0 : i32
    %c0_i32_1 = arith.constant 0 : i32
    return %c0_i32, %c0_i32_0 : i32, i32
  }
  func.func @transform_7(%arg0: i32) -> (i32, i32) {
    %c0_i32 = arith.constant 0 : i32
    %c0_i32_0 = arith.constant 0 : i32
    %c0_i32_1 = arith.constant 0 : i32
    return %c0_i32, %c0_i32_0 : i32, i32
  }
  func.func @transform_8(%arg0: i32) -> (i32, i32) {
    %c0_i32 = arith.constant 0 : i32
    %c0_i32_0 = arith.constant 0 : i32
    %c0_i32_1 = arith.constant 0 : i32
    return %c0_i32, %c0_i32_0 : i32, i32
  }
  func.func @transform_9(%arg0: i32) -> (i32, i32, i32) {
    %c0_i32 = arith.constant 0 : i32
    %c0_i32_0 = arith.constant 0 : i32
    %c0_i32_1 = arith.constant 0 : i32
    return %arg0, %c0_i32, %c0_i32_0 : i32, i32, i32
  }
  func.func @transform_10(%arg0: i32) -> (i32, i32) {
    %c0_i32 = arith.constant 0 : i32
    %c0_i32_0 = arith.constant 0 : i32
    %c0_i32_1 = arith.constant 0 : i32
    return %c0_i32, %c0_i32_0 : i32, i32
  }
  func.func @transform_11(%arg0: i32) -> (i32, i32) {
    %c0_i32 = arith.constant 0 : i32
    %c0_i32_0 = arith.constant 0 : i32
    %c0_i32_1 = arith.constant 0 : i32
    return %c0_i32, %c0_i32_0 : i32, i32
  }
  func.func @transform_12(%arg0: i32) -> (i32, i32) {
    %c0_i32 = arith.constant 0 : i32
    %c0_i32_0 = arith.constant 0 : i32
    %c0_i32_1 = arith.constant 0 : i32
    return %c0_i32, %c0_i32_0 : i32, i32
  }
  func.func @transform_13(%arg0: i32) -> (i32, i32, i32) {
    %c0_i32 = arith.constant 0 : i32
    %c0_i32_0 = arith.constant 0 : i32
    %c0_i32_1 = arith.constant 0 : i32
    return %arg0, %c0_i32, %c0_i32_0 : i32, i32, i32
  }
}

module attributes {stable_mosaic.version = 11 : i64} {
  func.func @_block_ab_s2_kernel(%arg0: i32, %arg1: memref<1x8x4x128xbf16, #tpu.memory_space<vmem>>, %arg2: memref<1x8x4x128xbf16, #tpu.memory_space<vmem>>, %arg3: memref<128x128xbf16, #tpu.memory_space<vmem>>, %arg4: memref<1x128xf32, #tpu.memory_space<vmem>>, %arg5: memref<1x128xf32, #tpu.memory_space<vmem>>, %arg6: memref<1x9x128x128xbf16, #tpu.memory_space<vmem>>, %arg7: memref<1x128xf32, #tpu.memory_space<vmem>>, %arg8: memref<1x128xf32, #tpu.memory_space<vmem>>, %arg9: memref<1x16x128xbf16, #tpu.memory_space<vmem>>, %arg10: memref<1x1x128xf32, #tpu.memory_space<vmem>>, %arg11: memref<10x5x128xf32, #tpu.memory_space<vmem>>, %arg12: memref<10x4x128xf32, #tpu.memory_space<vmem>>) attributes {dimension_semantics = [#tpu.dimension_semantics<parallel>], iteration_bounds = array<i64: 2>, scalar_prefetch = 0 : i64, scratch_operands = 2 : i64, tpu.core_type = #tpu.core_type<tc>, window_params = [{transform_indices = @transform_0, window_bounds = array<i64: 1, 8, 4, 128>}, {transform_indices = @transform_1, window_bounds = array<i64: 1, 8, 4, 128>}, {pipeline_mode = #tpu.pipeline_mode<synchronous>, transform_indices = @transform_2, window_bounds = array<i64: 128, 128>}, {pipeline_mode = #tpu.pipeline_mode<synchronous>, transform_indices = @transform_3, window_bounds = array<i64: 1, 128>}, {pipeline_mode = #tpu.pipeline_mode<synchronous>, transform_indices = @transform_4, window_bounds = array<i64: 1, 128>}, {pipeline_mode = #tpu.pipeline_mode<synchronous>, transform_indices = @transform_5, window_bounds = array<i64: 1, 9, 128, 128>}, {pipeline_mode = #tpu.pipeline_mode<synchronous>, transform_indices = @transform_6, window_bounds = array<i64: 1, 128>}, {pipeline_mode = #tpu.pipeline_mode<synchronous>, transform_indices = @transform_7, window_bounds = array<i64: 1, 128>}, {transform_indices = @transform_8, window_bounds = array<i64: 1, 16, 128>}, {transform_indices = @transform_9, window_bounds = array<i64: 1, 1, 128>}]} {
    %c0 = arith.constant 0 : index
    %c0_0 = arith.constant 0 : index
    %c0_1 = arith.constant 0 : index
    %c0_2 = arith.constant 0 : index
    %0 = vector.load %arg1[%c0, %c0_0, %c0_1, %c0_2] : memref<1x8x4x128xbf16, #tpu.memory_space<vmem>>, vector<1x8x4x128xbf16>
    %1 = vector.shape_cast %0 : vector<1x8x4x128xbf16> to vector<8x4x128xbf16>
    %2 = vector.shape_cast %1 : vector<8x4x128xbf16> to vector<32x128xbf16>
    %c0_3 = arith.constant 0 : index
    %c0_4 = arith.constant 0 : index
    %3 = vector.load %arg3[%c0_3, %c0_4] : memref<128x128xbf16, #tpu.memory_space<vmem>>, vector<128x128xbf16>
    %cst = arith.constant dense<0.000000e+00> : vector<32x128xf32>
    %4 = tpu.matmul %2, %3, %cst {dimension_numbers = #tpu.dot_dimension_numbers<[1], [0], [0], [1], [0, 0, 1, 1], [], []>} : vector<32x128xbf16>, vector<128x128xbf16>, vector<32x128xf32> -> vector<32x128xf32>
    %c0_5 = arith.constant 0 : index
    %c0_6 = arith.constant 0 : index
    %5 = vector.load %arg4[%c0_5, %c0_6] : memref<1x128xf32, #tpu.memory_space<vmem>>, vector<1x128xf32>
    %6 = vector.broadcast %5 : vector<1x128xf32> to vector<32x128xf32>
    %7 = arith.mulf %4, %6 : vector<32x128xf32>
    %c0_7 = arith.constant 0 : index
    %c0_8 = arith.constant 0 : index
    %8 = vector.load %arg5[%c0_7, %c0_8] : memref<1x128xf32, #tpu.memory_space<vmem>>, vector<1x128xf32>
    %9 = vector.broadcast %8 : vector<1x128xf32> to vector<32x128xf32>
    %10 = arith.addf %7, %9 : vector<32x128xf32>
    %cst_9 = arith.constant 0.000000e+00 : f32
    %11 = vector.broadcast %cst_9 : f32 to vector<32x128xf32>
    %12 = arith.maximumf %10, %11 : vector<32x128xf32>
    %13 = vector.shape_cast %12 : vector<32x128xf32> to vector<8x4x128xf32>
    %c0_10 = arith.constant 0 : index
    %c0_11 = arith.constant 0 : index
    %c0_12 = arith.constant 0 : index
    %c0_13 = arith.constant 0 : index
    %14 = vector.load %arg2[%c0_10, %c0_11, %c0_12, %c0_13] : memref<1x8x4x128xbf16, #tpu.memory_space<vmem>>, vector<1x8x4x128xbf16>
    %15 = vector.shape_cast %14 : vector<1x8x4x128xbf16> to vector<8x4x128xbf16>
    %16 = vector.shape_cast %15 : vector<8x4x128xbf16> to vector<32x128xbf16>
    %c0_14 = arith.constant 0 : index
    %c0_15 = arith.constant 0 : index
    %17 = vector.load %arg3[%c0_14, %c0_15] : memref<128x128xbf16, #tpu.memory_space<vmem>>, vector<128x128xbf16>
    %cst_16 = arith.constant dense<0.000000e+00> : vector<32x128xf32>
    %18 = tpu.matmul %16, %17, %cst_16 {dimension_numbers = #tpu.dot_dimension_numbers<[1], [0], [0], [1], [0, 0, 1, 1], [], []>} : vector<32x128xbf16>, vector<128x128xbf16>, vector<32x128xf32> -> vector<32x128xf32>
    %c0_17 = arith.constant 0 : index
    %c0_18 = arith.constant 0 : index
    %19 = vector.load %arg4[%c0_17, %c0_18] : memref<1x128xf32, #tpu.memory_space<vmem>>, vector<1x128xf32>
    %20 = vector.broadcast %19 : vector<1x128xf32> to vector<32x128xf32>
    %21 = arith.mulf %18, %20 : vector<32x128xf32>
    %c0_19 = arith.constant 0 : index
    %c0_20 = arith.constant 0 : index
    %22 = vector.load %arg5[%c0_19, %c0_20] : memref<1x128xf32, #tpu.memory_space<vmem>>, vector<1x128xf32>
    %23 = vector.broadcast %22 : vector<1x128xf32> to vector<32x128xf32>
    %24 = arith.addf %21, %23 : vector<32x128xf32>
    %cst_21 = arith.constant 0.000000e+00 : f32
    %25 = vector.broadcast %cst_21 : f32 to vector<32x128xf32>
    %26 = arith.maximumf %24, %25 : vector<32x128xf32>
    %27 = vector.shape_cast %26 : vector<32x128xf32> to vector<8x4x128xf32>
    %cst_22 = arith.constant 0.000000e+00 : f32
    %28 = vector.broadcast %cst_22 : f32 to vector<10x5x128xf32>
    %c0_23 = arith.constant 0 : index
    %c0_24 = arith.constant 0 : index
    %c0_25 = arith.constant 0 : index
    %29 = vector.load %arg11[%c0_23, %c0_24, %c0_25] : memref<10x5x128xf32, #tpu.memory_space<vmem>>, vector<10x5x128xf32>
    tpu.vector_store %arg11[%c0_23, %c0_24, %c0_25], %28 {strides = array<i32>} : memref<10x5x128xf32, #tpu.memory_space<vmem>>, vector<10x5x128xf32>,
    %cst_26 = arith.constant 0.000000e+00 : f32
    %30 = vector.broadcast %cst_26 : f32 to vector<10x4x128xf32>
    %c0_27 = arith.constant 0 : index
    %c0_28 = arith.constant 0 : index
    %c0_29 = arith.constant 0 : index
    %31 = vector.load %arg12[%c0_27, %c0_28, %c0_29] : memref<10x4x128xf32, #tpu.memory_space<vmem>>, vector<10x4x128xf32>
    tpu.vector_store %arg12[%c0_27, %c0_28, %c0_29], %30 {strides = array<i32>} : memref<10x4x128xf32, #tpu.memory_space<vmem>>, vector<10x4x128xf32>,
    %c1 = arith.constant 1 : index
    %c1_30 = arith.constant 1 : index
    %c0_31 = arith.constant 0 : index
    %32 = vector.load %arg11[%c1, %c1_30, %c0_31] : memref<10x5x128xf32, #tpu.memory_space<vmem>>, vector<8x4x128xf32>
    tpu.vector_store %arg11[%c1, %c1_30, %c0_31], %27 {strides = array<i32>} : memref<10x5x128xf32, #tpu.memory_space<vmem>>, vector<8x4x128xf32>,
    %c1_32 = arith.constant 1 : index
    %c0_33 = arith.constant 0 : index
    %c0_34 = arith.constant 0 : index
    %33 = vector.load %arg12[%c1_32, %c0_33, %c0_34] : memref<10x4x128xf32, #tpu.memory_space<vmem>>, vector<8x4x128xf32>
    tpu.vector_store %arg12[%c1_32, %c0_33, %c0_34], %13 {strides = array<i32>} : memref<10x4x128xf32, #tpu.memory_space<vmem>>, vector<8x4x128xf32>,
    %cst_35 = arith.constant 0.000000e+00 : f32
    %34 = vector.broadcast %cst_35 : f32 to vector<16x128xf32>
    %c0_36 = arith.constant 0 : index
    %c0_37 = arith.constant 0 : index
    %c0_38 = arith.constant 0 : index
    %35 = vector.load %arg11[%c0_36, %c0_37, %c0_38] : memref<10x5x128xf32, #tpu.memory_space<vmem>>, vector<8x4x128xf32>
    %36 = vector.shape_cast %35 : vector<8x4x128xf32> to vector<4x2x4x128xf32>
    %37 = vector.extract_strided_slice %36 {offsets = [0, 0, 0, 0], sizes = [4, 1, 4, 128], strides = [1, 1, 1, 1]} : vector<4x2x4x128xf32> to vector<4x1x4x128xf32>
    %38 = vector.shape_cast %37 : vector<4x1x4x128xf32> to vector<4x4x128xf32>
    %39 = arith.truncf %38 : vector<4x4x128xf32> to vector<4x4x128xbf16>
    %40 = vector.shape_cast %39 : vector<4x4x128xbf16> to vector<16x128xbf16>
    %c0_39 = arith.constant 0 : index
    %c0_40 = arith.constant 0 : index
    %c0_41 = arith.constant 0 : index
    %c0_42 = arith.constant 0 : index
    %41 = vector.load %arg6[%c0_39, %c0_40, %c0_41, %c0_42] : memref<1x9x128x128xbf16, #tpu.memory_space<vmem>>, vector<1x1x128x128xbf16>
    %42 = vector.shape_cast %41 : vector<1x1x128x128xbf16> to vector<128x128xbf16>
    %cst_43 = arith.constant dense<0.000000e+00> : vector<16x128xf32>
    %43 = tpu.matmul %40, %42, %cst_43 {dimension_numbers = #tpu.dot_dimension_numbers<[1], [0], [0], [1], [0, 0, 1, 1], [], []>} : vector<16x128xbf16>, vector<128x128xbf16>, vector<16x128xf32> -> vector<16x128xf32>
    %44 = arith.addf %34, %43 : vector<16x128xf32>
    %c0_44 = arith.constant 0 : index
    %c0_45 = arith.constant 0 : index
    %c0_46 = arith.constant 0 : index
    %45 = vector.load %arg12[%c0_44, %c0_45, %c0_46] : memref<10x4x128xf32, #tpu.memory_space<vmem>>, vector<8x4x128xf32>
    %46 = vector.shape_cast %45 : vector<8x4x128xf32> to vector<4x2x4x128xf32>
    %47 = vector.extract_strided_slice %46 {offsets = [0, 0, 0, 0], sizes = [4, 1, 4, 128], strides = [1, 1, 1, 1]} : vector<4x2x4x128xf32> to vector<4x1x4x128xf32>
    %48 = vector.shape_cast %47 : vector<4x1x4x128xf32> to vector<4x4x128xf32>
    %49 = arith.truncf %48 : vector<4x4x128xf32> to vector<4x4x128xbf16>
    %50 = vector.shape_cast %49 : vector<4x4x128xbf16> to vector<16x128xbf16>
    %c0_47 = arith.constant 0 : index
    %c1_48 = arith.constant 1 : index
    %c0_49 = arith.constant 0 : index
    %c0_50 = arith.constant 0 : index
    %51 = vector.load %arg6[%c0_47, %c1_48, %c0_49, %c0_50] : memref<1x9x128x128xbf16, #tpu.memory_space<vmem>>, vector<1x1x128x128xbf16>
    %52 = vector.shape_cast %51 : vector<1x1x128x128xbf16> to vector<128x128xbf16>
    %cst_51 = arith.constant dense<0.000000e+00> : vector<16x128xf32>
    %53 = tpu.matmul %50, %52, %cst_51 {dimension_numbers = #tpu.dot_dimension_numbers<[1], [0], [0], [1], [0, 0, 1, 1], [], []>} : vector<16x128xbf16>, vector<128x128xbf16>, vector<16x128xf32> -> vector<16x128xf32>
    %54 = arith.addf %44, %53 : vector<16x128xf32>
    %c0_52 = arith.constant 0 : index
    %c1_53 = arith.constant 1 : index
    %c0_54 = arith.constant 0 : index
    %55 = vector.load %arg11[%c0_52, %c1_53, %c0_54] : memref<10x5x128xf32, #tpu.memory_space<vmem>>, vector<8x4x128xf32>
    %56 = vector.shape_cast %55 : vector<8x4x128xf32> to vector<4x2x4x128xf32>
    %57 = vector.extract_strided_slice %56 {offsets = [0, 0, 0, 0], sizes = [4, 1, 4, 128], strides = [1, 1, 1, 1]} : vector<4x2x4x128xf32> to vector<4x1x4x128xf32>
    %58 = vector.shape_cast %57 : vector<4x1x4x128xf32> to vector<4x4x128xf32>
    %59 = arith.truncf %58 : vector<4x4x128xf32> to vector<4x4x128xbf16>
    %60 = vector.shape_cast %59 : vector<4x4x128xbf16> to vector<16x128xbf16>
    %c0_55 = arith.constant 0 : index
    %c2 = arith.constant 2 : index
    %c0_56 = arith.constant 0 : index
    %c0_57 = arith.constant 0 : index
    %61 = vector.load %arg6[%c0_55, %c2, %c0_56, %c0_57] : memref<1x9x128x128xbf16, #tpu.memory_space<vmem>>, vector<1x1x128x128xbf16>
    %62 = vector.shape_cast %61 : vector<1x1x128x128xbf16> to vector<128x128xbf16>
    %cst_58 = arith.constant dense<0.000000e+00> : vector<16x128xf32>
    %63 = tpu.matmul %60, %62, %cst_58 {dimension_numbers = #tpu.dot_dimension_numbers<[1], [0], [0], [1], [0, 0, 1, 1], [], []>} : vector<16x128xbf16>, vector<128x128xbf16>, vector<16x128xf32> -> vector<16x128xf32>
    %64 = arith.addf %54, %63 : vector<16x128xf32>
    %c1_59 = arith.constant 1 : index
    %c0_60 = arith.constant 0 : index
    %c0_61 = arith.constant 0 : index
    %65 = vector.load %arg11[%c1_59, %c0_60, %c0_61] : memref<10x5x128xf32, #tpu.memory_space<vmem>>, vector<8x4x128xf32>
    %66 = vector.shape_cast %65 : vector<8x4x128xf32> to vector<4x2x4x128xf32>
    %67 = vector.extract_strided_slice %66 {offsets = [0, 0, 0, 0], sizes = [4, 1, 4, 128], strides = [1, 1, 1, 1]} : vector<4x2x4x128xf32> to vector<4x1x4x128xf32>
    %68 = vector.shape_cast %67 : vector<4x1x4x128xf32> to vector<4x4x128xf32>
    %69 = arith.truncf %68 : vector<4x4x128xf32> to vector<4x4x128xbf16>
    %70 = vector.shape_cast %69 : vector<4x4x128xbf16> to vector<16x128xbf16>
    %c0_62 = arith.constant 0 : index
    %c3 = arith.constant 3 : index
    %c0_63 = arith.constant 0 : index
    %c0_64 = arith.constant 0 : index
    %71 = vector.load %arg6[%c0_62, %c3, %c0_63, %c0_64] : memref<1x9x128x128xbf16, #tpu.memory_space<vmem>>, vector<1x1x128x128xbf16>
    %72 = vector.shape_cast %71 : vector<1x1x128x128xbf16> to vector<128x128xbf16>
    %cst_65 = arith.constant dense<0.000000e+00> : vector<16x128xf32>
    %73 = tpu.matmul %70, %72, %cst_65 {dimension_numbers = #tpu.dot_dimension_numbers<[1], [0], [0], [1], [0, 0, 1, 1], [], []>} : vector<16x128xbf16>, vector<128x128xbf16>, vector<16x128xf32> -> vector<16x128xf32>
    %74 = arith.addf %64, %73 : vector<16x128xf32>
    %c1_66 = arith.constant 1 : index
    %c0_67 = arith.constant 0 : index
    %c0_68 = arith.constant 0 : index
    %75 = vector.load %arg12[%c1_66, %c0_67, %c0_68] : memref<10x4x128xf32, #tpu.memory_space<vmem>>, vector<8x4x128xf32>
    %76 = vector.shape_cast %75 : vector<8x4x128xf32> to vector<4x2x4x128xf32>
    %77 = vector.extract_strided_slice %76 {offsets = [0, 0, 0, 0], sizes = [4, 1, 4, 128], strides = [1, 1, 1, 1]} : vector<4x2x4x128xf32> to vector<4x1x4x128xf32>
    %78 = vector.shape_cast %77 : vector<4x1x4x128xf32> to vector<4x4x128xf32>
    %79 = arith.truncf %78 : vector<4x4x128xf32> to vector<4x4x128xbf16>
    %80 = vector.shape_cast %79 : vector<4x4x128xbf16> to vector<16x128xbf16>
    %c0_69 = arith.constant 0 : index
    %c4 = arith.constant 4 : index
    %c0_70 = arith.constant 0 : index
    %c0_71 = arith.constant 0 : index
    %81 = vector.load %arg6[%c0_69, %c4, %c0_70, %c0_71] : memref<1x9x128x128xbf16, #tpu.memory_space<vmem>>, vector<1x1x128x128xbf16>
    %82 = vector.shape_cast %81 : vector<1x1x128x128xbf16> to vector<128x128xbf16>
    %cst_72 = arith.constant dense<0.000000e+00> : vector<16x128xf32>
    %83 = tpu.matmul %80, %82, %cst_72 {dimension_numbers = #tpu.dot_dimension_numbers<[1], [0], [0], [1], [0, 0, 1, 1], [], []>} : vector<16x128xbf16>, vector<128x128xbf16>, vector<16x128xf32> -> vector<16x128xf32>
    %84 = arith.addf %74, %83 : vector<16x128xf32>
    %c1_73 = arith.constant 1 : index
    %c1_74 = arith.constant 1 : index
    %c0_75 = arith.constant 0 : index
    %85 = vector.load %arg11[%c1_73, %c1_74, %c0_75] : memref<10x5x128xf32, #tpu.memory_space<vmem>>, vector<8x4x128xf32>
    %86 = vector.shape_cast %85 : vector<8x4x128xf32> to vector<4x2x4x128xf32>
    %87 = vector.extract_strided_slice %86 {offsets = [0, 0, 0, 0], sizes = [4, 1, 4, 128], strides = [1, 1, 1, 1]} : vector<4x2x4x128xf32> to vector<4x1x4x128xf32>
    %88 = vector.shape_cast %87 : vector<4x1x4x128xf32> to vector<4x4x128xf32>
    %89 = arith.truncf %88 : vector<4x4x128xf32> to vector<4x4x128xbf16>
    %90 = vector.shape_cast %89 : vector<4x4x128xbf16> to vector<16x128xbf16>
    %c0_76 = arith.constant 0 : index
    %c5 = arith.constant 5 : index
    %c0_77 = arith.constant 0 : index
    %c0_78 = arith.constant 0 : index
    %91 = vector.load %arg6[%c0_76, %c5, %c0_77, %c0_78] : memref<1x9x128x128xbf16, #tpu.memory_space<vmem>>, vector<1x1x128x128xbf16>
    %92 = vector.shape_cast %91 : vector<1x1x128x128xbf16> to vector<128x128xbf16>
    %cst_79 = arith.constant dense<0.000000e+00> : vector<16x128xf32>
    %93 = tpu.matmul %90, %92, %cst_79 {dimension_numbers = #tpu.dot_dimension_numbers<[1], [0], [0], [1], [0, 0, 1, 1], [], []>} : vector<16x128xbf16>, vector<128x128xbf16>, vector<16x128xf32> -> vector<16x128xf32>
    %94 = arith.addf %84, %93 : vector<16x128xf32>
    %c2_80 = arith.constant 2 : index
    %c0_81 = arith.constant 0 : index
    %c0_82 = arith.constant 0 : index
    %95 = vector.load %arg11[%c2_80, %c0_81, %c0_82] : memref<10x5x128xf32, #tpu.memory_space<vmem>>, vector<8x4x128xf32>
    %96 = vector.shape_cast %95 : vector<8x4x128xf32> to vector<4x2x4x128xf32>
    %97 = vector.extract_strided_slice %96 {offsets = [0, 0, 0, 0], sizes = [4, 1, 4, 128], strides = [1, 1, 1, 1]} : vector<4x2x4x128xf32> to vector<4x1x4x128xf32>
    %98 = vector.shape_cast %97 : vector<4x1x4x128xf32> to vector<4x4x128xf32>
    %99 = arith.truncf %98 : vector<4x4x128xf32> to vector<4x4x128xbf16>
    %100 = vector.shape_cast %99 : vector<4x4x128xbf16> to vector<16x128xbf16>
    %c0_83 = arith.constant 0 : index
    %c6 = arith.constant 6 : index
    %c0_84 = arith.constant 0 : index
    %c0_85 = arith.constant 0 : index
    %101 = vector.load %arg6[%c0_83, %c6, %c0_84, %c0_85] : memref<1x9x128x128xbf16, #tpu.memory_space<vmem>>, vector<1x1x128x128xbf16>
    %102 = vector.shape_cast %101 : vector<1x1x128x128xbf16> to vector<128x128xbf16>
    %cst_86 = arith.constant dense<0.000000e+00> : vector<16x128xf32>
    %103 = tpu.matmul %100, %102, %cst_86 {dimension_numbers = #tpu.dot_dimension_numbers<[1], [0], [0], [1], [0, 0, 1, 1], [], []>} : vector<16x128xbf16>, vector<128x128xbf16>, vector<16x128xf32> -> vector<16x128xf32>
    %104 = arith.addf %94, %103 : vector<16x128xf32>
    %c2_87 = arith.constant 2 : index
    %c0_88 = arith.constant 0 : index
    %c0_89 = arith.constant 0 : index
    %105 = vector.load %arg12[%c2_87, %c0_88, %c0_89] : memref<10x4x128xf32, #tpu.memory_space<vmem>>, vector<8x4x128xf32>
    %106 = vector.shape_cast %105 : vector<8x4x128xf32> to vector<4x2x4x128xf32>
    %107 = vector.extract_strided_slice %106 {offsets = [0, 0, 0, 0], sizes = [4, 1, 4, 128], strides = [1, 1, 1, 1]} : vector<4x2x4x128xf32> to vector<4x1x4x128xf32>
    %108 = vector.shape_cast %107 : vector<4x1x4x128xf32> to vector<4x4x128xf32>
    %109 = arith.truncf %108 : vector<4x4x128xf32> to vector<4x4x128xbf16>
    %110 = vector.shape_cast %109 : vector<4x4x128xbf16> to vector<16x128xbf16>
    %c0_90 = arith.constant 0 : index
    %c7 = arith.constant 7 : index
    %c0_91 = arith.constant 0 : index
    %c0_92 = arith.constant 0 : index
    %111 = vector.load %arg6[%c0_90, %c7, %c0_91, %c0_92] : memref<1x9x128x128xbf16, #tpu.memory_space<vmem>>, vector<1x1x128x128xbf16>
    %112 = vector.shape_cast %111 : vector<1x1x128x128xbf16> to vector<128x128xbf16>
    %cst_93 = arith.constant dense<0.000000e+00> : vector<16x128xf32>
    %113 = tpu.matmul %110, %112, %cst_93 {dimension_numbers = #tpu.dot_dimension_numbers<[1], [0], [0], [1], [0, 0, 1, 1], [], []>} : vector<16x128xbf16>, vector<128x128xbf16>, vector<16x128xf32> -> vector<16x128xf32>
    %114 = arith.addf %104, %113 : vector<16x128xf32>
    %c2_94 = arith.constant 2 : index
    %c1_95 = arith.constant 1 : index
    %c0_96 = arith.constant 0 : index
    %115 = vector.load %arg11[%c2_94, %c1_95, %c0_96] : memref<10x5x128xf32, #tpu.memory_space<vmem>>, vector<8x4x128xf32>
    %116 = vector.shape_cast %115 : vector<8x4x128xf32> to vector<4x2x4x128xf32>
    %117 = vector.extract_strided_slice %116 {offsets = [0, 0, 0, 0], sizes = [4, 1, 4, 128], strides = [1, 1, 1, 1]} : vector<4x2x4x128xf32> to vector<4x1x4x128xf32>
    %118 = vector.shape_cast %117 : vector<4x1x4x128xf32> to vector<4x4x128xf32>
    %119 = arith.truncf %118 : vector<4x4x128xf32> to vector<4x4x128xbf16>
    %120 = vector.shape_cast %119 : vector<4x4x128xbf16> to vector<16x128xbf16>
    %c0_97 = arith.constant 0 : index
    %c8 = arith.constant 8 : index
    %c0_98 = arith.constant 0 : index
    %c0_99 = arith.constant 0 : index
    %121 = vector.load %arg6[%c0_97, %c8, %c0_98, %c0_99] : memref<1x9x128x128xbf16, #tpu.memory_space<vmem>>, vector<1x1x128x128xbf16>
    %122 = vector.shape_cast %121 : vector<1x1x128x128xbf16> to vector<128x128xbf16>
    %cst_100 = arith.constant dense<0.000000e+00> : vector<16x128xf32>
    %123 = tpu.matmul %120, %122, %cst_100 {dimension_numbers = #tpu.dot_dimension_numbers<[1], [0], [0], [1], [0, 0, 1, 1], [], []>} : vector<16x128xbf16>, vector<128x128xbf16>, vector<16x128xf32> -> vector<16x128xf32>
    %124 = arith.addf %114, %123 : vector<16x128xf32>
    %c0_101 = arith.constant 0 : index
    %c0_102 = arith.constant 0 : index
    %125 = vector.load %arg7[%c0_101, %c0_102] : memref<1x128xf32, #tpu.memory_space<vmem>>, vector<1x128xf32>
    %126 = vector.broadcast %125 : vector<1x128xf32> to vector<16x128xf32>
    %127 = arith.mulf %124, %126 : vector<16x128xf32>
    %c0_103 = arith.constant 0 : index
    %c0_104 = arith.constant 0 : index
    %128 = vector.load %arg8[%c0_103, %c0_104] : memref<1x128xf32, #tpu.memory_space<vmem>>, vector<1x128xf32>
    %129 = vector.broadcast %128 : vector<1x128xf32> to vector<16x128xf32>
    %130 = arith.addf %127, %129 : vector<16x128xf32>
    %131 = arith.truncf %130 : vector<16x128xf32> to vector<16x128xbf16>
    %c0_105 = arith.constant 0 : index
    %c0_106 = arith.constant 0 : index
    %c0_107 = arith.constant 0 : index
    %132 = vector.load %arg9[%c0_105, %c0_106, %c0_107] : memref<1x16x128xbf16, #tpu.memory_space<vmem>>, vector<1x16x128xbf16>
    %133 = vector.shape_cast %132 : vector<1x16x128xbf16> to vector<16x128xbf16>
    %134 = vector.shape_cast %131 : vector<16x128xbf16> to vector<1x16x128xbf16>
    tpu.vector_store %arg9[%c0_105, %c0_106, %c0_107], %134 {strides = array<i32>} : memref<1x16x128xbf16, #tpu.memory_space<vmem>>, vector<1x16x128xbf16>,
    %cst_108 = arith.constant dense<0.000000e+00> : vector<128xf32>
    %135 = vector.multi_reduction <add>, %130, %cst_108 [0] : vector<16x128xf32> to vector<128xf32>
    %136 = vector.shape_cast %135 : vector<128xf32> to vector<1x128xf32>
    %cst_109 = arith.constant 6.250000e-02 : f32
    %137 = vector.broadcast %cst_109 : f32 to vector<1x128xf32>
    %138 = arith.mulf %136, %137 : vector<1x128xf32>
    %c0_110 = arith.constant 0 : index
    %c0_111 = arith.constant 0 : index
    %c0_112 = arith.constant 0 : index
    %139 = vector.load %arg10[%c0_110, %c0_111, %c0_112] : memref<1x1x128xf32, #tpu.memory_space<vmem>>, vector<1x1x128xf32>
    %140 = vector.shape_cast %139 : vector<1x1x128xf32> to vector<1x128xf32>
    %141 = vector.shape_cast %138 : vector<1x128xf32> to vector<1x1x128xf32>
    tpu.vector_store %arg10[%c0_110, %c0_111, %c0_112], %141 {strides = array<i32>} : memref<1x1x128xf32, #tpu.memory_space<vmem>>, vector<1x1x128xf32>,
    return
  }
  func.func @transform_0(%arg0: i32) -> (i32, i32, i32, i32) {
    %c0_i32 = arith.constant 0 : i32
    %c0_i32_0 = arith.constant 0 : i32
    %c0_i32_1 = arith.constant 0 : i32
    %c0_i32_2 = arith.constant 0 : i32
    return %arg0, %c0_i32, %c0_i32_0, %c0_i32_1 : i32, i32, i32, i32
  }
  func.func @transform_1(%arg0: i32) -> (i32, i32, i32, i32) {
    %c0_i32 = arith.constant 0 : i32
    %c0_i32_0 = arith.constant 0 : i32
    %c0_i32_1 = arith.constant 0 : i32
    %c0_i32_2 = arith.constant 0 : i32
    return %arg0, %c0_i32, %c0_i32_0, %c0_i32_1 : i32, i32, i32, i32
  }
  func.func @transform_2(%arg0: i32) -> (i32, i32) {
    %c0_i32 = arith.constant 0 : i32
    %c0_i32_0 = arith.constant 0 : i32
    %c0_i32_1 = arith.constant 0 : i32
    return %c0_i32, %c0_i32_0 : i32, i32
  }
  func.func @transform_3(%arg0: i32) -> (i32, i32) {
    %c0_i32 = arith.constant 0 : i32
    %c0_i32_0 = arith.constant 0 : i32
    %c0_i32_1 = arith.constant 0 : i32
    return %c0_i32, %c0_i32_0 : i32, i32
  }
  func.func @transform_4(%arg0: i32) -> (i32, i32) {
    %c0_i32 = arith.constant 0 : i32
    %c0_i32_0 = arith.constant 0 : i32
    %c0_i32_1 = arith.constant 0 : i32
    return %c0_i32, %c0_i32_0 : i32, i32
  }
  func.func @transform_5(%arg0: i32) -> (i32, i32, i32, i32) {
    %c0_i32 = arith.constant 0 : i32
    %c0_i32_0 = arith.constant 0 : i32
    %c0_i32_1 = arith.constant 0 : i32
    %c0_i32_2 = arith.constant 0 : i32
    %c0_i32_3 = arith.constant 0 : i32
    return %c0_i32, %c0_i32_0, %c0_i32_1, %c0_i32_2 : i32, i32, i32, i32
  }
  func.func @transform_6(%arg0: i32) -> (i32, i32) {
    %c0_i32 = arith.constant 0 : i32
    %c0_i32_0 = arith.constant 0 : i32
    %c0_i32_1 = arith.constant 0 : i32
    return %c0_i32, %c0_i32_0 : i32, i32
  }
  func.func @transform_7(%arg0: i32) -> (i32, i32) {
    %c0_i32 = arith.constant 0 : i32
    %c0_i32_0 = arith.constant 0 : i32
    %c0_i32_1 = arith.constant 0 : i32
    return %c0_i32, %c0_i32_0 : i32, i32
  }
  func.func @transform_8(%arg0: i32) -> (i32, i32, i32) {
    %c0_i32 = arith.constant 0 : i32
    %c0_i32_0 = arith.constant 0 : i32
    %c0_i32_1 = arith.constant 0 : i32
    return %arg0, %c0_i32, %c0_i32_0 : i32, i32, i32
  }
  func.func @transform_9(%arg0: i32) -> (i32, i32, i32) {
    %c0_i32 = arith.constant 0 : i32
    %c0_i32_0 = arith.constant 0 : i32
    %c0_i32_1 = arith.constant 0 : i32
    return %arg0, %c0_i32, %c0_i32_0 : i32, i32, i32
  }
}

module attributes {stable_mosaic.version = 11 : i64} {
  func.func @_convc_se_res_ds_kernel(%arg0: i32, %arg1: memref<1x16x128xbf16, #tpu.memory_space<vmem>>, %arg2: memref<1x1x128xf32, #tpu.memory_space<vmem>>, %arg3: memref<128x128xf32, #tpu.memory_space<vmem>>, %arg4: memref<1x128xf32, #tpu.memory_space<vmem>>, %arg5: memref<128x128xf32, #tpu.memory_space<vmem>>, %arg6: memref<1x128xf32, #tpu.memory_space<vmem>>, %arg7: memref<128x128xbf16, #tpu.memory_space<vmem>>, %arg8: memref<1x128xf32, #tpu.memory_space<vmem>>, %arg9: memref<1x128xf32, #tpu.memory_space<vmem>>, %arg10: memref<1x16x128xbf16, #tpu.memory_space<vmem>>, %arg11: memref<128x128xbf16, #tpu.memory_space<vmem>>, %arg12: memref<1x128xf32, #tpu.memory_space<vmem>>, %arg13: memref<1x128xf32, #tpu.memory_space<vmem>>, %arg14: memref<1x16x128xbf16, #tpu.memory_space<vmem>>) attributes {dimension_semantics = [#tpu.dimension_semantics<parallel>], iteration_bounds = array<i64: 2>, scalar_prefetch = 0 : i64, scratch_operands = 0 : i64, tpu.core_type = #tpu.core_type<tc>, window_params = [{transform_indices = @transform_0, window_bounds = array<i64: 1, 16, 128>}, {transform_indices = @transform_1, window_bounds = array<i64: 1, 1, 128>}, {pipeline_mode = #tpu.pipeline_mode<synchronous>, transform_indices = @transform_2, window_bounds = array<i64: 128, 128>}, {pipeline_mode = #tpu.pipeline_mode<synchronous>, transform_indices = @transform_3, window_bounds = array<i64: 1, 128>}, {pipeline_mode = #tpu.pipeline_mode<synchronous>, transform_indices = @transform_4, window_bounds = array<i64: 128, 128>}, {pipeline_mode = #tpu.pipeline_mode<synchronous>, transform_indices = @transform_5, window_bounds = array<i64: 1, 128>}, {pipeline_mode = #tpu.pipeline_mode<synchronous>, transform_indices = @transform_6, window_bounds = array<i64: 128, 128>}, {pipeline_mode = #tpu.pipeline_mode<synchronous>, transform_indices = @transform_7, window_bounds = array<i64: 1, 128>}, {pipeline_mode = #tpu.pipeline_mode<synchronous>, transform_indices = @transform_8, window_bounds = array<i64: 1, 128>}, {transform_indices = @transform_9, window_bounds = array<i64: 1, 16, 128>}, {pipeline_mode = #tpu.pipeline_mode<synchronous>, transform_indices = @transform_10, window_bounds = array<i64: 128, 128>}, {pipeline_mode = #tpu.pipeline_mode<synchronous>, transform_indices = @transform_11, window_bounds = array<i64: 1, 128>}, {pipeline_mode = #tpu.pipeline_mode<synchronous>, transform_indices = @transform_12, window_bounds = array<i64: 1, 128>}, {transform_indices = @transform_13, window_bounds = array<i64: 1, 16, 128>}]} {
    %c0 = arith.constant 0 : index
    %c0_0 = arith.constant 0 : index
    %c0_1 = arith.constant 0 : index
    %0 = vector.load %arg2[%c0, %c0_0, %c0_1] : memref<1x1x128xf32, #tpu.memory_space<vmem>>, vector<1x1x128xf32>
    %1 = vector.shape_cast %0 : vector<1x1x128xf32> to vector<1x128xf32>
    %c0_2 = arith.constant 0 : index
    %c0_3 = arith.constant 0 : index
    %2 = vector.load %arg3[%c0_2, %c0_3] : memref<128x128xf32, #tpu.memory_space<vmem>>, vector<128x128xf32>
    %cst = arith.constant dense<0.000000e+00> : vector<1x128xf32>
    %3 = tpu.matmul %1, %2, %cst {dimension_numbers = #tpu.dot_dimension_numbers<[1], [0], [0], [1], [0, 0, 1, 1], [], []>} : vector<1x128xf32>, vector<128x128xf32>, vector<1x128xf32> -> vector<1x128xf32>
    %c0_4 = arith.constant 0 : index
    %c0_5 = arith.constant 0 : index
    %4 = vector.load %arg4[%c0_4, %c0_5] : memref<1x128xf32, #tpu.memory_space<vmem>>, vector<1x128xf32>
    %5 = arith.addf %3, %4 : vector<1x128xf32>
    %cst_6 = arith.constant 0.000000e+00 : f32
    %6 = vector.broadcast %cst_6 : f32 to vector<1x128xf32>
    %7 = arith.maximumf %5, %6 : vector<1x128xf32>
    %c0_7 = arith.constant 0 : index
    %c0_8 = arith.constant 0 : index
    %8 = vector.load %arg5[%c0_7, %c0_8] : memref<128x128xf32, #tpu.memory_space<vmem>>, vector<128x128xf32>
    %cst_9 = arith.constant dense<0.000000e+00> : vector<1x128xf32>
    %9 = tpu.matmul %7, %8, %cst_9 {dimension_numbers = #tpu.dot_dimension_numbers<[1], [0], [0], [1], [0, 0, 1, 1], [], []>} : vector<1x128xf32>, vector<128x128xf32>, vector<1x128xf32> -> vector<1x128xf32>
    %c0_10 = arith.constant 0 : index
    %c0_11 = arith.constant 0 : index
    %10 = vector.load %arg6[%c0_10, %c0_11] : memref<1x128xf32, #tpu.memory_space<vmem>>, vector<1x128xf32>
    %11 = arith.addf %9, %10 : vector<1x128xf32>
    %cst_12 = arith.constant 0.000000e+00 : f32
    %12 = vector.broadcast %cst_12 : f32 to vector<1x128xf32>
    %13 = arith.subf %12, %11 : vector<1x128xf32>
    %14 = math.exp %13 : vector<1x128xf32>
    %cst_13 = arith.constant 1.000000e+00 : f32
    %15 = vector.broadcast %cst_13 : f32 to vector<1x128xf32>
    %16 = arith.addf %15, %14 : vector<1x128xf32>
    %cst_14 = arith.constant 1.000000e+00 : f32
    %17 = vector.broadcast %cst_14 : f32 to vector<1x128xf32>
    %18 = arith.divf %17, %16 : vector<1x128xf32>
    %19 = arith.truncf %18 : vector<1x128xf32> to vector<1x128xbf16>
    %c0_15 = arith.constant 0 : index
    %c0_16 = arith.constant 0 : index
    %c0_17 = arith.constant 0 : index
    %20 = vector.load %arg1[%c0_15, %c0_16, %c0_17] : memref<1x16x128xbf16, #tpu.memory_space<vmem>>, vector<1x16x128xbf16>
    %21 = vector.shape_cast %20 : vector<1x16x128xbf16> to vector<16x128xbf16>
    %22 = vector.broadcast %19 : vector<1x128xbf16> to vector<16x128xbf16>
    %23 = arith.mulf %21, %22 : vector<16x128xbf16>
    %c0_18 = arith.constant 0 : index
    %c0_19 = arith.constant 0 : index
    %24 = vector.load %arg7[%c0_18, %c0_19] : memref<128x128xbf16, #tpu.memory_space<vmem>>, vector<128x128xbf16>
    %cst_20 = arith.constant dense<0.000000e+00> : vector<16x128xf32>
    %25 = tpu.matmul %23, %24, %cst_20 {dimension_numbers = #tpu.dot_dimension_numbers<[1], [0], [0], [1], [0, 0, 1, 1], [], []>} : vector<16x128xbf16>, vector<128x128xbf16>, vector<16x128xf32> -> vector<16x128xf32>
    %c0_21 = arith.constant 0 : index
    %c0_22 = arith.constant 0 : index
    %26 = vector.load %arg8[%c0_21, %c0_22] : memref<1x128xf32, #tpu.memory_space<vmem>>, vector<1x128xf32>
    %27 = vector.broadcast %26 : vector<1x128xf32> to vector<16x128xf32>
    %28 = arith.mulf %25, %27 : vector<16x128xf32>
    %c0_23 = arith.constant 0 : index
    %c0_24 = arith.constant 0 : index
    %29 = vector.load %arg9[%c0_23, %c0_24] : memref<1x128xf32, #tpu.memory_space<vmem>>, vector<1x128xf32>
    %30 = vector.broadcast %29 : vector<1x128xf32> to vector<16x128xf32>
    %31 = arith.addf %28, %30 : vector<16x128xf32>
    %c0_25 = arith.constant 0 : index
    %c0_26 = arith.constant 0 : index
    %c0_27 = arith.constant 0 : index
    %32 = vector.load %arg10[%c0_25, %c0_26, %c0_27] : memref<1x16x128xbf16, #tpu.memory_space<vmem>>, vector<1x16x128xbf16>
    %33 = vector.shape_cast %32 : vector<1x16x128xbf16> to vector<16x128xbf16>
    %c0_28 = arith.constant 0 : index
    %c0_29 = arith.constant 0 : index
    %34 = vector.load %arg11[%c0_28, %c0_29] : memref<128x128xbf16, #tpu.memory_space<vmem>>, vector<128x128xbf16>
    %cst_30 = arith.constant dense<0.000000e+00> : vector<16x128xf32>
    %35 = tpu.matmul %33, %34, %cst_30 {dimension_numbers = #tpu.dot_dimension_numbers<[1], [0], [0], [1], [0, 0, 1, 1], [], []>} : vector<16x128xbf16>, vector<128x128xbf16>, vector<16x128xf32> -> vector<16x128xf32>
    %c0_31 = arith.constant 0 : index
    %c0_32 = arith.constant 0 : index
    %36 = vector.load %arg12[%c0_31, %c0_32] : memref<1x128xf32, #tpu.memory_space<vmem>>, vector<1x128xf32>
    %37 = vector.broadcast %36 : vector<1x128xf32> to vector<16x128xf32>
    %38 = arith.mulf %35, %37 : vector<16x128xf32>
    %c0_33 = arith.constant 0 : index
    %c0_34 = arith.constant 0 : index
    %39 = vector.load %arg13[%c0_33, %c0_34] : memref<1x128xf32, #tpu.memory_space<vmem>>, vector<1x128xf32>
    %40 = vector.broadcast %39 : vector<1x128xf32> to vector<16x128xf32>
    %41 = arith.addf %38, %40 : vector<16x128xf32>
    %42 = arith.addf %31, %41 : vector<16x128xf32>
    %cst_35 = arith.constant 0.000000e+00 : f32
    %43 = vector.broadcast %cst_35 : f32 to vector<16x128xf32>
    %44 = arith.maximumf %42, %43 : vector<16x128xf32>
    %45 = arith.truncf %44 : vector<16x128xf32> to vector<16x128xbf16>
    %c0_36 = arith.constant 0 : index
    %c0_37 = arith.constant 0 : index
    %c0_38 = arith.constant 0 : index
    %46 = vector.load %arg14[%c0_36, %c0_37, %c0_38] : memref<1x16x128xbf16, #tpu.memory_space<vmem>>, vector<1x16x128xbf16>
    %47 = vector.shape_cast %46 : vector<1x16x128xbf16> to vector<16x128xbf16>
    %48 = vector.shape_cast %45 : vector<16x128xbf16> to vector<1x16x128xbf16>
    tpu.vector_store %arg14[%c0_36, %c0_37, %c0_38], %48 {strides = array<i32>} : memref<1x16x128xbf16, #tpu.memory_space<vmem>>, vector<1x16x128xbf16>,
    return
  }
  func.func @transform_0(%arg0: i32) -> (i32, i32, i32) {
    %c0_i32 = arith.constant 0 : i32
    %c0_i32_0 = arith.constant 0 : i32
    %c0_i32_1 = arith.constant 0 : i32
    return %arg0, %c0_i32, %c0_i32_0 : i32, i32, i32
  }
  func.func @transform_1(%arg0: i32) -> (i32, i32, i32) {
    %c0_i32 = arith.constant 0 : i32
    %c0_i32_0 = arith.constant 0 : i32
    %c0_i32_1 = arith.constant 0 : i32
    return %arg0, %c0_i32, %c0_i32_0 : i32, i32, i32
  }
  func.func @transform_2(%arg0: i32) -> (i32, i32) {
    %c0_i32 = arith.constant 0 : i32
    %c0_i32_0 = arith.constant 0 : i32
    %c0_i32_1 = arith.constant 0 : i32
    return %c0_i32, %c0_i32_0 : i32, i32
  }
  func.func @transform_3(%arg0: i32) -> (i32, i32) {
    %c0_i32 = arith.constant 0 : i32
    %c0_i32_0 = arith.constant 0 : i32
    %c0_i32_1 = arith.constant 0 : i32
    return %c0_i32, %c0_i32_0 : i32, i32
  }
  func.func @transform_4(%arg0: i32) -> (i32, i32) {
    %c0_i32 = arith.constant 0 : i32
    %c0_i32_0 = arith.constant 0 : i32
    %c0_i32_1 = arith.constant 0 : i32
    return %c0_i32, %c0_i32_0 : i32, i32
  }
  func.func @transform_5(%arg0: i32) -> (i32, i32) {
    %c0_i32 = arith.constant 0 : i32
    %c0_i32_0 = arith.constant 0 : i32
    %c0_i32_1 = arith.constant 0 : i32
    return %c0_i32, %c0_i32_0 : i32, i32
  }
  func.func @transform_6(%arg0: i32) -> (i32, i32) {
    %c0_i32 = arith.constant 0 : i32
    %c0_i32_0 = arith.constant 0 : i32
    %c0_i32_1 = arith.constant 0 : i32
    return %c0_i32, %c0_i32_0 : i32, i32
  }
  func.func @transform_7(%arg0: i32) -> (i32, i32) {
    %c0_i32 = arith.constant 0 : i32
    %c0_i32_0 = arith.constant 0 : i32
    %c0_i32_1 = arith.constant 0 : i32
    return %c0_i32, %c0_i32_0 : i32, i32
  }
  func.func @transform_8(%arg0: i32) -> (i32, i32) {
    %c0_i32 = arith.constant 0 : i32
    %c0_i32_0 = arith.constant 0 : i32
    %c0_i32_1 = arith.constant 0 : i32
    return %c0_i32, %c0_i32_0 : i32, i32
  }
  func.func @transform_9(%arg0: i32) -> (i32, i32, i32) {
    %c0_i32 = arith.constant 0 : i32
    %c0_i32_0 = arith.constant 0 : i32
    %c0_i32_1 = arith.constant 0 : i32
    return %arg0, %c0_i32, %c0_i32_0 : i32, i32, i32
  }
  func.func @transform_10(%arg0: i32) -> (i32, i32) {
    %c0_i32 = arith.constant 0 : i32
    %c0_i32_0 = arith.constant 0 : i32
    %c0_i32_1 = arith.constant 0 : i32
    return %c0_i32, %c0_i32_0 : i32, i32
  }
  func.func @transform_11(%arg0: i32) -> (i32, i32) {
    %c0_i32 = arith.constant 0 : i32
    %c0_i32_0 = arith.constant 0 : i32
    %c0_i32_1 = arith.constant 0 : i32
    return %c0_i32, %c0_i32_0 : i32, i32
  }
  func.func @transform_12(%arg0: i32) -> (i32, i32) {
    %c0_i32 = arith.constant 0 : i32
    %c0_i32_0 = arith.constant 0 : i32
    %c0_i32_1 = arith.constant 0 : i32
    return %c0_i32, %c0_i32_0 : i32, i32
  }
  func.func @transform_13(%arg0: i32) -> (i32, i32, i32) {
    %c0_i32 = arith.constant 0 : i32
    %c0_i32_0 = arith.constant 0 : i32
    %c0_i32_1 = arith.constant 0 : i32
    return %arg0, %c0_i32, %c0_i32_0 : i32, i32, i32
  }
}

module attributes {stable_mosaic.version = 11 : i64} {
  func.func @_block_ab_s1_kernel(%arg0: i32, %arg1: memref<1x4x4x128xbf16, #tpu.memory_space<vmem>>, %arg2: memref<128x128xbf16, #tpu.memory_space<vmem>>, %arg3: memref<1x128xf32, #tpu.memory_space<vmem>>, %arg4: memref<1x128xf32, #tpu.memory_space<vmem>>, %arg5: memref<1x9x128x128xbf16, #tpu.memory_space<vmem>>, %arg6: memref<1x128xf32, #tpu.memory_space<vmem>>, %arg7: memref<1x128xf32, #tpu.memory_space<vmem>>, %arg8: memref<1x16x128xbf16, #tpu.memory_space<vmem>>, %arg9: memref<1x1x128xf32, #tpu.memory_space<vmem>>, %arg10: memref<6x6x128xf32, #tpu.memory_space<vmem>>) attributes {dimension_semantics = [#tpu.dimension_semantics<parallel>], iteration_bounds = array<i64: 2>, scalar_prefetch = 0 : i64, scratch_operands = 1 : i64, tpu.core_type = #tpu.core_type<tc>, window_params = [{transform_indices = @transform_0, window_bounds = array<i64: 1, 4, 4, 128>}, {pipeline_mode = #tpu.pipeline_mode<synchronous>, transform_indices = @transform_1, window_bounds = array<i64: 128, 128>}, {pipeline_mode = #tpu.pipeline_mode<synchronous>, transform_indices = @transform_2, window_bounds = array<i64: 1, 128>}, {pipeline_mode = #tpu.pipeline_mode<synchronous>, transform_indices = @transform_3, window_bounds = array<i64: 1, 128>}, {pipeline_mode = #tpu.pipeline_mode<synchronous>, transform_indices = @transform_4, window_bounds = array<i64: 1, 9, 128, 128>}, {pipeline_mode = #tpu.pipeline_mode<synchronous>, transform_indices = @transform_5, window_bounds = array<i64: 1, 128>}, {pipeline_mode = #tpu.pipeline_mode<synchronous>, transform_indices = @transform_6, window_bounds = array<i64: 1, 128>}, {transform_indices = @transform_7, window_bounds = array<i64: 1, 16, 128>}, {transform_indices = @transform_8, window_bounds = array<i64: 1, 1, 128>}]} {
    %c0 = arith.constant 0 : index
    %c0_0 = arith.constant 0 : index
    %c0_1 = arith.constant 0 : index
    %c0_2 = arith.constant 0 : index
    %0 = vector.load %arg1[%c0, %c0_0, %c0_1, %c0_2] : memref<1x4x4x128xbf16, #tpu.memory_space<vmem>>, vector<1x4x4x128xbf16>
    %1 = vector.shape_cast %0 : vector<1x4x4x128xbf16> to vector<4x4x128xbf16>
    %2 = vector.shape_cast %1 : vector<4x4x128xbf16> to vector<16x128xbf16>
    %c0_3 = arith.constant 0 : index
    %c0_4 = arith.constant 0 : index
    %3 = vector.load %arg2[%c0_3, %c0_4] : memref<128x128xbf16, #tpu.memory_space<vmem>>, vector<128x128xbf16>
    %cst = arith.constant dense<0.000000e+00> : vector<16x128xf32>
    %4 = tpu.matmul %2, %3, %cst {dimension_numbers = #tpu.dot_dimension_numbers<[1], [0], [0], [1], [0, 0, 1, 1], [], []>} : vector<16x128xbf16>, vector<128x128xbf16>, vector<16x128xf32> -> vector<16x128xf32>
    %c0_5 = arith.constant 0 : index
    %c0_6 = arith.constant 0 : index
    %5 = vector.load %arg3[%c0_5, %c0_6] : memref<1x128xf32, #tpu.memory_space<vmem>>, vector<1x128xf32>
    %6 = vector.broadcast %5 : vector<1x128xf32> to vector<16x128xf32>
    %7 = arith.mulf %4, %6 : vector<16x128xf32>
    %c0_7 = arith.constant 0 : index
    %c0_8 = arith.constant 0 : index
    %8 = vector.load %arg4[%c0_7, %c0_8] : memref<1x128xf32, #tpu.memory_space<vmem>>, vector<1x128xf32>
    %9 = vector.broadcast %8 : vector<1x128xf32> to vector<16x128xf32>
    %10 = arith.addf %7, %9 : vector<16x128xf32>
    %cst_9 = arith.constant 0.000000e+00 : f32
    %11 = vector.broadcast %cst_9 : f32 to vector<16x128xf32>
    %12 = arith.maximumf %10, %11 : vector<16x128xf32>
    %cst_10 = arith.constant 0.000000e+00 : f32
    %13 = vector.broadcast %cst_10 : f32 to vector<6x6x128xf32>
    %c0_11 = arith.constant 0 : index
    %c0_12 = arith.constant 0 : index
    %c0_13 = arith.constant 0 : index
    %14 = vector.load %arg10[%c0_11, %c0_12, %c0_13] : memref<6x6x128xf32, #tpu.memory_space<vmem>>, vector<6x6x128xf32>
    tpu.vector_store %arg10[%c0_11, %c0_12, %c0_13], %13 {strides = array<i32>} : memref<6x6x128xf32, #tpu.memory_space<vmem>>, vector<6x6x128xf32>,
    %15 = vector.shape_cast %12 : vector<16x128xf32> to vector<4x4x128xf32>
    %c1 = arith.constant 1 : index
    %c1_14 = arith.constant 1 : index
    %c0_15 = arith.constant 0 : index
    %16 = vector.load %arg10[%c1, %c1_14, %c0_15] : memref<6x6x128xf32, #tpu.memory_space<vmem>>, vector<4x4x128xf32>
    tpu.vector_store %arg10[%c1, %c1_14, %c0_15], %15 {strides = array<i32>} : memref<6x6x128xf32, #tpu.memory_space<vmem>>, vector<4x4x128xf32>,
    %cst_16 = arith.constant 0.000000e+00 : f32
    %17 = vector.broadcast %cst_16 : f32 to vector<16x128xf32>
    %c0_17 = arith.constant 0 : index
    %c0_18 = arith.constant 0 : index
    %c0_19 = arith.constant 0 : index
    %18 = vector.load %arg10[%c0_17, %c0_18, %c0_19] : memref<6x6x128xf32, #tpu.memory_space<vmem>>, vector<4x4x128xf32>
    %19 = arith.truncf %18 : vector<4x4x128xf32> to vector<4x4x128xbf16>
    %20 = vector.shape_cast %19 : vector<4x4x128xbf16> to vector<16x128xbf16>
    %c0_20 = arith.constant 0 : index
    %c0_21 = arith.constant 0 : index
    %c0_22 = arith.constant 0 : index
    %c0_23 = arith.constant 0 : index
    %21 = vector.load %arg5[%c0_20, %c0_21, %c0_22, %c0_23] : memref<1x9x128x128xbf16, #tpu.memory_space<vmem>>, vector<1x1x128x128xbf16>
    %22 = vector.shape_cast %21 : vector<1x1x128x128xbf16> to vector<128x128xbf16>
    %cst_24 = arith.constant dense<0.000000e+00> : vector<16x128xf32>
    %23 = tpu.matmul %20, %22, %cst_24 {dimension_numbers = #tpu.dot_dimension_numbers<[1], [0], [0], [1], [0, 0, 1, 1], [], []>} : vector<16x128xbf16>, vector<128x128xbf16>, vector<16x128xf32> -> vector<16x128xf32>
    %24 = arith.addf %17, %23 : vector<16x128xf32>
    %c0_25 = arith.constant 0 : index
    %c1_26 = arith.constant 1 : index
    %c0_27 = arith.constant 0 : index
    %25 = vector.load %arg10[%c0_25, %c1_26, %c0_27] : memref<6x6x128xf32, #tpu.memory_space<vmem>>, vector<4x4x128xf32>
    %26 = arith.truncf %25 : vector<4x4x128xf32> to vector<4x4x128xbf16>
    %27 = vector.shape_cast %26 : vector<4x4x128xbf16> to vector<16x128xbf16>
    %c0_28 = arith.constant 0 : index
    %c1_29 = arith.constant 1 : index
    %c0_30 = arith.constant 0 : index
    %c0_31 = arith.constant 0 : index
    %28 = vector.load %arg5[%c0_28, %c1_29, %c0_30, %c0_31] : memref<1x9x128x128xbf16, #tpu.memory_space<vmem>>, vector<1x1x128x128xbf16>
    %29 = vector.shape_cast %28 : vector<1x1x128x128xbf16> to vector<128x128xbf16>
    %cst_32 = arith.constant dense<0.000000e+00> : vector<16x128xf32>
    %30 = tpu.matmul %27, %29, %cst_32 {dimension_numbers = #tpu.dot_dimension_numbers<[1], [0], [0], [1], [0, 0, 1, 1], [], []>} : vector<16x128xbf16>, vector<128x128xbf16>, vector<16x128xf32> -> vector<16x128xf32>
    %31 = arith.addf %24, %30 : vector<16x128xf32>
    %c0_33 = arith.constant 0 : index
    %c2 = arith.constant 2 : index
    %c0_34 = arith.constant 0 : index
    %32 = vector.load %arg10[%c0_33, %c2, %c0_34] : memref<6x6x128xf32, #tpu.memory_space<vmem>>, vector<4x4x128xf32>
    %33 = arith.truncf %32 : vector<4x4x128xf32> to vector<4x4x128xbf16>
    %34 = vector.shape_cast %33 : vector<4x4x128xbf16> to vector<16x128xbf16>
    %c0_35 = arith.constant 0 : index
    %c2_36 = arith.constant 2 : index
    %c0_37 = arith.constant 0 : index
    %c0_38 = arith.constant 0 : index
    %35 = vector.load %arg5[%c0_35, %c2_36, %c0_37, %c0_38] : memref<1x9x128x128xbf16, #tpu.memory_space<vmem>>, vector<1x1x128x128xbf16>
    %36 = vector.shape_cast %35 : vector<1x1x128x128xbf16> to vector<128x128xbf16>
    %cst_39 = arith.constant dense<0.000000e+00> : vector<16x128xf32>
    %37 = tpu.matmul %34, %36, %cst_39 {dimension_numbers = #tpu.dot_dimension_numbers<[1], [0], [0], [1], [0, 0, 1, 1], [], []>} : vector<16x128xbf16>, vector<128x128xbf16>, vector<16x128xf32> -> vector<16x128xf32>
    %38 = arith.addf %31, %37 : vector<16x128xf32>
    %c1_40 = arith.constant 1 : index
    %c0_41 = arith.constant 0 : index
    %c0_42 = arith.constant 0 : index
    %39 = vector.load %arg10[%c1_40, %c0_41, %c0_42] : memref<6x6x128xf32, #tpu.memory_space<vmem>>, vector<4x4x128xf32>
    %40 = arith.truncf %39 : vector<4x4x128xf32> to vector<4x4x128xbf16>
    %41 = vector.shape_cast %40 : vector<4x4x128xbf16> to vector<16x128xbf16>
    %c0_43 = arith.constant 0 : index
    %c3 = arith.constant 3 : index
    %c0_44 = arith.constant 0 : index
    %c0_45 = arith.constant 0 : index
    %42 = vector.load %arg5[%c0_43, %c3, %c0_44, %c0_45] : memref<1x9x128x128xbf16, #tpu.memory_space<vmem>>, vector<1x1x128x128xbf16>
    %43 = vector.shape_cast %42 : vector<1x1x128x128xbf16> to vector<128x128xbf16>
    %cst_46 = arith.constant dense<0.000000e+00> : vector<16x128xf32>
    %44 = tpu.matmul %41, %43, %cst_46 {dimension_numbers = #tpu.dot_dimension_numbers<[1], [0], [0], [1], [0, 0, 1, 1], [], []>} : vector<16x128xbf16>, vector<128x128xbf16>, vector<16x128xf32> -> vector<16x128xf32>
    %45 = arith.addf %38, %44 : vector<16x128xf32>
    %c1_47 = arith.constant 1 : index
    %c1_48 = arith.constant 1 : index
    %c0_49 = arith.constant 0 : index
    %46 = vector.load %arg10[%c1_47, %c1_48, %c0_49] : memref<6x6x128xf32, #tpu.memory_space<vmem>>, vector<4x4x128xf32>
    %47 = arith.truncf %46 : vector<4x4x128xf32> to vector<4x4x128xbf16>
    %48 = vector.shape_cast %47 : vector<4x4x128xbf16> to vector<16x128xbf16>
    %c0_50 = arith.constant 0 : index
    %c4 = arith.constant 4 : index
    %c0_51 = arith.constant 0 : index
    %c0_52 = arith.constant 0 : index
    %49 = vector.load %arg5[%c0_50, %c4, %c0_51, %c0_52] : memref<1x9x128x128xbf16, #tpu.memory_space<vmem>>, vector<1x1x128x128xbf16>
    %50 = vector.shape_cast %49 : vector<1x1x128x128xbf16> to vector<128x128xbf16>
    %cst_53 = arith.constant dense<0.000000e+00> : vector<16x128xf32>
    %51 = tpu.matmul %48, %50, %cst_53 {dimension_numbers = #tpu.dot_dimension_numbers<[1], [0], [0], [1], [0, 0, 1, 1], [], []>} : vector<16x128xbf16>, vector<128x128xbf16>, vector<16x128xf32> -> vector<16x128xf32>
    %52 = arith.addf %45, %51 : vector<16x128xf32>
    %c1_54 = arith.constant 1 : index
    %c2_55 = arith.constant 2 : index
    %c0_56 = arith.constant 0 : index
    %53 = vector.load %arg10[%c1_54, %c2_55, %c0_56] : memref<6x6x128xf32, #tpu.memory_space<vmem>>, vector<4x4x128xf32>
    %54 = arith.truncf %53 : vector<4x4x128xf32> to vector<4x4x128xbf16>
    %55 = vector.shape_cast %54 : vector<4x4x128xbf16> to vector<16x128xbf16>
    %c0_57 = arith.constant 0 : index
    %c5 = arith.constant 5 : index
    %c0_58 = arith.constant 0 : index
    %c0_59 = arith.constant 0 : index
    %56 = vector.load %arg5[%c0_57, %c5, %c0_58, %c0_59] : memref<1x9x128x128xbf16, #tpu.memory_space<vmem>>, vector<1x1x128x128xbf16>
    %57 = vector.shape_cast %56 : vector<1x1x128x128xbf16> to vector<128x128xbf16>
    %cst_60 = arith.constant dense<0.000000e+00> : vector<16x128xf32>
    %58 = tpu.matmul %55, %57, %cst_60 {dimension_numbers = #tpu.dot_dimension_numbers<[1], [0], [0], [1], [0, 0, 1, 1], [], []>} : vector<16x128xbf16>, vector<128x128xbf16>, vector<16x128xf32> -> vector<16x128xf32>
    %59 = arith.addf %52, %58 : vector<16x128xf32>
    %c2_61 = arith.constant 2 : index
    %c0_62 = arith.constant 0 : index
    %c0_63 = arith.constant 0 : index
    %60 = vector.load %arg10[%c2_61, %c0_62, %c0_63] : memref<6x6x128xf32, #tpu.memory_space<vmem>>, vector<4x4x128xf32>
    %61 = arith.truncf %60 : vector<4x4x128xf32> to vector<4x4x128xbf16>
    %62 = vector.shape_cast %61 : vector<4x4x128xbf16> to vector<16x128xbf16>
    %c0_64 = arith.constant 0 : index
    %c6 = arith.constant 6 : index
    %c0_65 = arith.constant 0 : index
    %c0_66 = arith.constant 0 : index
    %63 = vector.load %arg5[%c0_64, %c6, %c0_65, %c0_66] : memref<1x9x128x128xbf16, #tpu.memory_space<vmem>>, vector<1x1x128x128xbf16>
    %64 = vector.shape_cast %63 : vector<1x1x128x128xbf16> to vector<128x128xbf16>
    %cst_67 = arith.constant dense<0.000000e+00> : vector<16x128xf32>
    %65 = tpu.matmul %62, %64, %cst_67 {dimension_numbers = #tpu.dot_dimension_numbers<[1], [0], [0], [1], [0, 0, 1, 1], [], []>} : vector<16x128xbf16>, vector<128x128xbf16>, vector<16x128xf32> -> vector<16x128xf32>
    %66 = arith.addf %59, %65 : vector<16x128xf32>
    %c2_68 = arith.constant 2 : index
    %c1_69 = arith.constant 1 : index
    %c0_70 = arith.constant 0 : index
    %67 = vector.load %arg10[%c2_68, %c1_69, %c0_70] : memref<6x6x128xf32, #tpu.memory_space<vmem>>, vector<4x4x128xf32>
    %68 = arith.truncf %67 : vector<4x4x128xf32> to vector<4x4x128xbf16>
    %69 = vector.shape_cast %68 : vector<4x4x128xbf16> to vector<16x128xbf16>
    %c0_71 = arith.constant 0 : index
    %c7 = arith.constant 7 : index
    %c0_72 = arith.constant 0 : index
    %c0_73 = arith.constant 0 : index
    %70 = vector.load %arg5[%c0_71, %c7, %c0_72, %c0_73] : memref<1x9x128x128xbf16, #tpu.memory_space<vmem>>, vector<1x1x128x128xbf16>
    %71 = vector.shape_cast %70 : vector<1x1x128x128xbf16> to vector<128x128xbf16>
    %cst_74 = arith.constant dense<0.000000e+00> : vector<16x128xf32>
    %72 = tpu.matmul %69, %71, %cst_74 {dimension_numbers = #tpu.dot_dimension_numbers<[1], [0], [0], [1], [0, 0, 1, 1], [], []>} : vector<16x128xbf16>, vector<128x128xbf16>, vector<16x128xf32> -> vector<16x128xf32>
    %73 = arith.addf %66, %72 : vector<16x128xf32>
    %c2_75 = arith.constant 2 : index
    %c2_76 = arith.constant 2 : index
    %c0_77 = arith.constant 0 : index
    %74 = vector.load %arg10[%c2_75, %c2_76, %c0_77] : memref<6x6x128xf32, #tpu.memory_space<vmem>>, vector<4x4x128xf32>
    %75 = arith.truncf %74 : vector<4x4x128xf32> to vector<4x4x128xbf16>
    %76 = vector.shape_cast %75 : vector<4x4x128xbf16> to vector<16x128xbf16>
    %c0_78 = arith.constant 0 : index
    %c8 = arith.constant 8 : index
    %c0_79 = arith.constant 0 : index
    %c0_80 = arith.constant 0 : index
    %77 = vector.load %arg5[%c0_78, %c8, %c0_79, %c0_80] : memref<1x9x128x128xbf16, #tpu.memory_space<vmem>>, vector<1x1x128x128xbf16>
    %78 = vector.shape_cast %77 : vector<1x1x128x128xbf16> to vector<128x128xbf16>
    %cst_81 = arith.constant dense<0.000000e+00> : vector<16x128xf32>
    %79 = tpu.matmul %76, %78, %cst_81 {dimension_numbers = #tpu.dot_dimension_numbers<[1], [0], [0], [1], [0, 0, 1, 1], [], []>} : vector<16x128xbf16>, vector<128x128xbf16>, vector<16x128xf32> -> vector<16x128xf32>
    %80 = arith.addf %73, %79 : vector<16x128xf32>
    %c0_82 = arith.constant 0 : index
    %c0_83 = arith.constant 0 : index
    %81 = vector.load %arg6[%c0_82, %c0_83] : memref<1x128xf32, #tpu.memory_space<vmem>>, vector<1x128xf32>
    %82 = vector.broadcast %81 : vector<1x128xf32> to vector<16x128xf32>
    %83 = arith.mulf %80, %82 : vector<16x128xf32>
    %c0_84 = arith.constant 0 : index
    %c0_85 = arith.constant 0 : index
    %84 = vector.load %arg7[%c0_84, %c0_85] : memref<1x128xf32, #tpu.memory_space<vmem>>, vector<1x128xf32>
    %85 = vector.broadcast %84 : vector<1x128xf32> to vector<16x128xf32>
    %86 = arith.addf %83, %85 : vector<16x128xf32>
    %cst_86 = arith.constant 0.000000e+00 : f32
    %87 = vector.broadcast %cst_86 : f32 to vector<16x128xf32>
    %88 = arith.maximumf %86, %87 : vector<16x128xf32>
    %89 = arith.truncf %88 : vector<16x128xf32> to vector<16x128xbf16>
    %c0_87 = arith.constant 0 : index
    %c0_88 = arith.constant 0 : index
    %c0_89 = arith.constant 0 : index
    %90 = vector.load %arg8[%c0_87, %c0_88, %c0_89] : memref<1x16x128xbf16, #tpu.memory_space<vmem>>, vector<1x16x128xbf16>
    %91 = vector.shape_cast %90 : vector<1x16x128xbf16> to vector<16x128xbf16>
    %92 = vector.shape_cast %89 : vector<16x128xbf16> to vector<1x16x128xbf16>
    tpu.vector_store %arg8[%c0_87, %c0_88, %c0_89], %92 {strides = array<i32>} : memref<1x16x128xbf16, #tpu.memory_space<vmem>>, vector<1x16x128xbf16>,
    %cst_90 = arith.constant dense<0.000000e+00> : vector<128xf32>
    %93 = vector.multi_reduction <add>, %88, %cst_90 [0] : vector<16x128xf32> to vector<128xf32>
    %94 = vector.shape_cast %93 : vector<128xf32> to vector<1x128xf32>
    %cst_91 = arith.constant 6.250000e-02 : f32
    %95 = vector.broadcast %cst_91 : f32 to vector<1x128xf32>
    %96 = arith.mulf %94, %95 : vector<1x128xf32>
    %c0_92 = arith.constant 0 : index
    %c0_93 = arith.constant 0 : index
    %c0_94 = arith.constant 0 : index
    %97 = vector.load %arg9[%c0_92, %c0_93, %c0_94] : memref<1x1x128xf32, #tpu.memory_space<vmem>>, vector<1x1x128xf32>
    %98 = vector.shape_cast %97 : vector<1x1x128xf32> to vector<1x128xf32>
    %99 = vector.shape_cast %96 : vector<1x128xf32> to vector<1x1x128xf32>
    tpu.vector_store %arg9[%c0_92, %c0_93, %c0_94], %99 {strides = array<i32>} : memref<1x1x128xf32, #tpu.memory_space<vmem>>, vector<1x1x128xf32>,
    return
  }
  func.func @transform_0(%arg0: i32) -> (i32, i32, i32, i32) {
    %c0_i32 = arith.constant 0 : i32
    %c0_i32_0 = arith.constant 0 : i32
    %c0_i32_1 = arith.constant 0 : i32
    %c0_i32_2 = arith.constant 0 : i32
    return %arg0, %c0_i32, %c0_i32_0, %c0_i32_1 : i32, i32, i32, i32
  }
  func.func @transform_1(%arg0: i32) -> (i32, i32) {
    %c0_i32 = arith.constant 0 : i32
    %c0_i32_0 = arith.constant 0 : i32
    %c0_i32_1 = arith.constant 0 : i32
    return %c0_i32, %c0_i32_0 : i32, i32
  }
  func.func @transform_2(%arg0: i32) -> (i32, i32) {
    %c0_i32 = arith.constant 0 : i32
    %c0_i32_0 = arith.constant 0 : i32
    %c0_i32_1 = arith.constant 0 : i32
    return %c0_i32, %c0_i32_0 : i32, i32
  }
  func.func @transform_3(%arg0: i32) -> (i32, i32) {
    %c0_i32 = arith.constant 0 : i32
    %c0_i32_0 = arith.constant 0 : i32
    %c0_i32_1 = arith.constant 0 : i32
    return %c0_i32, %c0_i32_0 : i32, i32
  }
  func.func @transform_4(%arg0: i32) -> (i32, i32, i32, i32) {
    %c0_i32 = arith.constant 0 : i32
    %c0_i32_0 = arith.constant 0 : i32
    %c0_i32_1 = arith.constant 0 : i32
    %c0_i32_2 = arith.constant 0 : i32
    %c0_i32_3 = arith.constant 0 : i32
    return %c0_i32, %c0_i32_0, %c0_i32_1, %c0_i32_2 : i32, i32, i32, i32
  }
  func.func @transform_5(%arg0: i32) -> (i32, i32) {
    %c0_i32 = arith.constant 0 : i32
    %c0_i32_0 = arith.constant 0 : i32
    %c0_i32_1 = arith.constant 0 : i32
    return %c0_i32, %c0_i32_0 : i32, i32
  }
  func.func @transform_6(%arg0: i32) -> (i32, i32) {
    %c0_i32 = arith.constant 0 : i32
    %c0_i32_0 = arith.constant 0 : i32
    %c0_i32_1 = arith.constant 0 : i32
    return %c0_i32, %c0_i32_0 : i32, i32
  }
  func.func @transform_7(%arg0: i32) -> (i32, i32, i32) {
    %c0_i32 = arith.constant 0 : i32
    %c0_i32_0 = arith.constant 0 : i32
    %c0_i32_1 = arith.constant 0 : i32
    return %arg0, %c0_i32, %c0_i32_0 : i32, i32, i32
  }
  func.func @transform_8(%arg0: i32) -> (i32, i32, i32) {
    %c0_i32 = arith.constant 0 : i32
    %c0_i32_0 = arith.constant 0 : i32
    %c0_i32_1 = arith.constant 0 : i32
    return %arg0, %c0_i32, %c0_i32_0 : i32, i32, i32
  }
}

module attributes {stable_mosaic.version = 11 : i64} {
  func.func @_convc_se_res_kernel(%arg0: i32, %arg1: memref<1x16x128xbf16, #tpu.memory_space<vmem>>, %arg2: memref<1x1x128xf32, #tpu.memory_space<vmem>>, %arg3: memref<128x128xf32, #tpu.memory_space<vmem>>, %arg4: memref<1x128xf32, #tpu.memory_space<vmem>>, %arg5: memref<128x128xf32, #tpu.memory_space<vmem>>, %arg6: memref<1x128xf32, #tpu.memory_space<vmem>>, %arg7: memref<128x128xbf16, #tpu.memory_space<vmem>>, %arg8: memref<1x128xf32, #tpu.memory_space<vmem>>, %arg9: memref<1x128xf32, #tpu.memory_space<vmem>>, %arg10: memref<1x16x128xbf16, #tpu.memory_space<vmem>>, %arg11: memref<1x16x128xbf16, #tpu.memory_space<vmem>>) attributes {dimension_semantics = [#tpu.dimension_semantics<parallel>], iteration_bounds = array<i64: 2>, scalar_prefetch = 0 : i64, scratch_operands = 0 : i64, tpu.core_type = #tpu.core_type<tc>, window_params = [{transform_indices = @transform_0, window_bounds = array<i64: 1, 16, 128>}, {transform_indices = @transform_1, window_bounds = array<i64: 1, 1, 128>}, {pipeline_mode = #tpu.pipeline_mode<synchronous>, transform_indices = @transform_2, window_bounds = array<i64: 128, 128>}, {pipeline_mode = #tpu.pipeline_mode<synchronous>, transform_indices = @transform_3, window_bounds = array<i64: 1, 128>}, {pipeline_mode = #tpu.pipeline_mode<synchronous>, transform_indices = @transform_4, window_bounds = array<i64: 128, 128>}, {pipeline_mode = #tpu.pipeline_mode<synchronous>, transform_indices = @transform_5, window_bounds = array<i64: 1, 128>}, {pipeline_mode = #tpu.pipeline_mode<synchronous>, transform_indices = @transform_6, window_bounds = array<i64: 128, 128>}, {pipeline_mode = #tpu.pipeline_mode<synchronous>, transform_indices = @transform_7, window_bounds = array<i64: 1, 128>}, {pipeline_mode = #tpu.pipeline_mode<synchronous>, transform_indices = @transform_8, window_bounds = array<i64: 1, 128>}, {transform_indices = @transform_9, window_bounds = array<i64: 1, 16, 128>}, {transform_indices = @transform_10, window_bounds = array<i64: 1, 16, 128>}]} {
    %c0 = arith.constant 0 : index
    %c0_0 = arith.constant 0 : index
    %c0_1 = arith.constant 0 : index
    %0 = vector.load %arg2[%c0, %c0_0, %c0_1] : memref<1x1x128xf32, #tpu.memory_space<vmem>>, vector<1x1x128xf32>
    %1 = vector.shape_cast %0 : vector<1x1x128xf32> to vector<1x128xf32>
    %c0_2 = arith.constant 0 : index
    %c0_3 = arith.constant 0 : index
    %2 = vector.load %arg3[%c0_2, %c0_3] : memref<128x128xf32, #tpu.memory_space<vmem>>, vector<128x128xf32>
    %cst = arith.constant dense<0.000000e+00> : vector<1x128xf32>
    %3 = tpu.matmul %1, %2, %cst {dimension_numbers = #tpu.dot_dimension_numbers<[1], [0], [0], [1], [0, 0, 1, 1], [], []>} : vector<1x128xf32>, vector<128x128xf32>, vector<1x128xf32> -> vector<1x128xf32>
    %c0_4 = arith.constant 0 : index
    %c0_5 = arith.constant 0 : index
    %4 = vector.load %arg4[%c0_4, %c0_5] : memref<1x128xf32, #tpu.memory_space<vmem>>, vector<1x128xf32>
    %5 = arith.addf %3, %4 : vector<1x128xf32>
    %cst_6 = arith.constant 0.000000e+00 : f32
    %6 = vector.broadcast %cst_6 : f32 to vector<1x128xf32>
    %7 = arith.maximumf %5, %6 : vector<1x128xf32>
    %c0_7 = arith.constant 0 : index
    %c0_8 = arith.constant 0 : index
    %8 = vector.load %arg5[%c0_7, %c0_8] : memref<128x128xf32, #tpu.memory_space<vmem>>, vector<128x128xf32>
    %cst_9 = arith.constant dense<0.000000e+00> : vector<1x128xf32>
    %9 = tpu.matmul %7, %8, %cst_9 {dimension_numbers = #tpu.dot_dimension_numbers<[1], [0], [0], [1], [0, 0, 1, 1], [], []>} : vector<1x128xf32>, vector<128x128xf32>, vector<1x128xf32> -> vector<1x128xf32>
    %c0_10 = arith.constant 0 : index
    %c0_11 = arith.constant 0 : index
    %10 = vector.load %arg6[%c0_10, %c0_11] : memref<1x128xf32, #tpu.memory_space<vmem>>, vector<1x128xf32>
    %11 = arith.addf %9, %10 : vector<1x128xf32>
    %cst_12 = arith.constant 0.000000e+00 : f32
    %12 = vector.broadcast %cst_12 : f32 to vector<1x128xf32>
    %13 = arith.subf %12, %11 : vector<1x128xf32>
    %14 = math.exp %13 : vector<1x128xf32>
    %cst_13 = arith.constant 1.000000e+00 : f32
    %15 = vector.broadcast %cst_13 : f32 to vector<1x128xf32>
    %16 = arith.addf %15, %14 : vector<1x128xf32>
    %cst_14 = arith.constant 1.000000e+00 : f32
    %17 = vector.broadcast %cst_14 : f32 to vector<1x128xf32>
    %18 = arith.divf %17, %16 : vector<1x128xf32>
    %19 = arith.truncf %18 : vector<1x128xf32> to vector<1x128xbf16>
    %c0_15 = arith.constant 0 : index
    %c0_16 = arith.constant 0 : index
    %c0_17 = arith.constant 0 : index
    %20 = vector.load %arg1[%c0_15, %c0_16, %c0_17] : memref<1x16x128xbf16, #tpu.memory_space<vmem>>, vector<1x16x128xbf16>
    %21 = vector.shape_cast %20 : vector<1x16x128xbf16> to vector<16x128xbf16>
    %22 = vector.broadcast %19 : vector<1x128xbf16> to vector<16x128xbf16>
    %23 = arith.mulf %21, %22 : vector<16x128xbf16>
    %c0_18 = arith.constant 0 : index
    %c0_19 = arith.constant 0 : index
    %24 = vector.load %arg7[%c0_18, %c0_19] : memref<128x128xbf16, #tpu.memory_space<vmem>>, vector<128x128xbf16>
    %cst_20 = arith.constant dense<0.000000e+00> : vector<16x128xf32>
    %25 = tpu.matmul %23, %24, %cst_20 {dimension_numbers = #tpu.dot_dimension_numbers<[1], [0], [0], [1], [0, 0, 1, 1], [], []>} : vector<16x128xbf16>, vector<128x128xbf16>, vector<16x128xf32> -> vector<16x128xf32>
    %c0_21 = arith.constant 0 : index
    %c0_22 = arith.constant 0 : index
    %26 = vector.load %arg8[%c0_21, %c0_22] : memref<1x128xf32, #tpu.memory_space<vmem>>, vector<1x128xf32>
    %27 = vector.broadcast %26 : vector<1x128xf32> to vector<16x128xf32>
    %28 = arith.mulf %25, %27 : vector<16x128xf32>
    %c0_23 = arith.constant 0 : index
    %c0_24 = arith.constant 0 : index
    %29 = vector.load %arg9[%c0_23, %c0_24] : memref<1x128xf32, #tpu.memory_space<vmem>>, vector<1x128xf32>
    %30 = vector.broadcast %29 : vector<1x128xf32> to vector<16x128xf32>
    %31 = arith.addf %28, %30 : vector<16x128xf32>
    %c0_25 = arith.constant 0 : index
    %c0_26 = arith.constant 0 : index
    %c0_27 = arith.constant 0 : index
    %32 = vector.load %arg10[%c0_25, %c0_26, %c0_27] : memref<1x16x128xbf16, #tpu.memory_space<vmem>>, vector<1x16x128xbf16>
    %33 = vector.shape_cast %32 : vector<1x16x128xbf16> to vector<16x128xbf16>
    %34 = arith.extf %33 : vector<16x128xbf16> to vector<16x128xf32>
    %35 = arith.addf %31, %34 : vector<16x128xf32>
    %cst_28 = arith.constant 0.000000e+00 : f32
    %36 = vector.broadcast %cst_28 : f32 to vector<16x128xf32>
    %37 = arith.maximumf %35, %36 : vector<16x128xf32>
    %38 = arith.truncf %37 : vector<16x128xf32> to vector<16x128xbf16>
    %c0_29 = arith.constant 0 : index
    %c0_30 = arith.constant 0 : index
    %c0_31 = arith.constant 0 : index
    %39 = vector.load %arg11[%c0_29, %c0_30, %c0_31] : memref<1x16x128xbf16, #tpu.memory_space<vmem>>, vector<1x16x128xbf16>
    %40 = vector.shape_cast %39 : vector<1x16x128xbf16> to vector<16x128xbf16>
    %41 = vector.shape_cast %38 : vector<16x128xbf16> to vector<1x16x128xbf16>
    tpu.vector_store %arg11[%c0_29, %c0_30, %c0_31], %41 {strides = array<i32>} : memref<1x16x128xbf16, #tpu.memory_space<vmem>>, vector<1x16x128xbf16>,
    return
  }
  func.func @transform_0(%arg0: i32) -> (i32, i32, i32) {
    %c0_i32 = arith.constant 0 : i32
    %c0_i32_0 = arith.constant 0 : i32
    %c0_i32_1 = arith.constant 0 : i32
    return %arg0, %c0_i32, %c0_i32_0 : i32, i32, i32
  }
  func.func @transform_1(%arg0: i32) -> (i32, i32, i32) {
    %c0_i32 = arith.constant 0 : i32
    %c0_i32_0 = arith.constant 0 : i32
    %c0_i32_1 = arith.constant 0 : i32
    return %arg0, %c0_i32, %c0_i32_0 : i32, i32, i32
  }
  func.func @transform_2(%arg0: i32) -> (i32, i32) {
    %c0_i32 = arith.constant 0 : i32
    %c0_i32_0 = arith.constant 0 : i32
    %c0_i32_1 = arith.constant 0 : i32
    return %c0_i32, %c0_i32_0 : i32, i32
  }
  func.func @transform_3(%arg0: i32) -> (i32, i32) {
    %c0_i32 = arith.constant 0 : i32
    %c0_i32_0 = arith.constant 0 : i32
    %c0_i32_1 = arith.constant 0 : i32
    return %c0_i32, %c0_i32_0 : i32, i32
  }
  func.func @transform_4(%arg0: i32) -> (i32, i32) {
    %c0_i32 = arith.constant 0 : i32
    %c0_i32_0 = arith.constant 0 : i32
    %c0_i32_1 = arith.constant 0 : i32
    return %c0_i32, %c0_i32_0 : i32, i32
  }
  func.func @transform_5(%arg0: i32) -> (i32, i32) {
    %c0_i32 = arith.constant 0 : i32
    %c0_i32_0 = arith.constant 0 : i32
    %c0_i32_1 = arith.constant 0 : i32
    return %c0_i32, %c0_i32_0 : i32, i32
  }
  func.func @transform_6(%arg0: i32) -> (i32, i32) {
    %c0_i32 = arith.constant 0 : i32
    %c0_i32_0 = arith.constant 0 : i32
    %c0_i32_1 = arith.constant 0 : i32
    return %c0_i32, %c0_i32_0 : i32, i32
  }
  func.func @transform_7(%arg0: i32) -> (i32, i32) {
    %c0_i32 = arith.constant 0 : i32
    %c0_i32_0 = arith.constant 0 : i32
    %c0_i32_1 = arith.constant 0 : i32
    return %c0_i32, %c0_i32_0 : i32, i32
  }
  func.func @transform_8(%arg0: i32) -> (i32, i32) {
    %c0_i32 = arith.constant 0 : i32
    %c0_i32_0 = arith.constant 0 : i32
    %c0_i32_1 = arith.constant 0 : i32
    return %c0_i32, %c0_i32_0 : i32, i32
  }
  func.func @transform_9(%arg0: i32) -> (i32, i32, i32) {
    %c0_i32 = arith.constant 0 : i32
    %c0_i32_0 = arith.constant 0 : i32
    %c0_i32_1 = arith.constant 0 : i32
    return %arg0, %c0_i32, %c0_i32_0 : i32, i32, i32
  }
  func.func @transform_10(%arg0: i32) -> (i32, i32, i32) {
    %c0_i32 = arith.constant 0 : i32
    %c0_i32_0 = arith.constant 0 : i32
    %c0_i32_1 = arith.constant 0 : i32
    return %arg0, %c0_i32, %c0_i32_0 : i32, i32, i32
  }
}

module attributes {stable_mosaic.version = 11 : i64} {
  func.func @_block_ab_s2_kernel(%arg0: i32, %arg1: memref<1x4x2x128xbf16, #tpu.memory_space<vmem>>, %arg2: memref<1x4x2x128xbf16, #tpu.memory_space<vmem>>, %arg3: memref<128x256xbf16, #tpu.memory_space<vmem>>, %arg4: memref<1x256xf32, #tpu.memory_space<vmem>>, %arg5: memref<1x256xf32, #tpu.memory_space<vmem>>, %arg6: memref<2x9x128x128xbf16, #tpu.memory_space<vmem>>, %arg7: memref<1x256xf32, #tpu.memory_space<vmem>>, %arg8: memref<1x256xf32, #tpu.memory_space<vmem>>, %arg9: memref<1x4x256xbf16, #tpu.memory_space<vmem>>, %arg10: memref<1x1x256xf32, #tpu.memory_space<vmem>>, %arg11: memref<6x3x256xf32, #tpu.memory_space<vmem>>, %arg12: memref<6x2x256xf32, #tpu.memory_space<vmem>>) attributes {dimension_semantics = [#tpu.dimension_semantics<parallel>], iteration_bounds = array<i64: 2>, scalar_prefetch = 0 : i64, scratch_operands = 2 : i64, tpu.core_type = #tpu.core_type<tc>, window_params = [{transform_indices = @transform_0, window_bounds = array<i64: 1, 4, 2, 128>}, {transform_indices = @transform_1, window_bounds = array<i64: 1, 4, 2, 128>}, {pipeline_mode = #tpu.pipeline_mode<synchronous>, transform_indices = @transform_2, window_bounds = array<i64: 128, 256>}, {pipeline_mode = #tpu.pipeline_mode<synchronous>, transform_indices = @transform_3, window_bounds = array<i64: 1, 256>}, {pipeline_mode = #tpu.pipeline_mode<synchronous>, transform_indices = @transform_4, window_bounds = array<i64: 1, 256>}, {pipeline_mode = #tpu.pipeline_mode<synchronous>, transform_indices = @transform_5, window_bounds = array<i64: 2, 9, 128, 128>}, {pipeline_mode = #tpu.pipeline_mode<synchronous>, transform_indices = @transform_6, window_bounds = array<i64: 1, 256>}, {pipeline_mode = #tpu.pipeline_mode<synchronous>, transform_indices = @transform_7, window_bounds = array<i64: 1, 256>}, {transform_indices = @transform_8, window_bounds = array<i64: 1, 4, 256>}, {transform_indices = @transform_9, window_bounds = array<i64: 1, 1, 256>}]} {
    %c0 = arith.constant 0 : index
    %c0_0 = arith.constant 0 : index
    %c0_1 = arith.constant 0 : index
    %c0_2 = arith.constant 0 : index
    %0 = vector.load %arg1[%c0, %c0_0, %c0_1, %c0_2] : memref<1x4x2x128xbf16, #tpu.memory_space<vmem>>, vector<1x4x2x128xbf16>
    %1 = vector.shape_cast %0 : vector<1x4x2x128xbf16> to vector<4x2x128xbf16>
    %2 = vector.shape_cast %1 : vector<4x2x128xbf16> to vector<8x128xbf16>
    %c0_3 = arith.constant 0 : index
    %c0_4 = arith.constant 0 : index
    %3 = vector.load %arg3[%c0_3, %c0_4] : memref<128x256xbf16, #tpu.memory_space<vmem>>, vector<128x256xbf16>
    %cst = arith.constant dense<0.000000e+00> : vector<8x256xf32>
    %4 = tpu.matmul %2, %3, %cst {dimension_numbers = #tpu.dot_dimension_numbers<[1], [0], [0], [1], [0, 0, 1, 1], [], []>} : vector<8x128xbf16>, vector<128x256xbf16>, vector<8x256xf32> -> vector<8x256xf32>
    %c0_5 = arith.constant 0 : index
    %c0_6 = arith.constant 0 : index
    %5 = vector.load %arg4[%c0_5, %c0_6] : memref<1x256xf32, #tpu.memory_space<vmem>>, vector<1x256xf32>
    %6 = vector.broadcast %5 : vector<1x256xf32> to vector<8x256xf32>
    %7 = arith.mulf %4, %6 : vector<8x256xf32>
    %c0_7 = arith.constant 0 : index
    %c0_8 = arith.constant 0 : index
    %8 = vector.load %arg5[%c0_7, %c0_8] : memref<1x256xf32, #tpu.memory_space<vmem>>, vector<1x256xf32>
    %9 = vector.broadcast %8 : vector<1x256xf32> to vector<8x256xf32>
    %10 = arith.addf %7, %9 : vector<8x256xf32>
    %cst_9 = arith.constant 0.000000e+00 : f32
    %11 = vector.broadcast %cst_9 : f32 to vector<8x256xf32>
    %12 = arith.maximumf %10, %11 : vector<8x256xf32>
    %13 = vector.shape_cast %12 : vector<8x256xf32> to vector<4x2x256xf32>
    %c0_10 = arith.constant 0 : index
    %c0_11 = arith.constant 0 : index
    %c0_12 = arith.constant 0 : index
    %c0_13 = arith.constant 0 : index
    %14 = vector.load %arg2[%c0_10, %c0_11, %c0_12, %c0_13] : memref<1x4x2x128xbf16, #tpu.memory_space<vmem>>, vector<1x4x2x128xbf16>
    %15 = vector.shape_cast %14 : vector<1x4x2x128xbf16> to vector<4x2x128xbf16>
    %16 = vector.shape_cast %15 : vector<4x2x128xbf16> to vector<8x128xbf16>
    %c0_14 = arith.constant 0 : index
    %c0_15 = arith.constant 0 : index
    %17 = vector.load %arg3[%c0_14, %c0_15] : memref<128x256xbf16, #tpu.memory_space<vmem>>, vector<128x256xbf16>
    %cst_16 = arith.constant dense<0.000000e+00> : vector<8x256xf32>
    %18 = tpu.matmul %16, %17, %cst_16 {dimension_numbers = #tpu.dot_dimension_numbers<[1], [0], [0], [1], [0, 0, 1, 1], [], []>} : vector<8x128xbf16>, vector<128x256xbf16>, vector<8x256xf32> -> vector<8x256xf32>
    %c0_17 = arith.constant 0 : index
    %c0_18 = arith.constant 0 : index
    %19 = vector.load %arg4[%c0_17, %c0_18] : memref<1x256xf32, #tpu.memory_space<vmem>>, vector<1x256xf32>
    %20 = vector.broadcast %19 : vector<1x256xf32> to vector<8x256xf32>
    %21 = arith.mulf %18, %20 : vector<8x256xf32>
    %c0_19 = arith.constant 0 : index
    %c0_20 = arith.constant 0 : index
    %22 = vector.load %arg5[%c0_19, %c0_20] : memref<1x256xf32, #tpu.memory_space<vmem>>, vector<1x256xf32>
    %23 = vector.broadcast %22 : vector<1x256xf32> to vector<8x256xf32>
    %24 = arith.addf %21, %23 : vector<8x256xf32>
    %cst_21 = arith.constant 0.000000e+00 : f32
    %25 = vector.broadcast %cst_21 : f32 to vector<8x256xf32>
    %26 = arith.maximumf %24, %25 : vector<8x256xf32>
    %27 = vector.shape_cast %26 : vector<8x256xf32> to vector<4x2x256xf32>
    %cst_22 = arith.constant 0.000000e+00 : f32
    %28 = vector.broadcast %cst_22 : f32 to vector<6x3x256xf32>
    %c0_23 = arith.constant 0 : index
    %c0_24 = arith.constant 0 : index
    %c0_25 = arith.constant 0 : index
    %29 = vector.load %arg11[%c0_23, %c0_24, %c0_25] : memref<6x3x256xf32, #tpu.memory_space<vmem>>, vector<6x3x256xf32>
    tpu.vector_store %arg11[%c0_23, %c0_24, %c0_25], %28 {strides = array<i32>} : memref<6x3x256xf32, #tpu.memory_space<vmem>>, vector<6x3x256xf32>,
    %cst_26 = arith.constant 0.000000e+00 : f32
    %30 = vector.broadcast %cst_26 : f32 to vector<6x2x256xf32>
    %c0_27 = arith.constant 0 : index
    %c0_28 = arith.constant 0 : index
    %c0_29 = arith.constant 0 : index
    %31 = vector.load %arg12[%c0_27, %c0_28, %c0_29] : memref<6x2x256xf32, #tpu.memory_space<vmem>>, vector<6x2x256xf32>
    tpu.vector_store %arg12[%c0_27, %c0_28, %c0_29], %30 {strides = array<i32>} : memref<6x2x256xf32, #tpu.memory_space<vmem>>, vector<6x2x256xf32>,
    %c1 = arith.constant 1 : index
    %c1_30 = arith.constant 1 : index
    %c0_31 = arith.constant 0 : index
    %32 = vector.load %arg11[%c1, %c1_30, %c0_31] : memref<6x3x256xf32, #tpu.memory_space<vmem>>, vector<4x2x256xf32>
    tpu.vector_store %arg11[%c1, %c1_30, %c0_31], %27 {strides = array<i32>} : memref<6x3x256xf32, #tpu.memory_space<vmem>>, vector<4x2x256xf32>,
    %c1_32 = arith.constant 1 : index
    %c0_33 = arith.constant 0 : index
    %c0_34 = arith.constant 0 : index
    %33 = vector.load %arg12[%c1_32, %c0_33, %c0_34] : memref<6x2x256xf32, #tpu.memory_space<vmem>>, vector<4x2x256xf32>
    tpu.vector_store %arg12[%c1_32, %c0_33, %c0_34], %13 {strides = array<i32>} : memref<6x2x256xf32, #tpu.memory_space<vmem>>, vector<4x2x256xf32>,
    %cst_35 = arith.constant 0.000000e+00 : f32
    %34 = vector.broadcast %cst_35 : f32 to vector<4x128xf32>
    %c0_36 = arith.constant 0 : index
    %c0_37 = arith.constant 0 : index
    %c0_38 = arith.constant 0 : index
    %35 = vector.load %arg11[%c0_36, %c0_37, %c0_38] : memref<6x3x256xf32, #tpu.memory_space<vmem>>, vector<4x2x128xf32>
    %36 = vector.shape_cast %35 : vector<4x2x128xf32> to vector<2x2x2x128xf32>
    %37 = vector.extract_strided_slice %36 {offsets = [0, 0, 0, 0], sizes = [2, 1, 2, 128], strides = [1, 1, 1, 1]} : vector<2x2x2x128xf32> to vector<2x1x2x128xf32>
    %38 = vector.shape_cast %37 : vector<2x1x2x128xf32> to vector<2x2x128xf32>
    %39 = arith.truncf %38 : vector<2x2x128xf32> to vector<2x2x128xbf16>
    %40 = vector.shape_cast %39 : vector<2x2x128xbf16> to vector<4x128xbf16>
    %c0_39 = arith.constant 0 : index
    %c0_40 = arith.constant 0 : index
    %c0_41 = arith.constant 0 : index
    %c0_42 = arith.constant 0 : index
    %41 = vector.load %arg6[%c0_39, %c0_40, %c0_41, %c0_42] : memref<2x9x128x128xbf16, #tpu.memory_space<vmem>>, vector<1x1x128x128xbf16>
    %42 = vector.shape_cast %41 : vector<1x1x128x128xbf16> to vector<128x128xbf16>
    %cst_43 = arith.constant dense<0.000000e+00> : vector<4x128xf32>
    %43 = tpu.matmul %40, %42, %cst_43 {dimension_numbers = #tpu.dot_dimension_numbers<[1], [0], [0], [1], [0, 0, 1, 1], [], []>} : vector<4x128xbf16>, vector<128x128xbf16>, vector<4x128xf32> -> vector<4x128xf32>
    %44 = arith.addf %34, %43 : vector<4x128xf32>
    %c0_44 = arith.constant 0 : index
    %c0_45 = arith.constant 0 : index
    %c0_46 = arith.constant 0 : index
    %45 = vector.load %arg12[%c0_44, %c0_45, %c0_46] : memref<6x2x256xf32, #tpu.memory_space<vmem>>, vector<4x2x128xf32>
    %46 = vector.shape_cast %45 : vector<4x2x128xf32> to vector<2x2x2x128xf32>
    %47 = vector.extract_strided_slice %46 {offsets = [0, 0, 0, 0], sizes = [2, 1, 2, 128], strides = [1, 1, 1, 1]} : vector<2x2x2x128xf32> to vector<2x1x2x128xf32>
    %48 = vector.shape_cast %47 : vector<2x1x2x128xf32> to vector<2x2x128xf32>
    %49 = arith.truncf %48 : vector<2x2x128xf32> to vector<2x2x128xbf16>
    %50 = vector.shape_cast %49 : vector<2x2x128xbf16> to vector<4x128xbf16>
    %c0_47 = arith.constant 0 : index
    %c1_48 = arith.constant 1 : index
    %c0_49 = arith.constant 0 : index
    %c0_50 = arith.constant 0 : index
    %51 = vector.load %arg6[%c0_47, %c1_48, %c0_49, %c0_50] : memref<2x9x128x128xbf16, #tpu.memory_space<vmem>>, vector<1x1x128x128xbf16>
    %52 = vector.shape_cast %51 : vector<1x1x128x128xbf16> to vector<128x128xbf16>
    %cst_51 = arith.constant dense<0.000000e+00> : vector<4x128xf32>
    %53 = tpu.matmul %50, %52, %cst_51 {dimension_numbers = #tpu.dot_dimension_numbers<[1], [0], [0], [1], [0, 0, 1, 1], [], []>} : vector<4x128xbf16>, vector<128x128xbf16>, vector<4x128xf32> -> vector<4x128xf32>
    %54 = arith.addf %44, %53 : vector<4x128xf32>
    %c0_52 = arith.constant 0 : index
    %c1_53 = arith.constant 1 : index
    %c0_54 = arith.constant 0 : index
    %55 = vector.load %arg11[%c0_52, %c1_53, %c0_54] : memref<6x3x256xf32, #tpu.memory_space<vmem>>, vector<4x2x128xf32>
    %56 = vector.shape_cast %55 : vector<4x2x128xf32> to vector<2x2x2x128xf32>
    %57 = vector.extract_strided_slice %56 {offsets = [0, 0, 0, 0], sizes = [2, 1, 2, 128], strides = [1, 1, 1, 1]} : vector<2x2x2x128xf32> to vector<2x1x2x128xf32>
    %58 = vector.shape_cast %57 : vector<2x1x2x128xf32> to vector<2x2x128xf32>
    %59 = arith.truncf %58 : vector<2x2x128xf32> to vector<2x2x128xbf16>
    %60 = vector.shape_cast %59 : vector<2x2x128xbf16> to vector<4x128xbf16>
    %c0_55 = arith.constant 0 : index
    %c2 = arith.constant 2 : index
    %c0_56 = arith.constant 0 : index
    %c0_57 = arith.constant 0 : index
    %61 = vector.load %arg6[%c0_55, %c2, %c0_56, %c0_57] : memref<2x9x128x128xbf16, #tpu.memory_space<vmem>>, vector<1x1x128x128xbf16>
    %62 = vector.shape_cast %61 : vector<1x1x128x128xbf16> to vector<128x128xbf16>
    %cst_58 = arith.constant dense<0.000000e+00> : vector<4x128xf32>
    %63 = tpu.matmul %60, %62, %cst_58 {dimension_numbers = #tpu.dot_dimension_numbers<[1], [0], [0], [1], [0, 0, 1, 1], [], []>} : vector<4x128xbf16>, vector<128x128xbf16>, vector<4x128xf32> -> vector<4x128xf32>
    %64 = arith.addf %54, %63 : vector<4x128xf32>
    %c1_59 = arith.constant 1 : index
    %c0_60 = arith.constant 0 : index
    %c0_61 = arith.constant 0 : index
    %65 = vector.load %arg11[%c1_59, %c0_60, %c0_61] : memref<6x3x256xf32, #tpu.memory_space<vmem>>, vector<4x2x128xf32>
    %66 = vector.shape_cast %65 : vector<4x2x128xf32> to vector<2x2x2x128xf32>
    %67 = vector.extract_strided_slice %66 {offsets = [0, 0, 0, 0], sizes = [2, 1, 2, 128], strides = [1, 1, 1, 1]} : vector<2x2x2x128xf32> to vector<2x1x2x128xf32>
    %68 = vector.shape_cast %67 : vector<2x1x2x128xf32> to vector<2x2x128xf32>
    %69 = arith.truncf %68 : vector<2x2x128xf32> to vector<2x2x128xbf16>
    %70 = vector.shape_cast %69 : vector<2x2x128xbf16> to vector<4x128xbf16>
    %c0_62 = arith.constant 0 : index
    %c3 = arith.constant 3 : index
    %c0_63 = arith.constant 0 : index
    %c0_64 = arith.constant 0 : index
    %71 = vector.load %arg6[%c0_62, %c3, %c0_63, %c0_64] : memref<2x9x128x128xbf16, #tpu.memory_space<vmem>>, vector<1x1x128x128xbf16>
    %72 = vector.shape_cast %71 : vector<1x1x128x128xbf16> to vector<128x128xbf16>
    %cst_65 = arith.constant dense<0.000000e+00> : vector<4x128xf32>
    %73 = tpu.matmul %70, %72, %cst_65 {dimension_numbers = #tpu.dot_dimension_numbers<[1], [0], [0], [1], [0, 0, 1, 1], [], []>} : vector<4x128xbf16>, vector<128x128xbf16>, vector<4x128xf32> -> vector<4x128xf32>
    %74 = arith.addf %64, %73 : vector<4x128xf32>
    %c1_66 = arith.constant 1 : index
    %c0_67 = arith.constant 0 : index
    %c0_68 = arith.constant 0 : index
    %75 = vector.load %arg12[%c1_66, %c0_67, %c0_68] : memref<6x2x256xf32, #tpu.memory_space<vmem>>, vector<4x2x128xf32>
    %76 = vector.shape_cast %75 : vector<4x2x128xf32> to vector<2x2x2x128xf32>
    %77 = vector.extract_strided_slice %76 {offsets = [0, 0, 0, 0], sizes = [2, 1, 2, 128], strides = [1, 1, 1, 1]} : vector<2x2x2x128xf32> to vector<2x1x2x128xf32>
    %78 = vector.shape_cast %77 : vector<2x1x2x128xf32> to vector<2x2x128xf32>
    %79 = arith.truncf %78 : vector<2x2x128xf32> to vector<2x2x128xbf16>
    %80 = vector.shape_cast %79 : vector<2x2x128xbf16> to vector<4x128xbf16>
    %c0_69 = arith.constant 0 : index
    %c4 = arith.constant 4 : index
    %c0_70 = arith.constant 0 : index
    %c0_71 = arith.constant 0 : index
    %81 = vector.load %arg6[%c0_69, %c4, %c0_70, %c0_71] : memref<2x9x128x128xbf16, #tpu.memory_space<vmem>>, vector<1x1x128x128xbf16>
    %82 = vector.shape_cast %81 : vector<1x1x128x128xbf16> to vector<128x128xbf16>
    %cst_72 = arith.constant dense<0.000000e+00> : vector<4x128xf32>
    %83 = tpu.matmul %80, %82, %cst_72 {dimension_numbers = #tpu.dot_dimension_numbers<[1], [0], [0], [1], [0, 0, 1, 1], [], []>} : vector<4x128xbf16>, vector<128x128xbf16>, vector<4x128xf32> -> vector<4x128xf32>
    %84 = arith.addf %74, %83 : vector<4x128xf32>
    %c1_73 = arith.constant 1 : index
    %c1_74 = arith.constant 1 : index
    %c0_75 = arith.constant 0 : index
    %85 = vector.load %arg11[%c1_73, %c1_74, %c0_75] : memref<6x3x256xf32, #tpu.memory_space<vmem>>, vector<4x2x128xf32>
    %86 = vector.shape_cast %85 : vector<4x2x128xf32> to vector<2x2x2x128xf32>
    %87 = vector.extract_strided_slice %86 {offsets = [0, 0, 0, 0], sizes = [2, 1, 2, 128], strides = [1, 1, 1, 1]} : vector<2x2x2x128xf32> to vector<2x1x2x128xf32>
    %88 = vector.shape_cast %87 : vector<2x1x2x128xf32> to vector<2x2x128xf32>
    %89 = arith.truncf %88 : vector<2x2x128xf32> to vector<2x2x128xbf16>
    %90 = vector.shape_cast %89 : vector<2x2x128xbf16> to vector<4x128xbf16>
    %c0_76 = arith.constant 0 : index
    %c5 = arith.constant 5 : index
    %c0_77 = arith.constant 0 : index
    %c0_78 = arith.constant 0 : index
    %91 = vector.load %arg6[%c0_76, %c5, %c0_77, %c0_78] : memref<2x9x128x128xbf16, #tpu.memory_space<vmem>>, vector<1x1x128x128xbf16>
    %92 = vector.shape_cast %91 : vector<1x1x128x128xbf16> to vector<128x128xbf16>
    %cst_79 = arith.constant dense<0.000000e+00> : vector<4x128xf32>
    %93 = tpu.matmul %90, %92, %cst_79 {dimension_numbers = #tpu.dot_dimension_numbers<[1], [0], [0], [1], [0, 0, 1, 1], [], []>} : vector<4x128xbf16>, vector<128x128xbf16>, vector<4x128xf32> -> vector<4x128xf32>
    %94 = arith.addf %84, %93 : vector<4x128xf32>
    %c2_80 = arith.constant 2 : index
    %c0_81 = arith.constant 0 : index
    %c0_82 = arith.constant 0 : index
    %95 = vector.load %arg11[%c2_80, %c0_81, %c0_82] : memref<6x3x256xf32, #tpu.memory_space<vmem>>, vector<4x2x128xf32>
    %96 = vector.shape_cast %95 : vector<4x2x128xf32> to vector<2x2x2x128xf32>
    %97 = vector.extract_strided_slice %96 {offsets = [0, 0, 0, 0], sizes = [2, 1, 2, 128], strides = [1, 1, 1, 1]} : vector<2x2x2x128xf32> to vector<2x1x2x128xf32>
    %98 = vector.shape_cast %97 : vector<2x1x2x128xf32> to vector<2x2x128xf32>
    %99 = arith.truncf %98 : vector<2x2x128xf32> to vector<2x2x128xbf16>
    %100 = vector.shape_cast %99 : vector<2x2x128xbf16> to vector<4x128xbf16>
    %c0_83 = arith.constant 0 : index
    %c6 = arith.constant 6 : index
    %c0_84 = arith.constant 0 : index
    %c0_85 = arith.constant 0 : index
    %101 = vector.load %arg6[%c0_83, %c6, %c0_84, %c0_85] : memref<2x9x128x128xbf16, #tpu.memory_space<vmem>>, vector<1x1x128x128xbf16>
    %102 = vector.shape_cast %101 : vector<1x1x128x128xbf16> to vector<128x128xbf16>
    %cst_86 = arith.constant dense<0.000000e+00> : vector<4x128xf32>
    %103 = tpu.matmul %100, %102, %cst_86 {dimension_numbers = #tpu.dot_dimension_numbers<[1], [0], [0], [1], [0, 0, 1, 1], [], []>} : vector<4x128xbf16>, vector<128x128xbf16>, vector<4x128xf32> -> vector<4x128xf32>
    %104 = arith.addf %94, %103 : vector<4x128xf32>
    %c2_87 = arith.constant 2 : index
    %c0_88 = arith.constant 0 : index
    %c0_89 = arith.constant 0 : index
    %105 = vector.load %arg12[%c2_87, %c0_88, %c0_89] : memref<6x2x256xf32, #tpu.memory_space<vmem>>, vector<4x2x128xf32>
    %106 = vector.shape_cast %105 : vector<4x2x128xf32> to vector<2x2x2x128xf32>
    %107 = vector.extract_strided_slice %106 {offsets = [0, 0, 0, 0], sizes = [2, 1, 2, 128], strides = [1, 1, 1, 1]} : vector<2x2x2x128xf32> to vector<2x1x2x128xf32>
    %108 = vector.shape_cast %107 : vector<2x1x2x128xf32> to vector<2x2x128xf32>
    %109 = arith.truncf %108 : vector<2x2x128xf32> to vector<2x2x128xbf16>
    %110 = vector.shape_cast %109 : vector<2x2x128xbf16> to vector<4x128xbf16>
    %c0_90 = arith.constant 0 : index
    %c7 = arith.constant 7 : index
    %c0_91 = arith.constant 0 : index
    %c0_92 = arith.constant 0 : index
    %111 = vector.load %arg6[%c0_90, %c7, %c0_91, %c0_92] : memref<2x9x128x128xbf16, #tpu.memory_space<vmem>>, vector<1x1x128x128xbf16>
    %112 = vector.shape_cast %111 : vector<1x1x128x128xbf16> to vector<128x128xbf16>
    %cst_93 = arith.constant dense<0.000000e+00> : vector<4x128xf32>
    %113 = tpu.matmul %110, %112, %cst_93 {dimension_numbers = #tpu.dot_dimension_numbers<[1], [0], [0], [1], [0, 0, 1, 1], [], []>} : vector<4x128xbf16>, vector<128x128xbf16>, vector<4x128xf32> -> vector<4x128xf32>
    %114 = arith.addf %104, %113 : vector<4x128xf32>
    %c2_94 = arith.constant 2 : index
    %c1_95 = arith.constant 1 : index
    %c0_96 = arith.constant 0 : index
    %115 = vector.load %arg11[%c2_94, %c1_95, %c0_96] : memref<6x3x256xf32, #tpu.memory_space<vmem>>, vector<4x2x128xf32>
    %116 = vector.shape_cast %115 : vector<4x2x128xf32> to vector<2x2x2x128xf32>
    %117 = vector.extract_strided_slice %116 {offsets = [0, 0, 0, 0], sizes = [2, 1, 2, 128], strides = [1, 1, 1, 1]} : vector<2x2x2x128xf32> to vector<2x1x2x128xf32>
    %118 = vector.shape_cast %117 : vector<2x1x2x128xf32> to vector<2x2x128xf32>
    %119 = arith.truncf %118 : vector<2x2x128xf32> to vector<2x2x128xbf16>
    %120 = vector.shape_cast %119 : vector<2x2x128xbf16> to vector<4x128xbf16>
    %c0_97 = arith.constant 0 : index
    %c8 = arith.constant 8 : index
    %c0_98 = arith.constant 0 : index
    %c0_99 = arith.constant 0 : index
    %121 = vector.load %arg6[%c0_97, %c8, %c0_98, %c0_99] : memref<2x9x128x128xbf16, #tpu.memory_space<vmem>>, vector<1x1x128x128xbf16>
    %122 = vector.shape_cast %121 : vector<1x1x128x128xbf16> to vector<128x128xbf16>
    %cst_100 = arith.constant dense<0.000000e+00> : vector<4x128xf32>
    %123 = tpu.matmul %120, %122, %cst_100 {dimension_numbers = #tpu.dot_dimension_numbers<[1], [0], [0], [1], [0, 0, 1, 1], [], []>} : vector<4x128xbf16>, vector<128x128xbf16>, vector<4x128xf32> -> vector<4x128xf32>
    %124 = arith.addf %114, %123 : vector<4x128xf32>
    %c0_101 = arith.constant 0 : index
    %c0_102 = arith.constant 0 : index
    %125 = vector.load %arg7[%c0_101, %c0_102] : memref<1x256xf32, #tpu.memory_space<vmem>>, vector<1x128xf32>
    %126 = vector.broadcast %125 : vector<1x128xf32> to vector<4x128xf32>
    %127 = arith.mulf %124, %126 : vector<4x128xf32>
    %c0_103 = arith.constant 0 : index
    %c0_104 = arith.constant 0 : index
    %128 = vector.load %arg8[%c0_103, %c0_104] : memref<1x256xf32, #tpu.memory_space<vmem>>, vector<1x128xf32>
    %129 = vector.broadcast %128 : vector<1x128xf32> to vector<4x128xf32>
    %130 = arith.addf %127, %129 : vector<4x128xf32>
    %cst_105 = arith.constant 0.000000e+00 : f32
    %131 = vector.broadcast %cst_105 : f32 to vector<4x128xf32>
    %c0_106 = arith.constant 0 : index
    %c0_107 = arith.constant 0 : index
    %c128 = arith.constant 128 : index
    %132 = vector.load %arg11[%c0_106, %c0_107, %c128] : memref<6x3x256xf32, #tpu.memory_space<vmem>>, vector<4x2x128xf32>
    %133 = vector.shape_cast %132 : vector<4x2x128xf32> to vector<2x2x2x128xf32>
    %134 = vector.extract_strided_slice %133 {offsets = [0, 0, 0, 0], sizes = [2, 1, 2, 128], strides = [1, 1, 1, 1]} : vector<2x2x2x128xf32> to vector<2x1x2x128xf32>
    %135 = vector.shape_cast %134 : vector<2x1x2x128xf32> to vector<2x2x128xf32>
    %136 = arith.truncf %135 : vector<2x2x128xf32> to vector<2x2x128xbf16>
    %137 = vector.shape_cast %136 : vector<2x2x128xbf16> to vector<4x128xbf16>
    %c1_108 = arith.constant 1 : index
    %c0_109 = arith.constant 0 : index
    %c0_110 = arith.constant 0 : index
    %c0_111 = arith.constant 0 : index
    %138 = vector.load %arg6[%c1_108, %c0_109, %c0_110, %c0_111] : memref<2x9x128x128xbf16, #tpu.memory_space<vmem>>, vector<1x1x128x128xbf16>
    %139 = vector.shape_cast %138 : vector<1x1x128x128xbf16> to vector<128x128xbf16>
    %cst_112 = arith.constant dense<0.000000e+00> : vector<4x128xf32>
    %140 = tpu.matmul %137, %139, %cst_112 {dimension_numbers = #tpu.dot_dimension_numbers<[1], [0], [0], [1], [0, 0, 1, 1], [], []>} : vector<4x128xbf16>, vector<128x128xbf16>, vector<4x128xf32> -> vector<4x128xf32>
    %141 = arith.addf %131, %140 : vector<4x128xf32>
    %c0_113 = arith.constant 0 : index
    %c0_114 = arith.constant 0 : index
    %c128_115 = arith.constant 128 : index
    %142 = vector.load %arg12[%c0_113, %c0_114, %c128_115] : memref<6x2x256xf32, #tpu.memory_space<vmem>>, vector<4x2x128xf32>
    %143 = vector.shape_cast %142 : vector<4x2x128xf32> to vector<2x2x2x128xf32>
    %144 = vector.extract_strided_slice %143 {offsets = [0, 0, 0, 0], sizes = [2, 1, 2, 128], strides = [1, 1, 1, 1]} : vector<2x2x2x128xf32> to vector<2x1x2x128xf32>
    %145 = vector.shape_cast %144 : vector<2x1x2x128xf32> to vector<2x2x128xf32>
    %146 = arith.truncf %145 : vector<2x2x128xf32> to vector<2x2x128xbf16>
    %147 = vector.shape_cast %146 : vector<2x2x128xbf16> to vector<4x128xbf16>
    %c1_116 = arith.constant 1 : index
    %c1_117 = arith.constant 1 : index
    %c0_118 = arith.constant 0 : index
    %c0_119 = arith.constant 0 : index
    %148 = vector.load %arg6[%c1_116, %c1_117, %c0_118, %c0_119] : memref<2x9x128x128xbf16, #tpu.memory_space<vmem>>, vector<1x1x128x128xbf16>
    %149 = vector.shape_cast %148 : vector<1x1x128x128xbf16> to vector<128x128xbf16>
    %cst_120 = arith.constant dense<0.000000e+00> : vector<4x128xf32>
    %150 = tpu.matmul %147, %149, %cst_120 {dimension_numbers = #tpu.dot_dimension_numbers<[1], [0], [0], [1], [0, 0, 1, 1], [], []>} : vector<4x128xbf16>, vector<128x128xbf16>, vector<4x128xf32> -> vector<4x128xf32>
    %151 = arith.addf %141, %150 : vector<4x128xf32>
    %c0_121 = arith.constant 0 : index
    %c1_122 = arith.constant 1 : index
    %c128_123 = arith.constant 128 : index
    %152 = vector.load %arg11[%c0_121, %c1_122, %c128_123] : memref<6x3x256xf32, #tpu.memory_space<vmem>>, vector<4x2x128xf32>
    %153 = vector.shape_cast %152 : vector<4x2x128xf32> to vector<2x2x2x128xf32>
    %154 = vector.extract_strided_slice %153 {offsets = [0, 0, 0, 0], sizes = [2, 1, 2, 128], strides = [1, 1, 1, 1]} : vector<2x2x2x128xf32> to vector<2x1x2x128xf32>
    %155 = vector.shape_cast %154 : vector<2x1x2x128xf32> to vector<2x2x128xf32>
    %156 = arith.truncf %155 : vector<2x2x128xf32> to vector<2x2x128xbf16>
    %157 = vector.shape_cast %156 : vector<2x2x128xbf16> to vector<4x128xbf16>
    %c1_124 = arith.constant 1 : index
    %c2_125 = arith.constant 2 : index
    %c0_126 = arith.constant 0 : index
    %c0_127 = arith.constant 0 : index
    %158 = vector.load %arg6[%c1_124, %c2_125, %c0_126, %c0_127] : memref<2x9x128x128xbf16, #tpu.memory_space<vmem>>, vector<1x1x128x128xbf16>
    %159 = vector.shape_cast %158 : vector<1x1x128x128xbf16> to vector<128x128xbf16>
    %cst_128 = arith.constant dense<0.000000e+00> : vector<4x128xf32>
    %160 = tpu.matmul %157, %159, %cst_128 {dimension_numbers = #tpu.dot_dimension_numbers<[1], [0], [0], [1], [0, 0, 1, 1], [], []>} : vector<4x128xbf16>, vector<128x128xbf16>, vector<4x128xf32> -> vector<4x128xf32>
    %161 = arith.addf %151, %160 : vector<4x128xf32>
    %c1_129 = arith.constant 1 : index
    %c0_130 = arith.constant 0 : index
    %c128_131 = arith.constant 128 : index
    %162 = vector.load %arg11[%c1_129, %c0_130, %c128_131] : memref<6x3x256xf32, #tpu.memory_space<vmem>>, vector<4x2x128xf32>
    %163 = vector.shape_cast %162 : vector<4x2x128xf32> to vector<2x2x2x128xf32>
    %164 = vector.extract_strided_slice %163 {offsets = [0, 0, 0, 0], sizes = [2, 1, 2, 128], strides = [1, 1, 1, 1]} : vector<2x2x2x128xf32> to vector<2x1x2x128xf32>
    %165 = vector.shape_cast %164 : vector<2x1x2x128xf32> to vector<2x2x128xf32>
    %166 = arith.truncf %165 : vector<2x2x128xf32> to vector<2x2x128xbf16>
    %167 = vector.shape_cast %166 : vector<2x2x128xbf16> to vector<4x128xbf16>
    %c1_132 = arith.constant 1 : index
    %c3_133 = arith.constant 3 : index
    %c0_134 = arith.constant 0 : index
    %c0_135 = arith.constant 0 : index
    %168 = vector.load %arg6[%c1_132, %c3_133, %c0_134, %c0_135] : memref<2x9x128x128xbf16, #tpu.memory_space<vmem>>, vector<1x1x128x128xbf16>
    %169 = vector.shape_cast %168 : vector<1x1x128x128xbf16> to vector<128x128xbf16>
    %cst_136 = arith.constant dense<0.000000e+00> : vector<4x128xf32>
    %170 = tpu.matmul %167, %169, %cst_136 {dimension_numbers = #tpu.dot_dimension_numbers<[1], [0], [0], [1], [0, 0, 1, 1], [], []>} : vector<4x128xbf16>, vector<128x128xbf16>, vector<4x128xf32> -> vector<4x128xf32>
    %171 = arith.addf %161, %170 : vector<4x128xf32>
    %c1_137 = arith.constant 1 : index
    %c0_138 = arith.constant 0 : index
    %c128_139 = arith.constant 128 : index
    %172 = vector.load %arg12[%c1_137, %c0_138, %c128_139] : memref<6x2x256xf32, #tpu.memory_space<vmem>>, vector<4x2x128xf32>
    %173 = vector.shape_cast %172 : vector<4x2x128xf32> to vector<2x2x2x128xf32>
    %174 = vector.extract_strided_slice %173 {offsets = [0, 0, 0, 0], sizes = [2, 1, 2, 128], strides = [1, 1, 1, 1]} : vector<2x2x2x128xf32> to vector<2x1x2x128xf32>
    %175 = vector.shape_cast %174 : vector<2x1x2x128xf32> to vector<2x2x128xf32>
    %176 = arith.truncf %175 : vector<2x2x128xf32> to vector<2x2x128xbf16>
    %177 = vector.shape_cast %176 : vector<2x2x128xbf16> to vector<4x128xbf16>
    %c1_140 = arith.constant 1 : index
    %c4_141 = arith.constant 4 : index
    %c0_142 = arith.constant 0 : index
    %c0_143 = arith.constant 0 : index
    %178 = vector.load %arg6[%c1_140, %c4_141, %c0_142, %c0_143] : memref<2x9x128x128xbf16, #tpu.memory_space<vmem>>, vector<1x1x128x128xbf16>
    %179 = vector.shape_cast %178 : vector<1x1x128x128xbf16> to vector<128x128xbf16>
    %cst_144 = arith.constant dense<0.000000e+00> : vector<4x128xf32>
    %180 = tpu.matmul %177, %179, %cst_144 {dimension_numbers = #tpu.dot_dimension_numbers<[1], [0], [0], [1], [0, 0, 1, 1], [], []>} : vector<4x128xbf16>, vector<128x128xbf16>, vector<4x128xf32> -> vector<4x128xf32>
    %181 = arith.addf %171, %180 : vector<4x128xf32>
    %c1_145 = arith.constant 1 : index
    %c1_146 = arith.constant 1 : index
    %c128_147 = arith.constant 128 : index
    %182 = vector.load %arg11[%c1_145, %c1_146, %c128_147] : memref<6x3x256xf32, #tpu.memory_space<vmem>>, vector<4x2x128xf32>
    %183 = vector.shape_cast %182 : vector<4x2x128xf32> to vector<2x2x2x128xf32>
    %184 = vector.extract_strided_slice %183 {offsets = [0, 0, 0, 0], sizes = [2, 1, 2, 128], strides = [1, 1, 1, 1]} : vector<2x2x2x128xf32> to vector<2x1x2x128xf32>
    %185 = vector.shape_cast %184 : vector<2x1x2x128xf32> to vector<2x2x128xf32>
    %186 = arith.truncf %185 : vector<2x2x128xf32> to vector<2x2x128xbf16>
    %187 = vector.shape_cast %186 : vector<2x2x128xbf16> to vector<4x128xbf16>
    %c1_148 = arith.constant 1 : index
    %c5_149 = arith.constant 5 : index
    %c0_150 = arith.constant 0 : index
    %c0_151 = arith.constant 0 : index
    %188 = vector.load %arg6[%c1_148, %c5_149, %c0_150, %c0_151] : memref<2x9x128x128xbf16, #tpu.memory_space<vmem>>, vector<1x1x128x128xbf16>
    %189 = vector.shape_cast %188 : vector<1x1x128x128xbf16> to vector<128x128xbf16>
    %cst_152 = arith.constant dense<0.000000e+00> : vector<4x128xf32>
    %190 = tpu.matmul %187, %189, %cst_152 {dimension_numbers = #tpu.dot_dimension_numbers<[1], [0], [0], [1], [0, 0, 1, 1], [], []>} : vector<4x128xbf16>, vector<128x128xbf16>, vector<4x128xf32> -> vector<4x128xf32>
    %191 = arith.addf %181, %190 : vector<4x128xf32>
    %c2_153 = arith.constant 2 : index
    %c0_154 = arith.constant 0 : index
    %c128_155 = arith.constant 128 : index
    %192 = vector.load %arg11[%c2_153, %c0_154, %c128_155] : memref<6x3x256xf32, #tpu.memory_space<vmem>>, vector<4x2x128xf32>
    %193 = vector.shape_cast %192 : vector<4x2x128xf32> to vector<2x2x2x128xf32>
    %194 = vector.extract_strided_slice %193 {offsets = [0, 0, 0, 0], sizes = [2, 1, 2, 128], strides = [1, 1, 1, 1]} : vector<2x2x2x128xf32> to vector<2x1x2x128xf32>
    %195 = vector.shape_cast %194 : vector<2x1x2x128xf32> to vector<2x2x128xf32>
    %196 = arith.truncf %195 : vector<2x2x128xf32> to vector<2x2x128xbf16>
    %197 = vector.shape_cast %196 : vector<2x2x128xbf16> to vector<4x128xbf16>
    %c1_156 = arith.constant 1 : index
    %c6_157 = arith.constant 6 : index
    %c0_158 = arith.constant 0 : index
    %c0_159 = arith.constant 0 : index
    %198 = vector.load %arg6[%c1_156, %c6_157, %c0_158, %c0_159] : memref<2x9x128x128xbf16, #tpu.memory_space<vmem>>, vector<1x1x128x128xbf16>
    %199 = vector.shape_cast %198 : vector<1x1x128x128xbf16> to vector<128x128xbf16>
    %cst_160 = arith.constant dense<0.000000e+00> : vector<4x128xf32>
    %200 = tpu.matmul %197, %199, %cst_160 {dimension_numbers = #tpu.dot_dimension_numbers<[1], [0], [0], [1], [0, 0, 1, 1], [], []>} : vector<4x128xbf16>, vector<128x128xbf16>, vector<4x128xf32> -> vector<4x128xf32>
    %201 = arith.addf %191, %200 : vector<4x128xf32>
    %c2_161 = arith.constant 2 : index
    %c0_162 = arith.constant 0 : index
    %c128_163 = arith.constant 128 : index
    %202 = vector.load %arg12[%c2_161, %c0_162, %c128_163] : memref<6x2x256xf32, #tpu.memory_space<vmem>>, vector<4x2x128xf32>
    %203 = vector.shape_cast %202 : vector<4x2x128xf32> to vector<2x2x2x128xf32>
    %204 = vector.extract_strided_slice %203 {offsets = [0, 0, 0, 0], sizes = [2, 1, 2, 128], strides = [1, 1, 1, 1]} : vector<2x2x2x128xf32> to vector<2x1x2x128xf32>
    %205 = vector.shape_cast %204 : vector<2x1x2x128xf32> to vector<2x2x128xf32>
    %206 = arith.truncf %205 : vector<2x2x128xf32> to vector<2x2x128xbf16>
    %207 = vector.shape_cast %206 : vector<2x2x128xbf16> to vector<4x128xbf16>
    %c1_164 = arith.constant 1 : index
    %c7_165 = arith.constant 7 : index
    %c0_166 = arith.constant 0 : index
    %c0_167 = arith.constant 0 : index
    %208 = vector.load %arg6[%c1_164, %c7_165, %c0_166, %c0_167] : memref<2x9x128x128xbf16, #tpu.memory_space<vmem>>, vector<1x1x128x128xbf16>
    %209 = vector.shape_cast %208 : vector<1x1x128x128xbf16> to vector<128x128xbf16>
    %cst_168 = arith.constant dense<0.000000e+00> : vector<4x128xf32>
    %210 = tpu.matmul %207, %209, %cst_168 {dimension_numbers = #tpu.dot_dimension_numbers<[1], [0], [0], [1], [0, 0, 1, 1], [], []>} : vector<4x128xbf16>, vector<128x128xbf16>, vector<4x128xf32> -> vector<4x128xf32>
    %211 = arith.addf %201, %210 : vector<4x128xf32>
    %c2_169 = arith.constant 2 : index
    %c1_170 = arith.constant 1 : index
    %c128_171 = arith.constant 128 : index
    %212 = vector.load %arg11[%c2_169, %c1_170, %c128_171] : memref<6x3x256xf32, #tpu.memory_space<vmem>>, vector<4x2x128xf32>
    %213 = vector.shape_cast %212 : vector<4x2x128xf32> to vector<2x2x2x128xf32>
    %214 = vector.extract_strided_slice %213 {offsets = [0, 0, 0, 0], sizes = [2, 1, 2, 128], strides = [1, 1, 1, 1]} : vector<2x2x2x128xf32> to vector<2x1x2x128xf32>
    %215 = vector.shape_cast %214 : vector<2x1x2x128xf32> to vector<2x2x128xf32>
    %216 = arith.truncf %215 : vector<2x2x128xf32> to vector<2x2x128xbf16>
    %217 = vector.shape_cast %216 : vector<2x2x128xbf16> to vector<4x128xbf16>
    %c1_172 = arith.constant 1 : index
    %c8_173 = arith.constant 8 : index
    %c0_174 = arith.constant 0 : index
    %c0_175 = arith.constant 0 : index
    %218 = vector.load %arg6[%c1_172, %c8_173, %c0_174, %c0_175] : memref<2x9x128x128xbf16, #tpu.memory_space<vmem>>, vector<1x1x128x128xbf16>
    %219 = vector.shape_cast %218 : vector<1x1x128x128xbf16> to vector<128x128xbf16>
    %cst_176 = arith.constant dense<0.000000e+00> : vector<4x128xf32>
    %220 = tpu.matmul %217, %219, %cst_176 {dimension_numbers = #tpu.dot_dimension_numbers<[1], [0], [0], [1], [0, 0, 1, 1], [], []>} : vector<4x128xbf16>, vector<128x128xbf16>, vector<4x128xf32> -> vector<4x128xf32>
    %221 = arith.addf %211, %220 : vector<4x128xf32>
    %c0_177 = arith.constant 0 : index
    %c128_178 = arith.constant 128 : index
    %222 = vector.load %arg7[%c0_177, %c128_178] : memref<1x256xf32, #tpu.memory_space<vmem>>, vector<1x128xf32>
    %223 = vector.broadcast %222 : vector<1x128xf32> to vector<4x128xf32>
    %224 = arith.mulf %221, %223 : vector<4x128xf32>
    %c0_179 = arith.constant 0 : index
    %c128_180 = arith.constant 128 : index
    %225 = vector.load %arg8[%c0_179, %c128_180] : memref<1x256xf32, #tpu.memory_space<vmem>>, vector<1x128xf32>
    %226 = vector.broadcast %225 : vector<1x128xf32> to vector<4x128xf32>
    %227 = arith.addf %224, %226 : vector<4x128xf32>
    %228 = arith.truncf %130 : vector<4x128xf32> to vector<4x128xbf16>
    %c0_181 = arith.constant 0 : index
    %c0_182 = arith.constant 0 : index
    %c0_183 = arith.constant 0 : index
    %229 = vector.load %arg9[%c0_181, %c0_182, %c0_183] : memref<1x4x256xbf16, #tpu.memory_space<vmem>>, vector<1x4x128xbf16>
    %230 = vector.shape_cast %229 : vector<1x4x128xbf16> to vector<4x128xbf16>
    %231 = vector.shape_cast %228 : vector<4x128xbf16> to vector<1x4x128xbf16>
    tpu.vector_store %arg9[%c0_181, %c0_182, %c0_183], %231 {strides = array<i32>} : memref<1x4x256xbf16, #tpu.memory_space<vmem>>, vector<1x4x128xbf16>,
    %cst_184 = arith.constant dense<0.000000e+00> : vector<128xf32>
    %232 = vector.multi_reduction <add>, %130, %cst_184 [0] : vector<4x128xf32> to vector<128xf32>
    %233 = vector.shape_cast %232 : vector<128xf32> to vector<1x128xf32>
    %cst_185 = arith.constant 2.500000e-01 : f32
    %234 = vector.broadcast %cst_185 : f32 to vector<1x128xf32>
    %235 = arith.mulf %233, %234 : vector<1x128xf32>
    %c0_186 = arith.constant 0 : index
    %c0_187 = arith.constant 0 : index
    %c0_188 = arith.constant 0 : index
    %236 = vector.load %arg10[%c0_186, %c0_187, %c0_188] : memref<1x1x256xf32, #tpu.memory_space<vmem>>, vector<1x1x128xf32>
    %237 = vector.shape_cast %236 : vector<1x1x128xf32> to vector<1x128xf32>
    %238 = vector.shape_cast %235 : vector<1x128xf32> to vector<1x1x128xf32>
    tpu.vector_store %arg10[%c0_186, %c0_187, %c0_188], %238 {strides = array<i32>} : memref<1x1x256xf32, #tpu.memory_space<vmem>>, vector<1x1x128xf32>,
    %239 = arith.truncf %227 : vector<4x128xf32> to vector<4x128xbf16>
    %c0_189 = arith.constant 0 : index
    %c0_190 = arith.constant 0 : index
    %c128_191 = arith.constant 128 : index
    %240 = vector.load %arg9[%c0_189, %c0_190, %c128_191] : memref<1x4x256xbf16, #tpu.memory_space<vmem>>, vector<1x4x128xbf16>
    %241 = vector.shape_cast %240 : vector<1x4x128xbf16> to vector<4x128xbf16>
    %242 = vector.shape_cast %239 : vector<4x128xbf16> to vector<1x4x128xbf16>
    tpu.vector_store %arg9[%c0_189, %c0_190, %c128_191], %242 {strides = array<i32>} : memref<1x4x256xbf16, #tpu.memory_space<vmem>>, vector<1x4x128xbf16>,
    %cst_192 = arith.constant dense<0.000000e+00> : vector<128xf32>
    %243 = vector.multi_reduction <add>, %227, %cst_192 [0] : vector<4x128xf32> to vector<128xf32>
    %244 = vector.shape_cast %243 : vector<128xf32> to vector<1x128xf32>
    %cst_193 = arith.constant 2.500000e-01 : f32
    %245 = vector.broadcast %cst_193 : f32 to vector<1x128xf32>
    %246 = arith.mulf %244, %245 : vector<1x128xf32>
    %c0_194 = arith.constant 0 : index
    %c0_195 = arith.constant 0 : index
    %c128_196 = arith.constant 128 : index
    %247 = vector.load %arg10[%c0_194, %c0_195, %c128_196] : memref<1x1x256xf32, #tpu.memory_space<vmem>>, vector<1x1x128xf32>
    %248 = vector.shape_cast %247 : vector<1x1x128xf32> to vector<1x128xf32>
    %249 = vector.shape_cast %246 : vector<1x128xf32> to vector<1x1x128xf32>
    tpu.vector_store %arg10[%c0_194, %c0_195, %c128_196], %249 {strides = array<i32>} : memref<1x1x256xf32, #tpu.memory_space<vmem>>, vector<1x1x128xf32>,
    return
  }
  func.func @transform_0(%arg0: i32) -> (i32, i32, i32, i32) {
    %c0_i32 = arith.constant 0 : i32
    %c0_i32_0 = arith.constant 0 : i32
    %c0_i32_1 = arith.constant 0 : i32
    %c0_i32_2 = arith.constant 0 : i32
    return %arg0, %c0_i32, %c0_i32_0, %c0_i32_1 : i32, i32, i32, i32
  }
  func.func @transform_1(%arg0: i32) -> (i32, i32, i32, i32) {
    %c0_i32 = arith.constant 0 : i32
    %c0_i32_0 = arith.constant 0 : i32
    %c0_i32_1 = arith.constant 0 : i32
    %c0_i32_2 = arith.constant 0 : i32
    return %arg0, %c0_i32, %c0_i32_0, %c0_i32_1 : i32, i32, i32, i32
  }
  func.func @transform_2(%arg0: i32) -> (i32, i32) {
    %c0_i32 = arith.constant 0 : i32
    %c0_i32_0 = arith.constant 0 : i32
    %c0_i32_1 = arith.constant 0 : i32
    return %c0_i32, %c0_i32_0 : i32, i32
  }
  func.func @transform_3(%arg0: i32) -> (i32, i32) {
    %c0_i32 = arith.constant 0 : i32
    %c0_i32_0 = arith.constant 0 : i32
    %c0_i32_1 = arith.constant 0 : i32
    return %c0_i32, %c0_i32_0 : i32, i32
  }
  func.func @transform_4(%arg0: i32) -> (i32, i32) {
    %c0_i32 = arith.constant 0 : i32
    %c0_i32_0 = arith.constant 0 : i32
    %c0_i32_1 = arith.constant 0 : i32
    return %c0_i32, %c0_i32_0 : i32, i32
  }
  func.func @transform_5(%arg0: i32) -> (i32, i32, i32, i32) {
    %c0_i32 = arith.constant 0 : i32
    %c0_i32_0 = arith.constant 0 : i32
    %c0_i32_1 = arith.constant 0 : i32
    %c0_i32_2 = arith.constant 0 : i32
    %c0_i32_3 = arith.constant 0 : i32
    return %c0_i32, %c0_i32_0, %c0_i32_1, %c0_i32_2 : i32, i32, i32, i32
  }
  func.func @transform_6(%arg0: i32) -> (i32, i32) {
    %c0_i32 = arith.constant 0 : i32
    %c0_i32_0 = arith.constant 0 : i32
    %c0_i32_1 = arith.constant 0 : i32
    return %c0_i32, %c0_i32_0 : i32, i32
  }
  func.func @transform_7(%arg0: i32) -> (i32, i32) {
    %c0_i32 = arith.constant 0 : i32
    %c0_i32_0 = arith.constant 0 : i32
    %c0_i32_1 = arith.constant 0 : i32
    return %c0_i32, %c0_i32_0 : i32, i32
  }
  func.func @transform_8(%arg0: i32) -> (i32, i32, i32) {
    %c0_i32 = arith.constant 0 : i32
    %c0_i32_0 = arith.constant 0 : i32
    %c0_i32_1 = arith.constant 0 : i32
    return %arg0, %c0_i32, %c0_i32_0 : i32, i32, i32
  }
  func.func @transform_9(%arg0: i32) -> (i32, i32, i32) {
    %c0_i32 = arith.constant 0 : i32
    %c0_i32_0 = arith.constant 0 : i32
    %c0_i32_1 = arith.constant 0 : i32
    return %arg0, %c0_i32, %c0_i32_0 : i32, i32, i32
  }
}

module attributes {stable_mosaic.version = 11 : i64} {
  func.func @_convc_se_res_ds_kernel(%arg0: i32, %arg1: memref<1x4x256xbf16, #tpu.memory_space<vmem>>, %arg2: memref<1x1x256xf32, #tpu.memory_space<vmem>>, %arg3: memref<256x128xf32, #tpu.memory_space<vmem>>, %arg4: memref<1x128xf32, #tpu.memory_space<vmem>>, %arg5: memref<128x256xf32, #tpu.memory_space<vmem>>, %arg6: memref<1x256xf32, #tpu.memory_space<vmem>>, %arg7: memref<256x256xbf16, #tpu.memory_space<vmem>>, %arg8: memref<1x256xf32, #tpu.memory_space<vmem>>, %arg9: memref<1x256xf32, #tpu.memory_space<vmem>>, %arg10: memref<1x4x128xbf16, #tpu.memory_space<vmem>>, %arg11: memref<128x256xbf16, #tpu.memory_space<vmem>>, %arg12: memref<1x256xf32, #tpu.memory_space<vmem>>, %arg13: memref<1x256xf32, #tpu.memory_space<vmem>>, %arg14: memref<1x4x256xbf16, #tpu.memory_space<vmem>>) attributes {dimension_semantics = [#tpu.dimension_semantics<parallel>], iteration_bounds = array<i64: 2>, scalar_prefetch = 0 : i64, scratch_operands = 0 : i64, tpu.core_type = #tpu.core_type<tc>, window_params = [{transform_indices = @transform_0, window_bounds = array<i64: 1, 4, 256>}, {transform_indices = @transform_1, window_bounds = array<i64: 1, 1, 256>}, {pipeline_mode = #tpu.pipeline_mode<synchronous>, transform_indices = @transform_2, window_bounds = array<i64: 256, 128>}, {pipeline_mode = #tpu.pipeline_mode<synchronous>, transform_indices = @transform_3, window_bounds = array<i64: 1, 128>}, {pipeline_mode = #tpu.pipeline_mode<synchronous>, transform_indices = @transform_4, window_bounds = array<i64: 128, 256>}, {pipeline_mode = #tpu.pipeline_mode<synchronous>, transform_indices = @transform_5, window_bounds = array<i64: 1, 256>}, {pipeline_mode = #tpu.pipeline_mode<synchronous>, transform_indices = @transform_6, window_bounds = array<i64: 256, 256>}, {pipeline_mode = #tpu.pipeline_mode<synchronous>, transform_indices = @transform_7, window_bounds = array<i64: 1, 256>}, {pipeline_mode = #tpu.pipeline_mode<synchronous>, transform_indices = @transform_8, window_bounds = array<i64: 1, 256>}, {transform_indices = @transform_9, window_bounds = array<i64: 1, 4, 128>}, {pipeline_mode = #tpu.pipeline_mode<synchronous>, transform_indices = @transform_10, window_bounds = array<i64: 128, 256>}, {pipeline_mode = #tpu.pipeline_mode<synchronous>, transform_indices = @transform_11, window_bounds = array<i64: 1, 256>}, {pipeline_mode = #tpu.pipeline_mode<synchronous>, transform_indices = @transform_12, window_bounds = array<i64: 1, 256>}, {transform_indices = @transform_13, window_bounds = array<i64: 1, 4, 256>}]} {
    %c0 = arith.constant 0 : index
    %c0_0 = arith.constant 0 : index
    %c0_1 = arith.constant 0 : index
    %0 = vector.load %arg2[%c0, %c0_0, %c0_1] : memref<1x1x256xf32, #tpu.memory_space<vmem>>, vector<1x1x256xf32>
    %1 = vector.shape_cast %0 : vector<1x1x256xf32> to vector<1x256xf32>
    %c0_2 = arith.constant 0 : index
    %c0_3 = arith.constant 0 : index
    %2 = vector.load %arg3[%c0_2, %c0_3] : memref<256x128xf32, #tpu.memory_space<vmem>>, vector<256x128xf32>
    %cst = arith.constant dense<0.000000e+00> : vector<1x128xf32>
    %3 = tpu.matmul %1, %2, %cst {dimension_numbers = #tpu.dot_dimension_numbers<[1], [0], [0], [1], [0, 0, 1, 1], [], []>} : vector<1x256xf32>, vector<256x128xf32>, vector<1x128xf32> -> vector<1x128xf32>
    %c0_4 = arith.constant 0 : index
    %c0_5 = arith.constant 0 : index
    %4 = vector.load %arg4[%c0_4, %c0_5] : memref<1x128xf32, #tpu.memory_space<vmem>>, vector<1x128xf32>
    %5 = arith.addf %3, %4 : vector<1x128xf32>
    %cst_6 = arith.constant 0.000000e+00 : f32
    %6 = vector.broadcast %cst_6 : f32 to vector<1x128xf32>
    %7 = arith.maximumf %5, %6 : vector<1x128xf32>
    %c0_7 = arith.constant 0 : index
    %c0_8 = arith.constant 0 : index
    %8 = vector.load %arg5[%c0_7, %c0_8] : memref<128x256xf32, #tpu.memory_space<vmem>>, vector<128x256xf32>
    %cst_9 = arith.constant dense<0.000000e+00> : vector<1x256xf32>
    %9 = tpu.matmul %7, %8, %cst_9 {dimension_numbers = #tpu.dot_dimension_numbers<[1], [0], [0], [1], [0, 0, 1, 1], [], []>} : vector<1x128xf32>, vector<128x256xf32>, vector<1x256xf32> -> vector<1x256xf32>
    %c0_10 = arith.constant 0 : index
    %c0_11 = arith.constant 0 : index
    %10 = vector.load %arg6[%c0_10, %c0_11] : memref<1x256xf32, #tpu.memory_space<vmem>>, vector<1x256xf32>
    %11 = arith.addf %9, %10 : vector<1x256xf32>
    %cst_12 = arith.constant 0.000000e+00 : f32
    %12 = vector.broadcast %cst_12 : f32 to vector<1x256xf32>
    %13 = arith.subf %12, %11 : vector<1x256xf32>
    %14 = math.exp %13 : vector<1x256xf32>
    %cst_13 = arith.constant 1.000000e+00 : f32
    %15 = vector.broadcast %cst_13 : f32 to vector<1x256xf32>
    %16 = arith.addf %15, %14 : vector<1x256xf32>
    %cst_14 = arith.constant 1.000000e+00 : f32
    %17 = vector.broadcast %cst_14 : f32 to vector<1x256xf32>
    %18 = arith.divf %17, %16 : vector<1x256xf32>
    %19 = arith.truncf %18 : vector<1x256xf32> to vector<1x256xbf16>
    %c0_15 = arith.constant 0 : index
    %c0_16 = arith.constant 0 : index
    %c0_17 = arith.constant 0 : index
    %20 = vector.load %arg1[%c0_15, %c0_16, %c0_17] : memref<1x4x256xbf16, #tpu.memory_space<vmem>>, vector<1x4x256xbf16>
    %21 = vector.shape_cast %20 : vector<1x4x256xbf16> to vector<4x256xbf16>
    %22 = vector.broadcast %19 : vector<1x256xbf16> to vector<4x256xbf16>
    %23 = arith.mulf %21, %22 : vector<4x256xbf16>
    %c0_18 = arith.constant 0 : index
    %c0_19 = arith.constant 0 : index
    %24 = vector.load %arg7[%c0_18, %c0_19] : memref<256x256xbf16, #tpu.memory_space<vmem>>, vector<256x256xbf16>
    %cst_20 = arith.constant dense<0.000000e+00> : vector<4x256xf32>
    %25 = tpu.matmul %23, %24, %cst_20 {dimension_numbers = #tpu.dot_dimension_numbers<[1], [0], [0], [1], [0, 0, 1, 1], [], []>} : vector<4x256xbf16>, vector<256x256xbf16>, vector<4x256xf32> -> vector<4x256xf32>
    %c0_21 = arith.constant 0 : index
    %c0_22 = arith.constant 0 : index
    %26 = vector.load %arg8[%c0_21, %c0_22] : memref<1x256xf32, #tpu.memory_space<vmem>>, vector<1x256xf32>
    %27 = vector.broadcast %26 : vector<1x256xf32> to vector<4x256xf32>
    %28 = arith.mulf %25, %27 : vector<4x256xf32>
    %c0_23 = arith.constant 0 : index
    %c0_24 = arith.constant 0 : index
    %29 = vector.load %arg9[%c0_23, %c0_24] : memref<1x256xf32, #tpu.memory_space<vmem>>, vector<1x256xf32>
    %30 = vector.broadcast %29 : vector<1x256xf32> to vector<4x256xf32>
    %31 = arith.addf %28, %30 : vector<4x256xf32>
    %c0_25 = arith.constant 0 : index
    %c0_26 = arith.constant 0 : index
    %c0_27 = arith.constant 0 : index
    %32 = vector.load %arg10[%c0_25, %c0_26, %c0_27] : memref<1x4x128xbf16, #tpu.memory_space<vmem>>, vector<1x4x128xbf16>
    %33 = vector.shape_cast %32 : vector<1x4x128xbf16> to vector<4x128xbf16>
    %c0_28 = arith.constant 0 : index
    %c0_29 = arith.constant 0 : index
    %34 = vector.load %arg11[%c0_28, %c0_29] : memref<128x256xbf16, #tpu.memory_space<vmem>>, vector<128x256xbf16>
    %cst_30 = arith.constant dense<0.000000e+00> : vector<4x256xf32>
    %35 = tpu.matmul %33, %34, %cst_30 {dimension_numbers = #tpu.dot_dimension_numbers<[1], [0], [0], [1], [0, 0, 1, 1], [], []>} : vector<4x128xbf16>, vector<128x256xbf16>, vector<4x256xf32> -> vector<4x256xf32>
    %c0_31 = arith.constant 0 : index
    %c0_32 = arith.constant 0 : index
    %36 = vector.load %arg12[%c0_31, %c0_32] : memref<1x256xf32, #tpu.memory_space<vmem>>, vector<1x256xf32>
    %37 = vector.broadcast %36 : vector<1x256xf32> to vector<4x256xf32>
    %38 = arith.mulf %35, %37 : vector<4x256xf32>
    %c0_33 = arith.constant 0 : index
    %c0_34 = arith.constant 0 : index
    %39 = vector.load %arg13[%c0_33, %c0_34] : memref<1x256xf32, #tpu.memory_space<vmem>>, vector<1x256xf32>
    %40 = vector.broadcast %39 : vector<1x256xf32> to vector<4x256xf32>
    %41 = arith.addf %38, %40 : vector<4x256xf32>
    %42 = arith.addf %31, %41 : vector<4x256xf32>
    %cst_35 = arith.constant 0.000000e+00 : f32
    %43 = vector.broadcast %cst_35 : f32 to vector<4x256xf32>
    %44 = arith.maximumf %42, %43 : vector<4x256xf32>
    %45 = arith.truncf %44 : vector<4x256xf32> to vector<4x256xbf16>
    %c0_36 = arith.constant 0 : index
    %c0_37 = arith.constant 0 : index
    %c0_38 = arith.constant 0 : index
    %46 = vector.load %arg14[%c0_36, %c0_37, %c0_38] : memref<1x4x256xbf16, #tpu.memory_space<vmem>>, vector<1x4x256xbf16>
    %47 = vector.shape_cast %46 : vector<1x4x256xbf16> to vector<4x256xbf16>
    %48 = vector.shape_cast %45 : vector<4x256xbf16> to vector<1x4x256xbf16>
    tpu.vector_store %arg14[%c0_36, %c0_37, %c0_38], %48 {strides = array<i32>} : memref<1x4x256xbf16, #tpu.memory_space<vmem>>, vector<1x4x256xbf16>,
    return
  }
  func.func @transform_0(%arg0: i32) -> (i32, i32, i32) {
    %c0_i32 = arith.constant 0 : i32
    %c0_i32_0 = arith.constant 0 : i32
    %c0_i32_1 = arith.constant 0 : i32
    return %arg0, %c0_i32, %c0_i32_0 : i32, i32, i32
  }
  func.func @transform_1(%arg0: i32) -> (i32, i32, i32) {
    %c0_i32 = arith.constant 0 : i32
    %c0_i32_0 = arith.constant 0 : i32
    %c0_i32_1 = arith.constant 0 : i32
    return %arg0, %c0_i32, %c0_i32_0 : i32, i32, i32
  }
  func.func @transform_2(%arg0: i32) -> (i32, i32) {
    %c0_i32 = arith.constant 0 : i32
    %c0_i32_0 = arith.constant 0 : i32
    %c0_i32_1 = arith.constant 0 : i32
    return %c0_i32, %c0_i32_0 : i32, i32
  }
  func.func @transform_3(%arg0: i32) -> (i32, i32) {
    %c0_i32 = arith.constant 0 : i32
    %c0_i32_0 = arith.constant 0 : i32
    %c0_i32_1 = arith.constant 0 : i32
    return %c0_i32, %c0_i32_0 : i32, i32
  }
  func.func @transform_4(%arg0: i32) -> (i32, i32) {
    %c0_i32 = arith.constant 0 : i32
    %c0_i32_0 = arith.constant 0 : i32
    %c0_i32_1 = arith.constant 0 : i32
    return %c0_i32, %c0_i32_0 : i32, i32
  }
  func.func @transform_5(%arg0: i32) -> (i32, i32) {
    %c0_i32 = arith.constant 0 : i32
    %c0_i32_0 = arith.constant 0 : i32
    %c0_i32_1 = arith.constant 0 : i32
    return %c0_i32, %c0_i32_0 : i32, i32
  }
  func.func @transform_6(%arg0: i32) -> (i32, i32) {
    %c0_i32 = arith.constant 0 : i32
    %c0_i32_0 = arith.constant 0 : i32
    %c0_i32_1 = arith.constant 0 : i32
    return %c0_i32, %c0_i32_0 : i32, i32
  }
  func.func @transform_7(%arg0: i32) -> (i32, i32) {
    %c0_i32 = arith.constant 0 : i32
    %c0_i32_0 = arith.constant 0 : i32
    %c0_i32_1 = arith.constant 0 : i32
    return %c0_i32, %c0_i32_0 : i32, i32
  }
  func.func @transform_8(%arg0: i32) -> (i32, i32) {
    %c0_i32 = arith.constant 0 : i32
    %c0_i32_0 = arith.constant 0 : i32
    %c0_i32_1 = arith.constant 0 : i32
    return %c0_i32, %c0_i32_0 : i32, i32
  }
  func.func @transform_9(%arg0: i32) -> (i32, i32, i32) {
    %c0_i32 = arith.constant 0 : i32
    %c0_i32_0 = arith.constant 0 : i32
    %c0_i32_1 = arith.constant 0 : i32
    return %arg0, %c0_i32, %c0_i32_0 : i32, i32, i32
  }
  func.func @transform_10(%arg0: i32) -> (i32, i32) {
    %c0_i32 = arith.constant 0 : i32
    %c0_i32_0 = arith.constant 0 : i32
    %c0_i32_1 = arith.constant 0 : i32
    return %c0_i32, %c0_i32_0 : i32, i32
  }
  func.func @transform_11(%arg0: i32) -> (i32, i32) {
    %c0_i32 = arith.constant 0 : i32
    %c0_i32_0 = arith.constant 0 : i32
    %c0_i32_1 = arith.constant 0 : i32
    return %c0_i32, %c0_i32_0 : i32, i32
  }
  func.func @transform_12(%arg0: i32) -> (i32, i32) {
    %c0_i32 = arith.constant 0 : i32
    %c0_i32_0 = arith.constant 0 : i32
    %c0_i32_1 = arith.constant 0 : i32
    return %c0_i32, %c0_i32_0 : i32, i32
  }
  func.func @transform_13(%arg0: i32) -> (i32, i32, i32) {
    %c0_i32 = arith.constant 0 : i32
    %c0_i32_0 = arith.constant 0 : i32
    %c0_i32_1 = arith.constant 0 : i32
    return %arg0, %c0_i32, %c0_i32_0 : i32, i32, i32
  }
}

module attributes {stable_mosaic.version = 11 : i64} {
  func.func @_gap_head_kernel(%arg0: i32, %arg1: memref<1x4x256xbf16, #tpu.memory_space<vmem>>, %arg2: memref<256x128xbf16, #tpu.memory_space<vmem>>, %arg3: memref<1x128xf32, #tpu.memory_space<vmem>>, %arg4: memref<1x1x128xf32, #tpu.memory_space<vmem>>) attributes {dimension_semantics = [#tpu.dimension_semantics<parallel>], iteration_bounds = array<i64: 2>, scalar_prefetch = 0 : i64, scratch_operands = 0 : i64, tpu.core_type = #tpu.core_type<tc>, window_params = [{transform_indices = @transform_0, window_bounds = array<i64: 1, 4, 256>}, {pipeline_mode = #tpu.pipeline_mode<synchronous>, transform_indices = @transform_1, window_bounds = array<i64: 256, 128>}, {pipeline_mode = #tpu.pipeline_mode<synchronous>, transform_indices = @transform_2, window_bounds = array<i64: 1, 128>}, {transform_indices = @transform_3, window_bounds = array<i64: 1, 1, 128>}]} {
    %c0 = arith.constant 0 : index
    %c0_0 = arith.constant 0 : index
    %c0_1 = arith.constant 0 : index
    %0 = vector.load %arg1[%c0, %c0_0, %c0_1] : memref<1x4x256xbf16, #tpu.memory_space<vmem>>, vector<1x4x256xbf16>
    %1 = vector.shape_cast %0 : vector<1x4x256xbf16> to vector<4x256xbf16>
    %2 = arith.extf %1 : vector<4x256xbf16> to vector<4x256xf32>
    %cst = arith.constant dense<0.000000e+00> : vector<256xf32>
    %3 = vector.multi_reduction <add>, %2, %cst [0] : vector<4x256xf32> to vector<256xf32>
    %4 = vector.shape_cast %3 : vector<256xf32> to vector<1x256xf32>
    %cst_2 = arith.constant 4.000000e+00 : f32
    %5 = vector.broadcast %cst_2 : f32 to vector<1x256xf32>
    %6 = arith.divf %4, %5 : vector<1x256xf32>
    %7 = arith.truncf %6 : vector<1x256xf32> to vector<1x256xbf16>
    %c0_3 = arith.constant 0 : index
    %c0_4 = arith.constant 0 : index
    %8 = vector.load %arg2[%c0_3, %c0_4] : memref<256x128xbf16, #tpu.memory_space<vmem>>, vector<256x128xbf16>
    %cst_5 = arith.constant dense<0.000000e+00> : vector<1x128xf32>
    %9 = tpu.matmul %7, %8, %cst_5 {dimension_numbers = #tpu.dot_dimension_numbers<[1], [0], [0], [1], [0, 0, 1, 1], [], []>} : vector<1x256xbf16>, vector<256x128xbf16>, vector<1x128xf32> -> vector<1x128xf32>
    %c0_6 = arith.constant 0 : index
    %c0_7 = arith.constant 0 : index
    %10 = vector.load %arg3[%c0_6, %c0_7] : memref<1x128xf32, #tpu.memory_space<vmem>>, vector<1x128xf32>
    %11 = arith.addf %9, %10 : vector<1x128xf32>
    %c0_8 = arith.constant 0 : index
    %c0_9 = arith.constant 0 : index
    %c0_10 = arith.constant 0 : index
    %12 = vector.load %arg4[%c0_8, %c0_9, %c0_10] : memref<1x1x128xf32, #tpu.memory_space<vmem>>, vector<1x1x128xf32>
    %13 = vector.shape_cast %12 : vector<1x1x128xf32> to vector<1x128xf32>
    %14 = vector.shape_cast %11 : vector<1x128xf32> to vector<1x1x128xf32>
    tpu.vector_store %arg4[%c0_8, %c0_9, %c0_10], %14 {strides = array<i32>} : memref<1x1x128xf32, #tpu.memory_space<vmem>>, vector<1x1x128xf32>,
    return
  }
  func.func @transform_0(%arg0: i32) -> (i32, i32, i32) {
    %c0_i32 = arith.constant 0 : i32
    %c0_i32_0 = arith.constant 0 : i32
    %c0_i32_1 = arith.constant 0 : i32
    return %arg0, %c0_i32, %c0_i32_0 : i32, i32, i32
  }
  func.func @transform_1(%arg0: i32) -> (i32, i32) {
    %c0_i32 = arith.constant 0 : i32
    %c0_i32_0 = arith.constant 0 : i32
    %c0_i32_1 = arith.constant 0 : i32
    return %c0_i32, %c0_i32_0 : i32, i32
  }
  func.func @transform_2(%arg0: i32) -> (i32, i32) {
    %c0_i32 = arith.constant 0 : i32
    %c0_i32_0 = arith.constant 0 : i32
    %c0_i32_1 = arith.constant 0 : i32
    return %c0_i32, %c0_i32_0 : i32, i32
  }
  func.func @transform_3(%arg0: i32) -> (i32, i32, i32) {
    %c0_i32 = arith.constant 0 : i32
    %c0_i32_0 = arith.constant 0 : i32
    %c0_i32_1 = arith.constant 0 : i32
    return %arg0, %c0_i32, %c0_i32_0 : i32, i32, i32
  }
}

</mosaic_0001>

<bundles_post_ra>
// kernel: _lambda_.10
= control target key start
LH: loop header
LB: loop body
LE: loop exit
PB: predicated region body
PF: predicated region fallthrough
CT: control target
= control target key end

     0   :  { %s1197_s15 = smov 0   ;;  %s1353_s0 = inlined_call_operand.vmem [shape: bf16[512,27], index: 0, kind: input, shape index: {}]   ;;  %s1354_s1 = inlined_call_operand.vmem [shape: bf16[27,128], index: 1, kind: input, shape index: {}]   ;;  %s1355_s2 = inlined_call_operand.vmem [shape: f32[1,128], index: 2, kind: input, shape index: {}]   ;;  %s1356_s3 = inlined_call_operand.vmem [shape: f32[1,128], index: 3, kind: input, shape index: {}]   ;;  %s1357_s4 = inlined_call_operand.vmem [shape: bf16[512,128], index: 4, kind: output, shape index: {}]  }
   0x1 LB: > { %s872_s16 = sadd.s32 4294967295, %s1169_s15   ;;  %p876_p0 = scmp.ge.s32.totalorder %s1169_s15, 1  ;;  %s1169_s15 = sphi %s1197_s15, %s14_s15  }
   0x2   : > { %p163_p1 = scmp.lt.s32.totalorder %s1169_s15, 3 }
   0x4   : > { %p164_p2 = pnand %p876_p0, %p163_p1 }
   0x5   : > { %v1145_v0 = vld [vmem:[%s1354_s1] sm:$0xff] (!%p164_p2)   ;;  %vm378_vm0 = vcmask (!%p164_p2), 1044480   ;;  %v1146_v1 = vld [vmem:[%s1354_s1 + $0x8] sm:$0x3f] (!%p164_p2)   ;;  %vm379_vm1 = vcmask (!%p164_p2), 1045504   ;;  %s877_s21 = sshll.u32 (!%p164_p2), %s872_s16, 5 }
   0x6   : > { %167 = sbr.rel (%p164_p2) target bundleno = 268 (0x10c), region = 36  ;;  %1096 = vmatprep.subr.bf16.mxu0 (!%p164_p2), %v1145_v0  ;;  %1132 = vmatprep.subr.bf16.mxu1 (!%p164_p2), %v1145_v0  ;;  %v1171_v2 = vmov (!%p164_p2), 65535   ;;  %p190_p3 = scmp.lt.s32.totalorder (!%p164_p2), %s877_s21, 63  ;;  %vm329_vm2 = vcmask (!%p164_p2), 220160   ;;  %v1256_v22 = vld [vmem:[%s1355_s2] ss:$0 sm:$0xff] (!%p164_p2) }
   0x7   : > { %1097 = vmatpush3.bf16.msra.mxu0 (!%p164_p2), %v1145_v0  ;;  %1134 = vmatpush3.bf16.msra.mxu1 (!%p164_p2), %v1145_v0  ;;  %v380_v3 = vsel (!%p164_p2), %vm378_vm0, 4294967295, %v1171_v2  ;;  %v1261_v24 = vld [vmem:[%s1356_s3] ss:$0 sm:$0xff] (!%p164_p2) }
   0x8   : > { %v381_v4 = vsel (!%p164_p2), %vm379_vm1, %v380_v3, 0 }
   0x9   : > { %v383_v5 = vand.u32 (!%p164_p2), %v1146_v1, %v381_v4 }
   0xb   : > { %1098 = vmatprep.subr.bf16.mxu0 (!%p164_p2), %v383_v5  ;;  %1133 = vmatprep.subr.bf16.mxu1 (!%p164_p2), %v383_v5 }
   0xc   : > { %1099 = vmatpush3.bf16.msra.mxu0 (!%p164_p2), %v383_v5  ;;  %1135 = vmatpush3.bf16.msra.mxu1 (!%p164_p2), %v383_v5 }
   0xd   : > { %s1359_s21 = smov (!%p190_p3, %s877_s21), 63 }
   0xe   : > { %s878_s22 = sshll.u32 %s1359_s21, 2 }
   0xf   : > { %s1219_s25 = scalar_lea.vmem %s1353_s0, %s878_s22  ;;  %s1284_s6 = scalar_lea.vmem %s1357_s4, %s878_s22 }
  0x10   : > { %v1147_v6 = vld [vmem:[%s1219_s25] sm:$0xff]   ;;  %v1149_v8 = vld [vmem:[%s1219_s25 + $0x8] sm:$0xff]   ;;  %v1151_v10 = vld [vmem:[%s1219_s25 + $0x10] sm:$0xff]  }
  0x11   : > { %v1148_v7 = vld [vmem:[%s1219_s25 + $0x40] sm:$0xff]   ;;  %1100 = vmatprep.mubr.msk.bf16.mxu0 %vm329_vm2, %v1147_v6  ;;  %v1150_v9 = vld [vmem:[%s1219_s25 + $0x48] sm:$0xff]   ;;  %v1152_v11 = vld [vmem:[%s1219_s25 + $0x50] sm:$0xff]  }
  0x12   : > { %1116 = vmatprep.mubr.msk.bf16.mxu1 %vm329_vm2, %v1148_v7  ;;  %1101 = vmatmul.mubr.msk.bf16.vlgmr.msra.gmra.mrb[0].mxu0 %vm329_vm2, %v1149_v8  ;;  %v1153_v12 = vld [vmem:[%s1219_s25 + $0x18] sm:$0xff]   ;;  %v1155_v14 = vld [vmem:[%s1219_s25 + $0x20] sm:$0xff]   ;;  %v1157_v16 = vld [vmem:[%s1219_s25 + $0x28] sm:$0xff]  }
  0x13   : > { %1117 = vmatmul.mubr.msk.bf16.vlgmr.msra.gmra.mrb[0].mxu1 %vm329_vm2, %v1150_v9  ;;  %1104 = vmatprep.mubr.msk.bf16.mxu0 %vm329_vm2, %v1151_v10  ;;  %v1154_v13 = vld [vmem:[%s1219_s25 + $0x58] sm:$0xff]   ;;  %v1156_v15 = vld [vmem:[%s1219_s25 + $0x60] sm:$0xff]   ;;  %v1158_v17 = vld [vmem:[%s1219_s25 + $0x68] sm:$0xff]  }
  0x14   : > { %1120 = vmatprep.mubr.msk.bf16.mxu1 %vm329_vm2, %v1152_v11  ;;  %v1159_v18 = vld [vmem:[%s1219_s25 + $0x30] sm:$0xff]   ;;  %v1161_v20 = vld [vmem:[%s1219_s25 + $0x38] sm:$0xff]  }
  0x15   : > { %v1160_v19 = vld [vmem:[%s1219_s25 + $0x70] sm:$0xff]   ;;  %v1162_v21 = vld [vmem:[%s1219_s25 + $0x78] sm:$0xff]  }
  0x1a   : > { %1105 = vmatmul.mubr.msk.bf16.gmra.mrb[4].mxu0 %vm329_vm2, %v1153_v12 }
  0x1b   : > { %1121 = vmatmul.mubr.msk.bf16.gmra.mrb[4].mxu1 %vm329_vm2, %v1154_v13  ;;  %1108 = vmatprep.mubr.msk.bf16.mxu0 %vm329_vm2, %v1155_v14 }
  0x1c   : > { %1124 = vmatprep.mubr.msk.bf16.mxu1 %vm329_vm2, %v1156_v15 }
  0x22   : > { %1109 = vmatmul.mubr.msk.bf16.gmra.mrb[8].mxu0 %vm329_vm2, %v1157_v16 }
  0x23   : > { %1125 = vmatmul.mubr.msk.bf16.gmra.mrb[8].mxu1 %vm329_vm2, %v1158_v17  ;;  %1112 = vmatprep.mubr.msk.bf16.mxu0 %vm329_vm2, %v1159_v18 }
  0x24   : > { %1128 = vmatprep.mubr.msk.bf16.mxu1 %vm329_vm2, %v1160_v19 }
  0x2a   : > { %1113 = vmatmul.mubr.msk.bf16.gmra.mrb[12].mxu0 %vm329_vm2, %v1161_v20 }
  0x2b   : > { %1129 = vmatmul.mubr.msk.bf16.gmra.mrb[12].mxu1 %vm329_vm2, %v1162_v21 }
  0xe5   : > { %v1102_v23 = vpop.f32.mrb[0].mxu0 }
  0xe6   : > { %v555_v25 = vmul.f32 %v1102_v23, %v1256_v22  ;;  %v1118_v26 = vpop.f32.mrb[0].mxu1  ;;  %v419_v27 = vpop.f32.mrb[1].mxu0 }
  0xe7   : > { %v571_v28 = vmul.f32 %v1118_v26, %v1256_v22  ;;  %v553_v29 = vmul.f32 %v1256_v22, %v419_v27  ;;  %v483_v30 = vpop.f32.mrb[1].mxu1  ;;  %v1103_v31 = vpop.f32.mrb[2].mxu0 }
  0xe8   : > { %v594_v32 = vadd.f32 %v1261_v24, %v555_v25  ;;  %v569_v33 = vmul.f32 %v1256_v22, %v483_v30  ;;  %v556_v34 = vmul.f32 %v1103_v31, %v1256_v22  ;;  %v1119_v35 = vpop.f32.mrb[2].mxu1  ;;  %v422_v36 = vpop.f32.mrb[3].mxu0 }
  0xe9   : > { %v610_v37 = vadd.f32 %v1261_v24, %v571_v28  ;;  %v592_v38 = vadd.f32 %v1261_v24, %v553_v29  ;;  %v572_v39 = vmul.f32 %v1119_v35, %v1256_v22  ;;  %v554_v40 = vmul.f32 %v1256_v22, %v422_v36  ;;  %v486_v41 = vpop.f32.mrb[3].mxu1 }
  0xea   : > { %v608_v42 = vadd.f32 %v1261_v24, %v569_v33  ;;  %v595_v43 = vadd.f32 %v1261_v24, %v556_v34  ;;  %v570_v44 = vmul.f32 %v1256_v22, %v486_v41  ;;  %v626_v47 = vmax.f32 %v594_v32, 0.0 }
  0xeb   : > { %v611_v45 = vadd.f32 %v1261_v24, %v572_v39  ;;  %v593_v46 = vadd.f32 %v1261_v24, %v554_v40  ;;  %v642_v50 = vmax.f32 %v610_v37, 0.0  ;;  %v624_v51 = vmax.f32 %v592_v38, 0.0 }
  0xec   : > { %v627_v48 = vmax.f32 %v595_v43, 0.0  ;;  %v609_v49 = vadd.f32 %v1261_v24, %v570_v44  ;;  %v640_v55 = vmax.f32 %v608_v42, 0.0 }
  0xed   : > { %v643_v52 = vmax.f32 %v611_v45, 0.0  ;;  %v625_v53 = vmax.f32 %v593_v46, 0.0  ;;  %v1106_v54 = vpop.f32.mrb[4].mxu0 }
  0xee   : > { %v991_v56 = vpack.c.bf16 %v627_v48, %v626_v47  ;;  %v641_v57 = vmax.f32 %v609_v49, 0.0  ;;  %v559_v58 = vmul.f32 %v1106_v54, %v1256_v22  ;;  %v1122_v59 = vpop.f32.mrb[4].mxu1  ;;  %v435_v60 = vpop.f32.mrb[5].mxu0 }
  0xef   : > { %v1031_v61 = vpack.c.bf16 %v643_v52, %v642_v50  ;;  %v986_v62 = vpack.c.bf16 %v625_v53, %v624_v51  ;;  %v575_v63 = vmul.f32 %v1122_v59, %v1256_v22  ;;  %v557_v0 = vmul.f32 %v1256_v22, %v435_v60  ;;  %v499_v1 = vpop.f32.mrb[5].mxu1  ;;  %v1107_v2 = vpop.f32.mrb[6].mxu0 }
  0xf0   : > { %1063 = vst [vmem:[%s1284_s6 + $0x8] sm:$0xff] %v991_v56   ;;  %v1026_v3 = vpack.c.bf16 %v641_v57, %v640_v55  ;;  %v598_v4 = vadd.f32 %v1261_v24, %v559_v58  ;;  %v573_v5 = vmul.f32 %v1256_v22, %v499_v1  ;;  %v560_v6 = vmul.f32 %v1107_v2, %v1256_v22  ;;  %v1123_v7 = vpop.f32.mrb[6].mxu1  ;;  %v438_v8 = vpop.f32.mrb[7].mxu0 }
  0xf1   : > { %1071 = vst [vmem:[%s1284_s6 + $0x48] sm:$0xff] %v1031_v61   ;;  %987 = vst [vmem:[%s1284_s6] sm:$0xff] %v986_v62   ;;  %v614_v9 = vadd.f32 %v1261_v24, %v575_v63  ;;  %v596_v10 = vadd.f32 %v1261_v24, %v557_v0  ;;  %v576_v11 = vmul.f32 %v1123_v7, %v1256_v22  ;;  %v502_v13 = vpop.f32.mrb[7].mxu1 }
  0xf2   : > { %v558_v12 = vmul.f32 %v1256_v22, %v438_v8  ;;  %1070 = vst [vmem:[%s1284_s6 + $0x40] sm:$0xff] %v1026_v3   ;;  %v612_v14 = vadd.f32 %v1261_v24, %v573_v5  ;;  %v599_v15 = vadd.f32 %v1261_v24, %v560_v6  ;;  %v574_v16 = vmul.f32 %v1256_v22, %v502_v13 }
  0xf3   : > { %v615_v17 = vadd.f32 %v1261_v24, %v576_v11  ;;  %v630_v19 = vmax.f32 %v598_v4, 0.0  ;;  %v646_v23 = vmax.f32 %v614_v9, 0.0  ;;  %v628_v25 = vmax.f32 %v596_v10, 0.0 }
  0xf4   : > { %v597_v18 = vadd.f32 %v1261_v24, %v558_v12  ;;  %v631_v20 = vmax.f32 %v599_v15, 0.0  ;;  %v613_v21 = vadd.f32 %v1261_v24, %v574_v16  ;;  %v644_v29 = vmax.f32 %v612_v14, 0.0 }
  0xf5   : > { %v647_v26 = vmax.f32 %v615_v17, 0.0  ;;  %v1110_v28 = vpop.f32.mrb[8].mxu0 }
  0xf6   : > { %v629_v27 = vmax.f32 %v597_v18, 0.0  ;;  %v1001_v30 = vpack.c.bf16 %v631_v20, %v630_v19  ;;  %v645_v31 = vmax.f32 %v613_v21, 0.0  ;;  %v563_v32 = vmul.f32 %v1110_v28, %v1256_v22  ;;  %v1126_v33 = vpop.f32.mrb[8].mxu1  ;;  %v451_v34 = vpop.f32.mrb[9].mxu0 }
  0xf7   : > { %v1041_v35 = vpack.c.bf16 %v647_v26, %v646_v23  ;;  %v579_v37 = vmul.f32 %v1126_v33, %v1256_v22  ;;  %v561_v38 = vmul.f32 %v1256_v22, %v451_v34  ;;  %v515_v39 = vpop.f32.mrb[9].mxu1  ;;  %v1111_v40 = vpop.f32.mrb[10].mxu0 }
  0xf8   : > { %v996_v36 = vpack.c.bf16 %v629_v27, %v628_v25  ;;  %1065 = vst [vmem:[%s1284_s6 + $0x18] sm:$0xff] %v1001_v30   ;;  %v1036_v41 = vpack.c.bf16 %v645_v31, %v644_v29  ;;  %v602_v42 = vadd.f32 %v1261_v24, %v563_v32  ;;  %v577_v43 = vmul.f32 %v1256_v22, %v515_v39  ;;  %v1127_v45 = vpop.f32.mrb[10].mxu1  ;;  %v454_v46 = vpop.f32.mrb[11].mxu0 }
  0xf9   : > { %v564_v44 = vmul.f32 %v1111_v40, %v1256_v22  ;;  %1073 = vst [vmem:[%s1284_s6 + $0x58] sm:$0xff] %v1041_v35   ;;  %v618_v47 = vadd.f32 %v1261_v24, %v579_v37  ;;  %v600_v48 = vadd.f32 %v1261_v24, %v561_v38  ;;  %v580_v49 = vmul.f32 %v1127_v45, %v1256_v22  ;;  %v518_v51 = vpop.f32.mrb[11].mxu1 }
  0xfa   : > { %1064 = vst [vmem:[%s1284_s6 + $0x10] sm:$0xff] %v996_v36   ;;  %v562_v50 = vmul.f32 %v1256_v22, %v454_v46  ;;  %1072 = vst [vmem:[%s1284_s6 + $0x50] sm:$0xff] %v1036_v41   ;;  %v616_v52 = vadd.f32 %v1261_v24, %v577_v43  ;;  %v578_v54 = vmul.f32 %v1256_v22, %v518_v51  ;;  %v634_v57 = vmax.f32 %v602_v42, 0.0 }
  0xfb   : > { %v603_v53 = vadd.f32 %v1261_v24, %v564_v44  ;;  %v619_v55 = vadd.f32 %v1261_v24, %v580_v49  ;;  %v650_v60 = vmax.f32 %v618_v47, 0.0  ;;  %v632_v61 = vmax.f32 %v600_v48, 0.0 }
  0xfc   : > { %v601_v56 = vadd.f32 %v1261_v24, %v562_v50  ;;  %v617_v59 = vadd.f32 %v1261_v24, %v578_v54  ;;  %v648_v1 = vmax.f32 %v616_v52, 0.0 }
  0xfd   : > { %v635_v58 = vmax.f32 %v603_v53, 0.0  ;;  %v651_v62 = vmax.f32 %v619_v55, 0.0  ;;  %v1114_v0 = vpop.f32.mrb[12].mxu0 }
  0xfe   : > { %v633_v63 = vmax.f32 %v601_v56, 0.0  ;;  %v649_v3 = vmax.f32 %v617_v59, 0.0  ;;  %v567_v4 = vmul.f32 %v1114_v0, %v1256_v22  ;;  %v1130_v5 = vpop.f32.mrb[12].mxu1  ;;  %v467_v6 = vpop.f32.mrb[13].mxu0 }
  0xff   : > { %v1011_v2 = vpack.c.bf16 %v635_v58, %v634_v57  ;;  %v1051_v7 = vpack.c.bf16 %v651_v62, %v650_v60  ;;  %v583_v9 = vmul.f32 %v1130_v5, %v1256_v22  ;;  %v565_v10 = vmul.f32 %v1256_v22, %v467_v6  ;;  %v531_v11 = vpop.f32.mrb[13].mxu1  ;;  %v1115_v12 = vpop.f32.mrb[14].mxu0 }
 0x100   : > { %v1006_v8 = vpack.c.bf16 %v633_v63, %v632_v61  ;;  %v1046_v13 = vpack.c.bf16 %v649_v3, %v648_v1  ;;  %v606_v14 = vadd.f32 %v1261_v24, %v567_v4  ;;  %v581_v15 = vmul.f32 %v1256_v22, %v531_v11  ;;  %v1131_v17 = vpop.f32.mrb[14].mxu1  ;;  %v470_v18 = vpop.f32.mrb[15].mxu0 }
 0x101   : > { %1067 = vst [vmem:[%s1284_s6 + $0x28] sm:$0xff] %v1011_v2   ;;  %v568_v16 = vmul.f32 %v1115_v12, %v1256_v22  ;;  %1075 = vst [vmem:[%s1284_s6 + $0x68] sm:$0xff] %v1051_v7   ;;  %v622_v19 = vadd.f32 %v1261_v24, %v583_v9  ;;  %v604_v20 = vadd.f32 %v1261_v24, %v565_v10  ;;  %v534_v25 = vpop.f32.mrb[15].mxu1 }
 0x102   : > { %1066 = vst [vmem:[%s1284_s6 + $0x20] sm:$0xff] %v1006_v8   ;;  %v584_v21 = vmul.f32 %v1131_v17, %v1256_v22  ;;  %v566_v23 = vmul.f32 %v1256_v22, %v470_v18  ;;  %1074 = vst [vmem:[%s1284_s6 + $0x60] sm:$0xff] %v1046_v13   ;;  %v620_v26 = vadd.f32 %v1261_v24, %v581_v15  ;;  %v638_v31 = vmax.f32 %v606_v14, 0.0 }
 0x103   : > { %v607_v27 = vadd.f32 %v1261_v24, %v568_v16  ;;  %v582_v28 = vmul.f32 %v1256_v22, %v534_v25  ;;  %v654_v34 = vmax.f32 %v622_v19, 0.0  ;;  %v636_v35 = vmax.f32 %v604_v20, 0.0 }
 0x104   : > { %v623_v29 = vadd.f32 %v1261_v24, %v584_v21  ;;  %v605_v30 = vadd.f32 %v1261_v24, %v566_v23  ;;  %v652_v38 = vmax.f32 %v620_v26, 0.0 }
 0x105   : > { %v639_v32 = vmax.f32 %v607_v27, 0.0  ;;  %v621_v33 = vadd.f32 %v1261_v24, %v582_v28 }
 0x106   : > { %v655_v36 = vmax.f32 %v623_v29, 0.0  ;;  %v637_v37 = vmax.f32 %v605_v30, 0.0 }
 0x107   : > { %v1021_v39 = vpack.c.bf16 %v639_v32, %v638_v31  ;;  %v653_v40 = vmax.f32 %v621_v33, 0.0 }
 0x108   : > { %v1061_v41 = vpack.c.bf16 %v655_v36, %v654_v34  ;;  %v1016_v22 = vpack.c.bf16 %v637_v37, %v636_v35 }
 0x109   : > { %1069 = vst [vmem:[%s1284_s6 + $0x38] sm:$0xff] %v1021_v39   ;;  %v1056_v42 = vpack.c.bf16 %v653_v40, %v652_v38 }
 0x10a   : > { %1077 = vst [vmem:[%s1284_s6 + $0x78] sm:$0xff] %v1061_v41   ;;  %1068 = vst [vmem:[%s1284_s6 + $0x30] sm:$0xff] %v1016_v22  }
 0x10b   : > { %1076 = vst [vmem:[%s1284_s6 + $0x70] sm:$0xff] %v1056_v42  }
 0x10c PF: > { %s14_s15 = sadd.s32 1, %s1169_s15  }
 0x10d   : > { %p11_p4 = scmp.ge.s32.totalorder %s14_s15, 4  }
 0x10f   :  { %13 = sbr.rel (!%p11_p4) target bundleno = 1 (0x1), region = 66 }

// kernel: _lambda_.12
= control target key start
LH: loop header
LB: loop body
LE: loop exit
PB: predicated region body
PF: predicated region fallthrough
CT: control target
= control target key end

     0   :  { %s1616_s25 = smov 0   ;;  %s1836_s0 = inlined_call_operand.vmem [shape: bf16[2,64,128], index: 0, kind: input, shape index: {}]   ;;  %s1837_s1 = inlined_call_operand.vmem [shape: f32[2,1,128], index: 1, kind: input, shape index: {}]   ;;  %s1838_s2 = inlined_call_operand.vmem [shape: f32[128,128], index: 2, kind: input, shape index: {}]   ;;  %s1839_s3 = inlined_call_operand.vmem [shape: f32[1,128], index: 3, kind: input, shape index: {}]   ;;  %s1840_s4 = inlined_call_operand.vmem [shape: f32[128,128], index: 4, kind: input, shape index: {}]   ;;  %s1841_s5 = inlined_call_operand.vmem [shape: f32[1,128], index: 5, kind: input, shape index: {}]   ;;  %s1842_s6 = inlined_call_operand.vmem [shape: bf16[128,128], index: 6, kind: input, shape index: {}]   ;;  %s1843_s7 = inlined_call_operand.vmem [shape: f32[1,128], index: 7, kind: input, shape index: {}, may-alias: {7,11}]   ;;  %s1844_s8 = inlined_call_operand.vmem [shape: f32[1,128], index: 8, kind: input, shape index: {}, may-alias: {8,12}]   ;;  %s1845_s9 = inlined_call_operand.vmem [shape: bf16[2,64,128], index: 9, kind: input, shape index: {}]   ;;  %s1846_s10 = inlined_call_operand.vmem [shape: bf16[128,128], index: 10, kind: input, shape index: {}]   ;;  %s1847_s11 = inlined_call_operand.vmem [shape: f32[1,128], index: 11, kind: input, shape index: {}, may-alias: {7,11}]   ;;  %s1848_s12 = inlined_call_operand.vmem [shape: f32[1,128], index: 12, kind: input, shape index: {}, may-alias: {8,12}]   ;;  %s1849_s13 = inlined_call_operand.vmem [shape: bf16[2,64,128], index: 13, kind: output, shape index: {}]  }
   0x1 LB: > { %s1192_s26 = sadd.s32 4294967295, %s1541_s25   ;;  %p1196_p0 = scmp.ge.s32.totalorder %s1541_s25, 1  ;;  %s1541_s25 = sphi %s1616_s25, %s23_s25  }
   0x2   : > { %p405_p1 = scmp.lt.s32.totalorder %s1541_s25, 3 }
   0x4   : > { %p406_p2 = pnand %p1196_p0, %p405_p1 }
   0x5   : > { %v477_v0 = vld [vmem:[%s1838_s2] sm:$0xff] (!%p406_p2)  ;;  %v478_v1 = vld [vmem:[%s1838_s2 + $0x8] sm:$0xff] (!%p406_p2)  ;;  %v479_v2 = vld [vmem:[%s1838_s2 + $0x10] sm:$0xff] (!%p406_p2)  ;;  %v1543_v3 = vmov (!%p406_p2), 0.0|0.0   ;;  %vm1544_vm0 = vmmov (!%p406_p2), 0   ;;  %v1545_v6 = vmov (!%p406_p2), 0.0  }
   0x6   : > { %409 = sbr.rel (%p406_p2) target bundleno = 744 (0x2e8), region = 72  ;;  %1452 = vmatprep.subr.bf16.mxu0 (!%p406_p2), %v1543_v3  ;;  %v1453_v4 = vpack.c.bf16 (!%p406_p2), %v478_v1, %v477_v0  ;;  %v480_v5 = vld [vmem:[%s1838_s2 + $0x18] sm:$0xff] (!%p406_p2)  ;;  %1366 = vmatprep.mubr.msk.f32.mxu0 (!%p406_p2), %vm1544_vm0, %v1545_v6  ;;  %v481_v8 = vld [vmem:[%s1838_s2 + $0x20] sm:$0xff] (!%p406_p2)  ;;  %v482_v9 = vld [vmem:[%s1838_s2 + $0x28] sm:$0xff] (!%p406_p2)  ;;  %p457_p3 = scmp.lt.s32.totalorder (!%p406_p2), %s1192_s26, 1 }
   0x7   : > { %1476 = vmatprep.subr.bf16.mxu1 (!%p406_p2), %v1543_v3  ;;  %1401 = vmatprep.mubr.msk.f32.mxu1 (!%p406_p2), %vm1544_vm0, %v1545_v6  ;;  %v1456_v7 = vpack.c.bf16 (!%p406_p2), %v480_v5, %v479_v2  ;;  %v565_v10 = vld [vmem:[%s1840_s4] sm:$0xff] (!%p406_p2)  ;;  %v566_v11 = vld [vmem:[%s1840_s4 + $0x8] sm:$0xff] (!%p406_p2)  ;;  %v567_v13 = vld [vmem:[%s1840_s4 + $0x10] sm:$0xff] (!%p406_p2)  ;;  %v1459_v15 = vpack.c.bf16 (!%p406_p2), %v482_v9, %v481_v8 }
   0x8   : > { %1454 = vmatpush3.bf16.msra.mxu0 (!%p406_p2), %v1453_v4  ;;  %v1477_v12 = vpack.c.bf16 (!%p406_p2), %v566_v11, %v565_v10  ;;  %v568_v14 = vld [vmem:[%s1840_s4 + $0x18] sm:$0xff] (!%p406_p2)  ;;  %v483_v16 = vld [vmem:[%s1838_s2 + $0x30] sm:$0xff] (!%p406_p2)  ;;  %v569_v19 = vld [vmem:[%s1840_s4 + $0x20] sm:$0xff] (!%p406_p2) }
   0x9   : > { %1455 = vmatprep.subr.bf16.mxu0 (!%p406_p2), %v1543_v3  ;;  %v484_v17 = vld [vmem:[%s1838_s2 + $0x38] sm:$0xff] (!%p406_p2)  ;;  %v1480_v18 = vpack.c.bf16 (!%p406_p2), %v568_v14, %v567_v13  ;;  %v570_v20 = vld [vmem:[%s1840_s4 + $0x28] sm:$0xff] (!%p406_p2)  ;;  %v485_v21 = vld [vmem:[%s1838_s2 + $0x40] sm:$0xff] (!%p406_p2) }
   0xa   : > { %1478 = vmatpush3.bf16.msra.mxu1 (!%p406_p2), %v1477_v12  ;;  %v486_v22 = vld [vmem:[%s1838_s2 + $0x48] sm:$0xff] (!%p406_p2)  ;;  %v1462_v23 = vpack.c.bf16 (!%p406_p2), %v484_v17, %v483_v16  ;;  %v571_v24 = vld [vmem:[%s1840_s4 + $0x30] sm:$0xff] (!%p406_p2)  ;;  %v572_v25 = vld [vmem:[%s1840_s4 + $0x38] sm:$0xff] (!%p406_p2)  ;;  %v1483_v26 = vpack.c.bf16 (!%p406_p2), %v570_v20, %v569_v19  ;;  %v670_v20 = vlaneseq (!%p406_p2) }
   0xb   : > { %1479 = vmatprep.subr.bf16.mxu1 (!%p406_p2), %v1543_v3  ;;  %v487_v27 = vld [vmem:[%s1838_s2 + $0x50] sm:$0xff] (!%p406_p2)  ;;  %v488_v28 = vld [vmem:[%s1838_s2 + $0x58] sm:$0xff] (!%p406_p2)  ;;  %v1465_v29 = vpack.c.bf16 (!%p406_p2), %v486_v22, %v485_v21  ;;  %v573_v30 = vld [vmem:[%s1840_s4 + $0x40] sm:$0xff] (!%p406_p2)  ;;  %v1486_v32 = vpack.c.bf16 (!%p406_p2), %v572_v25, %v571_v24 }
   0xc   : > { %1457 = vmatpush3.bf16.msra.mxu0 (!%p406_p2), %v1456_v7  ;;  %v574_v31 = vld [vmem:[%s1840_s4 + $0x48] sm:$0xff] (!%p406_p2)  ;;  %v489_v33 = vld [vmem:[%s1838_s2 + $0x60] sm:$0xff] (!%p406_p2)  ;;  %v1468_v35 = vpack.c.bf16 (!%p406_p2), %v488_v28, %v487_v27  ;;  %v575_v36 = vld [vmem:[%s1840_s4 + $0x50] sm:$0xff] (!%p406_p2)  ;;  %v671_v21 = vshrl.u32 (!%p406_p2), %v670_v20, 7 }
   0xd   : > { %1458 = vmatprep.subr.bf16.mxu0 %v1543_v3  ;;  %s1851_s26 = smov (!%p457_p3, %s1192_s26), 1  ;;  %v490_v34 = vld [vmem:[%s1838_s2 + $0x68] sm:$0xff]  ;;  %v576_v37 = vld [vmem:[%s1840_s4 + $0x58] sm:$0xff]  ;;  %v1489_v38 = vpack.c.bf16 %v574_v31, %v573_v30  ;;  %v491_v40 = vld [vmem:[%s1838_s2 + $0x70] sm:$0xff] }
   0xe   : > { %s1684_s29 = sshll.u32 %s1851_s26, 5  ;;  %1481 = vmatpush3.bf16.msra.mxu1 %v1480_v18  ;;  %v1471_v39 = vpack.c.bf16 %v490_v34, %v489_v33  ;;  %v492_v41 = vld [vmem:[%s1838_s2 + $0x78] sm:$0xff]  ;;  %v1492_v42 = vpack.c.bf16 %v576_v37, %v575_v36  ;;  %v577_v43 = vld [vmem:[%s1840_s4 + $0x60] sm:$0xff]  ;;  %v578_v44 = vld [vmem:[%s1840_s4 + $0x68] sm:$0xff]  ;;  %s464_s18 = scalar_lea.vmem %s1837_s1, %s1851_s26  ;;  %v672_v24 = vsub.s32 0, %v671_v21 }
   0xf   : > { %1482 = vmatprep.subr.bf16.mxu1 %v1543_v3  ;;  %s1725_s21 = scalar_lea.vmem %s1845_s9, %s1684_s29  ;;  %v1474_v45 = vpack.c.bf16 %v492_v41, %v491_v40  ;;  %v1495_v46 = vpack.c.bf16 %v578_v44, %v577_v43  ;;  %v476_v47 = vld [vmem:[%s464_s18] sm:$0x1]  ;;  %v579_v48 = vld [vmem:[%s1840_s4 + $0x70] sm:$0xff]  ;;  %v580_v49 = vld [vmem:[%s1840_s4 + $0x78] sm:$0xff]  ;;  %s461_s18 = scalar_lea.vmem %s1836_s0, %s1684_s29 }
  0x10   : > { %1460 = vmatpush3.bf16.msra.mxu0 %v1459_v15  ;;  %v1498_v50 = vpack.c.bf16 %v580_v49, %v579_v48  ;;  %v493_v51 = vld [vmem:[%s1839_s3] sm:$0x1]  ;;  %v1513_v58 = vld [vmem:[%s1846_s10 + $0x8] sm:$0xff]   ;;  %v1515_v60 = vld [vmem:[%s1846_s10 + $0x10] sm:$0xff]   ;;  %s474_s15 = scalar_lea.vmem %s1849_s13, %s1684_s29 }
  0x11   : > { %1461 = vmatprep.subr.bf16.mxu0 %v1543_v3  ;;  %v1511_v56 = vld [vmem:[%s1846_s10] sm:$0xff]   ;;  %v1514_v59 = vld [vmem:[%s1842_s6 + $0x8] sm:$0xff]   ;;  %v1516_v61 = vld [vmem:[%s1842_s6 + $0x10] sm:$0xff]  }
  0x12   : > { %1484 = vmatpush3.bf16.msra.mxu1 %v1483_v26  ;;  %v1512_v57 = vld [vmem:[%s1842_s6] sm:$0xff]   ;;  %v1517_v62 = vld [vmem:[%s1846_s10 + $0x18] sm:$0xff]   ;;  %v1521_v2 = vld [vmem:[%s1846_s10 + $0x28] sm:$0xff]  }
  0x13   : > { %1485 = vmatprep.subr.bf16.mxu1 %v1543_v3  ;;  %v1518_v63 = vld [vmem:[%s1842_s6 + $0x18] sm:$0xff]   ;;  %v1519_v0 = vld [vmem:[%s1846_s10 + $0x20] sm:$0xff]   ;;  %v1523_v4 = vld [vmem:[%s1846_s10 + $0x30] sm:$0xff]  }
  0x14   : > { %1463 = vmatpush3.bf16.msra.mxu0 %v1462_v23  ;;  %v1520_v1 = vld [vmem:[%s1842_s6 + $0x20] sm:$0xff]   ;;  %v1524_v5 = vld [vmem:[%s1842_s6 + $0x30] sm:$0xff]   ;;  %v1525_v6 = vld [vmem:[%s1846_s10 + $0x38] sm:$0xff]  }
  0x15   : > { %1464 = vmatprep.subr.bf16.mxu0 %v1543_v3  ;;  %v1526_v7 = vld [vmem:[%s1842_s6 + $0x38] sm:$0xff]   ;;  %v1527_v8 = vld [vmem:[%s1725_s21] sm:$0xff]   ;;  %v1528_v9 = vld [vmem:[%s1725_s21 + $0x8] sm:$0xff]  }
  0x16   : > { %1487 = vmatpush3.bf16.msra.mxu1 %v1486_v32  ;;  %v1529_v10 = vld [vmem:[%s1725_s21 + $0x10] sm:$0xff]   ;;  %v1530_v11 = vld [vmem:[%s1725_s21 + $0x18] sm:$0xff]   ;;  %v581_v12 = vld [vmem:[%s1841_s5] sm:$0x1] }
  0x17   : > { %1488 = vmatprep.subr.bf16.mxu1 %v1543_v3  ;;  %v659_v27 = vld [vmem:[%s461_s18] sm:$0xf]  ;;  %v660_v28 = vld [vmem:[%s461_s18 + $0x4] sm:$0xf]  ;;  %v662_v30 = vld [vmem:[%s461_s18 + $0xc] sm:$0xf] }
  0x18   : > { %1466 = vmatpush3.bf16.msra.mxu0 %v1465_v29  ;;  %v661_v29 = vld [vmem:[%s461_s18 + $0x8] sm:$0xf]  ;;  %v663_v31 = vld [vmem:[%s461_s18 + $0x10] sm:$0xf]  ;;  %v664_v33 = vld [vmem:[%s461_s18 + $0x14] sm:$0xf] }
  0x19   : > { %1467 = vmatprep.subr.bf16.mxu0 %v1543_v3  ;;  %v665_v34 = vld [vmem:[%s461_s18 + $0x18] sm:$0xf] }
  0x1a   : > { %1490 = vmatpush3.bf16.msra.mxu1 %v1489_v38 }
  0x1b   : > { %1491 = vmatprep.subr.bf16.mxu1 %v1543_v3 }
  0x1c   : > { %1469 = vmatpush3.bf16.msra.mxu0 %v1468_v35  ;;  %v666_v35 = vld [vmem:[%s461_s18 + $0x1c] sm:$0xf] }
  0x1d   : > { %1470 = vmatprep.subr.bf16.mxu0 %v1543_v3 }
  0x1e   : > { %1493 = vmatpush3.bf16.msra.mxu1 %v1492_v42 }
  0x1f   : > { %1494 = vmatprep.subr.bf16.mxu1 %v1543_v3 }
  0x20   : > { %1472 = vmatpush3.bf16.msra.mxu0 %v1471_v39 }
  0x21   : > { %1473 = vmatprep.subr.bf16.mxu0 %v1543_v3 }
  0x22   : > { %1496 = vmatpush3.bf16.msra.mxu1 %v1495_v46 }
  0x23   : > { %1497 = vmatprep.subr.bf16.mxu1 %v1543_v3  ;;  %v1522_v3 = vld [vmem:[%s1842_s6 + $0x28] sm:$0xff]  }
  0x24   : > { %1475 = vmatpush3.bf16.msra.mxu0 %v1474_v45 }
  0x25   : > { %1404 = vmatprep.subr.bf16.mxu0 %v1512_v57 }
  0x26   : > { %1499 = vmatpush3.bf16.msra.mxu1 %v1498_v50 }
  0x27   : > { %1367 = vmatmul.mubr.f32.vlgmr.msra.gmra.mrb[0].mxu0 %v476_v47  ;;  %1428 = vmatprep.subr.bf16.mxu1 %v1511_v56 }
  0x28   : > { %1405 = vmatpush3.bf16.msra.mxu0 %v1512_v57 }
  0x29   : > { %1406 = vmatprep.subr.bf16.mxu0 %v1514_v59 }
  0x2c   : > { %1407 = vmatpush3.bf16.msra.mxu0 %v1514_v59 }
  0x2d   : > { %1408 = vmatprep.subr.bf16.mxu0 %v1516_v61 }
  0x30   : > { %1409 = vmatpush3.bf16.msra.mxu0 %v1516_v61 }
  0x31   : > { %1410 = vmatprep.subr.bf16.mxu0 %v1518_v63 }
  0x34   : > { %1411 = vmatpush3.bf16.msra.mxu0 %v1518_v63 }
  0x35   : > { %1412 = vmatprep.subr.bf16.mxu0 %v1520_v1 }
  0x38   : > { %1413 = vmatpush3.bf16.msra.mxu0 %v1520_v1 }
  0x39   : > { %1414 = vmatprep.subr.bf16.mxu0 %v1522_v3 }
  0x3c   : > { %1415 = vmatpush3.bf16.msra.mxu0 %v1522_v3 }
  0x3d   : > { %1416 = vmatprep.subr.bf16.mxu0 %v1524_v5 }
  0x40   : > { %1417 = vmatpush3.bf16.msra.mxu0 %v1524_v5 }
  0x41   : > { %1418 = vmatprep.subr.bf16.mxu0 %v1526_v7 }
  0x44   : > { %1419 = vmatpush3.bf16.msra.mxu0 %v1526_v7 }
  0xfa   : > { %v560_v52 = vpop.f32.mrb[0].mxu0 }
  0xfb   : > { %v561_v53 = vadd.f32 %v560_v52, %v493_v51  ;;  %v1368_v54 = vpop.f32.mrb[1].mxu0 }
  0xfd   : > { %v564_v55 = vmax.f32 %v561_v53, 0.0 }
  0xff   : > { %1402 = vmatmul.mubr.f32.vlgmr.msra.gmra.mrb[0].mxu1 %v564_v55 }
 0x100   : > { %1429 = vmatpush3.bf16.msra.mxu1 %v1511_v56  ;;  %1444 = vmatprep.mubr.bf16.mxu1 %v1527_v8  ;;  %v1230_v56 = vld [vmem:[%s1847_s11] ss:$0 sm:$0xff] }
 0x101   : > { %1430 = vmatprep.subr.bf16.mxu1 %v1513_v58 }
 0x104   : > { %1431 = vmatpush3.bf16.msra.mxu1 %v1513_v58  ;;  %v1231_v58 = vld [vmem:[%s1848_s12] ss:$0 sm:$0xff] }
 0x105   : > { %1432 = vmatprep.subr.bf16.mxu1 %v1515_v60 }
 0x108   : > { %1433 = vmatpush3.bf16.msra.mxu1 %v1515_v60  ;;  %v1216_v60 = vld [vmem:[%s1843_s7] ss:$0 sm:$0xff] }
 0x109   : > { %1434 = vmatprep.subr.bf16.mxu1 %v1517_v62 }
 0x10c   : > { %1435 = vmatpush3.bf16.msra.mxu1 %v1517_v62  ;;  %v1217_v62 = vld [vmem:[%s1844_s8] ss:$0 sm:$0xff] }
 0x10d   : > { %1436 = vmatprep.subr.bf16.mxu1 %v1519_v0 }
 0x110   : > { %1437 = vmatpush3.bf16.msra.mxu1 %v1519_v0 }
 0x111   : > { %1438 = vmatprep.subr.bf16.mxu1 %v1521_v2 }
 0x114   : > { %1439 = vmatpush3.bf16.msra.mxu1 %v1521_v2 }
 0x115   : > { %1440 = vmatprep.subr.bf16.mxu1 %v1523_v4 }
 0x118   : > { %1441 = vmatpush3.bf16.msra.mxu1 %v1523_v4 }
 0x119   : > { %1442 = vmatprep.subr.bf16.mxu1 %v1525_v6 }
 0x11c   : > { %1443 = vmatpush3.bf16.msra.mxu1 %v1525_v6 }
 0x11f   : > { %1445 = vmatmul.mubr.bf16.vlgmr.msra.gmra.mrb[4].mxu1 %v1528_v9 }
 0x120   : > { %1448 = vmatprep.mubr.bf16.mxu1 %v1529_v10 }
 0x127   : > { %1449 = vmatmul.mubr.bf16.gmra.mrb[8].mxu1 %v1530_v11 }
 0x1d2   : > { %v648_v13 = vpop.f32.mrb[0].mxu1 }
 0x1d3   : > { %v649_v14 = vadd.f32 %v648_v13, %v581_v12  ;;  %v1403_v15 = vpop.f32.mrb[1].mxu1 }
 0x1d5   : > { %v652_v16 = vsub.f32 0.0, %v649_v14 }
 0x1d7   : > { %v653_v17 = vmul.f32 1.442695, %v652_v16 }
 0x1d9   : > { %1531 = vpow2.f32 %v653_v17 }
 0x1e3   : > { %v1532_v18 = vpop.eup %1531 }
 0x1e4   : > { %v655_v19 = vadd.f32 1.0, %v1532_v18 }
 0x1e6   : > { %1533 = vrcp.f32 %v655_v19 }
 0x1f0   : > { %v1534_v22 = vpop.eup %1533 }
 0x1f1   : > { %v658_v23 = vpack.c.bf16 %v1534_v22, %v1534_v22 }
 0x1f2   : > { %v1446_v48 = vpop.f32.mrb[4].mxu1 }
 0x1f3   : > { %v668_v25 = vpack.i.b16 %v658_v23, %v658_v23  ;;  %v999_v49 = vpop.f32.mrb[5].mxu1  ;;  %v1039_v57 = vmul.f32 %v1446_v48, %v1230_v56 }
 0x1f4   : > { %v1447_v50 = vpop.f32.mrb[6].mxu1  ;;  %v1037_v59 = vmul.f32 %v1230_v56, %v999_v49 }
 0x1f5   : > { %v673_v26 = vrot.slane %v668_v25, %v672_v24  ;;  %v1002_v51 = vpop.f32.mrb[7].mxu1  ;;  %v1054_v63 = vadd.f32 %v1231_v58, %v1039_v57  ;;  %v1040_v0 = vmul.f32 %v1447_v50, %v1230_v56 }
 0x1f6   : > { %v1052_v3 = vadd.f32 %v1231_v58, %v1037_v59  ;;  %v1038_v4 = vmul.f32 %v1230_v56, %v1002_v51 }
 0x1f7   : > { %v1203_v32 = vcombine.low %v673_v26, %v673_v26  ;;  %v1055_v12 = vadd.f32 %v1231_v58, %v1040_v0 }
 0x1f8   : > { %v1053_v16 = vadd.f32 %v1231_v58, %v1038_v4 }
 0x1f9   : > { %v678_v36 = vmul.bf16 %v1203_v32, %v659_v27  ;;  %v679_v37 = vmul.bf16 %v1203_v32, %v660_v28  ;;  %v680_v38 = vmul.bf16 %v1203_v32, %v661_v29  ;;  %v681_v39 = vmul.bf16 %v1203_v32, %v662_v30 }
 0x1fa   : > { %v682_v40 = vmul.bf16 %v1203_v32, %v663_v31  ;;  %v683_v41 = vmul.bf16 %v1203_v32, %v664_v33  ;;  %v684_v42 = vmul.bf16 %v1203_v32, %v665_v34  ;;  %v685_v43 = vmul.bf16 %v1203_v32, %v666_v35  ;;  %v1450_v52 = vpop.f32.mrb[8].mxu1 }
 0x1fb   : > { %v1204_v44 = vcombine.low %v678_v36, %v679_v37  ;;  %v1205_v45 = vcombine.low %v680_v38, %v681_v39  ;;  %v1015_v53 = vpop.f32.mrb[9].mxu1  ;;  %v1043_v15 = vmul.f32 %v1450_v52, %v1230_v56 }
 0x1fc   : > { %v1206_v46 = vcombine.low %v682_v40, %v683_v41  ;;  %v1207_v47 = vcombine.low %v684_v42, %v685_v43  ;;  %v1451_v54 = vpop.f32.mrb[10].mxu1  ;;  %v1041_v19 = vmul.f32 %v1230_v56, %v1015_v53 }
 0x1fd   : > { %1420 = vmatprep.mubr.bf16.mxu0 %v1204_v44  ;;  %v1018_v55 = vpop.f32.mrb[11].mxu1  ;;  %v1044_v22 = vmul.f32 %v1451_v54, %v1230_v56  ;;  %v1058_v27 = vadd.f32 %v1231_v58, %v1043_v15 }
 0x1fe   : > { %1421 = vmatmul.mubr.bf16.vlgmr.msra.gmra.mrb[4].mxu0 %v1205_v45  ;;  %v1042_v24 = vmul.f32 %v1230_v56, %v1018_v55  ;;  %v1056_v32 = vadd.f32 %v1231_v58, %v1041_v19 }
 0x1ff   : > { %1424 = vmatprep.mubr.bf16.mxu0 %v1206_v46  ;;  %v1059_v42 = vadd.f32 %v1231_v58, %v1044_v22 }
 0x200   : > { %v1057_v45 = vadd.f32 %v1231_v58, %v1042_v24 }
 0x206   : > { %1425 = vmatmul.mubr.bf16.gmra.mrb[8].mxu0 %v1207_v47 }
 0x2d1   : > { %v1422_v61 = vpop.f32.mrb[4].mxu0 }
 0x2d2   : > { %v848_v1 = vmul.f32 %v1422_v61, %v1216_v60  ;;  %v808_v2 = vpop.f32.mrb[5].mxu0 }
 0x2d3   : > { %v846_v5 = vmul.f32 %v1216_v60, %v808_v2  ;;  %v1423_v6 = vpop.f32.mrb[6].mxu0 }
 0x2d4   : > { %v863_v7 = vadd.f32 %v1217_v62, %v848_v1  ;;  %v849_v8 = vmul.f32 %v1423_v6, %v1216_v60  ;;  %v811_v9 = vpop.f32.mrb[7].mxu0 }
 0x2d5   : > { %v861_v10 = vadd.f32 %v1217_v62, %v846_v5  ;;  %v847_v11 = vmul.f32 %v1216_v60, %v811_v9 }
 0x2d6   : > { %v1062_v13 = vadd.f32 %v1054_v63, %v863_v7  ;;  %v864_v14 = vadd.f32 %v1217_v62, %v849_v8 }
 0x2d7   : > { %v1060_v17 = vadd.f32 %v1052_v3, %v861_v10  ;;  %v862_v18 = vadd.f32 %v1217_v62, %v847_v11 }
 0x2d8   : > { %v1063_v20 = vadd.f32 %v1055_v12, %v864_v14  ;;  %v1070_v25 = vmax.f32 %v1062_v13, 0.0 }
 0x2d9   : > { %v1061_v21 = vadd.f32 %v1053_v16, %v862_v18  ;;  %v1426_v23 = vpop.f32.mrb[8].mxu0  ;;  %v1068_v30 = vmax.f32 %v1060_v17, 0.0 }
 0x2da   : > { %v1071_v26 = vmax.f32 %v1063_v20, 0.0  ;;  %v852_v28 = vmul.f32 %v1426_v23, %v1216_v60  ;;  %v824_v29 = vpop.f32.mrb[9].mxu0 }
 0x2db   : > { %v1069_v31 = vmax.f32 %v1061_v21, 0.0  ;;  %v850_v33 = vmul.f32 %v1216_v60, %v824_v29  ;;  %v1427_v34 = vpop.f32.mrb[10].mxu0 }
 0x2dc   : > { %v1261_v35 = vpack.c.bf16 %v1071_v26, %v1070_v25  ;;  %v867_v36 = vadd.f32 %v1217_v62, %v852_v28  ;;  %v853_v37 = vmul.f32 %v1427_v34, %v1216_v60  ;;  %v827_v38 = vpop.f32.mrb[11].mxu0 }
 0x2dd   : > { %v1256_v39 = vpack.c.bf16 %v1069_v31, %v1068_v30  ;;  %v865_v40 = vadd.f32 %v1217_v62, %v850_v33  ;;  %v851_v41 = vmul.f32 %v1216_v60, %v827_v38 }
 0x2de   : > { %1273 = vst [vmem:[%s474_s15 + $0x8] sm:$0xff] %v1261_v35   ;;  %v1066_v43 = vadd.f32 %v1058_v27, %v867_v36  ;;  %v868_v44 = vadd.f32 %v1217_v62, %v853_v37 }
 0x2df   : > { %1257 = vst [vmem:[%s474_s15] sm:$0xff] %v1256_v39   ;;  %v1064_v46 = vadd.f32 %v1056_v32, %v865_v40  ;;  %v866_v47 = vadd.f32 %v1217_v62, %v851_v41 }
 0x2e0   : > { %v1067_v48 = vadd.f32 %v1059_v42, %v868_v44  ;;  %v1074_v50 = vmax.f32 %v1066_v43, 0.0 }
 0x2e1   : > { %v1065_v49 = vadd.f32 %v1057_v45, %v866_v47  ;;  %v1072_v52 = vmax.f32 %v1064_v46, 0.0 }
 0x2e2   : > { %v1075_v51 = vmax.f32 %v1067_v48, 0.0 }
 0x2e3   : > { %v1073_v53 = vmax.f32 %v1065_v49, 0.0 }
 0x2e4   : > { %v1271_v54 = vpack.c.bf16 %v1075_v51, %v1074_v50 }
 0x2e5   : > { %v1266_v55 = vpack.c.bf16 %v1073_v53, %v1072_v52 }
 0x2e6   : > { %1275 = vst [vmem:[%s474_s15 + $0x18] sm:$0xff] %v1271_v54  }
 0x2e7   : > { %1274 = vst [vmem:[%s474_s15 + $0x10] sm:$0xff] %v1266_v55  }
 0x2e8 PF: > { %s23_s25 = sadd.s32 1, %s1541_s25  }
 0x2e9   : > { %p20_p4 = scmp.ge.s32.totalorder %s23_s25, 4  }
 0x2eb   :  { %22 = sbr.rel (!%p20_p4) target bundleno = 1 (0x1), region = 108 }

// kernel: _lambda_.11
= control target key start
LH: loop header
LB: loop body
LE: loop exit
PB: predicated region body
PF: predicated region fallthrough
CT: control target
= control target key end

     0   :  { %s3730_s30 = smov 0   ;;  %s4307_s0 = inlined_call_operand.vmem [shape: bf16[2,16,8,128], index: 0, kind: input, shape index: {}]   ;;  %s4308_s1 = inlined_call_operand.vmem [shape: bf16[2,16,8,128], index: 1, kind: input, shape index: {}]   ;;  %s4309_s2 = inlined_call_operand.vmem [shape: bf16[128,128], index: 2, kind: input, shape index: {}]   ;;  %s4310_s3 = inlined_call_operand.vmem [shape: f32[1,128], index: 3, kind: input, shape index: {}, may-alias: {3,6}]   ;;  %s4311_s4 = inlined_call_operand.vmem [shape: f32[1,128], index: 4, kind: input, shape index: {}, may-alias: {4,7}]   ;;  %s4312_s5 = inlined_call_operand.vmem [shape: bf16[1,9,128,128], index: 5, kind: input, shape index: {}]   ;;  %s4313_s6 = inlined_call_operand.vmem [shape: f32[1,128], index: 6, kind: input, shape index: {}, may-alias: {3,6}]   ;;  %s4314_s7 = inlined_call_operand.vmem [shape: f32[1,128], index: 7, kind: input, shape index: {}, may-alias: {4,7}]   ;;  %s4315_s8 = inlined_call_operand.vmem [shape: bf16[2,64,128], index: 8, kind: output, shape index: {0}]   ;;  %s4316_s9 = inlined_call_operand.vmem [shape: f32[2,1,128], index: 9, kind: output, shape index: {1}]  }
   0x1 LB: > { %s2711_s10 = sadd.s32 4294967295, %s3677_s30   ;;  %p2715_p0 = scmp.ge.s32.totalorder %s3677_s30, 1  ;;  %s3677_s30 = sphi %s3730_s30, %s20_s30  }
   0x2   : > { %p300_p1 = scmp.lt.s32.totalorder %s3677_s30, 3 }
   0x4   : > { %p301_p2 = pnand %p2715_p0, %p300_p1 }
   0x5   : > { %v3575_v0 = vld [vmem:[%s4309_s2] sm:$0xff] (!%p301_p2)   ;;  %p344_p3 = scmp.lt.s32.totalorder (!%p301_p2), %s2711_s10, 1  ;;  %v3576_v1 = vld [vmem:[%s4309_s2 + $0x8] sm:$0xff] (!%p301_p2)   ;;  %v3577_v2 = vld [vmem:[%s4309_s2 + $0x10] sm:$0xff] (!%p301_p2)   ;;  %v3679_v31 = vmov (!%p301_p2), 0.0  }
   0x6   : > { %304 = sbr.rel (%p301_p2) target bundleno = 717 (0x2cd), region = 52  ;;  %3206 = vmatprep.subr.bf16.mxu1 (!%p301_p2), %v3575_v0  ;;  %v3578_v3 = vld [vmem:[%s4309_s2 + $0x18] sm:$0xff] (!%p301_p2)   ;;  %v3579_v5 = vld [vmem:[%s4309_s2 + $0x20] sm:$0xff] (!%p301_p2)   ;;  %v3580_v6 = vld [vmem:[%s4309_s2 + $0x28] sm:$0xff] (!%p301_p2)   ;;  %859 = vst [vmem:[#allocation2] sm:$0xff] (!%p301_p2), %v3679_v31 }
   0x7   : > { %3207 = vmatpush3.bf16.msra.mxu1 (!%p301_p2), %v3575_v0  ;;  %v3581_v7 = vld [vmem:[%s4309_s2 + $0x30] sm:$0xff] (!%p301_p2)   ;;  %v3582_v8 = vld [vmem:[%s4309_s2 + $0x38] sm:$0xff] (!%p301_p2)   ;;  %v3599_v17 = vld [vmem:[%s4312_s5 + $0x40] sm:$0xff] (!%p301_p2)   ;;  %860 = vst [vmem:[#allocation2 + $0x8] sm:$0x1] (!%p301_p2), %v3679_v31 }
   0x8   : > { %3208 = vmatprep.subr.bf16.mxu1 (!%p301_p2), %v3576_v1  ;;  %v3600_v20 = vld [vmem:[%s4312_s5 + $0x48] sm:$0xff] (!%p301_p2)   ;;  %v3601_v21 = vld [vmem:[%s4312_s5 + $0x50] sm:$0xff] (!%p301_p2)   ;;  %v3602_v27 = vld [vmem:[%s4312_s5 + $0x58] sm:$0xff] (!%p301_p2)   ;;  %861 = vst [vmem:[#allocation2 + $0x10] sm:$0xff] (!%p301_p2), %v3679_v31 }
   0x9   : > { %v3603_v28 = vld [vmem:[%s4312_s5 + $0x60] sm:$0xff] (!%p301_p2)   ;;  %v3604_v29 = vld [vmem:[%s4312_s5 + $0x68] sm:$0xff] (!%p301_p2)   ;;  %v3605_v30 = vld [vmem:[%s4312_s5 + $0x70] sm:$0xff] (!%p301_p2)   ;;  %863 = vst [vmem:[#allocation2 + $0x20] sm:$0xff] (!%p301_p2), %v3679_v31 }
   0xa   : > { %865 = vst [vmem:[#allocation2 + $0x30] sm:$0xff] (!%p301_p2), %v3679_v31  ;;  %867 = vst [vmem:[#allocation2 + $0x40] sm:$0xff] (!%p301_p2), %v3679_v31  ;;  %v3606_v32 = vld [vmem:[%s4312_s5 + $0x78] sm:$0xff] (!%p301_p2)   ;;  %v3607_v33 = vld [vmem:[%s4312_s5 + $0xc0] sm:$0xff] (!%p301_p2)  }
   0xb   : > { %3209 = vmatpush3.bf16.msra.mxu1 (!%p301_p2), %v3576_v1  ;;  %869 = vst [vmem:[#allocation2 + $0x50] sm:$0xff] (!%p301_p2), %v3679_v31  ;;  %871 = vst [vmem:[#allocation2 + $0x60] sm:$0xff] (!%p301_p2), %v3679_v31  ;;  %3342 = vmatprep.subr.bf16.mxu0 (!%p301_p2), %v3607_v33  ;;  %v3839_v34 = vld [vmem:[%s4312_s5] sm:$0xff] (!%p301_p2)   ;;  %v3609_v35 = vld [vmem:[%s4312_s5 + $0xc8] sm:$0xff] (!%p301_p2)  }
   0xc   : > { %3210 = vmatprep.subr.bf16.mxu1 (!%p301_p2), %v3577_v2  ;;  %873 = vst [vmem:[#allocation2 + $0x70] sm:$0xff] (!%p301_p2), %v3679_v31  ;;  %875 = vst [vmem:[#allocation2 + $0x80] sm:$0xff] (!%p301_p2), %v3679_v31  ;;  %3343 = vmatpush3.bf16.msra.mxu0 (!%p301_p2), %v3607_v33  ;;  %v3611_v36 = vld [vmem:[%s4312_s5 + $0xd0] sm:$0xff] (!%p301_p2)   ;;  %v3613_v37 = vld [vmem:[%s4312_s5 + $0xd8] sm:$0xff] (!%p301_p2)  }
   0xd   : > { %s4318_s10 = smov (!%p344_p3, %s2711_s10), 1  ;;  %877 = vst [vmem:[#allocation2 + $0x90] sm:$0xff] %v3679_v31  ;;  %879 = vst [vmem:[#allocation2 + $0xa0] sm:$0xff] %v3679_v31  ;;  %3344 = vmatprep.subr.bf16.mxu0 %v3609_v35  ;;  %v3615_v38 = vld [vmem:[%s4312_s5 + $0xe0] sm:$0xff]   ;;  %v3617_v39 = vld [vmem:[%s4312_s5 + $0xe8] sm:$0xff]  }
   0xe   : > { %s2996_s17 = sshll.u32 %s4318_s10, 6  ;;  %881 = vst [vmem:[#allocation2 + $0xb0] sm:$0xff] %v3679_v31  ;;  %883 = vst [vmem:[#allocation2 + $0xc0] sm:$0xff] %v3679_v31  ;;  %v3619_v40 = vld [vmem:[%s4312_s5 + $0xf0] sm:$0xff]   ;;  %v3621_v41 = vld [vmem:[%s4312_s5 + $0xf8] sm:$0xff]   ;;  %s2998_s15 = sshll.u32 %s4318_s10, 5 }
   0xf   : > { %s3753_s20 = scalar_lea.vmem %s4307_s0, %s2996_s17  ;;  %3211 = vmatpush3.bf16.msra.mxu1 %v3577_v2  ;;  %s3765_s27 = scalar_lea.vmem %s4308_s1, %s2996_s17  ;;  %885 = vst [vmem:[#allocation2 + $0xd0] sm:$0xff] %v3679_v31  ;;  %887 = vst [vmem:[#allocation2 + $0xe0] sm:$0xff] %v3679_v31  ;;  %v3866_v42 = vld [vmem:[%s4312_s5 + $0x100] sm:$0xff]  }
  0x10   : > { %v3583_v4 = vld [vmem:[%s3753_s20] sm:$0xff]   ;;  %3212 = vmatprep.subr.bf16.mxu1 %v3578_v3  ;;  %v3584_v9 = vld [vmem:[%s3753_s20 + $0x8] sm:$0xff]   ;;  %v3585_v10 = vld [vmem:[%s3753_s20 + $0x10] sm:$0xff]   ;;  %889 = vst [vmem:[#allocation2 + $0xf0] sm:$0xff] %v3679_v31  ;;  %3345 = vmatpush3.bf16.msra.mxu0 %v3609_v35  ;;  %s358_s18 = scalar_lea.vmem %s4315_s8, %s2998_s15  ;;  %s361_s21 = scalar_lea.vmem %s4316_s9, %s4318_s10 }
  0x11   : > { %3222 = vmatprep.mubr.bf16.mxu1 %v3583_v4  ;;  %v3586_v11 = vld [vmem:[%s3753_s20 + $0x18] sm:$0xff]   ;;  %v3587_v12 = vld [vmem:[%s3753_s20 + $0x20] sm:$0xff]   ;;  %v3588_v13 = vld [vmem:[%s3753_s20 + $0x28] sm:$0xff]   ;;  %891 = vst [vmem:[#allocation2 + $0x100] sm:$0xff] %v3679_v31  ;;  %3346 = vmatprep.subr.bf16.mxu0 %v3611_v36 }
  0x12   : > { %v3589_v14 = vld [vmem:[%s3753_s20 + $0x30] sm:$0xff]   ;;  %v3590_v15 = vld [vmem:[%s3753_s20 + $0x38] sm:$0xff]   ;;  %v3591_v16 = vld [vmem:[%s3765_s27] sm:$0xff]  }
  0x13   : > { %3213 = vmatpush3.bf16.msra.mxu1 %v3578_v3  ;;  %v3592_v18 = vld [vmem:[%s3765_s27 + $0x8] sm:$0xff]   ;;  %v3593_v19 = vld [vmem:[%s3765_s27 + $0x10] sm:$0xff]   ;;  %v3594_v22 = vld [vmem:[%s3765_s27 + $0x18] sm:$0xff]  }
  0x14   : > { %3214 = vmatprep.subr.bf16.mxu1 %v3579_v5  ;;  %v3595_v23 = vld [vmem:[%s3765_s27 + $0x20] sm:$0xff]   ;;  %v3596_v24 = vld [vmem:[%s3765_s27 + $0x28] sm:$0xff]   ;;  %v3597_v25 = vld [vmem:[%s3765_s27 + $0x30] sm:$0xff]   ;;  %3347 = vmatpush3.bf16.msra.mxu0 %v3611_v36 }
  0x15   : > { %v3598_v26 = vld [vmem:[%s3765_s27 + $0x38] sm:$0xff]   ;;  %3348 = vmatprep.subr.bf16.mxu0 %v3613_v37  ;;  %v3872_v43 = vld [vmem:[%s4310_s3] ss:$0 sm:$0xff]  ;;  %v3612_v36 = vld [vmem:[%s4312_s5 + $0x10] sm:$0xff]  }
  0x16   : > { %v3877_v45 = vld [vmem:[%s4311_s4] ss:$0 sm:$0xff] }
  0x17   : > { %3215 = vmatpush3.bf16.msra.mxu1 %v3579_v5 }
  0x18   : > { %3216 = vmatprep.subr.bf16.mxu1 %v3580_v6  ;;  %3349 = vmatpush3.bf16.msra.mxu0 %v3613_v37 }
  0x19   : > { %3350 = vmatprep.subr.bf16.mxu0 %v3615_v38 }
  0x1b   : > { %3217 = vmatpush3.bf16.msra.mxu1 %v3580_v6 }
  0x1c   : > { %3218 = vmatprep.subr.bf16.mxu1 %v3581_v7  ;;  %3351 = vmatpush3.bf16.msra.mxu0 %v3615_v38 }
  0x1d   : > { %3352 = vmatprep.subr.bf16.mxu0 %v3617_v39 }
  0x1f   : > { %3219 = vmatpush3.bf16.msra.mxu1 %v3581_v7 }
  0x20   : > { %3220 = vmatprep.subr.bf16.mxu1 %v3582_v8  ;;  %3353 = vmatpush3.bf16.msra.mxu0 %v3617_v39 }
  0x21   : > { %3354 = vmatprep.subr.bf16.mxu0 %v3619_v40 }
  0x23   : > { %3221 = vmatpush3.bf16.msra.mxu1 %v3582_v8 }
  0x24   : > { %3238 = vmatprep.subr.bf16.mxu1 %v3575_v0  ;;  %3355 = vmatpush3.bf16.msra.mxu0 %v3619_v40 }
  0x25   : > { %3356 = vmatprep.subr.bf16.mxu0 %v3621_v41 }
  0x26   : > { %3223 = vmatmul.mubr.bf16.vlgmr.msra.gmra.mrb[0].mxu1 %v3584_v9 }
  0x27   : > { %3239 = vmatpush3.bf16.msra.mxu1 %v3575_v0  ;;  %3226 = vmatprep.mubr.bf16.mxu1 %v3585_v10 }
  0x28   : > { %3240 = vmatprep.subr.bf16.mxu1 %v3576_v1  ;;  %3357 = vmatpush3.bf16.msra.mxu0 %v3621_v41 }
  0x29   : > { %3366 = vmatprep.subr.bf16.mxu0 %v3866_v42 }
  0x2b   : > { %3241 = vmatpush3.bf16.msra.mxu1 %v3576_v1 }
  0x2c   : > { %3242 = vmatprep.subr.bf16.mxu1 %v3577_v2 }
  0x2e   : > { %3227 = vmatmul.mubr.bf16.gmra.mrb[4].mxu1 %v3586_v11 }
  0x2f   : > { %3243 = vmatpush3.bf16.msra.mxu1 %v3577_v2  ;;  %3230 = vmatprep.mubr.bf16.mxu1 %v3587_v12 }
  0x30   : > { %3244 = vmatprep.subr.bf16.mxu1 %v3578_v3 }
  0x33   : > { %3245 = vmatpush3.bf16.msra.mxu1 %v3578_v3 }
  0x34   : > { %3246 = vmatprep.subr.bf16.mxu1 %v3579_v5 }
  0x36   : > { %3231 = vmatmul.mubr.bf16.gmra.mrb[8].mxu1 %v3588_v13 }
  0x37   : > { %3247 = vmatpush3.bf16.msra.mxu1 %v3579_v5  ;;  %3234 = vmatprep.mubr.bf16.mxu1 %v3589_v14 }
  0x38   : > { %3248 = vmatprep.subr.bf16.mxu1 %v3580_v6 }
  0x3b   : > { %3249 = vmatpush3.bf16.msra.mxu1 %v3580_v6 }
  0x3c   : > { %3250 = vmatprep.subr.bf16.mxu1 %v3581_v7 }
  0x3e   : > { %3235 = vmatmul.mubr.bf16.gmra.mrb[12].mxu1 %v3590_v15 }
  0x3f   : > { %3251 = vmatpush3.bf16.msra.mxu1 %v3581_v7  ;;  %3254 = vmatprep.mubr.bf16.mxu1 %v3591_v16 }
  0x40   : > { %3252 = vmatprep.subr.bf16.mxu1 %v3582_v8 }
  0x43   : > { %3253 = vmatpush3.bf16.msra.mxu1 %v3582_v8 }
  0x44   : > { %3270 = vmatprep.subr.bf16.mxu1 %v3599_v17 }
  0x46   : > { %3255 = vmatmul.mubr.bf16.vlgmr.msra.gmra.mrb[16].mxu1 %v3592_v18 }
  0x47   : > { %3258 = vmatprep.mubr.bf16.mxu1 %v3593_v19  ;;  %3271 = vmatpush3.bf16.msra.mxu1 %v3599_v17 }
  0x48   : > { %3272 = vmatprep.subr.bf16.mxu1 %v3600_v20 }
  0x4b   : > { %3273 = vmatpush3.bf16.msra.mxu1 %v3600_v20 }
  0x4c   : > { %3274 = vmatprep.subr.bf16.mxu1 %v3601_v21 }
  0x4e   : > { %3259 = vmatmul.mubr.bf16.gmra.mrb[20].mxu1 %v3594_v22 }
  0x4f   : > { %3262 = vmatprep.mubr.bf16.mxu1 %v3595_v23  ;;  %3275 = vmatpush3.bf16.msra.mxu1 %v3601_v21 }
  0x50   : > { %3276 = vmatprep.subr.bf16.mxu1 %v3602_v27 }
  0x53   : > { %3277 = vmatpush3.bf16.msra.mxu1 %v3602_v27 }
  0x54   : > { %3278 = vmatprep.subr.bf16.mxu1 %v3603_v28 }
  0x56   : > { %3263 = vmatmul.mubr.bf16.gmra.mrb[24].mxu1 %v3596_v24  ;;  %v3610_v24 = vld [vmem:[%s4312_s5 + $0x8] sm:$0xff]  }
  0x57   : > { %3266 = vmatprep.mubr.bf16.mxu1 %v3597_v25  ;;  %3279 = vmatpush3.bf16.msra.mxu1 %v3603_v28 }
  0x58   : > { %3280 = vmatprep.subr.bf16.mxu1 %v3604_v29 }
  0x5b   : > { %3281 = vmatpush3.bf16.msra.mxu1 %v3604_v29 }
  0x5c   : > { %3282 = vmatprep.subr.bf16.mxu1 %v3605_v30 }
  0x5e   : > { %3267 = vmatmul.mubr.bf16.gmra.mrb[28].mxu1 %v3598_v26 }
  0x5f   : > { %3283 = vmatpush3.bf16.msra.mxu1 %v3605_v30 }
  0x60   : > { %3284 = vmatprep.subr.bf16.mxu1 %v3606_v32 }
  0x63   : > { %3285 = vmatpush3.bf16.msra.mxu1 %v3606_v32 }
  0x64   : > { %3294 = vmatprep.subr.bf16.mxu1 %v3839_v34 }
  0xf9   : > { %v3224_v44 = vpop.f32.mrb[0].mxu1 }
  0xfa   : > { %v597_v46 = vmul.f32 %v3224_v44, %v3872_v43  ;;  %v525_v47 = vpop.f32.mrb[1].mxu1 }
  0xfb   : > { %v595_v48 = vmul.f32 %v3872_v43, %v525_v47  ;;  %v3225_v49 = vpop.f32.mrb[2].mxu1 }
  0xfc   : > { %v620_v50 = vadd.f32 %v3877_v45, %v597_v46  ;;  %v598_v51 = vmul.f32 %v3225_v49, %v3872_v43  ;;  %v528_v52 = vpop.f32.mrb[3].mxu1 }
  0xfd   : > { %v618_v53 = vadd.f32 %v3877_v45, %v595_v48  ;;  %v596_v54 = vmul.f32 %v3872_v43, %v528_v52  ;;  %v3614_v48 = vld [vmem:[%s4312_s5 + $0x18] sm:$0xff]  }
  0xfe   : > { %v636_v55 = vmax.f32 %v620_v50, 0.0  ;;  %v621_v56 = vadd.f32 %v3877_v45, %v598_v51 }
  0xff   : > { %v634_v57 = vmax.f32 %v618_v53, 0.0  ;;  %v619_v58 = vadd.f32 %v3877_v45, %v596_v54 }
 0x100   : > { %v637_v59 = vmax.f32 %v621_v56, 0.0 }
 0x101   : > { %v635_v60 = vmax.f32 %v619_v58, 0.0  ;;  %v3228_v61 = vpop.f32.mrb[4].mxu1  ;;  %v3887_v62 = vpack.c.bf16 %v636_v55, %v634_v57 }
 0x102   : > { %v601_v63 = vmul.f32 %v3228_v61, %v3872_v43  ;;  %v541_v0 = vpop.f32.mrb[5].mxu1 }
 0x103   : > { %v599_v1 = vmul.f32 %v3872_v43, %v541_v0  ;;  %v3229_v2 = vpop.f32.mrb[6].mxu1  ;;  %v2999_v3 = vpack.c.bf16 %v635_v60, %v3679_v31  ;;  %v3892_v4 = vpack.c.bf16 %v637_v59, %v635_v60 }
 0x104   : > { %v624_v5 = vadd.f32 %v3877_v45, %v601_v63  ;;  %v602_v6 = vmul.f32 %v3229_v2, %v3872_v43  ;;  %v544_v7 = vpop.f32.mrb[7].mxu1 }
 0x105   : > { %v622_v8 = vadd.f32 %v3877_v45, %v599_v1  ;;  %v600_v9 = vmul.f32 %v3872_v43, %v544_v7  ;;  %3286 = vmatprep.mubr.bf16.mxu1 %v2999_v3  ;;  %v3618_v7 = vld [vmem:[%s4312_s5 + $0x28] sm:$0xff]  }
 0x106   : > { %v640_v10 = vmax.f32 %v624_v5, 0.0  ;;  %v625_v11 = vadd.f32 %v3877_v45, %v602_v6 }
 0x107   : > { %v638_v12 = vmax.f32 %v622_v8, 0.0  ;;  %v623_v13 = vadd.f32 %v3877_v45, %v600_v9 }
 0x108   : > { %v641_v14 = vmax.f32 %v625_v11, 0.0 }
 0x109   : > { %v3900_v15 = vpack.c.bf16 %v640_v10, %v638_v12  ;;  %v639_v16 = vmax.f32 %v623_v13, 0.0  ;;  %v3232_v17 = vpop.f32.mrb[8].mxu1 }
 0x10a   : > { %v605_v18 = vmul.f32 %v3232_v17, %v3872_v43  ;;  %v557_v19 = vpop.f32.mrb[9].mxu1 }
 0x10b   : > { %v3000_v20 = vpack.c.bf16 %v639_v16, %v637_v59  ;;  %v3903_v21 = vpack.c.bf16 %v641_v14, %v639_v16  ;;  %v603_v22 = vmul.f32 %v3872_v43, %v557_v19  ;;  %v3233_v23 = vpop.f32.mrb[10].mxu1  ;;  %v3616_v59 = vld [vmem:[%s4312_s5 + $0x20] sm:$0xff]   ;;  %v3620_v19 = vld [vmem:[%s4312_s5 + $0x30] sm:$0xff]  }
 0x10c   : > { %v628_v25 = vadd.f32 %v3877_v45, %v605_v18  ;;  %v606_v26 = vmul.f32 %v3233_v23, %v3872_v43  ;;  %v560_v27 = vpop.f32.mrb[11].mxu1 }
 0x10d   : > { %v626_v28 = vadd.f32 %v3877_v45, %v603_v22  ;;  %v604_v29 = vmul.f32 %v3872_v43, %v560_v27  ;;  %3287 = vmatmul.mubr.bf16.vlgmr.msra.gmra.mrb[32].mxu1 %v3000_v20 }
 0x10e   : > { %v644_v30 = vmax.f32 %v628_v25, 0.0  ;;  %v629_v32 = vadd.f32 %v3877_v45, %v606_v26  ;;  %3295 = vmatpush3.bf16.msra.mxu1 %v3839_v34 }
 0x10f   : > { %v642_v33 = vmax.f32 %v626_v28, 0.0  ;;  %v627_v35 = vadd.f32 %v3877_v45, %v604_v29  ;;  %3296 = vmatprep.subr.bf16.mxu1 %v3610_v24  ;;  %v3622_v29 = vld [vmem:[%s4312_s5 + $0x38] sm:$0xff]  }
 0x110   : > { %v645_v37 = vmax.f32 %v629_v32, 0.0 }
 0x111   : > { %v643_v38 = vmax.f32 %v627_v35, 0.0  ;;  %v3236_v39 = vpop.f32.mrb[12].mxu1  ;;  %v3919_v40 = vpack.c.bf16 %v644_v30, %v642_v33 }
 0x112   : > { %v609_v41 = vmul.f32 %v3236_v39, %v3872_v43  ;;  %v573_v44 = vpop.f32.mrb[13].mxu1  ;;  %3297 = vmatpush3.bf16.msra.mxu1 %v3610_v24 }
 0x113   : > { %v607_v46 = vmul.f32 %v3872_v43, %v573_v44  ;;  %v3237_v34 = vpop.f32.mrb[14].mxu1  ;;  %v3001_v47 = vpack.c.bf16 %v643_v38, %v641_v14  ;;  %3298 = vmatprep.subr.bf16.mxu1 %v3612_v36  ;;  %v3926_v49 = vpack.c.bf16 %v645_v37, %v643_v38 }
 0x114   : > { %v632_v50 = vadd.f32 %v3877_v45, %v609_v41  ;;  %v610_v51 = vmul.f32 %v3237_v34, %v3872_v43  ;;  %v576_v52 = vpop.f32.mrb[15].mxu1  ;;  %v3979_v34 = vld [vmem:[%s4312_s5 + $0x80] sm:$0xff]  }
 0x115   : > { %v630_v53 = vadd.f32 %v3877_v45, %v607_v46  ;;  %v608_v54 = vmul.f32 %v3872_v43, %v576_v52  ;;  %3290 = vmatprep.mubr.bf16.mxu1 %v3001_v47 }
 0x116   : > { %v648_v55 = vmax.f32 %v632_v50, 0.0  ;;  %v633_v56 = vadd.f32 %v3877_v45, %v610_v51  ;;  %3299 = vmatpush3.bf16.msra.mxu1 %v3612_v36 }
 0x117   : > { %v646_v57 = vmax.f32 %v630_v53, 0.0  ;;  %v631_v58 = vadd.f32 %v3877_v45, %v608_v54  ;;  %3300 = vmatprep.subr.bf16.mxu1 %v3614_v48 }
 0x118   : > { %v649_v60 = vmax.f32 %v633_v56, 0.0 }
 0x119   : > { %v647_v61 = vmax.f32 %v631_v58, 0.0  ;;  %v3256_v63 = vpop.f32.mrb[16].mxu1  ;;  %v3937_v0 = vpack.c.bf16 %v648_v55, %v646_v57 }
 0x11a   : > { %v813_v1 = vmul.f32 %v3256_v63, %v3872_v43  ;;  %v748_v2 = vpop.f32.mrb[17].mxu1  ;;  %3301 = vmatpush3.bf16.msra.mxu1 %v3614_v48 }
 0x11b   : > { %v811_v3 = vmul.f32 %v3872_v43, %v748_v2  ;;  %v3257_v5 = vpop.f32.mrb[18].mxu1  ;;  %v3002_v6 = vpack.c.bf16 %v647_v61, %v645_v37  ;;  %3302 = vmatprep.subr.bf16.mxu1 %v3616_v59  ;;  %v3944_v8 = vpack.c.bf16 %v649_v60, %v647_v61 }
 0x11c   : > { %v829_v9 = vadd.f32 %v3877_v45, %v813_v1  ;;  %v814_v10 = vmul.f32 %v3257_v5, %v3872_v43  ;;  %v751_v11 = vpop.f32.mrb[19].mxu1 }
 0x11d   : > { %v827_v12 = vadd.f32 %v3877_v45, %v811_v3  ;;  %v812_v13 = vmul.f32 %v3872_v43, %v751_v11  ;;  %3291 = vmatmul.mubr.bf16.gmra.mrb[36].mxu1 %v3002_v6 }
 0x11e   : > { %v845_v14 = vmax.f32 %v829_v9, 0.0  ;;  %v830_v16 = vadd.f32 %v3877_v45, %v814_v10  ;;  %3303 = vmatpush3.bf16.msra.mxu1 %v3616_v59 }
 0x11f   : > { %v843_v17 = vmax.f32 %v827_v12, 0.0  ;;  %v828_v18 = vadd.f32 %v3877_v45, %v812_v13  ;;  %3304 = vmatprep.subr.bf16.mxu1 %v3618_v7 }
 0x120   : > { %916 = vst [vmem:[#allocation2 + $0x31] sm:$0xff] %v845_v14  ;;  %v3955_v20 = vmax.f32 %v830_v16, 0.0 }
 0x121   : > { %914 = vst [vmem:[#allocation2 + $0x11] sm:$0xff] %v843_v17  ;;  %v3957_v22 = vmax.f32 %v828_v18, 0.0  ;;  %v3260_v23 = vpop.f32.mrb[20].mxu1  ;;  %v3959_v24 = vpack.c.bf16 %v845_v14, %v843_v17 }
 0x122   : > { %917 = vst [vmem:[#allocation2 + $0x41] sm:$0xff] %v3955_v20  ;;  %v817_v25 = vmul.f32 %v3260_v23, %v3872_v43  ;;  %v764_v26 = vpop.f32.mrb[21].mxu1  ;;  %3305 = vmatpush3.bf16.msra.mxu1 %v3618_v7 }
 0x123   : > { %915 = vst [vmem:[#allocation2 + $0x21] sm:$0xff] %v3957_v22  ;;  %v815_v27 = vmul.f32 %v3872_v43, %v764_v26  ;;  %v3261_v28 = vpop.f32.mrb[22].mxu1  ;;  %3306 = vmatprep.subr.bf16.mxu1 %v3620_v19  ;;  %v3031_v30 = vpack.c.bf16 %v3955_v20, %v3957_v22 }
 0x124   : > { %v833_v32 = vadd.f32 %v3877_v45, %v817_v25  ;;  %v818_v33 = vmul.f32 %v3261_v28, %v3872_v43  ;;  %v767_v35 = vpop.f32.mrb[23].mxu1 }
 0x125   : > { %v831_v36 = vadd.f32 %v3877_v45, %v815_v27  ;;  %v816_v37 = vmul.f32 %v3872_v43, %v767_v35  ;;  %v3626_v35 = vld [vmem:[%s4312_s5 + $0x88] sm:$0xff]  }
 0x126   : > { %v849_v38 = vmax.f32 %v833_v32, 0.0  ;;  %v834_v39 = vadd.f32 %v3877_v45, %v818_v33  ;;  %3307 = vmatpush3.bf16.msra.mxu1 %v3620_v19  ;;  %v3625_v19 = vld [vmem:[%s4312_s5 + $0x108] sm:$0xff]  }
 0x127   : > { %v847_v41 = vmax.f32 %v831_v36, 0.0  ;;  %v832_v44 = vadd.f32 %v3877_v45, %v816_v37  ;;  %v1465_v46 = vld [vmem:[#allocation2 + $0x30] sm:$0xff]  ;;  %3308 = vmatprep.subr.bf16.mxu1 %v3622_v29 }
 0x128   : > { %920 = vst [vmem:[#allocation2 + $0x71] sm:$0xff] %v849_v38  ;;  %v3981_v47 = vmax.f32 %v834_v39, 0.0  ;;  %v1464_v48 = vld [vmem:[#allocation2 + $0x10] sm:$0xff] }
 0x129   : > { %918 = vst [vmem:[#allocation2 + $0x51] sm:$0xff] %v847_v41  ;;  %v3983_v50 = vmax.f32 %v832_v44, 0.0  ;;  %v3264_v51 = vpop.f32.mrb[24].mxu1  ;;  %v3011_v52 = vpack.c.bf16 %v1465_v46, %v1464_v48  ;;  %v3985_v53 = vld [vmem:[#allocation2 + $0x40] sm:$0xff]  ;;  %v3987_v54 = vpack.c.bf16 %v849_v38, %v847_v41 }
 0x12a   : > { %921 = vst [vmem:[#allocation2 + $0x81] sm:$0xff] %v3981_v47  ;;  %v821_v55 = vmul.f32 %v3264_v51, %v3872_v43  ;;  %v780_v56 = vpop.f32.mrb[25].mxu1  ;;  %v3991_v57 = vld [vmem:[#allocation2 + $0x20] sm:$0xff]  ;;  %3309 = vmatpush3.bf16.msra.mxu1 %v3622_v29  ;;  %v3627_v51 = vld [vmem:[%s4312_s5 + $0x110] sm:$0xff]  }
 0x12b   : > { %919 = vst [vmem:[#allocation2 + $0x61] sm:$0xff] %v3983_v50  ;;  %v819_v58 = vmul.f32 %v3872_v43, %v780_v56  ;;  %v3265_v59 = vpop.f32.mrb[26].mxu1  ;;  %3358 = vmatprep.mubr.bf16.mxu0 %v3011_v52  ;;  %v3003_v60 = vpack.c.bf16 %v3991_v57, %v3679_v31  ;;  %3318 = vmatprep.subr.bf16.mxu1 %v3979_v34 }
 0x12c   : > { %v3008_v61 = vpack.c.bf16 %v3983_v50, %v3955_v20  ;;  %v837_v63 = vadd.f32 %v3877_v45, %v821_v55  ;;  %v822_v1 = vmul.f32 %v3265_v59, %v3872_v43  ;;  %v783_v2 = vpop.f32.mrb[27].mxu1  ;;  %v3023_v3 = vpack.c.bf16 %v3985_v53, %v3991_v57  ;;  %v3663_v57 = vld [vmem:[%s4312_s5 + $0x1c0] sm:$0xff]  }
 0x12d   : > { %v3032_v5 = vpack.c.bf16 %v3981_v47, %v3983_v50  ;;  %v835_v6 = vadd.f32 %v3877_v45, %v819_v58  ;;  %v820_v31 = vmul.f32 %v3872_v43, %v783_v2  ;;  %3310 = vmatprep.mubr.bf16.mxu1 %v3003_v60  ;;  %v3628_v58 = vld [vmem:[%s4312_s5 + $0x90] sm:$0xff]  }
 0x12e   : > { %v853_v7 = vmax.f32 %v837_v63, 0.0  ;;  %v838_v9 = vadd.f32 %v3877_v45, %v822_v1 }
 0x12f   : > { %v851_v10 = vmax.f32 %v835_v6, 0.0  ;;  %v836_v11 = vadd.f32 %v3877_v45, %v820_v31  ;;  %v1467_v12 = vld [vmem:[#allocation2 + $0x70] sm:$0xff] }
 0x130   : > { %924 = vst [vmem:[#allocation2 + $0xb1] sm:$0xff] %v853_v7  ;;  %v4010_v13 = vmax.f32 %v838_v9, 0.0  ;;  %v1466_v14 = vld [vmem:[#allocation2 + $0x50] sm:$0xff] }
 0x131   : > { %922 = vst [vmem:[#allocation2 + $0x91] sm:$0xff] %v851_v10  ;;  %v4012_v16 = vmax.f32 %v836_v11, 0.0  ;;  %v3268_v17 = vpop.f32.mrb[28].mxu1  ;;  %v3012_v18 = vpack.c.bf16 %v1467_v12, %v1466_v14  ;;  %v4017_v23 = vld [vmem:[#allocation2 + $0x80] sm:$0xff]  ;;  %v4019_v25 = vpack.c.bf16 %v853_v7, %v851_v10  ;;  %v3630_v7 = vld [vmem:[%s4312_s5 + $0x98] sm:$0xff]  }
 0x132   : > { %925 = vst [vmem:[#allocation2 + $0xc1] sm:$0xff] %v4010_v13  ;;  %v825_v26 = vmul.f32 %v3268_v17, %v3872_v43  ;;  %v796_v27 = vpop.f32.mrb[29].mxu1  ;;  %v4023_v28 = vld [vmem:[#allocation2 + $0x60] sm:$0xff] }
 0x133   : > { %923 = vst [vmem:[#allocation2 + $0xa1] sm:$0xff] %v4012_v16  ;;  %v823_v29 = vmul.f32 %v3872_v43, %v796_v27  ;;  %v3269_v32 = vpop.f32.mrb[30].mxu1  ;;  %3359 = vmatmul.mubr.bf16.vlgmr.msra.gmra.mrb[0].mxu0 %v3012_v18  ;;  %v3004_v33 = vpack.c.bf16 %v4023_v28, %v3985_v53  ;;  %v3009_v36 = vpack.c.bf16 %v4012_v16, %v3981_v47  ;;  %v3631_v12 = vld [vmem:[%s4312_s5 + $0x120] sm:$0xff]   ;;  %v3633_v27 = vld [vmem:[%s4312_s5 + $0x128] sm:$0xff]   ;;  %v3662_v53 = vld [vmem:[%s4312_s5 + $0x1b8] sm:$0xff]  }
 0x134   : > { %v3033_v37 = vpack.c.bf16 %v4010_v13, %v4012_v16  ;;  %v841_v38 = vadd.f32 %v3877_v45, %v825_v26  ;;  %v826_v39 = vmul.f32 %v3269_v32, %v3872_v43  ;;  %3367 = vmatpush3.bf16.msra.mxu0 %v3866_v42  ;;  %v799_v41 = vpop.f32.mrb[31].mxu1  ;;  %v3024_v44 = vpack.c.bf16 %v4017_v23, %v4023_v28  ;;  %v3632_v17 = vld [vmem:[%s4312_s5 + $0xa0] sm:$0xff]   ;;  %v3651_v16 = vld [vmem:[%s4312_s5 + $0x170] sm:$0xff]  }
 0x135   : > { %v839_v46 = vadd.f32 %v3877_v45, %v823_v29  ;;  %v824_v48 = vmul.f32 %v3872_v43, %v799_v41  ;;  %3311 = vmatmul.mubr.bf16.vlgmr.msra.gmra.mrb[32].mxu1 %v3004_v33  ;;  %3368 = vmatprep.subr.bf16.mxu0 %v3625_v19  ;;  %v1286_v26 = vld [vmem:[#allocation2 + $0x1] sm:$0xff]  ;;  %v3638_v41 = vld [vmem:[%s4312_s5 + $0xb8] sm:$0xff]   ;;  %v2984_v47 = vld [vmem:[%s4313_s6] ss:$0 sm:$0xff] }
 0x136   : > { %v857_v52 = vmax.f32 %v841_v38, 0.0  ;;  %v842_v55 = vadd.f32 %v3877_v45, %v826_v39  ;;  %3319 = vmatpush3.bf16.msra.mxu1 %v3979_v34  ;;  %v3629_v34 = vld [vmem:[%s4312_s5 + $0x118] sm:$0xff]   ;;  %v3634_v33 = vld [vmem:[%s4312_s5 + $0xa8] sm:$0xff]   ;;  %v3635_v38 = vld [vmem:[%s4312_s5 + $0x130] sm:$0xff]  }
 0x137   : > { %v855_v42 = vmax.f32 %v839_v46, 0.0  ;;  %v840_v56 = vadd.f32 %v3877_v45, %v824_v48  ;;  %3320 = vmatprep.subr.bf16.mxu1 %v3626_v35  ;;  %v1469_v43 = vld [vmem:[#allocation2 + $0xb0] sm:$0xff]  ;;  %v3639_v46 = vld [vmem:[%s4312_s5 + $0x140] sm:$0xff]  }
 0x138   : > { %928 = vst [vmem:[#allocation2 + $0xf1] sm:$0xff] %v857_v52  ;;  %v858_v59 = vmax.f32 %v842_v55, 0.0  ;;  %3369 = vmatpush3.bf16.msra.mxu0 %v3625_v19  ;;  %v1468_v60 = vld [vmem:[#allocation2 + $0x90] sm:$0xff]  ;;  %v4112_v48 = vld [vmem:[%s4312_s5 + $0x200] sm:$0xff]  }
 0x139   : > { %926 = vst [vmem:[#allocation2 + $0xd1] sm:$0xff] %v855_v42  ;;  %v4052_v63 = vmax.f32 %v840_v56, 0.0  ;;  %3370 = vmatprep.subr.bf16.mxu0 %v3627_v51  ;;  %v3013_v1 = vpack.c.bf16 %v1469_v43, %v1468_v60  ;;  %v4057_v45 = vld [vmem:[#allocation2 + $0xc0] sm:$0xff]  ;;  %v4059_v2 = vpack.c.bf16 %v857_v52, %v855_v42  ;;  %v3636_v39 = vld [vmem:[%s4312_s5 + $0xb0] sm:$0xff]   ;;  %v4122_v52 = vld [vmem:[%s4312_s5 + $0x208] sm:$0xff]  }
 0x13a   : > { %929 = vst [vmem:[#allocation2 + $0x101] sm:$0xff] %v858_v59  ;;  %3321 = vmatpush3.bf16.msra.mxu1 %v3626_v35  ;;  %v4061_v6 = vld [vmem:[#allocation2 + $0xa0] sm:$0xff]  ;;  %v3007_v35 = vpack.c.bf16 %v3957_v22, %v1286_v26  ;;  %v3643_v55 = vld [vmem:[%s4312_s5 + $0x150] sm:$0xff]   ;;  %v3653_v42 = vld [vmem:[%s4312_s5 + $0x178] sm:$0xff]  }
 0x13b   : > { %927 = vst [vmem:[#allocation2 + $0xe1] sm:$0xff] %v4052_v63  ;;  %3322 = vmatprep.subr.bf16.mxu1 %v3628_v58  ;;  %v3005_v31 = vpack.c.bf16 %v4061_v6, %v4017_v23  ;;  %3362 = vmatprep.mubr.bf16.mxu0 %v3013_v1  ;;  %v3010_v9 = vpack.c.bf16 %v4052_v63, %v4010_v13  ;;  %v4177_v13 = vld [vmem:[%s4312_s5 + $0x228] sm:$0xff]   ;;  %v4197_v56 = vld [vmem:[%s4312_s5 + $0x238] sm:$0xff]   ;;  %v3667_v28 = vld [vmem:[%s4312_s5 + $0x1e0] sm:$0xff]  }
 0x13c   : > { %v4072_v10 = vpack.c.bf16 %v858_v59, %v4052_v63  ;;  %3371 = vmatpush3.bf16.msra.mxu0 %v3627_v51  ;;  %v3025_v11 = vpack.c.bf16 %v4057_v45, %v4061_v6  ;;  %v3641_v51 = vld [vmem:[%s4312_s5 + $0x148] sm:$0xff]   ;;  %v3657_v59 = vld [vmem:[%s4312_s5 + $0x190] sm:$0xff]   ;;  %v3658_v60 = vld [vmem:[%s4312_s5 + $0x198] sm:$0xff]  }
 0x13d   : > { %3314 = vmatprep.mubr.bf16.mxu1 %v3005_v31  ;;  %3372 = vmatprep.subr.bf16.mxu0 %v3629_v34  ;;  %v3656_v43 = vld [vmem:[%s4312_s5 + $0x188] sm:$0xff]   ;;  %v3661_v63 = vld [vmem:[%s4312_s5 + $0x1b0] sm:$0xff]   ;;  %v3666_v23 = vld [vmem:[%s4312_s5 + $0x1d8] sm:$0xff]  }
 0x13e   : > { %3323 = vmatpush3.bf16.msra.mxu1 %v3628_v58  ;;  %v3655_v58 = vld [vmem:[%s4312_s5 + $0x180] sm:$0xff]  }
 0x13f   : > { %3324 = vmatprep.subr.bf16.mxu1 %v3630_v7  ;;  %v1471_v14 = vld [vmem:[#allocation2 + $0xf0] sm:$0xff] }
 0x140   : > { %3373 = vmatpush3.bf16.msra.mxu0 %v3629_v34  ;;  %v1470_v18 = vld [vmem:[#allocation2 + $0xd0] sm:$0xff] }
 0x141   : > { %3374 = vmatprep.subr.bf16.mxu0 %v3631_v12  ;;  %v3014_v19 = vpack.c.bf16 %v1471_v14, %v1470_v18  ;;  %v3665_v34 = vld [vmem:[%s4312_s5 + $0x1d0] sm:$0xff]   ;;  %v2006_v1 = vld [vmem:[#allocation2 + $0x100] sm:$0xff] }
 0x142   : > { %3325 = vmatpush3.bf16.msra.mxu1 %v3630_v7  ;;  %v4085_v29 = vld [vmem:[#allocation2 + $0xe0] sm:$0xff] }
 0x143   : > { %3363 = vmatmul.mubr.bf16.gmra.mrb[4].mxu0 %v3014_v19  ;;  %3326 = vmatprep.subr.bf16.mxu1 %v3632_v17  ;;  %v3006_v32 = vpack.c.bf16 %v4085_v29, %v4057_v45  ;;  %v3669_v45 = vld [vmem:[%s4312_s5 + $0x1f0] sm:$0xff]  }
 0x144   : > { %3375 = vmatpush3.bf16.msra.mxu0 %v3631_v12  ;;  %3382 = vmatprep.mubr.bf16.mxu0 %v3887_v62  ;;  %v3637_v62 = vld [vmem:[%s4312_s5 + $0x138] sm:$0xff]  }
 0x145   : > { %3315 = vmatmul.mubr.bf16.gmra.mrb[36].mxu1 %v3006_v32  ;;  %3376 = vmatprep.subr.bf16.mxu0 %v3633_v27 }
 0x146   : > { %3327 = vmatpush3.bf16.msra.mxu1 %v3632_v17  ;;  %3334 = vmatprep.mubr.bf16.mxu1 %v3007_v35  ;;  %v2985_v35 = vld [vmem:[%s4314_s7] ss:$0 sm:$0xff] }
 0x147   : > { %3328 = vmatprep.subr.bf16.mxu1 %v3634_v33 }
 0x148   : > { %3377 = vmatpush3.bf16.msra.mxu0 %v3633_v27 }
 0x149   : > { %3378 = vmatprep.subr.bf16.mxu0 %v3635_v38 }
 0x14a   : > { %3329 = vmatpush3.bf16.msra.mxu1 %v3634_v33 }
 0x14b   : > { %3330 = vmatprep.subr.bf16.mxu1 %v3636_v39 }
 0x14c   : > { %3379 = vmatpush3.bf16.msra.mxu0 %v3635_v38 }
 0x14d   : > { %3380 = vmatprep.subr.bf16.mxu0 %v3637_v62 }
 0x14e   : > { %3331 = vmatpush3.bf16.msra.mxu1 %v3636_v39 }
 0x14f   : > { %3332 = vmatprep.subr.bf16.mxu1 %v3638_v41 }
 0x150   : > { %3381 = vmatpush3.bf16.msra.mxu0 %v3637_v62 }
 0x151   : > { %3390 = vmatprep.subr.bf16.mxu0 %v3639_v46 }
 0x152   : > { %3333 = vmatpush3.bf16.msra.mxu1 %v3638_v41 }
 0x153   : > { %3383 = vmatmul.mubr.bf16.vlgmr.msra.gmra.mrb[0].mxu0 %v3900_v15  ;;  %3486 = vmatprep.subr.bf16.mxu1 %v4112_v48  ;;  %v4139_v15 = vld [vmem:[%s4312_s5 + $0x210] sm:$0xff]  }
 0x154   : > { %3386 = vmatprep.mubr.bf16.mxu0 %v3919_v40  ;;  %3391 = vmatpush3.bf16.msra.mxu0 %v3639_v46  ;;  %v3645_v40 = vld [vmem:[%s4312_s5 + $0x158] sm:$0xff]  }
 0x155   : > { %3335 = vmatmul.mubr.bf16.vlgmr.msra.gmra.mrb[32].mxu1 %v3008_v61  ;;  %3392 = vmatprep.subr.bf16.mxu0 %v3641_v51  ;;  %v4150_v61 = vld [vmem:[%s4312_s5 + $0x218] sm:$0xff]  }
 0x156   : > { %3338 = vmatprep.mubr.bf16.mxu1 %v3009_v36  ;;  %3494 = vmatpush3.bf16.msra.mxu1 %v4112_v48  ;;  %v3647_v36 = vld [vmem:[%s4312_s5 + $0x160] sm:$0xff]  }
 0x157   : > { %3487 = vmatprep.subr.bf16.mxu1 %v4122_v52 }
 0x158   : > { %3393 = vmatpush3.bf16.msra.mxu0 %v3641_v51 }
 0x159   : > { %3394 = vmatprep.subr.bf16.mxu0 %v3643_v55 }
 0x15a   : > { %3495 = vmatpush3.bf16.msra.mxu1 %v4122_v52 }
 0x15b   : > { %3387 = vmatmul.mubr.bf16.gmra.mrb[4].mxu0 %v3937_v0  ;;  %3488 = vmatprep.subr.bf16.mxu1 %v4139_v15  ;;  %v4167_v0 = vld [vmem:[%s4312_s5 + $0x220] sm:$0xff]  }
 0x15c   : > { %3395 = vmatpush3.bf16.msra.mxu0 %v3643_v55  ;;  %3406 = vmatprep.mubr.bf16.mxu0 %v3959_v24  ;;  %v3649_v24 = vld [vmem:[%s4312_s5 + $0x168] sm:$0xff]  }
 0x15d   : > { %3339 = vmatmul.mubr.bf16.gmra.mrb[36].mxu1 %v3010_v9  ;;  %3396 = vmatprep.subr.bf16.mxu0 %v3645_v40 }
 0x15e   : > { %3496 = vmatpush3.bf16.msra.mxu1 %v4139_v15  ;;  %3482 = vmatprep.mubr.bf16.mxu1 %v3033_v37  ;;  %v4187_v37 = vld [vmem:[%s4312_s5 + $0x230] sm:$0xff]  }
 0x15f   : > { %3489 = vmatprep.subr.bf16.mxu1 %v4150_v61 }
 0x160   : > { %3397 = vmatpush3.bf16.msra.mxu0 %v3645_v40 }
 0x161   : > { %3398 = vmatprep.subr.bf16.mxu0 %v3647_v36 }
 0x162   : > { %3497 = vmatpush3.bf16.msra.mxu1 %v4150_v61 }
 0x163   : > { %3490 = vmatprep.subr.bf16.mxu1 %v4167_v0 }
 0x164   : > { %3399 = vmatpush3.bf16.msra.mxu0 %v3647_v36 }
 0x165   : > { %3400 = vmatprep.subr.bf16.mxu0 %v3649_v24 }
 0x166   : > { %3498 = vmatpush3.bf16.msra.mxu1 %v4167_v0 }
 0x167   : > { %3491 = vmatprep.subr.bf16.mxu1 %v4177_v13 }
 0x168   : > { %3401 = vmatpush3.bf16.msra.mxu0 %v3649_v24 }
 0x169   : > { %3402 = vmatprep.subr.bf16.mxu0 %v3651_v16 }
 0x16a   : > { %3499 = vmatpush3.bf16.msra.mxu1 %v4177_v13 }
 0x16b   : > { %3492 = vmatprep.subr.bf16.mxu1 %v4187_v37 }
 0x16c   : > { %3403 = vmatpush3.bf16.msra.mxu0 %v3651_v16 }
 0x16d   : > { %3404 = vmatprep.subr.bf16.mxu0 %v3653_v42 }
 0x16e   : > { %3500 = vmatpush3.bf16.msra.mxu1 %v4187_v37 }
 0x16f   : > { %3493 = vmatprep.subr.bf16.mxu1 %v4197_v56 }
 0x170   : > { %3405 = vmatpush3.bf16.msra.mxu0 %v3653_v42 }
 0x171   : > { %3414 = vmatprep.subr.bf16.mxu0 %v3655_v58 }
 0x172   : > { %3501 = vmatpush3.bf16.msra.mxu1 %v4197_v56 }
 0x173   : > { %3407 = vmatmul.mubr.bf16.vlgmr.msra.gmra.mrb[0].mxu0 %v3987_v54  ;;  %v3659_v54 = vld [vmem:[%s4312_s5 + $0x1a0] sm:$0xff]  }
 0x174   : > { %3410 = vmatprep.mubr.bf16.mxu0 %v4019_v25  ;;  %3415 = vmatpush3.bf16.msra.mxu0 %v3655_v58  ;;  %v3660_v25 = vld [vmem:[%s4312_s5 + $0x1a8] sm:$0xff]  }
 0x175   : > { %3483 = vmatmul.mubr.bf16.vlgmr.msra.gmra.mrb[40].mxu1 %v4072_v10  ;;  %3416 = vmatprep.subr.bf16.mxu0 %v3656_v43 }
 0x178   : > { %3417 = vmatpush3.bf16.msra.mxu0 %v3656_v43 }
 0x179   : > { %3418 = vmatprep.subr.bf16.mxu0 %v3657_v59 }
 0x17b   : > { %3411 = vmatmul.mubr.bf16.gmra.mrb[4].mxu0 %v4059_v2  ;;  %v3026_v2 = vpack.c.bf16 %v2006_v1, %v4085_v29 }
 0x17c   : > { %3419 = vmatpush3.bf16.msra.mxu0 %v3657_v59  ;;  %3430 = vmatprep.mubr.bf16.mxu0 %v3023_v3  ;;  %v3664_v3 = vld [vmem:[%s4312_s5 + $0x1c8] sm:$0xff]  }
 0x17d   : > { %3420 = vmatprep.subr.bf16.mxu0 %v3658_v60 }
 0x180   : > { %3421 = vmatpush3.bf16.msra.mxu0 %v3658_v60 }
 0x181   : > { %3422 = vmatprep.subr.bf16.mxu0 %v3659_v54 }
 0x184   : > { %3423 = vmatpush3.bf16.msra.mxu0 %v3659_v54 }
 0x185   : > { %3424 = vmatprep.subr.bf16.mxu0 %v3660_v25 }
 0x188   : > { %3425 = vmatpush3.bf16.msra.mxu0 %v3660_v25 }
 0x189   : > { %3426 = vmatprep.subr.bf16.mxu0 %v3661_v63 }
 0x18c   : > { %3427 = vmatpush3.bf16.msra.mxu0 %v3661_v63 }
 0x18d   : > { %3428 = vmatprep.subr.bf16.mxu0 %v3662_v53 }
 0x190   : > { %3429 = vmatpush3.bf16.msra.mxu0 %v3662_v53 }
 0x191   : > { %3438 = vmatprep.subr.bf16.mxu0 %v3663_v57 }
 0x193   : > { %3431 = vmatmul.mubr.bf16.vlgmr.msra.gmra.mrb[0].mxu0 %v3024_v44  ;;  %v3668_v44 = vld [vmem:[%s4312_s5 + $0x1e8] sm:$0xff]  }
 0x194   : > { %3434 = vmatprep.mubr.bf16.mxu0 %v3025_v11  ;;  %3439 = vmatpush3.bf16.msra.mxu0 %v3663_v57 }
 0x195   : > { %3440 = vmatprep.subr.bf16.mxu0 %v3664_v3 }
 0x198   : > { %3441 = vmatpush3.bf16.msra.mxu0 %v3664_v3 }
 0x199   : > { %3442 = vmatprep.subr.bf16.mxu0 %v3665_v34 }
 0x19b   : > { %3435 = vmatmul.mubr.bf16.gmra.mrb[4].mxu0 %v3026_v2 }
 0x19c   : > { %3443 = vmatpush3.bf16.msra.mxu0 %v3665_v34  ;;  %3454 = vmatprep.mubr.bf16.mxu0 %v3892_v4  ;;  %v3670_v4 = vld [vmem:[%s4312_s5 + $0x1f8] sm:$0xff]  }
 0x19d   : > { %3444 = vmatprep.subr.bf16.mxu0 %v3666_v23 }
 0x1a0   : > { %3445 = vmatpush3.bf16.msra.mxu0 %v3666_v23 }
 0x1a1   : > { %3446 = vmatprep.subr.bf16.mxu0 %v3667_v28 }
 0x1a4   : > { %3447 = vmatpush3.bf16.msra.mxu0 %v3667_v28 }
 0x1a5   : > { %3448 = vmatprep.subr.bf16.mxu0 %v3668_v44 }
 0x1a8   : > { %3449 = vmatpush3.bf16.msra.mxu0 %v3668_v44 }
 0x1a9   : > { %3450 = vmatprep.subr.bf16.mxu0 %v3669_v45 }
 0x1ac   : > { %3451 = vmatpush3.bf16.msra.mxu0 %v3669_v45 }
 0x1ad   : > { %3452 = vmatprep.subr.bf16.mxu0 %v3670_v4 }
 0x1b0   : > { %3453 = vmatpush3.bf16.msra.mxu0 %v3670_v4 }
 0x1b1   : > { %3462 = vmatprep.subr.bf16.mxu0 %v4112_v48 }
 0x1b3   : > { %3455 = vmatmul.mubr.bf16.vlgmr.msra.gmra.mrb[0].mxu0 %v3903_v21 }
 0x1b4   : > { %3458 = vmatprep.mubr.bf16.mxu0 %v3926_v49  ;;  %3463 = vmatpush3.bf16.msra.mxu0 %v4112_v48 }
 0x1b5   : > { %3464 = vmatprep.subr.bf16.mxu0 %v4122_v52 }
 0x1b8   : > { %3465 = vmatpush3.bf16.msra.mxu0 %v4122_v52 }
 0x1b9   : > { %3466 = vmatprep.subr.bf16.mxu0 %v4139_v15 }
 0x1bb   : > { %3459 = vmatmul.mubr.bf16.gmra.mrb[4].mxu0 %v3944_v8 }
 0x1bc   : > { %3467 = vmatpush3.bf16.msra.mxu0 %v4139_v15  ;;  %3478 = vmatprep.mubr.bf16.mxu0 %v3031_v30 }
 0x1bd   : > { %3468 = vmatprep.subr.bf16.mxu0 %v4150_v61 }
 0x1c0   : > { %3469 = vmatpush3.bf16.msra.mxu0 %v4150_v61 }
 0x1c1   : > { %3470 = vmatprep.subr.bf16.mxu0 %v4167_v0 }
 0x1c4   : > { %3471 = vmatpush3.bf16.msra.mxu0 %v4167_v0 }
 0x1c5   : > { %3472 = vmatprep.subr.bf16.mxu0 %v4177_v13 }
 0x1c8   : > { %3473 = vmatpush3.bf16.msra.mxu0 %v4177_v13 }
 0x1c9   : > { %3474 = vmatprep.subr.bf16.mxu0 %v4187_v37 }
 0x1cc   : > { %3475 = vmatpush3.bf16.msra.mxu0 %v4187_v37 }
 0x1cd   : > { %3476 = vmatprep.subr.bf16.mxu0 %v4197_v56 }
 0x1d0   : > { %3477 = vmatpush3.bf16.msra.mxu0 %v4197_v56 }
 0x1d3   : > { %3479 = vmatmul.mubr.bf16.vlgmr.msra.gmra.mrb[0].mxu0 %v3032_v5 }
 0x228   : > { %v3336_v21 = vpop.f32.mrb[32].mxu1 }
 0x229   : > { %v1425_v49 = vpop.f32.mrb[33].mxu1 }
 0x22a   : > { %v3337_v8 = vpop.f32.mrb[34].mxu1 }
 0x22b   : > { %v1428_v20 = vpop.f32.mrb[35].mxu1 }
 0x230   : > { %v3340_v22 = vpop.f32.mrb[36].mxu1 }
 0x231   : > { %v1441_v30 = vpop.f32.mrb[37].mxu1 }
 0x232   : > { %v3341_v6 = vpop.f32.mrb[38].mxu1 }
 0x233   : > { %v1444_v31 = vpop.f32.mrb[39].mxu1 }
 0x248   : > { %v3484_v7 = vpop.f32.mrb[40].mxu1 }
 0x249   : > { %v2511_v9 = vpop.f32.mrb[41].mxu1 }
 0x24a   : > { %v3485_v10 = vpop.f32.mrb[42].mxu1 }
 0x24b   : > { %v2514_v11 = vpop.f32.mrb[43].mxu1 }
 0x28e   : > { %v3460_v12 = vpop.f32.mrb[4].mxu0 }
 0x28f   : > { %v3506_v14 = vadd.f32 %v3460_v12, %v3340_v22  ;;  %v2333_v17 = vpop.f32.mrb[5].mxu0 }
 0x290   : > { %v3508_v50 = vadd.f32 %v2333_v17, %v1441_v30  ;;  %v3461_v5 = vpop.f32.mrb[6].mxu0 }
 0x291   : > { %v3507_v18 = vadd.f32 %v3506_v14, %v3484_v7  ;;  %v3510_v19 = vadd.f32 %v3461_v5, %v3341_v6  ;;  %v2336_v26 = vpop.f32.mrb[7].mxu0 }
 0x292   : > { %v3509_v27 = vadd.f32 %v3508_v50, %v2511_v9  ;;  %v3512_v29 = vadd.f32 %v2336_v26, %v1444_v31 }
 0x293   : > { %v2547_v32 = vmul.f32 %v3507_v18, %v2984_v47  ;;  %v3511_v33 = vadd.f32 %v3510_v19, %v3485_v10 }
 0x294   : > { %v2545_v38 = vmul.f32 %v3509_v27, %v2984_v47  ;;  %v3513_v39 = vadd.f32 %v3512_v29, %v2514_v11 }
 0x295   : > { %v2548_v62 = vmul.f32 %v3511_v33, %v2984_v47  ;;  %v2562_v46 = vadd.f32 %v2985_v35, %v2547_v32 }
 0x296   : > { %v2546_v41 = vmul.f32 %v3513_v39, %v2984_v47  ;;  %v2560_v51 = vadd.f32 %v2985_v35, %v2545_v38 }
 0x297   : > { %v2563_v48 = vadd.f32 %v2985_v35, %v2548_v62 }
 0x298   : > { %v2561_v52 = vadd.f32 %v2985_v35, %v2546_v41 }
 0x299   : > { %v3061_v55 = vpack.c.bf16 %v2563_v48, %v2562_v46 }
 0x29a   : > { %v3056_v15 = vpack.c.bf16 %v2561_v52, %v2560_v51 }
 0x29b   : > { %3065 = vst [vmem:[%s358_s18 + $0x18] sm:$0xff] %v3061_v55  }
 0x29c   : > { %3064 = vst [vmem:[%s358_s18 + $0x10] sm:$0xff] %v3056_v15  }
 0x2a6   : > { %v3480_v40 = vpop.f32.mrb[0].mxu0 }
 0x2a7   : > { %v3502_v61 = vadd.f32 %v3480_v40, %v3336_v21  ;;  %v2495_v36 = vpop.f32.mrb[1].mxu0 }
 0x2a8   : > { %v3503_v0 = vadd.f32 %v2495_v36, %v1425_v49  ;;  %v3481_v24 = vpop.f32.mrb[2].mxu0 }
 0x2a9   : > { %v2543_v13 = vmul.f32 %v3502_v61, %v2984_v47  ;;  %v3504_v16 = vadd.f32 %v3481_v24, %v3337_v8  ;;  %v2498_v37 = vpop.f32.mrb[3].mxu0 }
 0x2aa   : > { %v2541_v42 = vmul.f32 %v3503_v0, %v2984_v47  ;;  %v3505_v56 = vadd.f32 %v2498_v37, %v1428_v20 }
 0x2ab   : > { %v2544_v58 = vmul.f32 %v3504_v16, %v2984_v47  ;;  %v2558_v59 = vadd.f32 %v2985_v35, %v2543_v13 }
 0x2ac   : > { %v2542_v43 = vmul.f32 %v3505_v56, %v2984_v47  ;;  %v2556_v54 = vadd.f32 %v2985_v35, %v2541_v42 }
 0x2ad   : > { %v2559_v60 = vadd.f32 %v2985_v35, %v2544_v58 }
 0x2ae   : > { %v2557_v25 = vadd.f32 %v2985_v35, %v2542_v43 }
 0x2af   : > { %v3051_v63 = vpack.c.bf16 %v2559_v60, %v2558_v59 }
 0x2b0   : > { %v3046_v53 = vpack.c.bf16 %v2557_v25, %v2556_v54  ;;  %v2604_v57 = vadd.f32 %v2557_v25, %v2556_v54 }
 0x2b1   : > { %3063 = vst [vmem:[%s358_s18 + $0x8] sm:$0xff] %v3051_v63  }
 0x2b2   : > { %3047 = vst [vmem:[%s358_s18] sm:$0xff] %v3046_v53   ;;  %v2605_v3 = vadd.f32 %v2604_v57, %v2558_v59 }
 0x2b4   : > { %v2606_v34 = vadd.f32 %v2605_v3, %v2559_v60 }
 0x2b6   : > { %v2607_v1 = vadd.f32 %v2606_v34, %v2560_v51 }
 0x2b8   : > { %v2608_v2 = vadd.f32 %v2607_v1, %v2561_v52 }
 0x2ba   : > { %v2609_v23 = vadd.f32 %v2608_v2, %v2562_v46 }
 0x2bc   : > { %v2610_v28 = vadd.f32 %v2609_v23, %v2563_v48 }
 0x2be   : > { %v2611_v44 = vrot.slane %v2610_v28, 4 }
 0x2c0   : > { %v2612_v45 = vadd.f32 %v2611_v44, %v2610_v28 }
 0x2c2   : > { %v2613_v4 = vrot.slane %v2612_v45, 2 }
 0x2c4   : > { %v2614_v21 = vadd.f32 %v2613_v4, %v2612_v45 }
 0x2c6   : > { %v2615_v49 = vrot.slane %v2614_v21, 1 }
 0x2c8   : > { %v2616_v8 = vadd.f32 %v2615_v49, %v2614_v21 }
 0x2ca   : > { %v2617_v20 = vmul.f32 0.015625, %v2616_v8 }
 0x2cc   : > { %2618 = vst [vmem:[%s361_s21] sm:$0x1] %v2617_v20 }
 0x2cd PF: > { %s20_s30 = sadd.s32 1, %s3677_s30  }
 0x2ce   : > { %p17_p4 = scmp.ge.s32.totalorder %s20_s30, 4  }
 0x2d0   :  { %19 = sbr.rel (!%p17_p4) target bundleno = 1 (0x1), region = 109 }

// kernel: _lambda_.14
= control target key start
LH: loop header
LB: loop body
LE: loop exit
PB: predicated region body
PF: predicated region fallthrough
CT: control target
= control target key end

     0   :  { %s1395_s25 = smov 0   ;;  %s1638_s0 = inlined_call_operand.vmem [shape: bf16[2,16,128], index: 0, kind: input, shape index: {}]   ;;  %s1639_s1 = inlined_call_operand.vmem [shape: f32[2,1,128], index: 1, kind: input, shape index: {}]   ;;  %s1640_s2 = inlined_call_operand.vmem [shape: f32[128,128], index: 2, kind: input, shape index: {}]   ;;  %s1641_s3 = inlined_call_operand.vmem [shape: f32[1,128], index: 3, kind: input, shape index: {}]   ;;  %s1642_s4 = inlined_call_operand.vmem [shape: f32[128,128], index: 4, kind: input, shape index: {}]   ;;  %s1643_s5 = inlined_call_operand.vmem [shape: f32[1,128], index: 5, kind: input, shape index: {}]   ;;  %s1644_s6 = inlined_call_operand.vmem [shape: bf16[128,128], index: 6, kind: input, shape index: {}]   ;;  %s1645_s7 = inlined_call_operand.vmem [shape: f32[1,128], index: 7, kind: input, shape index: {}, may-alias: {7,11}]   ;;  %s1646_s8 = inlined_call_operand.vmem [shape: f32[1,128], index: 8, kind: input, shape index: {}, may-alias: {8,12}]   ;;  %s1647_s9 = inlined_call_operand.vmem [shape: bf16[2,16,128], index: 9, kind: input, shape index: {}]   ;;  %s1648_s10 = inlined_call_operand.vmem [shape: bf16[128,128], index: 10, kind: input, shape index: {}]   ;;  %s1649_s11 = inlined_call_operand.vmem [shape: f32[1,128], index: 11, kind: input, shape index: {}, may-alias: {7,11}]   ;;  %s1650_s12 = inlined_call_operand.vmem [shape: f32[1,128], index: 12, kind: input, shape index: {}, may-alias: {8,12}]   ;;  %s1651_s13 = inlined_call_operand.vmem [shape: bf16[2,16,128], index: 13, kind: output, shape index: {}]  }
   0x1 LB: > { %s1024_s26 = sadd.s32 4294967295, %s1320_s25   ;;  %p1028_p0 = scmp.ge.s32.totalorder %s1320_s25, 1  ;;  %s1320_s25 = sphi %s1395_s25, %s23_s25  }
   0x2   : > { %p405_p1 = scmp.lt.s32.totalorder %s1320_s25, 3 }
   0x4   : > { %p406_p2 = pnand %p1028_p0, %p405_p1 }
   0x5   : > { %v477_v0 = vld [vmem:[%s1640_s2] sm:$0xff] (!%p406_p2)  ;;  %v478_v1 = vld [vmem:[%s1640_s2 + $0x8] sm:$0xff] (!%p406_p2)  ;;  %v479_v2 = vld [vmem:[%s1640_s2 + $0x10] sm:$0xff] (!%p406_p2)  ;;  %v1322_v3 = vmov (!%p406_p2), 0.0|0.0   ;;  %vm1323_vm0 = vmmov (!%p406_p2), 0   ;;  %v1324_v6 = vmov (!%p406_p2), 0.0  }
   0x6   : > { %409 = sbr.rel (%p406_p2) target bundleno = 734 (0x2de), region = 72  ;;  %1234 = vmatprep.subr.bf16.mxu0 (!%p406_p2), %v1322_v3  ;;  %v1235_v4 = vpack.c.bf16 (!%p406_p2), %v478_v1, %v477_v0  ;;  %v480_v5 = vld [vmem:[%s1640_s2 + $0x18] sm:$0xff] (!%p406_p2)  ;;  %1156 = vmatprep.mubr.msk.f32.mxu0 (!%p406_p2), %vm1323_vm0, %v1324_v6  ;;  %v481_v8 = vld [vmem:[%s1640_s2 + $0x20] sm:$0xff] (!%p406_p2)  ;;  %v482_v9 = vld [vmem:[%s1640_s2 + $0x28] sm:$0xff] (!%p406_p2)  ;;  %p457_p3 = scmp.lt.s32.totalorder (!%p406_p2), %s1024_s26, 1 }
   0x7   : > { %1258 = vmatprep.subr.bf16.mxu1 (!%p406_p2), %v1322_v3  ;;  %1191 = vmatprep.mubr.msk.f32.mxu1 (!%p406_p2), %vm1323_vm0, %v1324_v6  ;;  %v1238_v7 = vpack.c.bf16 (!%p406_p2), %v480_v5, %v479_v2  ;;  %v565_v10 = vld [vmem:[%s1642_s4] sm:$0xff] (!%p406_p2)  ;;  %v566_v11 = vld [vmem:[%s1642_s4 + $0x8] sm:$0xff] (!%p406_p2)  ;;  %v567_v13 = vld [vmem:[%s1642_s4 + $0x10] sm:$0xff] (!%p406_p2)  ;;  %v1241_v15 = vpack.c.bf16 (!%p406_p2), %v482_v9, %v481_v8 }
   0x8   : > { %1236 = vmatpush3.bf16.msra.mxu0 (!%p406_p2), %v1235_v4  ;;  %v1259_v12 = vpack.c.bf16 (!%p406_p2), %v566_v11, %v565_v10  ;;  %v568_v14 = vld [vmem:[%s1642_s4 + $0x18] sm:$0xff] (!%p406_p2)  ;;  %v483_v16 = vld [vmem:[%s1640_s2 + $0x30] sm:$0xff] (!%p406_p2)  ;;  %v569_v19 = vld [vmem:[%s1642_s4 + $0x20] sm:$0xff] (!%p406_p2) }
   0x9   : > { %1237 = vmatprep.subr.bf16.mxu0 (!%p406_p2), %v1322_v3  ;;  %v484_v17 = vld [vmem:[%s1640_s2 + $0x38] sm:$0xff] (!%p406_p2)  ;;  %v1262_v18 = vpack.c.bf16 (!%p406_p2), %v568_v14, %v567_v13  ;;  %v570_v20 = vld [vmem:[%s1642_s4 + $0x28] sm:$0xff] (!%p406_p2)  ;;  %v485_v21 = vld [vmem:[%s1640_s2 + $0x40] sm:$0xff] (!%p406_p2) }
   0xa   : > { %1260 = vmatpush3.bf16.msra.mxu1 (!%p406_p2), %v1259_v12  ;;  %v486_v22 = vld [vmem:[%s1640_s2 + $0x48] sm:$0xff] (!%p406_p2)  ;;  %v1244_v23 = vpack.c.bf16 (!%p406_p2), %v484_v17, %v483_v16  ;;  %v571_v24 = vld [vmem:[%s1642_s4 + $0x30] sm:$0xff] (!%p406_p2)  ;;  %v572_v25 = vld [vmem:[%s1642_s4 + $0x38] sm:$0xff] (!%p406_p2)  ;;  %v1265_v26 = vpack.c.bf16 (!%p406_p2), %v570_v20, %v569_v19  ;;  %v664_v17 = vlaneseq (!%p406_p2) }
   0xb   : > { %1261 = vmatprep.subr.bf16.mxu1 (!%p406_p2), %v1322_v3  ;;  %v487_v27 = vld [vmem:[%s1640_s2 + $0x50] sm:$0xff] (!%p406_p2)  ;;  %v488_v28 = vld [vmem:[%s1640_s2 + $0x58] sm:$0xff] (!%p406_p2)  ;;  %v1247_v29 = vpack.c.bf16 (!%p406_p2), %v486_v22, %v485_v21  ;;  %v573_v30 = vld [vmem:[%s1642_s4 + $0x40] sm:$0xff] (!%p406_p2)  ;;  %v1268_v32 = vpack.c.bf16 (!%p406_p2), %v572_v25, %v571_v24 }
   0xc   : > { %1239 = vmatpush3.bf16.msra.mxu0 (!%p406_p2), %v1238_v7  ;;  %v574_v31 = vld [vmem:[%s1642_s4 + $0x48] sm:$0xff] (!%p406_p2)  ;;  %v489_v33 = vld [vmem:[%s1640_s2 + $0x60] sm:$0xff] (!%p406_p2)  ;;  %v1250_v35 = vpack.c.bf16 (!%p406_p2), %v488_v28, %v487_v27  ;;  %v575_v36 = vld [vmem:[%s1642_s4 + $0x50] sm:$0xff] (!%p406_p2) }
   0xd   : > { %1240 = vmatprep.subr.bf16.mxu0 %v1322_v3  ;;  %s1653_s26 = smov (!%p457_p3, %s1024_s26), 1  ;;  %v490_v34 = vld [vmem:[%s1640_s2 + $0x68] sm:$0xff]  ;;  %v576_v37 = vld [vmem:[%s1642_s4 + $0x58] sm:$0xff]  ;;  %v1271_v38 = vpack.c.bf16 %v574_v31, %v573_v30  ;;  %v491_v40 = vld [vmem:[%s1640_s2 + $0x70] sm:$0xff] }
   0xe   : > { %s1467_s29 = sshll.u32 %s1653_s26, 3  ;;  %1263 = vmatpush3.bf16.msra.mxu1 %v1262_v18  ;;  %v1253_v39 = vpack.c.bf16 %v490_v34, %v489_v33  ;;  %v492_v41 = vld [vmem:[%s1640_s2 + $0x78] sm:$0xff]  ;;  %v1274_v42 = vpack.c.bf16 %v576_v37, %v575_v36  ;;  %v577_v43 = vld [vmem:[%s1642_s4 + $0x60] sm:$0xff]  ;;  %v578_v44 = vld [vmem:[%s1642_s4 + $0x68] sm:$0xff]  ;;  %s464_s18 = scalar_lea.vmem %s1639_s1, %s1653_s26  ;;  %v665_v18 = vshrl.u32 %v664_v17, 7 }
   0xf   : > { %1264 = vmatprep.subr.bf16.mxu1 %v1322_v3  ;;  %s469_s21 = scalar_lea.vmem %s1647_s9, %s1467_s29  ;;  %v1256_v45 = vpack.c.bf16 %v492_v41, %v491_v40  ;;  %v1277_v46 = vpack.c.bf16 %v578_v44, %v577_v43  ;;  %v476_v47 = vld [vmem:[%s464_s18] sm:$0x1]  ;;  %v579_v48 = vld [vmem:[%s1642_s4 + $0x70] sm:$0xff]  ;;  %v580_v49 = vld [vmem:[%s1642_s4 + $0x78] sm:$0xff]  ;;  %s461_s20 = scalar_lea.vmem %s1638_s0, %s1467_s29 }
  0x10   : > { %1242 = vmatpush3.bf16.msra.mxu0 %v1241_v15  ;;  %v1280_v50 = vpack.c.bf16 %v580_v49, %v579_v48  ;;  %v493_v51 = vld [vmem:[%s1641_s3] sm:$0x1]  ;;  %v1295_v58 = vld [vmem:[%s1648_s10 + $0x8] sm:$0xff]   ;;  %v1297_v60 = vld [vmem:[%s1648_s10 + $0x10] sm:$0xff]   ;;  %v666_v21 = vsub.s32 0, %v665_v18  ;;  %s474_s17 = scalar_lea.vmem %s1651_s13, %s1467_s29 }
  0x11   : > { %1243 = vmatprep.subr.bf16.mxu0 %v1322_v3  ;;  %v1293_v56 = vld [vmem:[%s1648_s10] sm:$0xff]   ;;  %v1296_v59 = vld [vmem:[%s1644_s6 + $0x8] sm:$0xff]   ;;  %v1298_v61 = vld [vmem:[%s1644_s6 + $0x10] sm:$0xff]  }
  0x12   : > { %1266 = vmatpush3.bf16.msra.mxu1 %v1265_v26  ;;  %v1294_v57 = vld [vmem:[%s1644_s6] sm:$0xff]   ;;  %v1299_v62 = vld [vmem:[%s1648_s10 + $0x18] sm:$0xff]   ;;  %v1303_v2 = vld [vmem:[%s1648_s10 + $0x28] sm:$0xff]  }
  0x13   : > { %1267 = vmatprep.subr.bf16.mxu1 %v1322_v3  ;;  %v1300_v63 = vld [vmem:[%s1644_s6 + $0x18] sm:$0xff]   ;;  %v1301_v0 = vld [vmem:[%s1648_s10 + $0x20] sm:$0xff]   ;;  %v1305_v4 = vld [vmem:[%s1648_s10 + $0x30] sm:$0xff]  }
  0x14   : > { %1245 = vmatpush3.bf16.msra.mxu0 %v1244_v23  ;;  %v1302_v1 = vld [vmem:[%s1644_s6 + $0x20] sm:$0xff]   ;;  %v1306_v5 = vld [vmem:[%s1644_s6 + $0x30] sm:$0xff]   ;;  %v1307_v7 = vld [vmem:[%s1648_s10 + $0x38] sm:$0xff]  }
  0x15   : > { %1246 = vmatprep.subr.bf16.mxu0 %v1322_v3  ;;  %v1308_v8 = vld [vmem:[%s1644_s6 + $0x38] sm:$0xff]   ;;  %v1309_v9 = vld [vmem:[%s469_s21] sm:$0xff]  }
  0x16   : > { %1269 = vmatpush3.bf16.msra.mxu1 %v1268_v32  ;;  %v581_v10 = vld [vmem:[%s1643_s5] sm:$0x1]  ;;  %v660_v25 = vld [vmem:[%s461_s20 + $0x4] sm:$0xf] }
  0x17   : > { %1270 = vmatprep.subr.bf16.mxu1 %v1322_v3  ;;  %v659_v24 = vld [vmem:[%s461_s20] sm:$0xf] }
  0x18   : > { %1248 = vmatpush3.bf16.msra.mxu0 %v1247_v29  ;;  %v1056_v34 = vld [vmem:[%s1649_s11] ss:$0 sm:$0xff] }
  0x19   : > { %1249 = vmatprep.subr.bf16.mxu0 %v1322_v3  ;;  %v1057_v36 = vld [vmem:[%s1650_s12] ss:$0 sm:$0xff] }
  0x1a   : > { %1272 = vmatpush3.bf16.msra.mxu1 %v1271_v38  ;;  %v1045_v37 = vld [vmem:[%s1645_s7] ss:$0 sm:$0xff] }
  0x1b   : > { %1273 = vmatprep.subr.bf16.mxu1 %v1322_v3 }
  0x1c   : > { %1251 = vmatpush3.bf16.msra.mxu0 %v1250_v35 }
  0x1d   : > { %1252 = vmatprep.subr.bf16.mxu0 %v1322_v3 }
  0x1e   : > { %1275 = vmatpush3.bf16.msra.mxu1 %v1274_v42 }
  0x1f   : > { %1276 = vmatprep.subr.bf16.mxu1 %v1322_v3 }
  0x20   : > { %1254 = vmatpush3.bf16.msra.mxu0 %v1253_v39  ;;  %v1046_v39 = vld [vmem:[%s1646_s8] ss:$0 sm:$0xff] }
  0x21   : > { %1255 = vmatprep.subr.bf16.mxu0 %v1322_v3 }
  0x22   : > { %1278 = vmatpush3.bf16.msra.mxu1 %v1277_v46 }
  0x23   : > { %1279 = vmatprep.subr.bf16.mxu1 %v1322_v3  ;;  %v1304_v3 = vld [vmem:[%s1644_s6 + $0x28] sm:$0xff]  }
  0x24   : > { %1257 = vmatpush3.bf16.msra.mxu0 %v1256_v45 }
  0x25   : > { %1194 = vmatprep.subr.bf16.mxu0 %v1324_v6 }
  0x26   : > { %1281 = vmatpush3.bf16.msra.mxu1 %v1280_v50 }
  0x27   : > { %1157 = vmatmul.mubr.f32.vlgmr.msra.gmra.mrb[0].mxu0 %v476_v47  ;;  %1214 = vmatprep.subr.bf16.mxu1 %v1324_v6 }
  0x28   : > { %1210 = vmatprep.mubr.msk.bf16.mxu0 %vm1323_vm0, %v1324_v6  ;;  %1195 = vmatpush3.bf16.msra.mxu0 %v1294_v57 }
  0x29   : > { %1196 = vmatprep.subr.bf16.mxu0 %v1324_v6 }
  0x2c   : > { %1197 = vmatpush3.bf16.msra.mxu0 %v1296_v59 }
  0x2d   : > { %1198 = vmatprep.subr.bf16.mxu0 %v1324_v6 }
  0x30   : > { %1199 = vmatpush3.bf16.msra.mxu0 %v1298_v61 }
  0x31   : > { %1200 = vmatprep.subr.bf16.mxu0 %v1324_v6 }
  0x34   : > { %1201 = vmatpush3.bf16.msra.mxu0 %v1300_v63 }
  0x35   : > { %1202 = vmatprep.subr.bf16.mxu0 %v1324_v6 }
  0x38   : > { %1203 = vmatpush3.bf16.msra.mxu0 %v1302_v1 }
  0x39   : > { %1204 = vmatprep.subr.bf16.mxu0 %v1324_v6 }
  0x3c   : > { %1205 = vmatpush3.bf16.msra.mxu0 %v1304_v3 }
  0x3d   : > { %1206 = vmatprep.subr.bf16.mxu0 %v1324_v6 }
  0x40   : > { %1207 = vmatpush3.bf16.msra.mxu0 %v1306_v5 }
  0x41   : > { %1208 = vmatprep.subr.bf16.mxu0 %v1324_v6 }
  0x44   : > { %1209 = vmatpush3.bf16.msra.mxu0 %v1308_v8 }
  0xfa   : > { %v560_v52 = vpop.f32.mrb[0].mxu0 }
  0xfb   : > { %v561_v53 = vadd.f32 %v560_v52, %v493_v51  ;;  %v1158_v54 = vpop.f32.mrb[1].mxu0 }
  0xfd   : > { %v564_v55 = vmax.f32 %v561_v53, 0.0 }
  0xff   : > { %1192 = vmatmul.mubr.f32.vlgmr.msra.gmra.mrb[0].mxu1 %v564_v55 }
 0x100   : > { %1230 = vmatprep.mubr.msk.bf16.mxu1 %vm1323_vm0, %v1324_v6  ;;  %1215 = vmatpush3.bf16.msra.mxu1 %v1293_v56 }
 0x101   : > { %1216 = vmatprep.subr.bf16.mxu1 %v1324_v6 }
 0x104   : > { %1217 = vmatpush3.bf16.msra.mxu1 %v1295_v58 }
 0x105   : > { %1218 = vmatprep.subr.bf16.mxu1 %v1324_v6 }
 0x108   : > { %1219 = vmatpush3.bf16.msra.mxu1 %v1297_v60 }
 0x109   : > { %1220 = vmatprep.subr.bf16.mxu1 %v1324_v6 }
 0x10c   : > { %1221 = vmatpush3.bf16.msra.mxu1 %v1299_v62 }
 0x10d   : > { %1222 = vmatprep.subr.bf16.mxu1 %v1324_v6 }
 0x110   : > { %1223 = vmatpush3.bf16.msra.mxu1 %v1301_v0 }
 0x111   : > { %1224 = vmatprep.subr.bf16.mxu1 %v1324_v6 }
 0x114   : > { %1225 = vmatpush3.bf16.msra.mxu1 %v1303_v2 }
 0x115   : > { %1226 = vmatprep.subr.bf16.mxu1 %v1324_v6 }
 0x118   : > { %1227 = vmatpush3.bf16.msra.mxu1 %v1305_v4 }
 0x119   : > { %1228 = vmatprep.subr.bf16.mxu1 %v1324_v6 }
 0x11c   : > { %1229 = vmatpush3.bf16.msra.mxu1 %v1307_v7 }
 0x11f   : > { %1231 = vmatmul.mubr.bf16.vlgmr.msra.gmra.mrb[4].mxu1 %v1309_v9 }
 0x1d2   : > { %v648_v11 = vpop.f32.mrb[0].mxu1 }
 0x1d3   : > { %v649_v12 = vadd.f32 %v648_v11, %v581_v10  ;;  %v1193_v13 = vpop.f32.mrb[1].mxu1 }
 0x1d5   : > { %v652_v6 = vsub.f32 0.0, %v649_v12 }
 0x1d7   : > { %v653_v14 = vmul.f32 1.442695, %v652_v6 }
 0x1d9   : > { %1310 = vpow2.f32 %v653_v14 }
 0x1e3   : > { %v1311_v15 = vpop.eup %1310 }
 0x1e4   : > { %v655_v16 = vadd.f32 1.0, %v1311_v15 }
 0x1e6   : > { %1312 = vrcp.f32 %v655_v16 }
 0x1f0   : > { %v1313_v19 = vpop.eup %1312 }
 0x1f1   : > { %v658_v20 = vpack.c.bf16 %v1313_v19, %v1313_v19 }
 0x1f2   : > { %v909_v30 = vpop.f32.mrb[4].mxu1 }
 0x1f3   : > { %v662_v22 = vpack.i.b16 %v658_v20, %v658_v20  ;;  %v1232_v31 = vpop.f32.mrb[5].mxu1  ;;  %v923_v35 = vmul.f32 %v1056_v34, %v909_v30 }
 0x1f4   : > { %v912_v32 = vpop.f32.mrb[6].mxu1 }
 0x1f5   : > { %v667_v23 = vrot.slane %v662_v22, %v666_v21  ;;  %v1233_v33 = vpop.f32.mrb[7].mxu1  ;;  %v932_v40 = vadd.f32 %v1057_v36, %v923_v35  ;;  %v924_v41 = vmul.f32 %v1056_v34, %v912_v32 }
 0x1f7   : > { %v1035_v26 = vcombine.low %v667_v23, %v667_v23  ;;  %v933_v48 = vadd.f32 %v1057_v36, %v924_v41 }
 0x1f9   : > { %v672_v27 = vmul.bf16 %v1035_v26, %v659_v24  ;;  %v673_v28 = vmul.bf16 %v1035_v26, %v660_v25 }
 0x1fb   : > { %v1036_v29 = vcombine.low %v672_v27, %v673_v28 }
 0x1fd   : > { %1211 = vmatmul.mubr.bf16.vlgmr.msra.gmra.mrb[4].mxu0 %v1036_v29 }
 0x2d0   : > { %v778_v38 = vpop.f32.mrb[4].mxu0 }
 0x2d1   : > { %v792_v42 = vmul.f32 %v1045_v37, %v778_v38  ;;  %v1212_v43 = vpop.f32.mrb[5].mxu0 }
 0x2d2   : > { %v781_v44 = vpop.f32.mrb[6].mxu0 }
 0x2d3   : > { %v801_v45 = vadd.f32 %v1046_v39, %v792_v42  ;;  %v793_v46 = vmul.f32 %v1045_v37, %v781_v44  ;;  %v1213_v47 = vpop.f32.mrb[7].mxu0 }
 0x2d5   : > { %v934_v49 = vadd.f32 %v932_v40, %v801_v45  ;;  %v802_v50 = vadd.f32 %v1046_v39, %v793_v46 }
 0x2d7   : > { %v935_v51 = vadd.f32 %v933_v48, %v802_v50  ;;  %v936_v52 = vmax.f32 %v934_v49, 0.0 }
 0x2d9   : > { %v937_v53 = vmax.f32 %v935_v51, 0.0 }
 0x2db   : > { %v1070_v54 = vpack.c.bf16 %v937_v53, %v936_v52 }
 0x2dd   : > { %1071 = vst [vmem:[%s474_s17] sm:$0xff] %v1070_v54  }
 0x2de PF: > { %s23_s25 = sadd.s32 1, %s1320_s25  }
 0x2df   : > { %p20_p4 = scmp.ge.s32.totalorder %s23_s25, 4  }
 0x2e1   :  { %22 = sbr.rel (!%p20_p4) target bundleno = 1 (0x1), region = 108 }

// kernel: _lambda_.13
= control target key start
LH: loop header
LB: loop body
LE: loop exit
PB: predicated region body
PF: predicated region fallthrough
CT: control target
= control target key end

     0   :  { %s2855_s30 = smov 0   ;;  %s3293_s0 = inlined_call_operand.vmem [shape: bf16[2,8,4,128], index: 0, kind: input, shape index: {}]   ;;  %s3294_s1 = inlined_call_operand.vmem [shape: bf16[2,8,4,128], index: 1, kind: input, shape index: {}]   ;;  %s3295_s2 = inlined_call_operand.vmem [shape: bf16[128,128], index: 2, kind: input, shape index: {}]   ;;  %s3296_s3 = inlined_call_operand.vmem [shape: f32[1,128], index: 3, kind: input, shape index: {}, may-alias: {3,6}]   ;;  %s3297_s4 = inlined_call_operand.vmem [shape: f32[1,128], index: 4, kind: input, shape index: {}, may-alias: {4,7}]   ;;  %s3298_s5 = inlined_call_operand.vmem [shape: bf16[1,9,128,128], index: 5, kind: input, shape index: {}]   ;;  %s3299_s6 = inlined_call_operand.vmem [shape: f32[1,128], index: 6, kind: input, shape index: {}, may-alias: {3,6}]   ;;  %s3300_s7 = inlined_call_operand.vmem [shape: f32[1,128], index: 7, kind: input, shape index: {}, may-alias: {4,7}]   ;;  %s3301_s8 = inlined_call_operand.vmem [shape: bf16[2,16,128], index: 8, kind: output, shape index: {0}]   ;;  %s3302_s9 = inlined_call_operand.vmem [shape: f32[2,1,128], index: 9, kind: output, shape index: {1}]  }
   0x1 LB: > { %s2097_s10 = sadd.s32 4294967295, %s2800_s30   ;;  %p2101_p0 = scmp.ge.s32.totalorder %s2800_s30, 1  ;;  %s2800_s30 = sphi %s2855_s30, %s20_s30  }
   0x2   : > { %p300_p1 = scmp.lt.s32.totalorder %s2800_s30, 3 }
   0x4   : > { %p301_p2 = pnand %p2101_p0, %p300_p1 }
   0x5   : > { %v2866_v0 = vld [vmem:[%s3295_s2] sm:$0xff] (!%p301_p2)   ;;  %p344_p3 = scmp.lt.s32.totalorder (!%p301_p2), %s2097_s10, 1  ;;  %v2871_v1 = vld [vmem:[%s3295_s2 + $0x8] sm:$0xff] (!%p301_p2)   ;;  %v2802_v2 = vmov (!%p301_p2), 0.0   ;;  %v2716_v3 = vld [vmem:[%s3295_s2 + $0x10] sm:$0xff] (!%p301_p2)   ;;  %v400_v4 = vlaneseq (!%p301_p2)  ;;  %vm2804_vm0 = vmmov (!%p301_p2), 0  }
   0x6   : > { %304 = sbr.rel (%p301_p2) target bundleno = 702 (0x2be), region = 52  ;;  %2453 = vmatprep.subr.bf16.mxu1 (!%p301_p2), %v2866_v0  ;;  %691 = vst [vmem:[#allocation2] sm:$0x1f] (!%p301_p2), %v2802_v2  ;;  %692 = vst [vmem:[#allocation2 + $0x8] sm:$0x1f] (!%p301_p2), %v2802_v2  ;;  %2553 = vmatprep.subr.bf16.mxu0 (!%p301_p2), %v2802_v2  ;;  %v2717_v5 = vld [vmem:[%s3295_s2 + $0x18] sm:$0xff] (!%p301_p2)  }
   0x7   : > { %693 = vst [vmem:[#allocation2 + $0x10] sm:$0x1f] (!%p301_p2), %v2802_v2  ;;  %694 = vst [vmem:[#allocation2 + $0x18] sm:$0x1f] (!%p301_p2), %v2802_v2  ;;  %2454 = vmatpush3.bf16.msra.mxu1 (!%p301_p2), %v2866_v0  ;;  %v2803_v10 = vmov (!%p301_p2), 1983009808   ;;  %2569 = vmatprep.mubr.msk.bf16.mxu0 (!%p301_p2), %vm2804_vm0, %v2802_v2 }
   0x8   : > { %695 = vst [vmem:[#allocation2 + $0x20] sm:$0x1f] (!%p301_p2), %v2802_v2  ;;  %696 = vst [vmem:[#allocation2 + $0x28] sm:$0x1f] (!%p301_p2), %v2802_v2  ;;  %2455 = vmatprep.subr.bf16.mxu1 (!%p301_p2), %v2871_v1  ;;  %v398_v11 = vunpack.c.l.s4 (!%p301_p2), %v2803_v10  ;;  %v401_v12 = vshrl.u32 (!%p301_p2), %v400_v4, 7  ;;  %v2718_v13 = vld [vmem:[%s3295_s2 + $0x20] sm:$0xff] (!%p301_p2)  }
   0x9   : > { %697 = vst [vmem:[#allocation2 + $0x30] sm:$0x1f] (!%p301_p2), %v2802_v2  ;;  %698 = vst [vmem:[#allocation2 + $0x38] sm:$0x1f] (!%p301_p2), %v2802_v2  ;;  %v2719_v18 = vld [vmem:[%s3295_s2 + $0x28] sm:$0xff] (!%p301_p2)   ;;  %v2720_v25 = vld [vmem:[%s3295_s2 + $0x30] sm:$0xff] (!%p301_p2)  }
   0xa   : > { %699 = vst [vmem:[#allocation2 + $0x40] sm:$0x1f] (!%p301_p2), %v2802_v2  ;;  %701 = vst [vmem:[#allocation3] sm:$0xf] (!%p301_p2), %v2802_v2  ;;  %v399_v16 = vunpack.c.0.s8 (!%p301_p2), %v398_v11  ;;  %v2721_v31 = vld [vmem:[%s3295_s2 + $0x38] sm:$0xff] (!%p301_p2)   ;;  %v2722_v51 = vld [vmem:[%s3298_s5 + $0x40] sm:$0xff] (!%p301_p2)  }
   0xb   : > { %702 = vst [vmem:[#allocation3 + $0x4] sm:$0xf] (!%p301_p2), %v2802_v2  ;;  %703 = vst [vmem:[#allocation3 + $0x8] sm:$0xf] (!%p301_p2), %v2802_v2  ;;  %2456 = vmatpush3.bf16.msra.mxu1 (!%p301_p2), %v2871_v1  ;;  %v2723_v52 = vld [vmem:[%s3298_s5 + $0x48] sm:$0xff] (!%p301_p2)   ;;  %v2724_v53 = vld [vmem:[%s3298_s5 + $0x50] sm:$0xff] (!%p301_p2)  }
   0xc   : > { %704 = vst [vmem:[#allocation3 + $0xc] sm:$0xf] (!%p301_p2), %v2802_v2  ;;  %705 = vst [vmem:[#allocation3 + $0x10] sm:$0xf] (!%p301_p2), %v2802_v2  ;;  %2457 = vmatprep.subr.bf16.mxu1 (!%p301_p2), %v2716_v3  ;;  %v2911_v17 = vsub.s32 (!%p301_p2), %v399_v16, %v401_v12  ;;  %v2725_v54 = vld [vmem:[%s3298_s5 + $0x58] sm:$0xff] (!%p301_p2)   ;;  %v2726_v55 = vld [vmem:[%s3298_s5 + $0x60] sm:$0xff] (!%p301_p2)  }
   0xd   : > { %s3304_s10 = smov (!%p344_p3, %s2097_s10), 1  ;;  %706 = vst [vmem:[#allocation3 + $0x14] sm:$0xf] %v2802_v2  ;;  %707 = vst [vmem:[#allocation3 + $0x18] sm:$0xf] %v2802_v2  ;;  %v2727_v56 = vld [vmem:[%s3298_s5 + $0x68] sm:$0xff]  }
   0xe   : > { %708 = vst [vmem:[#allocation3 + $0x1c] sm:$0xf] %v2802_v2  ;;  %709 = vst [vmem:[#allocation3 + $0x20] sm:$0xf] %v2802_v2  ;;  %s2342_s17 = sshll.u32 %s3304_s10, 4  ;;  %v2730_v57 = vld [vmem:[%s3298_s5 + $0xc0] sm:$0xff]   ;;  %s361_s21 = scalar_lea.vmem %s3302_s9, %s3304_s10 }
   0xf   : > { %s348_s20 = scalar_lea.vmem %s3293_s0, %s2342_s17  ;;  %2458 = vmatpush3.bf16.msra.mxu1 %v2716_v3  ;;  %s2919_s29 = scalar_lea.vmem %s3294_s1, %s2342_s17  ;;  %v2728_v58 = vld [vmem:[%s3298_s5 + $0x70] sm:$0xff]   ;;  %2554 = vmatpush3.bf16.msra.mxu0 %v2730_v57  ;;  %v2729_v59 = vld [vmem:[%s3298_s5 + $0x78] sm:$0xff]   ;;  %v2732_v60 = vld [vmem:[%s3298_s5 + $0xc8] sm:$0xff]  }
  0x10   : > { %v363_v6 = vld [vmem:[%s348_s20] sm:$0x3]  ;;  %v364_v7 = vld [vmem:[%s348_s20 + $0x2] sm:$0x3]  ;;  %v365_v8 = vld [vmem:[%s348_s20 + $0x4] sm:$0x3]  ;;  %2459 = vmatprep.subr.bf16.mxu1 %v2717_v5  ;;  %2555 = vmatprep.subr.bf16.mxu0 %v2802_v2 }
  0x11   : > { %v366_v9 = vld [vmem:[%s348_s20 + $0x6] sm:$0x3]  ;;  %v395_v14 = vcombine.low %v363_v6, %v364_v7  ;;  %v367_v21 = vld [vmem:[%s348_s20 + $0x8] sm:$0x3]  ;;  %v368_v22 = vld [vmem:[%s348_s20 + $0xa] sm:$0x3] }
  0x12   : > { %v396_v15 = vcombine.low %v365_v8, %v366_v9  ;;  %v369_v23 = vld [vmem:[%s348_s20 + $0xc] sm:$0x3]  ;;  %v370_v24 = vld [vmem:[%s348_s20 + $0xe] sm:$0x3]  ;;  %v566_v27 = vld [vmem:[%s2919_s29] sm:$0x3]  ;;  %v412_v32 = vcombine.low %v367_v21, %v368_v22 }
  0x13   : > { %2460 = vmatpush3.bf16.msra.mxu1 %v2717_v5  ;;  %v403_v19 = vrot.slane %v395_v14, %v2911_v17  ;;  %v567_v28 = vld [vmem:[%s2919_s29 + $0x2] sm:$0x3]  ;;  %v568_v29 = vld [vmem:[%s2919_s29 + $0x4] sm:$0x3]  ;;  %v569_v30 = vld [vmem:[%s2919_s29 + $0x6] sm:$0x3]  ;;  %v413_v33 = vcombine.low %v369_v23, %v370_v24  ;;  %2556 = vmatpush3.bf16.msra.mxu0 %v2732_v60 }
  0x14   : > { %2461 = vmatprep.subr.bf16.mxu1 %v2718_v13  ;;  %v410_v20 = vrot.slane %v396_v15, %v2911_v17  ;;  %v582_v34 = vcombine.low %v566_v27, %v567_v28  ;;  %v583_v35 = vcombine.low %v568_v29, %v569_v30  ;;  %v420_v36 = vrot.slane %v412_v32, %v2911_v17  ;;  %v570_v42 = vld [vmem:[%s2919_s29 + $0x8] sm:$0x3]  ;;  %v571_v43 = vld [vmem:[%s2919_s29 + $0xa] sm:$0x3]  ;;  %v572_v44 = vld [vmem:[%s2919_s29 + $0xc] sm:$0x3] }
  0x15   : > { %v427_v37 = vrot.slane %v413_v33, %v2911_v17  ;;  %v573_v45 = vld [vmem:[%s2919_s29 + $0xe] sm:$0x3]  ;;  %v599_v46 = vcombine.low %v570_v42, %v571_v43  ;;  %2557 = vmatprep.subr.bf16.mxu0 %v2802_v2  ;;  %v2734_v61 = vld [vmem:[%s3298_s5 + $0xd0] sm:$0xff]   ;;  %v2736_v62 = vld [vmem:[%s3298_s5 + $0xd8] sm:$0xff]   ;;  %s2344_s15 = sshll.u32 %s3304_s10, 3 }
  0x16   : > { %v411_v26 = vcombine.low %v403_v19, %v410_v20  ;;  %v590_v38 = vrot.slane %v582_v34, %v2911_v17  ;;  %v597_v39 = vrot.slane %v583_v35, %v2911_v17  ;;  %v600_v47 = vcombine.low %v572_v44, %v573_v45  ;;  %v2738_v63 = vld [vmem:[%s3298_s5 + $0xe0] sm:$0xff]   ;;  %v753_v27 = vld [vmem:[#allocation3] sm:$0xf]  ;;  %s358_s18 = scalar_lea.vmem %s3301_s8, %s2344_s15 }
  0x17   : > { %2462 = vmatpush3.bf16.msra.mxu1 %v2718_v13  ;;  %v428_v40 = vcombine.low %v420_v36, %v427_v37  ;;  %v607_v48 = vrot.slane %v599_v46, %v2911_v17  ;;  %2558 = vmatpush3.bf16.msra.mxu0 %v2734_v61  ;;  %v2116_v4 = vld [vmem:[%s3296_s3] ss:$0 sm:$0xff]  ;;  %v2733_v37 = vld [vmem:[%s3298_s5 + $0x8] sm:$0xff]  }
  0x18   : > { %2463 = vmatprep.subr.bf16.mxu1 %v2719_v18  ;;  %2469 = vmatprep.mubr.bf16.mxu1 %v411_v26  ;;  %v598_v41 = vcombine.low %v590_v38, %v597_v39  ;;  %v614_v49 = vrot.slane %v600_v47, %v2911_v17  ;;  %v2117_v6 = vld [vmem:[%s3297_s4] ss:$0 sm:$0xff]  ;;  %v2735_v38 = vld [vmem:[%s3298_s5 + $0x10] sm:$0xff]   ;;  %v2737_v47 = vld [vmem:[%s3298_s5 + $0x18] sm:$0xff]  }
  0x19   : > { %2559 = vmatprep.subr.bf16.mxu0 %v2802_v2  ;;  %v2731_v35 = vld [vmem:[%s3298_s5] sm:$0xff]   ;;  %v2741_v61 = vld [vmem:[%s3298_s5 + $0x28] sm:$0xff]  }
  0x1a   : > { %v615_v50 = vcombine.low %v607_v48, %v614_v49 }
  0x1b   : > { %2464 = vmatpush3.bf16.msra.mxu1 %v2719_v18  ;;  %2560 = vmatpush3.bf16.msra.mxu0 %v2736_v62  ;;  %v2743_v62 = vld [vmem:[%s3298_s5 + $0x30] sm:$0xff]  }
  0x1c   : > { %2465 = vmatprep.subr.bf16.mxu1 %v2720_v25  ;;  %2561 = vmatprep.subr.bf16.mxu0 %v2802_v2 }
  0x1f   : > { %2466 = vmatpush3.bf16.msra.mxu1 %v2720_v25  ;;  %2562 = vmatpush3.bf16.msra.mxu0 %v2738_v63  ;;  %v729_v63 = vld [vmem:[#allocation2] sm:$0xf] }
  0x20   : > { %2467 = vmatprep.subr.bf16.mxu1 %v2721_v31  ;;  %2563 = vmatprep.subr.bf16.mxu0 %v2802_v2 }
  0x23   : > { %2468 = vmatpush3.bf16.msra.mxu1 %v2721_v31 }
  0x24   : > { %2473 = vmatprep.subr.bf16.mxu1 %v2866_v0 }
  0x26   : > { %2470 = vmatmul.mubr.bf16.vlgmr.msra.gmra.mrb[0].mxu1 %v428_v40 }
  0x27   : > { %2474 = vmatpush3.bf16.msra.mxu1 %v2866_v0  ;;  %2489 = vmatprep.mubr.bf16.mxu1 %v598_v41  ;;  %v2740_v0 = vld [vmem:[%s3298_s5 + $0xe8] sm:$0xff]  }
  0x28   : > { %2475 = vmatprep.subr.bf16.mxu1 %v2871_v1  ;;  %2564 = vmatpush3.bf16.msra.mxu0 %v2740_v0 }
  0x29   : > { %2565 = vmatprep.subr.bf16.mxu0 %v2802_v2 }
  0x2b   : > { %2476 = vmatpush3.bf16.msra.mxu1 %v2871_v1  ;;  %v2742_v1 = vld [vmem:[%s3298_s5 + $0xf0] sm:$0xff]  }
  0x2c   : > { %2477 = vmatprep.subr.bf16.mxu1 %v2716_v3  ;;  %2566 = vmatpush3.bf16.msra.mxu0 %v2742_v1 }
  0x2d   : > { %2567 = vmatprep.subr.bf16.mxu0 %v2802_v2 }
  0x2f   : > { %2478 = vmatpush3.bf16.msra.mxu1 %v2716_v3  ;;  %v2744_v3 = vld [vmem:[%s3298_s5 + $0xf8] sm:$0xff]  }
  0x30   : > { %2479 = vmatprep.subr.bf16.mxu1 %v2717_v5  ;;  %2568 = vmatpush3.bf16.msra.mxu0 %v2744_v3 }
  0x31   : > { %2573 = vmatprep.subr.bf16.mxu0 %v2802_v2 }
  0x33   : > { %2480 = vmatpush3.bf16.msra.mxu1 %v2717_v5 }
  0x34   : > { %2481 = vmatprep.subr.bf16.mxu1 %v2718_v13 }
  0x37   : > { %2482 = vmatpush3.bf16.msra.mxu1 %v2718_v13 }
  0x38   : > { %2483 = vmatprep.subr.bf16.mxu1 %v2719_v18 }
  0x3b   : > { %2484 = vmatpush3.bf16.msra.mxu1 %v2719_v18 }
  0x3c   : > { %2485 = vmatprep.subr.bf16.mxu1 %v2720_v25 }
  0x3f   : > { %2486 = vmatpush3.bf16.msra.mxu1 %v2720_v25 }
  0x40   : > { %2487 = vmatprep.subr.bf16.mxu1 %v2721_v31 }
  0x43   : > { %2488 = vmatpush3.bf16.msra.mxu1 %v2721_v31 }
  0x44   : > { %2493 = vmatprep.subr.bf16.mxu1 %v2802_v2 }
  0x46   : > { %2490 = vmatmul.mubr.bf16.vlgmr.msra.gmra.mrb[4].mxu1 %v615_v50 }
  0x47   : > { %2494 = vmatpush3.bf16.msra.mxu1 %v2722_v51  ;;  %2509 = vmatprep.mubr.msk.bf16.mxu1 %vm2804_vm0, %v2802_v2 }
  0x48   : > { %2495 = vmatprep.subr.bf16.mxu1 %v2802_v2 }
  0x4b   : > { %2496 = vmatpush3.bf16.msra.mxu1 %v2723_v52 }
  0x4c   : > { %2497 = vmatprep.subr.bf16.mxu1 %v2802_v2 }
  0x4f   : > { %2498 = vmatpush3.bf16.msra.mxu1 %v2724_v53 }
  0x50   : > { %2499 = vmatprep.subr.bf16.mxu1 %v2802_v2 }
  0x53   : > { %2500 = vmatpush3.bf16.msra.mxu1 %v2725_v54 }
  0x54   : > { %2501 = vmatprep.subr.bf16.mxu1 %v2802_v2 }
  0x57   : > { %2502 = vmatpush3.bf16.msra.mxu1 %v2726_v55 }
  0x58   : > { %2503 = vmatprep.subr.bf16.mxu1 %v2802_v2 }
  0x5b   : > { %2504 = vmatpush3.bf16.msra.mxu1 %v2727_v56  ;;  %v2739_v56 = vld [vmem:[%s3298_s5 + $0x20] sm:$0xff]  }
  0x5c   : > { %2505 = vmatprep.subr.bf16.mxu1 %v2802_v2 }
  0x5f   : > { %2506 = vmatpush3.bf16.msra.mxu1 %v2728_v58 }
  0x60   : > { %2507 = vmatprep.subr.bf16.mxu1 %v2802_v2 }
  0x63   : > { %2508 = vmatpush3.bf16.msra.mxu1 %v2729_v59 }
  0x64   : > { %2513 = vmatprep.subr.bf16.mxu1 %v2802_v2 }
  0xf9   : > { %v2471_v5 = vpop.f32.mrb[0].mxu1 }
  0xfa   : > { %v537_v7 = vmul.f32 %v2471_v5, %v2116_v4  ;;  %v513_v8 = vpop.f32.mrb[1].mxu1 }
  0xfb   : > { %v535_v9 = vmul.f32 %v2116_v4, %v513_v8  ;;  %v2472_v10 = vpop.f32.mrb[2].mxu1 }
  0xfc   : > { %v548_v11 = vadd.f32 %v2117_v6, %v537_v7  ;;  %v538_v12 = vmul.f32 %v2472_v10, %v2116_v4  ;;  %v516_v13 = vpop.f32.mrb[3].mxu1 }
  0xfd   : > { %v546_v14 = vadd.f32 %v2117_v6, %v535_v9  ;;  %v536_v15 = vmul.f32 %v2116_v4, %v516_v13  ;;  %v2745_v9 = vld [vmem:[%s3298_s5 + $0x38] sm:$0xff]  }
  0xfe   : > { %v552_v16 = vmax.f32 %v548_v11, 0.0  ;;  %v549_v18 = vadd.f32 %v2117_v6, %v538_v12 }
  0xff   : > { %v550_v19 = vmax.f32 %v546_v14, 0.0  ;;  %v547_v20 = vadd.f32 %v2117_v6, %v536_v15  ;;  %v2746_v15 = vld [vmem:[%s3298_s5 + $0x100] sm:$0xff]  }
 0x100   : > { %v560_v21 = vcombine.high %v552_v16, %v552_v16  ;;  %725 = vst [vmem:[#allocation3 + $0x14] sm:$0xf] %v552_v16  ;;  %v553_v22 = vmax.f32 %v549_v18, 0.0 }
 0x101   : > { %v558_v23 = vcombine.high %v550_v19, %v550_v19  ;;  %721 = vst [vmem:[#allocation3 + $0x4] sm:$0xf] %v550_v19  ;;  %v551_v24 = vmax.f32 %v547_v20, 0.0  ;;  %v2747_v20 = vld [vmem:[%s3298_s5 + $0x80] sm:$0xff]  }
 0x102   : > { %726 = vst [vmem:[#allocation3 + $0x18] sm:$0xf] %v560_v21  ;;  %v561_v25 = vcombine.high %v553_v22, %v553_v22  ;;  %727 = vst [vmem:[#allocation3 + $0x1c] sm:$0xf] %v553_v22  ;;  %v2748_v22 = vld [vmem:[%s3298_s5 + $0x108] sm:$0xff]  }
 0x103   : > { %722 = vst [vmem:[#allocation3 + $0x8] sm:$0xf] %v558_v23  ;;  %v559_v26 = vcombine.high %v551_v24, %v551_v24  ;;  %723 = vst [vmem:[#allocation3 + $0xc] sm:$0xf] %v551_v24  ;;  %v2749_v23 = vld [vmem:[%s3298_s5 + $0x88] sm:$0xff]   ;;  %v2750_v24 = vld [vmem:[%s3298_s5 + $0x110] sm:$0xff]  }
 0x104   : > { %728 = vst [vmem:[#allocation3 + $0x20] sm:$0xf] %v561_v25  ;;  %v2751_v25 = vld [vmem:[%s3298_s5 + $0x90] sm:$0xff]  }
 0x105   : > { %724 = vst [vmem:[#allocation3 + $0x10] sm:$0xf] %v559_v26  ;;  %v2752_v26 = vld [vmem:[%s3298_s5 + $0x118] sm:$0xff]  }
 0x109   : > { %v756_v31 = vld [vmem:[#allocation3 + $0x18] sm:$0xf] }
 0x10a   : > { %v754_v28 = vld [vmem:[#allocation3 + $0x8] sm:$0xf] }
 0x10b   : > { %v2134_v29 = vpack.c.bf16 %v754_v28, %v753_v27  ;;  %v2753_v27 = vld [vmem:[%s3298_s5 + $0x98] sm:$0xff]   ;;  %v2754_v28 = vld [vmem:[%s3298_s5 + $0x120] sm:$0xff]  }
 0x10c   : > { %v755_v30 = vld [vmem:[#allocation3 + $0x10] sm:$0xf] }
 0x10d   : > { %v2135_v32 = vpack.c.bf16 %v756_v31, %v755_v30  ;;  %v790_v33 = vrot.slane %v2134_v29, %v2911_v17  ;;  %v2755_v29 = vld [vmem:[%s3298_s5 + $0xa0] sm:$0xff]   ;;  %v2756_v30 = vld [vmem:[%s3298_s5 + $0x128] sm:$0xff]  }
 0x10e   : > { %v2757_v31 = vld [vmem:[%s3298_s5 + $0xa8] sm:$0xff]  }
 0x10f   : > { %v797_v34 = vrot.slane %v2135_v32, %v2911_v17  ;;  %v1277_v32 = vld [vmem:[#allocation3 + $0xc] sm:$0xf] }
 0x111   : > { %v798_v36 = vcombine.low %v790_v33, %v797_v34  ;;  %v1278_v33 = vld [vmem:[#allocation3 + $0x14] sm:$0xf]  ;;  %v1279_v34 = vld [vmem:[#allocation3 + $0x1c] sm:$0xf] }
 0x113   : > { %2510 = vmatmul.mubr.bf16.vlgmr.msra.gmra.mrb[8].mxu1 %v798_v36  ;;  %v1276_v36 = vld [vmem:[#allocation3 + $0x4] sm:$0xf] }
 0x114   : > { %2514 = vmatpush3.bf16.msra.mxu1 %v2731_v35  ;;  %2529 = vmatprep.mubr.msk.bf16.mxu1 %vm2804_vm0, %v2802_v2  ;;  %v2758_v35 = vld [vmem:[%s3298_s5 + $0x130] sm:$0xff]  }
 0x115   : > { %2515 = vmatprep.subr.bf16.mxu1 %v2802_v2 }
 0x118   : > { %2516 = vmatpush3.bf16.msra.mxu1 %v2733_v37 }
 0x119   : > { %v2491_v39 = vpop.f32.mrb[4].mxu1  ;;  %2517 = vmatprep.subr.bf16.mxu1 %v2802_v2 }
 0x11a   : > { %v669_v40 = vmul.f32 %v2491_v39, %v2116_v4  ;;  %v652_v41 = vpop.f32.mrb[5].mxu1  ;;  %v2223_v39 = vpack.c.bf16 %v1279_v34, %v1278_v33  ;;  %v1694_v33 = vld [vmem:[#allocation3 + $0x18] sm:$0xf]  ;;  %v1695_v34 = vld [vmem:[#allocation3 + $0x20] sm:$0xf] }
 0x11b   : > { %v667_v42 = vmul.f32 %v2116_v4, %v652_v41  ;;  %v2492_v43 = vpop.f32.mrb[6].mxu1  ;;  %v2759_v41 = vld [vmem:[%s3298_s5 + $0xb0] sm:$0xff]  }
 0x11c   : > { %v673_v44 = vadd.f32 %v2117_v6, %v669_v40  ;;  %v670_v45 = vmul.f32 %v2492_v43, %v2116_v4  ;;  %2518 = vmatpush3.bf16.msra.mxu1 %v2735_v38  ;;  %v655_v46 = vpop.f32.mrb[7].mxu1  ;;  %v2222_v38 = vpack.c.bf16 %v1277_v32, %v1276_v36  ;;  %v1000_v40 = vld [vmem:[#allocation2 + $0x1] sm:$0xf]  ;;  %v1692_v36 = vld [vmem:[#allocation3 + $0x8] sm:$0xf] }
 0x11d   : > { %v671_v48 = vadd.f32 %v2117_v6, %v667_v42  ;;  %v668_v49 = vmul.f32 %v2116_v4, %v655_v46  ;;  %2519 = vmatprep.subr.bf16.mxu1 %v2802_v2  ;;  %v1693_v32 = vld [vmem:[#allocation3 + $0x10] sm:$0xf] }
 0x11e   : > { %v677_v50 = vmax.f32 %v673_v44, 0.0  ;;  %v674_v51 = vadd.f32 %v2117_v6, %v670_v45  ;;  %v2760_v45 = vld [vmem:[%s3298_s5 + $0x138] sm:$0xff]   ;;  %v1313_v46 = vrot.slane %v2222_v38, %v2911_v17  ;;  %v2301_v38 = vpack.c.bf16 %v1695_v34, %v1694_v33 }
 0x11f   : > { %v675_v52 = vmax.f32 %v671_v48, 0.0  ;;  %v672_v53 = vadd.f32 %v2117_v6, %v668_v49  ;;  %v2761_v49 = vld [vmem:[%s3298_s5 + $0xb8] sm:$0xff]  }
 0x120   : > { %v685_v54 = vcombine.high %v677_v50, %v677_v50  ;;  %716 = vst [vmem:[#allocation2 + $0x29] sm:$0xf] %v677_v50  ;;  %v678_v55 = vmax.f32 %v674_v51, 0.0  ;;  %2520 = vmatpush3.bf16.msra.mxu1 %v2737_v47  ;;  %v1320_v47 = vrot.slane %v2223_v39, %v2911_v17  ;;  %v2762_v51 = vld [vmem:[%s3298_s5 + $0x140] sm:$0xff]   ;;  %v2785_v39 = vld [vmem:[%s3298_s5 + $0x1f8] sm:$0xff]  }
 0x121   : > { %v683_v57 = vcombine.high %v675_v52, %v675_v52  ;;  %712 = vst [vmem:[#allocation2 + $0x9] sm:$0xf] %v675_v52  ;;  %v676_v58 = vmax.f32 %v672_v53, 0.0  ;;  %2521 = vmatprep.subr.bf16.mxu1 %v2802_v2 }
 0x122   : > { %717 = vst [vmem:[#allocation2 + $0x31] sm:$0xf] %v685_v54  ;;  %v686_v59 = vcombine.high %v678_v55, %v678_v55  ;;  %718 = vst [vmem:[#allocation2 + $0x39] sm:$0xf] %v678_v55  ;;  %v1321_v52 = vcombine.low %v1313_v46, %v1320_v47  ;;  %v2763_v55 = vld [vmem:[%s3298_s5 + $0x148] sm:$0xff]   ;;  %v2789_v46 = vld [vmem:[%s3298_s5 + $0x218] sm:$0xff]  }
 0x123   : > { %713 = vst [vmem:[#allocation2 + $0x11] sm:$0xf] %v683_v57  ;;  %v684_v60 = vcombine.high %v676_v58, %v676_v58  ;;  %714 = vst [vmem:[#allocation2 + $0x19] sm:$0xf] %v676_v58  ;;  %v2765_v57 = vld [vmem:[%s3298_s5 + $0x158] sm:$0xff]   ;;  %v2766_v58 = vld [vmem:[%s3298_s5 + $0x160] sm:$0xff]  }
 0x124   : > { %719 = vst [vmem:[#allocation2 + $0x41] sm:$0xf] %v686_v59  ;;  %2522 = vmatpush3.bf16.msra.mxu1 %v2739_v56  ;;  %v2764_v56 = vld [vmem:[%s3298_s5 + $0x150] sm:$0xff]   ;;  %v2767_v59 = vld [vmem:[%s3298_s5 + $0x168] sm:$0xff]   ;;  %v2790_v47 = vld [vmem:[%s3298_s5 + $0x220] sm:$0xff]  }
 0x125   : > { %715 = vst [vmem:[#allocation2 + $0x21] sm:$0xf] %v684_v60  ;;  %2523 = vmatprep.subr.bf16.mxu1 %v2802_v2 }
 0x127   : > { %v1140_v0 = vld [vmem:[#allocation2 + $0x28] sm:$0xf] }
 0x128   : > { %2524 = vmatpush3.bf16.msra.mxu1 %v2741_v61  ;;  %v1138_v3 = vld [vmem:[#allocation2 + $0x8] sm:$0xf] }
 0x129   : > { %2525 = vmatprep.subr.bf16.mxu1 %v2802_v2  ;;  %v1141_v1 = vld [vmem:[#allocation2 + $0x38] sm:$0xf]  ;;  %v732_v12 = vld [vmem:[#allocation2 + $0x30] sm:$0xf] }
 0x12a   : > { %v1139_v4 = vld [vmem:[#allocation2 + $0x18] sm:$0xf]  ;;  %v2197_v5 = vpack.c.bf16 %v1141_v1, %v1140_v0  ;;  %v730_v6 = vld [vmem:[#allocation2 + $0x10] sm:$0xf]  ;;  %v1416_v0 = vld [vmem:[#allocation2 + $0x29] sm:$0xf] }
 0x12b   : > { %v2196_v7 = vpack.c.bf16 %v1139_v4, %v1138_v3  ;;  %v2144_v8 = vpack.c.bf16 %v730_v6, %v729_v63  ;;  %v1001_v42 = vld [vmem:[#allocation2 + $0x11] sm:$0xf]  ;;  %v1415_v60 = vld [vmem:[#allocation2 + $0x19] sm:$0xf]  ;;  %v1414_v63 = vld [vmem:[#allocation2 + $0x9] sm:$0xf] }
 0x12c   : > { %2526 = vmatpush3.bf16.msra.mxu1 %v2743_v62  ;;  %v1182_v10 = vrot.slane %v2197_v5, %v2911_v17  ;;  %v731_v11 = vld [vmem:[#allocation2 + $0x20] sm:$0xf]  ;;  %v1003_v43 = vld [vmem:[#allocation2 + $0x31] sm:$0xf]  ;;  %v2170_v48 = vpack.c.bf16 %v1001_v42, %v1000_v40  ;;  %v1417_v61 = vld [vmem:[#allocation2 + $0x39] sm:$0xf]  ;;  %v2248_v1 = vpack.c.bf16 %v1415_v60, %v1414_v63 }
 0x12d   : > { %2527 = vmatprep.subr.bf16.mxu1 %v2802_v2  ;;  %v1175_v13 = vrot.slane %v2196_v7, %v2911_v17  ;;  %v2145_v14 = vpack.c.bf16 %v732_v12, %v731_v11  ;;  %v901_v18 = vrot.slane %v2144_v8, %v2911_v17  ;;  %v1002_v37 = vld [vmem:[#allocation2 + $0x21] sm:$0xf]  ;;  %v2768_v62 = vld [vmem:[%s3298_s5 + $0x170] sm:$0xff]   ;;  %v2249_v3 = vpack.c.bf16 %v1417_v61, %v1416_v0  ;;  %v2769_v4 = vld [vmem:[%s3298_s5 + $0x178] sm:$0xff]  }
 0x12e   : > { %v2171_v44 = vpack.c.bf16 %v1003_v43, %v1002_v37  ;;  %v1037_v53 = vrot.slane %v2170_v48, %v2911_v17  ;;  %v1451_v5 = vrot.slane %v2248_v1, %v2911_v17  ;;  %v2770_v7 = vld [vmem:[%s3298_s5 + $0x180] sm:$0xff]   ;;  %v2773_v11 = vld [vmem:[%s3298_s5 + $0x198] sm:$0xff]   ;;  %v2300_v37 = vpack.c.bf16 %v1693_v32, %v1692_v36  ;;  %v2791_v48 = vld [vmem:[%s3298_s5 + $0x228] sm:$0xff]  }
 0x12f   : > { %v1183_v16 = vcombine.low %v1175_v13, %v1182_v10  ;;  %v908_v19 = vrot.slane %v2145_v14, %v2911_v17  ;;  %v1458_v6 = vrot.slane %v2249_v3, %v2911_v17  ;;  %v2772_v10 = vld [vmem:[%s3298_s5 + $0x190] sm:$0xff]   ;;  %v2774_v12 = vld [vmem:[%s3298_s5 + $0x1a0] sm:$0xff]   ;;  %v2775_v13 = vld [vmem:[%s3298_s5 + $0x1a8] sm:$0xff]  }
 0x130   : > { %2528 = vmatpush3.bf16.msra.mxu1 %v2745_v9  ;;  %v1044_v50 = vrot.slane %v2171_v44, %v2911_v17  ;;  %v2771_v9 = vld [vmem:[%s3298_s5 + $0x188] sm:$0xff]   ;;  %v1554_v14 = vld [vmem:[#allocation2 + $0x20] sm:$0xf]  ;;  %v1729_v40 = vrot.slane %v2300_v37, %v2911_v17 }
 0x131   : > { %2570 = vmatmul.mubr.bf16.vlgmr.msra.gmra.mrb[0].mxu0 %v1183_v16  ;;  %2533 = vmatprep.subr.bf16.mxu1 %v2802_v2  ;;  %v909_v21 = vcombine.low %v901_v18, %v908_v19  ;;  %v1459_v8 = vcombine.low %v1451_v5, %v1458_v6  ;;  %v2776_v16 = vld [vmem:[%s3298_s5 + $0x1b0] sm:$0xff]   ;;  %v2786_v42 = vld [vmem:[%s3298_s5 + $0x200] sm:$0xff]   ;;  %v2787_v44 = vld [vmem:[%s3298_s5 + $0x208] sm:$0xff]  }
 0x132   : > { %2574 = vmatpush3.bf16.msra.mxu0 %v2746_v15  ;;  %2589 = vmatprep.mubr.msk.bf16.mxu0 %vm2804_vm0, %v2802_v2  ;;  %v1045_v54 = vcombine.low %v1037_v53, %v1044_v50  ;;  %v1556_v15 = vld [vmem:[#allocation2 + $0x40] sm:$0xf]  ;;  %v1553_v18 = vld [vmem:[#allocation2 + $0x10] sm:$0xf] }
 0x133   : > { %2530 = vmatmul.mubr.bf16.vlgmr.msra.gmra.mrb[8].mxu1 %v909_v21  ;;  %2575 = vmatprep.subr.bf16.mxu0 %v2802_v2  ;;  %v1555_v19 = vld [vmem:[#allocation2 + $0x30] sm:$0xf]  ;;  %v1833_v50 = vld [vmem:[#allocation2 + $0x41] sm:$0xf]  ;;  %v2336_v1 = vld [vmem:[%s3299_s6] ss:$0 sm:$0xff] }
 0x134   : > { %2534 = vmatpush3.bf16.msra.mxu1 %v2747_v20  ;;  %2549 = vmatprep.mubr.msk.bf16.mxu1 %vm2804_vm0, %v2802_v2  ;;  %v2274_v20 = vpack.c.bf16 %v1554_v14, %v1553_v18  ;;  %v2275_v21 = vpack.c.bf16 %v1556_v15, %v1555_v19  ;;  %v1832_v53 = vld [vmem:[#allocation2 + $0x31] sm:$0xf] }
 0x135   : > { %2535 = vmatprep.subr.bf16.mxu1 %v2802_v2 }
 0x136   : > { %2576 = vmatpush3.bf16.msra.mxu0 %v2748_v22  ;;  %v2777_v22 = vld [vmem:[%s3298_s5 + $0x1b8] sm:$0xff]  }
 0x137   : > { %2577 = vmatprep.subr.bf16.mxu0 %v2802_v2 }
 0x138   : > { %2536 = vmatpush3.bf16.msra.mxu1 %v2749_v23  ;;  %v1590_v23 = vrot.slane %v2274_v20, %v2911_v17 }
 0x139   : > { %2537 = vmatprep.subr.bf16.mxu1 %v2802_v2 }
 0x13a   : > { %2578 = vmatpush3.bf16.msra.mxu0 %v2750_v24  ;;  %v1597_v24 = vrot.slane %v2275_v21, %v2911_v17 }
 0x13b   : > { %2579 = vmatprep.subr.bf16.mxu0 %v2802_v2 }
 0x13c   : > { %2538 = vmatpush3.bf16.msra.mxu1 %v2751_v25  ;;  %v2778_v25 = vld [vmem:[%s3298_s5 + $0x1c0] sm:$0xff]  }
 0x13d   : > { %2539 = vmatprep.subr.bf16.mxu1 %v2802_v2 }
 0x13e   : > { %2580 = vmatpush3.bf16.msra.mxu0 %v2752_v26  ;;  %v1598_v26 = vcombine.low %v1590_v23, %v1597_v24 }
 0x13f   : > { %2581 = vmatprep.subr.bf16.mxu0 %v2802_v2 }
 0x140   : > { %2540 = vmatpush3.bf16.msra.mxu1 %v2753_v27  ;;  %v2779_v27 = vld [vmem:[%s3298_s5 + $0x1c8] sm:$0xff]  }
 0x141   : > { %2541 = vmatprep.subr.bf16.mxu1 %v2802_v2 }
 0x142   : > { %2582 = vmatpush3.bf16.msra.mxu0 %v2754_v28  ;;  %v2780_v28 = vld [vmem:[%s3298_s5 + $0x1d0] sm:$0xff]  }
 0x143   : > { %2583 = vmatprep.subr.bf16.mxu0 %v2802_v2 }
 0x144   : > { %2542 = vmatpush3.bf16.msra.mxu1 %v2755_v29  ;;  %v2781_v29 = vld [vmem:[%s3298_s5 + $0x1d8] sm:$0xff]  }
 0x145   : > { %2543 = vmatprep.subr.bf16.mxu1 %v2802_v2 }
 0x146   : > { %2584 = vmatpush3.bf16.msra.mxu0 %v2756_v30  ;;  %v2782_v30 = vld [vmem:[%s3298_s5 + $0x1e0] sm:$0xff]  }
 0x147   : > { %2585 = vmatprep.subr.bf16.mxu0 %v2802_v2 }
 0x148   : > { %2544 = vmatpush3.bf16.msra.mxu1 %v2757_v31  ;;  %v2783_v31 = vld [vmem:[%s3298_s5 + $0x1e8] sm:$0xff]  }
 0x149   : > { %2545 = vmatprep.subr.bf16.mxu1 %v2802_v2 }
 0x14a   : > { %2586 = vmatpush3.bf16.msra.mxu0 %v2758_v35  ;;  %v2784_v35 = vld [vmem:[%s3298_s5 + $0x1f0] sm:$0xff]  }
 0x14b   : > { %2587 = vmatprep.subr.bf16.mxu0 %v2802_v2 }
 0x14c   : > { %2546 = vmatpush3.bf16.msra.mxu1 %v2759_v41  ;;  %v1736_v41 = vrot.slane %v2301_v38, %v2911_v17 }
 0x14d   : > { %2547 = vmatprep.subr.bf16.mxu1 %v2802_v2 }
 0x14e   : > { %2588 = vmatpush3.bf16.msra.mxu0 %v2760_v45  ;;  %v1737_v43 = vcombine.low %v1729_v40, %v1736_v41  ;;  %v2788_v45 = vld [vmem:[%s3298_s5 + $0x210] sm:$0xff]  }
 0x14f   : > { %2593 = vmatprep.subr.bf16.mxu0 %v2802_v2 }
 0x150   : > { %2548 = vmatpush3.bf16.msra.mxu1 %v2761_v49  ;;  %v1831_v49 = vld [vmem:[#allocation2 + $0x21] sm:$0xf] }
 0x151   : > { %2590 = vmatmul.mubr.bf16.vlgmr.msra.gmra.mrb[0].mxu0 %v1321_v52  ;;  %v1830_v52 = vld [vmem:[#allocation2 + $0x11] sm:$0xf] }
 0x152   : > { %2594 = vmatpush3.bf16.msra.mxu0 %v2762_v51  ;;  %2609 = vmatprep.mubr.msk.bf16.mxu0 %vm2804_vm0, %v2802_v2  ;;  %v2792_v51 = vld [vmem:[%s3298_s5 + $0x230] sm:$0xff]  }
 0x153   : > { %2550 = vmatmul.mubr.bf16.vlgmr.msra.gmra.mrb[8].mxu1 %v1045_v54  ;;  %2595 = vmatprep.subr.bf16.mxu0 %v2802_v2  ;;  %v2326_v54 = vpack.c.bf16 %v1831_v49, %v1830_v52 }
 0x156   : > { %2596 = vmatpush3.bf16.msra.mxu0 %v2763_v55  ;;  %v2327_v55 = vpack.c.bf16 %v1833_v50, %v1832_v53 }
 0x157   : > { %2597 = vmatprep.subr.bf16.mxu0 %v2802_v2 }
 0x15a   : > { %2598 = vmatpush3.bf16.msra.mxu0 %v2764_v56  ;;  %v2793_v56 = vld [vmem:[%s3298_s5 + $0x238] sm:$0xff]  }
 0x15b   : > { %2599 = vmatprep.subr.bf16.mxu0 %v2802_v2 }
 0x15e   : > { %2600 = vmatpush3.bf16.msra.mxu0 %v2765_v57  ;;  %v1867_v57 = vrot.slane %v2326_v54, %v2911_v17 }
 0x15f   : > { %2601 = vmatprep.subr.bf16.mxu0 %v2802_v2 }
 0x162   : > { %2602 = vmatpush3.bf16.msra.mxu0 %v2766_v58  ;;  %v1874_v58 = vrot.slane %v2327_v55, %v2911_v17  ;;  %v2337_v17 = vld [vmem:[%s3300_s7] ss:$0 sm:$0xff] }
 0x163   : > { %2603 = vmatprep.subr.bf16.mxu0 %v2802_v2 }
 0x166   : > { %2604 = vmatpush3.bf16.msra.mxu0 %v2767_v59  ;;  %v1875_v59 = vcombine.low %v1867_v57, %v1874_v58 }
 0x167   : > { %2605 = vmatprep.subr.bf16.mxu0 %v2802_v2 }
 0x16a   : > { %2606 = vmatpush3.bf16.msra.mxu0 %v2768_v62 }
 0x16b   : > { %2607 = vmatprep.subr.bf16.mxu0 %v2802_v2 }
 0x16e   : > { %2608 = vmatpush3.bf16.msra.mxu0 %v2769_v4 }
 0x16f   : > { %2613 = vmatprep.subr.bf16.mxu0 %v2802_v2 }
 0x171   : > { %2610 = vmatmul.mubr.bf16.vlgmr.msra.gmra.mrb[0].mxu0 %v1459_v8 }
 0x172   : > { %2614 = vmatpush3.bf16.msra.mxu0 %v2770_v7  ;;  %2629 = vmatprep.mubr.msk.bf16.mxu0 %vm2804_vm0, %v2802_v2 }
 0x173   : > { %2615 = vmatprep.subr.bf16.mxu0 %v2802_v2 }
 0x176   : > { %2616 = vmatpush3.bf16.msra.mxu0 %v2771_v9 }
 0x177   : > { %2617 = vmatprep.subr.bf16.mxu0 %v2802_v2 }
 0x17a   : > { %2618 = vmatpush3.bf16.msra.mxu0 %v2772_v10 }
 0x17b   : > { %2619 = vmatprep.subr.bf16.mxu0 %v2802_v2 }
 0x17e   : > { %2620 = vmatpush3.bf16.msra.mxu0 %v2773_v11 }
 0x17f   : > { %2621 = vmatprep.subr.bf16.mxu0 %v2802_v2 }
 0x182   : > { %2622 = vmatpush3.bf16.msra.mxu0 %v2774_v12 }
 0x183   : > { %2623 = vmatprep.subr.bf16.mxu0 %v2802_v2 }
 0x186   : > { %2624 = vmatpush3.bf16.msra.mxu0 %v2775_v13 }
 0x187   : > { %2625 = vmatprep.subr.bf16.mxu0 %v2802_v2 }
 0x18a   : > { %2626 = vmatpush3.bf16.msra.mxu0 %v2776_v16 }
 0x18b   : > { %2627 = vmatprep.subr.bf16.mxu0 %v2802_v2 }
 0x18e   : > { %2628 = vmatpush3.bf16.msra.mxu0 %v2777_v22 }
 0x18f   : > { %2633 = vmatprep.subr.bf16.mxu0 %v2802_v2 }
 0x191   : > { %2630 = vmatmul.mubr.bf16.vlgmr.msra.gmra.mrb[0].mxu0 %v1598_v26 }
 0x192   : > { %2634 = vmatpush3.bf16.msra.mxu0 %v2778_v25  ;;  %2649 = vmatprep.mubr.msk.bf16.mxu0 %vm2804_vm0, %v2802_v2 }
 0x193   : > { %2635 = vmatprep.subr.bf16.mxu0 %v2802_v2 }
 0x196   : > { %2636 = vmatpush3.bf16.msra.mxu0 %v2779_v27 }
 0x197   : > { %2637 = vmatprep.subr.bf16.mxu0 %v2802_v2 }
 0x19a   : > { %2638 = vmatpush3.bf16.msra.mxu0 %v2780_v28 }
 0x19b   : > { %2639 = vmatprep.subr.bf16.mxu0 %v2802_v2 }
 0x19e   : > { %2640 = vmatpush3.bf16.msra.mxu0 %v2781_v29 }
 0x19f   : > { %2641 = vmatprep.subr.bf16.mxu0 %v2802_v2 }
 0x1a2   : > { %2642 = vmatpush3.bf16.msra.mxu0 %v2782_v30 }
 0x1a3   : > { %2643 = vmatprep.subr.bf16.mxu0 %v2802_v2 }
 0x1a6   : > { %2644 = vmatpush3.bf16.msra.mxu0 %v2783_v31 }
 0x1a7   : > { %2645 = vmatprep.subr.bf16.mxu0 %v2802_v2 }
 0x1aa   : > { %2646 = vmatpush3.bf16.msra.mxu0 %v2784_v35 }
 0x1ab   : > { %2647 = vmatprep.subr.bf16.mxu0 %v2802_v2 }
 0x1ae   : > { %2648 = vmatpush3.bf16.msra.mxu0 %v2785_v39 }
 0x1af   : > { %2653 = vmatprep.subr.bf16.mxu0 %v2802_v2 }
 0x1b1   : > { %2650 = vmatmul.mubr.bf16.vlgmr.msra.gmra.mrb[0].mxu0 %v1737_v43 }
 0x1b2   : > { %2654 = vmatpush3.bf16.msra.mxu0 %v2786_v42  ;;  %2669 = vmatprep.mubr.msk.bf16.mxu0 %vm2804_vm0, %v2802_v2 }
 0x1b3   : > { %2655 = vmatprep.subr.bf16.mxu0 %v2802_v2 }
 0x1b6   : > { %2656 = vmatpush3.bf16.msra.mxu0 %v2787_v44 }
 0x1b7   : > { %2657 = vmatprep.subr.bf16.mxu0 %v2802_v2 }
 0x1ba   : > { %2658 = vmatpush3.bf16.msra.mxu0 %v2788_v45 }
 0x1bb   : > { %2659 = vmatprep.subr.bf16.mxu0 %v2802_v2 }
 0x1be   : > { %2660 = vmatpush3.bf16.msra.mxu0 %v2789_v46 }
 0x1bf   : > { %2661 = vmatprep.subr.bf16.mxu0 %v2802_v2 }
 0x1c2   : > { %2662 = vmatpush3.bf16.msra.mxu0 %v2790_v47 }
 0x1c3   : > { %2663 = vmatprep.subr.bf16.mxu0 %v2802_v2 }
 0x1c6   : > { %2664 = vmatpush3.bf16.msra.mxu0 %v2791_v48 }
 0x1c7   : > { %2665 = vmatprep.subr.bf16.mxu0 %v2802_v2 }
 0x1ca   : > { %2666 = vmatpush3.bf16.msra.mxu0 %v2792_v51 }
 0x1cb   : > { %2667 = vmatprep.subr.bf16.mxu0 %v2802_v2 }
 0x1ce   : > { %2668 = vmatpush3.bf16.msra.mxu0 %v2793_v56 }
 0x1d1   : > { %2670 = vmatmul.mubr.bf16.vlgmr.msra.gmra.mrb[0].mxu0 %v1875_v59 }
 0x226   : > { %v1129_v60 = vpop.f32.mrb[8].mxu1 }
 0x227   : > { %v2551_v61 = vpop.f32.mrb[9].mxu1 }
 0x228   : > { %v1132_v62 = vpop.f32.mrb[10].mxu1 }
 0x229   : > { %v2552_v63 = vpop.f32.mrb[11].mxu1 }
 0x2a4   : > { %v1959_v0 = vpop.f32.mrb[0].mxu0 }
 0x2a5   : > { %v2673_v3 = vadd.f32 %v1959_v0, %v1129_v60  ;;  %v2671_v4 = vpop.f32.mrb[1].mxu0 }
 0x2a6   : > { %v1962_v2 = vpop.f32.mrb[2].mxu0 }
 0x2a7   : > { %v1975_v5 = vmul.f32 %v2673_v3, %v2336_v1  ;;  %v2674_v6 = vadd.f32 %v1962_v2, %v1132_v62  ;;  %v2672_v7 = vpop.f32.mrb[3].mxu0 }
 0x2a9   : > { %v1976_v8 = vmul.f32 %v2674_v6, %v2336_v1  ;;  %v1984_v9 = vadd.f32 %v2337_v17, %v1975_v5 }
 0x2ab   : > { %v1985_v10 = vadd.f32 %v2337_v17, %v1976_v8 }
 0x2ad   : > { %v2350_v11 = vpack.c.bf16 %v1985_v10, %v1984_v9  ;;  %v1996_v12 = vadd.f32 %v1985_v10, %v1984_v9 }
 0x2af   : > { %2351 = vst [vmem:[%s358_s18] sm:$0xff] %v2350_v11   ;;  %v1997_v13 = vrot.slane %v1996_v12, 4 }
 0x2b1   : > { %v1998_v14 = vadd.f32 %v1997_v13, %v1996_v12 }
 0x2b3   : > { %v1999_v15 = vrot.slane %v1998_v14, 2 }
 0x2b5   : > { %v2000_v16 = vadd.f32 %v1999_v15, %v1998_v14 }
 0x2b7   : > { %v2001_v18 = vrot.slane %v2000_v16, 1 }
 0x2b9   : > { %v2002_v19 = vadd.f32 %v2001_v18, %v2000_v16 }
 0x2bb   : > { %v2003_v20 = vmul.f32 0.0625, %v2002_v19 }
 0x2bd   : > { %2004 = vst [vmem:[%s361_s21] sm:$0x1] %v2003_v20 }
 0x2be PF: > { %s20_s30 = sadd.s32 1, %s2800_s30  }
 0x2bf   : > { %p17_p4 = scmp.ge.s32.totalorder %s20_s30, 4  }
 0x2c1   :  { %19 = sbr.rel (!%p17_p4) target bundleno = 1 (0x1), region = 109 }

// kernel: _lambda_.15
= control target key start
LH: loop header
LB: loop body
LE: loop exit
PB: predicated region body
PF: predicated region fallthrough
CT: control target
= control target key end

     0   :  { %s2560_s27 = smov 0   ;;  %s2968_s0 = inlined_call_operand.vmem [shape: bf16[2,4,4,128], index: 0, kind: input, shape index: {}]   ;;  %s2969_s1 = inlined_call_operand.vmem [shape: bf16[128,128], index: 1, kind: input, shape index: {}]   ;;  %s2970_s2 = inlined_call_operand.vmem [shape: f32[1,128], index: 2, kind: input, shape index: {}, may-alias: {2,5}]   ;;  %s2971_s3 = inlined_call_operand.vmem [shape: f32[1,128], index: 3, kind: input, shape index: {}, may-alias: {3,6}]   ;;  %s2972_s4 = inlined_call_operand.vmem [shape: bf16[1,9,128,128], index: 4, kind: input, shape index: {}]   ;;  %s2973_s5 = inlined_call_operand.vmem [shape: f32[1,128], index: 5, kind: input, shape index: {}, may-alias: {2,5}]   ;;  %s2974_s6 = inlined_call_operand.vmem [shape: f32[1,128], index: 6, kind: input, shape index: {}, may-alias: {3,6}]   ;;  %s2975_s7 = inlined_call_operand.vmem [shape: bf16[2,16,128], index: 7, kind: output, shape index: {0}]   ;;  %s2976_s8 = inlined_call_operand.vmem [shape: f32[2,1,128], index: 8, kind: output, shape index: {1}]  }
   0x1 LB: > { %s1841_s28 = sadd.s32 4294967295, %s2510_s27   ;;  %p1845_p0 = scmp.ge.s32.totalorder %s2510_s27, 1  ;;  %s2510_s27 = sphi %s2560_s27, %s19_s27  }
   0x2   : > { %p265_p1 = scmp.lt.s32.totalorder %s2510_s27, 3 }
   0x4   : > { %p266_p2 = pnand %p1845_p0, %p265_p1 }
   0x5   : > { %v2424_v0 = vld [vmem:[%s2969_s1] sm:$0xff] (!%p266_p2)   ;;  %v2512_v1 = vmov (!%p266_p2), 0.0   ;;  %v2425_v2 = vld [vmem:[%s2969_s1 + $0x8] sm:$0xff] (!%p266_p2)   ;;  %vm2513_vm0 = vmmov (!%p266_p2), 0   ;;  %p302_p3 = scmp.lt.s32.totalorder (!%p266_p2), %s1841_s28, 1  ;;  %v2426_v3 = vld [vmem:[%s2969_s1 + $0x10] sm:$0xff] (!%p266_p2)   ;;  %v345_v5 = vlaneseq (!%p266_p2) }
   0x6   : > { %269 = sbr.rel (%p266_p2) target bundleno = 641 (0x281), region = 48  ;;  %2183 = vmatprep.subr.bf16.mxu0 (!%p266_p2), %v2512_v1  ;;  %467 = vst [vmem:[#allocation2] sm:$0x3f] (!%p266_p2), %v2512_v1  ;;  %468 = vst [vmem:[#allocation2 + $0x8] sm:$0x3f] (!%p266_p2), %v2512_v1  ;;  %2283 = vmatprep.subr.bf16.mxu1 (!%p266_p2), %v2512_v1  ;;  %v2427_v4 = vld [vmem:[%s2969_s1 + $0x18] sm:$0xff] (!%p266_p2)  }
   0x7   : > { %469 = vst [vmem:[#allocation2 + $0x10] sm:$0x3f] (!%p266_p2), %v2512_v1  ;;  %470 = vst [vmem:[#allocation2 + $0x18] sm:$0x3f] (!%p266_p2), %v2512_v1  ;;  %2184 = vmatpush3.bf16.msra.mxu0 (!%p266_p2), %v2424_v0  ;;  %2199 = vmatprep.mubr.msk.bf16.mxu0 (!%p266_p2), %vm2513_vm0, %v2512_v1  ;;  %v2433_v6 = vld [vmem:[%s2972_s4 + $0x100] sm:$0xff] (!%p266_p2)   ;;  %v2435_v9 = vld [vmem:[%s2972_s4 + $0x108] sm:$0xff] (!%p266_p2)  }
   0x8   : > { %471 = vst [vmem:[#allocation2 + $0x20] sm:$0x3f] (!%p266_p2), %v2512_v1  ;;  %472 = vst [vmem:[#allocation2 + $0x28] sm:$0x3f] (!%p266_p2), %v2512_v1  ;;  %2185 = vmatprep.subr.bf16.mxu0 (!%p266_p2), %v2512_v1  ;;  %2299 = vmatprep.mubr.msk.bf16.mxu1 (!%p266_p2), %vm2513_vm0, %v2512_v1  ;;  %v2514_v7 = vmov (!%p266_p2), 1983009808  }
   0x9   : > { %v343_v8 = vunpack.c.l.s4 (!%p266_p2), %v2514_v7  ;;  %2284 = vmatpush3.bf16.msra.mxu1 (!%p266_p2), %v2433_v6  ;;  %v2428_v10 = vld [vmem:[%s2969_s1 + $0x20] sm:$0xff] (!%p266_p2)   ;;  %v346_v11 = vshrl.u32 (!%p266_p2), %v345_v5, 7  ;;  %v2429_v12 = vld [vmem:[%s2969_s1 + $0x28] sm:$0xff] (!%p266_p2)   ;;  %v2430_v18 = vld [vmem:[%s2969_s1 + $0x30] sm:$0xff] (!%p266_p2)  }
   0xa   : > { %2285 = vmatprep.subr.bf16.mxu1 (!%p266_p2), %v2512_v1  ;;  %v2431_v22 = vld [vmem:[%s2969_s1 + $0x38] sm:$0xff] (!%p266_p2)   ;;  %v2432_v25 = vld [vmem:[%s2972_s4 + $0x40] sm:$0xff] (!%p266_p2)   ;;  %v2434_v27 = vld [vmem:[%s2972_s4 + $0x48] sm:$0xff] (!%p266_p2)  }
   0xb   : > { %2186 = vmatpush3.bf16.msra.mxu0 (!%p266_p2), %v2425_v2  ;;  %v344_v17 = vunpack.c.0.s8 (!%p266_p2), %v343_v8  ;;  %v2436_v28 = vld [vmem:[%s2972_s4 + $0x50] sm:$0xff] (!%p266_p2)   ;;  %v2438_v30 = vld [vmem:[%s2972_s4 + $0x58] sm:$0xff] (!%p266_p2)   ;;  %v2440_v32 = vld [vmem:[%s2972_s4 + $0x60] sm:$0xff] (!%p266_p2)  }
   0xc   : > { %2187 = vmatprep.subr.bf16.mxu0 (!%p266_p2), %v2512_v1  ;;  %v2437_v29 = vld [vmem:[%s2972_s4 + $0x110] sm:$0xff] (!%p266_p2)   ;;  %v2439_v31 = vld [vmem:[%s2972_s4 + $0x118] sm:$0xff] (!%p266_p2)   ;;  %v2441_v33 = vld [vmem:[%s2972_s4 + $0x120] sm:$0xff] (!%p266_p2)  }
   0xd   : > { %s2978_s28 = smov (!%p302_p3, %s1841_s28), 1  ;;  %2286 = vmatpush3.bf16.msra.mxu1 %v2435_v9  ;;  %v2622_v21 = vsub.s32 %v344_v17, %v346_v11  ;;  %v2442_v34 = vld [vmem:[%s2972_s4 + $0x68] sm:$0xff]   ;;  %v2444_v36 = vld [vmem:[%s2972_s4 + $0x70] sm:$0xff]   ;;  %v2446_v38 = vld [vmem:[%s2972_s4 + $0x78] sm:$0xff]  }
   0xe   : > { %s2084_s15 = sshll.u32 %s2978_s28, 3  ;;  %2287 = vmatprep.subr.bf16.mxu1 %v2512_v1  ;;  %v2443_v35 = vld [vmem:[%s2972_s4 + $0x128] sm:$0xff]   ;;  %v2445_v37 = vld [vmem:[%s2972_s4 + $0x130] sm:$0xff]   ;;  %v2447_v39 = vld [vmem:[%s2972_s4 + $0x138] sm:$0xff]   ;;  %s314_s12 = scalar_lea.vmem %s2976_s8, %s2978_s28 }
   0xf   : > { %2188 = vmatpush3.bf16.msra.mxu0 %v2426_v3  ;;  %s306_s20 = scalar_lea.vmem %s2968_s0, %s2084_s15  ;;  %v1858_v40 = vld [vmem:[%s2970_s2] ss:$0 sm:$0xff]  ;;  %v508_v54 = vld [vmem:[#allocation2 + $0x1] sm:$0xf]  ;;  %v2450_v11 = vld [vmem:[%s2972_s4 + $0x8] sm:$0xff]   ;;  %s311_s9 = scalar_lea.vmem %s2975_s7, %s2084_s15 }
  0x10   : > { %2189 = vmatprep.subr.bf16.mxu0 %v2512_v1  ;;  %v316_v13 = vld [vmem:[%s306_s20] sm:$0x3]  ;;  %v317_v14 = vld [vmem:[%s306_s20 + $0x2] sm:$0x3]  ;;  %v318_v15 = vld [vmem:[%s306_s20 + $0x4] sm:$0x3] }
  0x11   : > { %v319_v16 = vld [vmem:[%s306_s20 + $0x6] sm:$0x3]  ;;  %v340_v19 = vcombine.low %v316_v13, %v317_v14  ;;  %2288 = vmatpush3.bf16.msra.mxu1 %v2437_v29  ;;  %v1859_v42 = vld [vmem:[%s2971_s3] ss:$0 sm:$0xff]  ;;  %v2452_v13 = vld [vmem:[%s2972_s4 + $0x10] sm:$0xff]  }
  0x12   : > { %v341_v20 = vcombine.low %v318_v15, %v319_v16  ;;  %2289 = vmatprep.subr.bf16.mxu1 %v2512_v1  ;;  %v2448_v5 = vld [vmem:[%s2972_s4] sm:$0xff]   ;;  %v2453_v14 = vld [vmem:[%s2972_s4 + $0x150] sm:$0xff]   ;;  %v2454_v15 = vld [vmem:[%s2972_s4 + $0x18] sm:$0xff]  }
  0x13   : > { %2190 = vmatpush3.bf16.msra.mxu0 %v2427_v4  ;;  %v348_v23 = vrot.slane %v340_v19, %v2622_v21  ;;  %v2449_v9 = vld [vmem:[%s2972_s4 + $0x140] sm:$0xff]   ;;  %v2455_v16 = vld [vmem:[%s2972_s4 + $0x158] sm:$0xff]   ;;  %v2458_v19 = vld [vmem:[%s2972_s4 + $0x28] sm:$0xff]  }
  0x14   : > { %2191 = vmatprep.subr.bf16.mxu0 %v2512_v1  ;;  %v355_v24 = vrot.slane %v341_v20, %v2622_v21  ;;  %v2456_v17 = vld [vmem:[%s2972_s4 + $0x20] sm:$0xff]   ;;  %v2459_v20 = vld [vmem:[%s2972_s4 + $0x168] sm:$0xff]   ;;  %v2461_v29 = vld [vmem:[%s2972_s4 + $0x170] sm:$0xff]  }
  0x15   : > { %2290 = vmatpush3.bf16.msra.mxu1 %v2439_v31 }
  0x16   : > { %v356_v26 = vcombine.low %v348_v23, %v355_v24  ;;  %2291 = vmatprep.subr.bf16.mxu1 %v2512_v1  ;;  %v484_v24 = vld [vmem:[#allocation2] sm:$0xf] }
  0x17   : > { %2192 = vmatpush3.bf16.msra.mxu0 %v2428_v10 }
  0x18   : > { %2193 = vmatprep.subr.bf16.mxu0 %v2512_v1 }
  0x19   : > { %2292 = vmatpush3.bf16.msra.mxu1 %v2441_v33 }
  0x1a   : > { %2293 = vmatprep.subr.bf16.mxu1 %v2512_v1 }
  0x1b   : > { %2194 = vmatpush3.bf16.msra.mxu0 %v2429_v12  ;;  %v2451_v12 = vld [vmem:[%s2972_s4 + $0x148] sm:$0xff]  }
  0x1c   : > { %2195 = vmatprep.subr.bf16.mxu0 %v2512_v1 }
  0x1d   : > { %2294 = vmatpush3.bf16.msra.mxu1 %v2443_v35 }
  0x1e   : > { %2295 = vmatprep.subr.bf16.mxu1 %v2512_v1 }
  0x1f   : > { %2196 = vmatpush3.bf16.msra.mxu0 %v2430_v18  ;;  %v2457_v18 = vld [vmem:[%s2972_s4 + $0x160] sm:$0xff]  }
  0x20   : > { %2197 = vmatprep.subr.bf16.mxu0 %v2512_v1 }
  0x21   : > { %2296 = vmatpush3.bf16.msra.mxu1 %v2445_v37 }
  0x22   : > { %2297 = vmatprep.subr.bf16.mxu1 %v2512_v1 }
  0x23   : > { %2198 = vmatpush3.bf16.msra.mxu0 %v2431_v22 }
  0x24   : > { %2203 = vmatprep.subr.bf16.mxu0 %v2512_v1 }
  0x25   : > { %2298 = vmatpush3.bf16.msra.mxu1 %v2447_v39 }
  0x26   : > { %2200 = vmatmul.mubr.bf16.vlgmr.msra.gmra.mrb[0].mxu0 %v356_v26  ;;  %2303 = vmatprep.subr.bf16.mxu1 %v2512_v1 }
  0x27   : > { %2204 = vmatpush3.bf16.msra.mxu0 %v2432_v25  ;;  %2219 = vmatprep.mubr.msk.bf16.mxu0 %vm2513_vm0, %v2512_v1  ;;  %v2460_v25 = vld [vmem:[%s2972_s4 + $0x30] sm:$0xff]  }
  0x28   : > { %2205 = vmatprep.subr.bf16.mxu0 %v2512_v1 }
  0x2b   : > { %2206 = vmatpush3.bf16.msra.mxu0 %v2434_v27 }
  0x2c   : > { %2207 = vmatprep.subr.bf16.mxu0 %v2512_v1 }
  0x2f   : > { %2208 = vmatpush3.bf16.msra.mxu0 %v2436_v28 }
  0x30   : > { %2209 = vmatprep.subr.bf16.mxu0 %v2512_v1 }
  0x33   : > { %2210 = vmatpush3.bf16.msra.mxu0 %v2438_v30 }
  0x34   : > { %2211 = vmatprep.subr.bf16.mxu0 %v2512_v1 }
  0x37   : > { %2212 = vmatpush3.bf16.msra.mxu0 %v2440_v32 }
  0x38   : > { %2213 = vmatprep.subr.bf16.mxu0 %v2512_v1 }
  0x3b   : > { %2214 = vmatpush3.bf16.msra.mxu0 %v2442_v34  ;;  %v2462_v34 = vld [vmem:[%s2972_s4 + $0x38] sm:$0xff]  }
  0x3c   : > { %2215 = vmatprep.subr.bf16.mxu0 %v2512_v1 }
  0x3f   : > { %2216 = vmatpush3.bf16.msra.mxu0 %v2444_v36 }
  0x40   : > { %2217 = vmatprep.subr.bf16.mxu0 %v2512_v1 }
  0x43   : > { %2218 = vmatpush3.bf16.msra.mxu0 %v2446_v38  ;;  %v2463_v38 = vld [vmem:[%s2972_s4 + $0x178] sm:$0xff]  }
  0x44   : > { %2223 = vmatprep.subr.bf16.mxu0 %v2512_v1 }
  0xf9   : > { %v440_v41 = vpop.f32.mrb[0].mxu0 }
  0xfa   : > { %v454_v43 = vmul.f32 %v1858_v40, %v440_v41  ;;  %v2201_v44 = vpop.f32.mrb[1].mxu0  ;;  %v2464_v41 = vld [vmem:[%s2972_s4 + $0x80] sm:$0xff]  }
  0xfb   : > { %v443_v45 = vpop.f32.mrb[2].mxu0  ;;  %v2465_v44 = vld [vmem:[%s2972_s4 + $0x180] sm:$0xff]  }
  0xfc   : > { %v463_v46 = vadd.f32 %v1859_v42, %v454_v43  ;;  %v455_v47 = vmul.f32 %v1858_v40, %v443_v45  ;;  %v2202_v48 = vpop.f32.mrb[3].mxu0 }
  0xfd   : > { %v2468_v48 = vld [vmem:[%s2972_s4 + $0x90] sm:$0xff]  }
  0xfe   : > { %v465_v49 = vmax.f32 %v463_v46, 0.0  ;;  %v464_v50 = vadd.f32 %v1859_v42, %v455_v47  ;;  %v2466_v46 = vld [vmem:[%s2972_s4 + $0x88] sm:$0xff]  }
  0xff   : > { %v2467_v47 = vld [vmem:[%s2972_s4 + $0x188] sm:$0xff]  }
 0x100   : > { %v475_v51 = vcombine.high %v465_v49, %v465_v49  ;;  %480 = vst [vmem:[#allocation2 + $0x9] sm:$0xf] %v465_v49  ;;  %v466_v52 = vmax.f32 %v464_v50, 0.0  ;;  %v2469_v49 = vld [vmem:[%s2972_s4 + $0x190] sm:$0xff]   ;;  %v2470_v50 = vld [vmem:[%s2972_s4 + $0x98] sm:$0xff]  }
 0x102   : > { %481 = vst [vmem:[#allocation2 + $0x11] sm:$0xf] %v475_v51  ;;  %v476_v53 = vcombine.high %v466_v52, %v466_v52  ;;  %482 = vst [vmem:[#allocation2 + $0x19] sm:$0xf] %v466_v52  ;;  %v2471_v51 = vld [vmem:[%s2972_s4 + $0x198] sm:$0xff]   ;;  %v2472_v52 = vld [vmem:[%s2972_s4 + $0xa0] sm:$0xff]  }
 0x104   : > { %483 = vst [vmem:[#allocation2 + $0x21] sm:$0xf] %v476_v53  ;;  %v2473_v53 = vld [vmem:[%s2972_s4 + $0x1a0] sm:$0xff]  }
 0x107   : > { %v509_v55 = vld [vmem:[#allocation2 + $0x9] sm:$0xf] }
 0x108   : > { %v1876_v56 = vpack.c.bf16 %v509_v55, %v508_v54  ;;  %v1031_v57 = vld [vmem:[#allocation2 + $0x9] sm:$0xf] }
 0x109   : > { %v510_v58 = vld [vmem:[#allocation2 + $0x11] sm:$0xf]  ;;  %v511_v59 = vld [vmem:[#allocation2 + $0x19] sm:$0xf]  ;;  %v485_v26 = vld [vmem:[#allocation2 + $0x8] sm:$0xf] }
 0x10a   : > { %v1032_v60 = vld [vmem:[#allocation2 + $0x11] sm:$0xf]  ;;  %v1877_v61 = vpack.c.bf16 %v511_v59, %v510_v58  ;;  %v1033_v63 = vld [vmem:[#allocation2 + $0x19] sm:$0xf]  ;;  %v545_v2 = vrot.slane %v1876_v56, %v2622_v21  ;;  %v1886_v32 = vpack.c.bf16 %v485_v26, %v484_v24  ;;  %v1169_v35 = vld [vmem:[#allocation2 + $0xa] sm:$0xf] }
 0x10b   : > { %v1964_v62 = vpack.c.bf16 %v1032_v60, %v1031_v57  ;;  %v1034_v0 = vld [vmem:[#allocation2 + $0x21] sm:$0xf]  ;;  %v486_v22 = vld [vmem:[#allocation2 + $0x10] sm:$0xf]  ;;  %v487_v23 = vld [vmem:[#allocation2 + $0x18] sm:$0xf] }
 0x10c   : > { %v552_v3 = vrot.slane %v1877_v61, %v2622_v21  ;;  %v1965_v4 = vpack.c.bf16 %v1034_v0, %v1033_v63  ;;  %v1172_v27 = vld [vmem:[#allocation2 + $0x22] sm:$0xf]  ;;  %v1887_v28 = vpack.c.bf16 %v487_v23, %v486_v22  ;;  %v1170_v30 = vld [vmem:[#allocation2 + $0x12] sm:$0xf]  ;;  %v1171_v31 = vld [vmem:[#allocation2 + $0x1a] sm:$0xf]  ;;  %v656_v39 = vrot.slane %v1886_v32, %v2622_v21 }
 0x10d   : > { %v1068_v7 = vrot.slane %v1964_v62, %v2622_v21  ;;  %v1991_v33 = vpack.c.bf16 %v1172_v27, %v1171_v31  ;;  %v1990_v37 = vpack.c.bf16 %v1170_v30, %v1169_v35  ;;  %v2474_v54 = vld [vmem:[%s2972_s4 + $0xa8] sm:$0xff]   ;;  %v757_v56 = vld [vmem:[#allocation2 + $0x12] sm:$0xf]  ;;  %v758_v57 = vld [vmem:[#allocation2 + $0x1a] sm:$0xf] }
 0x10e   : > { %v553_v6 = vcombine.low %v545_v2, %v552_v3  ;;  %v1075_v8 = vrot.slane %v1965_v4, %v2622_v21  ;;  %v663_v36 = vrot.slane %v1887_v28, %v2622_v21  ;;  %v2475_v55 = vld [vmem:[%s2972_s4 + $0x1a8] sm:$0xff]   ;;  %v755_v58 = vld [vmem:[#allocation2 + $0x2] sm:$0xf]  ;;  %v2476_v60 = vld [vmem:[%s2972_s4 + $0xb0] sm:$0xff]   ;;  %v1913_v63 = vpack.c.bf16 %v758_v57, %v757_v56 }
 0x10f   : > { %v1213_v40 = vrot.slane %v1991_v33, %v2622_v21  ;;  %v1206_v43 = vrot.slane %v1990_v37, %v2622_v21  ;;  %v1311_v59 = vld [vmem:[#allocation2 + $0x28] sm:$0xf]  ;;  %v1310_v62 = vld [vmem:[#allocation2 + $0x20] sm:$0xf]  ;;  %v2477_v0 = vld [vmem:[%s2972_s4 + $0x1b0] sm:$0xff]  }
 0x110   : > { %2220 = vmatmul.mubr.bf16.vlgmr.msra.gmra.mrb[4].mxu0 %v553_v6  ;;  %v1076_v10 = vcombine.low %v1068_v7, %v1075_v8  ;;  %v664_v42 = vcombine.low %v656_v39, %v663_v36  ;;  %v756_v61 = vld [vmem:[#allocation2 + $0xa] sm:$0xf]  ;;  %v1308_v2 = vld [vmem:[#allocation2 + $0x10] sm:$0xf]  ;;  %v1309_v3 = vld [vmem:[#allocation2 + $0x18] sm:$0xf]  ;;  %v799_v7 = vrot.slane %v1913_v63, %v2622_v21 }
 0x111   : > { %2224 = vmatpush3.bf16.msra.mxu0 %v2448_v5  ;;  %2239 = vmatprep.mubr.msk.bf16.mxu0 %vm2513_vm0, %v2512_v1  ;;  %v1214_v45 = vcombine.low %v1206_v43, %v1213_v40  ;;  %v1912_v4 = vpack.c.bf16 %v756_v61, %v755_v58  ;;  %v2017_v5 = vpack.c.bf16 %v1311_v59, %v1310_v62  ;;  %v2478_v6 = vld [vmem:[%s2972_s4 + $0xb8] sm:$0xff]   ;;  %v2488_v24 = vld [vmem:[%s2972_s4 + $0xe0] sm:$0xff]   ;;  %v2490_v26 = vld [vmem:[%s2972_s4 + $0xe8] sm:$0xff]  }
 0x112   : > { %2300 = vmatmul.mubr.bf16.vlgmr.msra.gmra.mrb[0].mxu1 %v1076_v10  ;;  %2225 = vmatprep.subr.bf16.mxu0 %v2512_v1  ;;  %v2016_v8 = vpack.c.bf16 %v1309_v3, %v1308_v2  ;;  %v2486_v22 = vld [vmem:[%s2972_s4 + $0xd8] sm:$0xff]   ;;  %v2491_v27 = vld [vmem:[%s2972_s4 + $0x1e8] sm:$0xff]   ;;  %v896_v28 = vld [vmem:[#allocation2 + $0x20] sm:$0xf] }
 0x113   : > { %2304 = vmatpush3.bf16.msra.mxu1 %v2449_v9  ;;  %2319 = vmatprep.mubr.msk.bf16.mxu1 %vm2513_vm0, %v2512_v1  ;;  %v2479_v9 = vld [vmem:[%s2972_s4 + $0x1b8] sm:$0xff]   ;;  %v792_v10 = vrot.slane %v1912_v4, %v2622_v21  ;;  %v1449_v30 = vld [vmem:[#allocation2 + $0x29] sm:$0xf]  ;;  %v894_v31 = vld [vmem:[#allocation2 + $0x10] sm:$0xf] }
 0x114   : > { %2305 = vmatprep.subr.bf16.mxu1 %v2512_v1  ;;  %v2487_v23 = vld [vmem:[%s2972_s4 + $0x1d8] sm:$0xff]   ;;  %v1448_v33 = vld [vmem:[#allocation2 + $0x21] sm:$0xf]  ;;  %v893_v36 = vld [vmem:[#allocation2 + $0x8] sm:$0xf] }
 0x115   : > { %2226 = vmatpush3.bf16.msra.mxu0 %v2450_v11  ;;  %v1352_v11 = vrot.slane %v2017_v5, %v2622_v21  ;;  %v895_v32 = vld [vmem:[#allocation2 + $0x18] sm:$0xf]  ;;  %v1446_v37 = vld [vmem:[#allocation2 + $0x11] sm:$0xf]  ;;  %v1938_v39 = vpack.c.bf16 %v894_v31, %v893_v36  ;;  %v2043_v40 = vpack.c.bf16 %v1449_v30, %v1448_v33  ;;  %v1586_v56 = vld [vmem:[#allocation2 + $0x22] sm:$0xf] }
 0x116   : > { %2227 = vmatprep.subr.bf16.mxu0 %v2512_v1  ;;  %v1939_v35 = vpack.c.bf16 %v896_v28, %v895_v32  ;;  %v1587_v57 = vld [vmem:[#allocation2 + $0x2a] sm:$0xf]  ;;  %v2502_v58 = vld [vmem:[%s2972_s4 + $0x230] sm:$0xff]   ;;  %v2503_v63 = vld [vmem:[%s2972_s4 + $0x238] sm:$0xff]  }
 0x117   : > { %2306 = vmatpush3.bf16.msra.mxu1 %v2451_v12  ;;  %v2480_v12 = vld [vmem:[%s2972_s4 + $0xc0] sm:$0xff]   ;;  %v1584_v59 = vld [vmem:[#allocation2 + $0x12] sm:$0xf]  ;;  %v2069_v61 = vpack.c.bf16 %v1587_v57, %v1586_v56 }
 0x118   : > { %2307 = vmatprep.subr.bf16.mxu1 %v2512_v1 }
 0x119   : > { %2228 = vmatpush3.bf16.msra.mxu0 %v2452_v13  ;;  %v800_v13 = vcombine.low %v792_v10, %v799_v7 }
 0x11a   : > { %2229 = vmatprep.subr.bf16.mxu0 %v2512_v1 }
 0x11b   : > { %2308 = vmatpush3.bf16.msra.mxu1 %v2453_v14  ;;  %v1345_v14 = vrot.slane %v2016_v8, %v2622_v21 }
 0x11c   : > { %2309 = vmatprep.subr.bf16.mxu1 %v2512_v1 }
 0x11d   : > { %2230 = vmatpush3.bf16.msra.mxu0 %v2454_v15  ;;  %v2481_v15 = vld [vmem:[%s2972_s4 + $0x1c0] sm:$0xff]  }
 0x11e   : > { %2231 = vmatprep.subr.bf16.mxu0 %v2512_v1 }
 0x11f   : > { %2310 = vmatpush3.bf16.msra.mxu1 %v2455_v16  ;;  %v1353_v16 = vcombine.low %v1345_v14, %v1352_v11 }
 0x120   : > { %2311 = vmatprep.subr.bf16.mxu1 %v2512_v1 }
 0x121   : > { %2232 = vmatpush3.bf16.msra.mxu0 %v2456_v17  ;;  %v2482_v17 = vld [vmem:[%s2972_s4 + $0xc8] sm:$0xff]  }
 0x122   : > { %2233 = vmatprep.subr.bf16.mxu0 %v2512_v1 }
 0x123   : > { %2312 = vmatpush3.bf16.msra.mxu1 %v2457_v18  ;;  %v2483_v18 = vld [vmem:[%s2972_s4 + $0x1c8] sm:$0xff]  }
 0x124   : > { %2313 = vmatprep.subr.bf16.mxu1 %v2512_v1 }
 0x125   : > { %2234 = vmatpush3.bf16.msra.mxu0 %v2458_v19  ;;  %v2484_v19 = vld [vmem:[%s2972_s4 + $0xd0] sm:$0xff]  }
 0x126   : > { %2235 = vmatprep.subr.bf16.mxu0 %v2512_v1 }
 0x127   : > { %2314 = vmatpush3.bf16.msra.mxu1 %v2459_v20  ;;  %v2485_v20 = vld [vmem:[%s2972_s4 + $0x1d0] sm:$0xff]  }
 0x128   : > { %2315 = vmatprep.subr.bf16.mxu1 %v2512_v1 }
 0x129   : > { %2236 = vmatpush3.bf16.msra.mxu0 %v2460_v25  ;;  %v2489_v25 = vld [vmem:[%s2972_s4 + $0x1e0] sm:$0xff]  }
 0x12a   : > { %2237 = vmatprep.subr.bf16.mxu0 %v2512_v1 }
 0x12b   : > { %2316 = vmatpush3.bf16.msra.mxu1 %v2461_v29  ;;  %v2492_v29 = vld [vmem:[%s2972_s4 + $0xf0] sm:$0xff]  }
 0x12c   : > { %2317 = vmatprep.subr.bf16.mxu1 %v2512_v1 }
 0x12d   : > { %2238 = vmatpush3.bf16.msra.mxu0 %v2462_v34  ;;  %v2493_v34 = vld [vmem:[%s2972_s4 + $0x1f0] sm:$0xff]  }
 0x12e   : > { %2243 = vmatprep.subr.bf16.mxu0 %v2512_v1 }
 0x12f   : > { %2318 = vmatpush3.bf16.msra.mxu1 %v2463_v38  ;;  %v1447_v38 = vld [vmem:[#allocation2 + $0x19] sm:$0xf] }
 0x130   : > { %2240 = vmatmul.mubr.bf16.vlgmr.msra.gmra.mrb[4].mxu0 %v664_v42  ;;  %2323 = vmatprep.subr.bf16.mxu1 %v2512_v1  ;;  %v937_v42 = vrot.slane %v1939_v35, %v2622_v21  ;;  %v2042_v43 = vpack.c.bf16 %v1447_v38, %v1446_v37 }
 0x131   : > { %2244 = vmatpush3.bf16.msra.mxu0 %v2464_v41  ;;  %2259 = vmatprep.mubr.msk.bf16.mxu0 %vm2513_vm0, %v2512_v1  ;;  %v2494_v41 = vld [vmem:[%s2972_s4 + $0xf8] sm:$0xff]  }
 0x132   : > { %2320 = vmatmul.mubr.bf16.vlgmr.msra.gmra.mrb[0].mxu1 %v1214_v45  ;;  %2245 = vmatprep.subr.bf16.mxu0 %v2512_v1  ;;  %v930_v45 = vrot.slane %v1938_v39, %v2622_v21 }
 0x133   : > { %2324 = vmatpush3.bf16.msra.mxu1 %v2465_v44  ;;  %2339 = vmatprep.mubr.msk.bf16.mxu1 %vm2513_vm0, %v2512_v1  ;;  %v2495_v44 = vld [vmem:[%s2972_s4 + $0x1f8] sm:$0xff]  }
 0x134   : > { %2325 = vmatprep.subr.bf16.mxu1 %v2512_v1 }
 0x135   : > { %2246 = vmatpush3.bf16.msra.mxu0 %v2466_v46  ;;  %v1490_v46 = vrot.slane %v2043_v40, %v2622_v21 }
 0x136   : > { %2247 = vmatprep.subr.bf16.mxu0 %v2512_v1 }
 0x137   : > { %2326 = vmatpush3.bf16.msra.mxu1 %v2467_v47  ;;  %v938_v47 = vcombine.low %v930_v45, %v937_v42 }
 0x138   : > { %2327 = vmatprep.subr.bf16.mxu1 %v2512_v1 }
 0x139   : > { %2248 = vmatpush3.bf16.msra.mxu0 %v2468_v48  ;;  %v1483_v48 = vrot.slane %v2042_v43, %v2622_v21 }
 0x13a   : > { %2249 = vmatprep.subr.bf16.mxu0 %v2512_v1 }
 0x13b   : > { %2328 = vmatpush3.bf16.msra.mxu1 %v2469_v49  ;;  %v2496_v49 = vld [vmem:[%s2972_s4 + $0x200] sm:$0xff]  }
 0x13c   : > { %2329 = vmatprep.subr.bf16.mxu1 %v2512_v1 }
 0x13d   : > { %2250 = vmatpush3.bf16.msra.mxu0 %v2470_v50  ;;  %v1491_v50 = vcombine.low %v1483_v48, %v1490_v46 }
 0x13e   : > { %2251 = vmatprep.subr.bf16.mxu0 %v2512_v1 }
 0x13f   : > { %2330 = vmatpush3.bf16.msra.mxu1 %v2471_v51  ;;  %v2497_v51 = vld [vmem:[%s2972_s4 + $0x208] sm:$0xff]  }
 0x140   : > { %2331 = vmatprep.subr.bf16.mxu1 %v2512_v1 }
 0x141   : > { %2252 = vmatpush3.bf16.msra.mxu0 %v2472_v52  ;;  %v2498_v52 = vld [vmem:[%s2972_s4 + $0x210] sm:$0xff]  }
 0x142   : > { %2253 = vmatprep.subr.bf16.mxu0 %v2512_v1 }
 0x143   : > { %2332 = vmatpush3.bf16.msra.mxu1 %v2473_v53  ;;  %v2499_v53 = vld [vmem:[%s2972_s4 + $0x218] sm:$0xff]  }
 0x144   : > { %2333 = vmatprep.subr.bf16.mxu1 %v2512_v1 }
 0x145   : > { %2254 = vmatpush3.bf16.msra.mxu0 %v2474_v54  ;;  %v2500_v54 = vld [vmem:[%s2972_s4 + $0x220] sm:$0xff]  }
 0x146   : > { %2255 = vmatprep.subr.bf16.mxu0 %v2512_v1 }
 0x147   : > { %2334 = vmatpush3.bf16.msra.mxu1 %v2475_v55  ;;  %v2501_v55 = vld [vmem:[%s2972_s4 + $0x228] sm:$0xff]  }
 0x148   : > { %2335 = vmatprep.subr.bf16.mxu1 %v2512_v1 }
 0x149   : > { %2256 = vmatpush3.bf16.msra.mxu0 %v2476_v60  ;;  %v1585_v60 = vld [vmem:[#allocation2 + $0x1a] sm:$0xf] }
 0x14a   : > { %2257 = vmatprep.subr.bf16.mxu0 %v2512_v1  ;;  %v2068_v62 = vpack.c.bf16 %v1585_v60, %v1584_v59 }
 0x14b   : > { %2336 = vmatpush3.bf16.msra.mxu1 %v2477_v0  ;;  %v1628_v0 = vrot.slane %v2069_v61, %v2622_v21 }
 0x14c   : > { %2337 = vmatprep.subr.bf16.mxu1 %v2512_v1  ;;  %v1621_v2 = vrot.slane %v2068_v62, %v2622_v21 }
 0x14d   : > { %2258 = vmatpush3.bf16.msra.mxu0 %v2478_v6 }
 0x14e   : > { %2263 = vmatprep.subr.bf16.mxu0 %v2512_v1  ;;  %v1629_v3 = vcombine.low %v1621_v2, %v1628_v0 }
 0x14f   : > { %2338 = vmatpush3.bf16.msra.mxu1 %v2479_v9  ;;  %v2078_v9 = vld [vmem:[%s2973_s5] ss:$0 sm:$0xff] }
 0x150   : > { %2260 = vmatmul.mubr.bf16.vlgmr.msra.gmra.mrb[4].mxu0 %v800_v13  ;;  %2343 = vmatprep.subr.bf16.mxu1 %v2512_v1 }
 0x151   : > { %2264 = vmatpush3.bf16.msra.mxu0 %v2480_v12  ;;  %2279 = vmatprep.mubr.msk.bf16.mxu0 %vm2513_vm0, %v2512_v1 }
 0x152   : > { %2340 = vmatmul.mubr.bf16.vlgmr.msra.gmra.mrb[0].mxu1 %v1353_v16  ;;  %2265 = vmatprep.subr.bf16.mxu0 %v2512_v1 }
 0x153   : > { %2344 = vmatpush3.bf16.msra.mxu1 %v2481_v15  ;;  %2359 = vmatprep.mubr.msk.bf16.mxu1 %vm2513_vm0, %v2512_v1 }
 0x154   : > { %2345 = vmatprep.subr.bf16.mxu1 %v2512_v1 }
 0x155   : > { %2266 = vmatpush3.bf16.msra.mxu0 %v2482_v17 }
 0x156   : > { %2267 = vmatprep.subr.bf16.mxu0 %v2512_v1 }
 0x157   : > { %2346 = vmatpush3.bf16.msra.mxu1 %v2483_v18 }
 0x158   : > { %2347 = vmatprep.subr.bf16.mxu1 %v2512_v1 }
 0x159   : > { %2268 = vmatpush3.bf16.msra.mxu0 %v2484_v19 }
 0x15a   : > { %2269 = vmatprep.subr.bf16.mxu0 %v2512_v1 }
 0x15b   : > { %2348 = vmatpush3.bf16.msra.mxu1 %v2485_v20 }
 0x15c   : > { %2349 = vmatprep.subr.bf16.mxu1 %v2512_v1 }
 0x15d   : > { %2270 = vmatpush3.bf16.msra.mxu0 %v2486_v22 }
 0x15e   : > { %2271 = vmatprep.subr.bf16.mxu0 %v2512_v1 }
 0x15f   : > { %2350 = vmatpush3.bf16.msra.mxu1 %v2487_v23 }
 0x160   : > { %2351 = vmatprep.subr.bf16.mxu1 %v2512_v1 }
 0x161   : > { %2272 = vmatpush3.bf16.msra.mxu0 %v2488_v24 }
 0x162   : > { %2273 = vmatprep.subr.bf16.mxu0 %v2512_v1 }
 0x163   : > { %2352 = vmatpush3.bf16.msra.mxu1 %v2489_v25 }
 0x164   : > { %2353 = vmatprep.subr.bf16.mxu1 %v2512_v1 }
 0x165   : > { %2274 = vmatpush3.bf16.msra.mxu0 %v2490_v26 }
 0x166   : > { %2275 = vmatprep.subr.bf16.mxu0 %v2512_v1 }
 0x167   : > { %2354 = vmatpush3.bf16.msra.mxu1 %v2491_v27 }
 0x168   : > { %2355 = vmatprep.subr.bf16.mxu1 %v2512_v1 }
 0x169   : > { %2276 = vmatpush3.bf16.msra.mxu0 %v2492_v29 }
 0x16a   : > { %2277 = vmatprep.subr.bf16.mxu0 %v2512_v1 }
 0x16b   : > { %2356 = vmatpush3.bf16.msra.mxu1 %v2493_v34 }
 0x16c   : > { %2357 = vmatprep.subr.bf16.mxu1 %v2512_v1 }
 0x16d   : > { %2278 = vmatpush3.bf16.msra.mxu0 %v2494_v41 }
 0x16f   : > { %2358 = vmatpush3.bf16.msra.mxu1 %v2495_v44 }
 0x170   : > { %2280 = vmatmul.mubr.bf16.vlgmr.msra.gmra.mrb[4].mxu0 %v938_v47  ;;  %2363 = vmatprep.subr.bf16.mxu1 %v2512_v1 }
 0x172   : > { %2360 = vmatmul.mubr.bf16.vlgmr.msra.gmra.mrb[0].mxu1 %v1491_v50 }
 0x173   : > { %2364 = vmatpush3.bf16.msra.mxu1 %v2496_v49  ;;  %2379 = vmatprep.mubr.msk.bf16.mxu1 %vm2513_vm0, %v2512_v1 }
 0x174   : > { %2365 = vmatprep.subr.bf16.mxu1 %v2512_v1 }
 0x177   : > { %2366 = vmatpush3.bf16.msra.mxu1 %v2497_v51 }
 0x178   : > { %2367 = vmatprep.subr.bf16.mxu1 %v2512_v1 }
 0x17b   : > { %2368 = vmatpush3.bf16.msra.mxu1 %v2498_v52 }
 0x17c   : > { %2369 = vmatprep.subr.bf16.mxu1 %v2512_v1 }
 0x17f   : > { %2370 = vmatpush3.bf16.msra.mxu1 %v2499_v53 }
 0x180   : > { %2371 = vmatprep.subr.bf16.mxu1 %v2512_v1 }
 0x183   : > { %2372 = vmatpush3.bf16.msra.mxu1 %v2500_v54 }
 0x184   : > { %2373 = vmatprep.subr.bf16.mxu1 %v2512_v1 }
 0x187   : > { %2374 = vmatpush3.bf16.msra.mxu1 %v2501_v55 }
 0x188   : > { %2375 = vmatprep.subr.bf16.mxu1 %v2512_v1 }
 0x18b   : > { %2376 = vmatpush3.bf16.msra.mxu1 %v2502_v58 }
 0x18c   : > { %2377 = vmatprep.subr.bf16.mxu1 %v2512_v1  ;;  %v2079_v1 = vld [vmem:[%s2974_s6] ss:$0 sm:$0xff] }
 0x18f   : > { %2378 = vmatpush3.bf16.msra.mxu1 %v2503_v63 }
 0x192   : > { %2380 = vmatmul.mubr.bf16.vlgmr.msra.gmra.mrb[0].mxu1 %v1629_v3 }
 0x243   : > { %v1022_v4 = vpop.f32.mrb[4].mxu0 }
 0x244   : > { %v2281_v5 = vpop.f32.mrb[5].mxu0 }
 0x245   : > { %v1025_v6 = vpop.f32.mrb[6].mxu0 }
 0x246   : > { %v2282_v7 = vpop.f32.mrb[7].mxu0 }
 0x265   : > { %v1713_v8 = vpop.f32.mrb[0].mxu1 }
 0x266   : > { %v2383_v10 = vadd.f32 %v1713_v8, %v1022_v4  ;;  %v2381_v11 = vpop.f32.mrb[1].mxu1 }
 0x267   : > { %v1716_v21 = vpop.f32.mrb[2].mxu1 }
 0x268   : > { %v1729_v12 = vmul.f32 %v2383_v10, %v2078_v9  ;;  %v2384_v13 = vadd.f32 %v1716_v21, %v1025_v6  ;;  %v2382_v14 = vpop.f32.mrb[3].mxu1 }
 0x26a   : > { %v1738_v15 = vadd.f32 %v2079_v1, %v1729_v12  ;;  %v1730_v16 = vmul.f32 %v2384_v13, %v2078_v9 }
 0x26c   : > { %v1739_v17 = vadd.f32 %v2079_v1, %v1730_v16  ;;  %v1740_v18 = vmax.f32 %v1738_v15, 0.0 }
 0x26e   : > { %v1741_v19 = vmax.f32 %v1739_v17, 0.0 }
 0x270   : > { %v2091_v20 = vpack.c.bf16 %v1741_v19, %v1740_v18  ;;  %v1752_v22 = vadd.f32 %v1741_v19, %v1740_v18 }
 0x272   : > { %2092 = vst [vmem:[%s311_s9] sm:$0xff] %v2091_v20   ;;  %v1753_v23 = vrot.slane %v1752_v22, 4 }
 0x274   : > { %v1754_v24 = vadd.f32 %v1753_v23, %v1752_v22 }
 0x276   : > { %v1755_v25 = vrot.slane %v1754_v24, 2 }
 0x278   : > { %v1756_v26 = vadd.f32 %v1755_v25, %v1754_v24 }
 0x27a   : > { %v1757_v27 = vrot.slane %v1756_v26, 1 }
 0x27c   : > { %v1758_v28 = vadd.f32 %v1757_v27, %v1756_v26 }
 0x27e   : > { %v1759_v29 = vmul.f32 0.0625, %v1758_v28 }
 0x280   : > { %1760 = vst [vmem:[%s314_s12] sm:$0x1] %v1759_v29 }
 0x281 PF: > { %s19_s27 = sadd.s32 1, %s2510_s27  }
 0x282   : > { %p16_p4 = scmp.ge.s32.totalorder %s19_s27, 4  }
 0x284   :  { %18 = sbr.rel (!%p16_p4) target bundleno = 1 (0x1), region = 100 }

// kernel: _lambda_.16
= control target key start
LH: loop header
LB: loop body
LE: loop exit
PB: predicated region body
PF: predicated region fallthrough
CT: control target
= control target key end

     0   :  { %s1127_s13 = smov 0   ;;  %s1325_s0 = inlined_call_operand.vmem [shape: bf16[2,16,128], index: 0, kind: input, shape index: {}]   ;;  %s1326_s1 = inlined_call_operand.vmem [shape: f32[2,1,128], index: 1, kind: input, shape index: {}]   ;;  %s1327_s2 = inlined_call_operand.vmem [shape: f32[128,128], index: 2, kind: input, shape index: {}]   ;;  %s1328_s3 = inlined_call_operand.vmem [shape: f32[1,128], index: 3, kind: input, shape index: {}]   ;;  %s1329_s4 = inlined_call_operand.vmem [shape: f32[128,128], index: 4, kind: input, shape index: {}]   ;;  %s1330_s5 = inlined_call_operand.vmem [shape: f32[1,128], index: 5, kind: input, shape index: {}]   ;;  %s1331_s6 = inlined_call_operand.vmem [shape: bf16[128,128], index: 6, kind: input, shape index: {}]   ;;  %s1332_s7 = inlined_call_operand.vmem [shape: f32[1,128], index: 7, kind: input, shape index: {}]   ;;  %s1333_s8 = inlined_call_operand.vmem [shape: f32[1,128], index: 8, kind: input, shape index: {}]   ;;  %s1334_s9 = inlined_call_operand.vmem [shape: bf16[2,16,128], index: 9, kind: input, shape index: {}]   ;;  %s1335_s10 = inlined_call_operand.vmem [shape: bf16[2,16,128], index: 10, kind: output, shape index: {}]  }
   0x1 LB: > { %s816_s14 = sadd.s32 4294967295, %s1067_s13   ;;  %p820_p0 = scmp.ge.s32.totalorder %s1067_s13, 1  ;;  %s1067_s13 = sphi %s1127_s13, %s20_s13  }
   0x2   : > { %p330_p1 = scmp.lt.s32.totalorder %s1067_s13, 3 }
   0x4   : > { %p331_p2 = pnand %p820_p0, %p330_p1 }
   0x5   : > { %v396_v0 = vld [vmem:[%s1327_s2] sm:$0xff] (!%p331_p2)  ;;  %v397_v1 = vld [vmem:[%s1327_s2 + $0x8] sm:$0xff] (!%p331_p2)  ;;  %v398_v2 = vld [vmem:[%s1327_s2 + $0x10] sm:$0xff] (!%p331_p2)  ;;  %v1069_v3 = vmov (!%p331_p2), 0.0|0.0   ;;  %vm1070_vm0 = vmmov (!%p331_p2), 0   ;;  %v1071_v6 = vmov (!%p331_p2), 0.0  }
   0x6   : > { %334 = sbr.rel (%p331_p2) target bundleno = 734 (0x2de), region = 60  ;;  %990 = vmatprep.subr.bf16.mxu1 (!%p331_p2), %v1069_v3  ;;  %v991_v4 = vpack.c.bf16 (!%p331_p2), %v397_v1, %v396_v0  ;;  %v399_v5 = vld [vmem:[%s1327_s2 + $0x18] sm:$0xff] (!%p331_p2)  ;;  %932 = vmatprep.mubr.msk.f32.mxu1 (!%p331_p2), %vm1070_vm0, %v1071_v6  ;;  %v400_v8 = vld [vmem:[%s1327_s2 + $0x20] sm:$0xff] (!%p331_p2)  ;;  %v401_v9 = vld [vmem:[%s1327_s2 + $0x28] sm:$0xff] (!%p331_p2)  ;;  %p376_p3 = scmp.lt.s32.totalorder (!%p331_p2), %s816_s14, 1 }
   0x7   : > { %970 = vmatprep.subr.bf16.mxu0 (!%p331_p2), %v1071_v6  ;;  %986 = vmatprep.mubr.msk.bf16.mxu0 (!%p331_p2), %vm1070_vm0, %v1071_v6  ;;  %v994_v7 = vpack.c.bf16 (!%p331_p2), %v399_v5, %v398_v2  ;;  %v997_v10 = vpack.c.bf16 (!%p331_p2), %v401_v9, %v400_v8  ;;  %v402_v11 = vld [vmem:[%s1327_s2 + $0x30] sm:$0xff] (!%p331_p2)  ;;  %v403_v12 = vld [vmem:[%s1327_s2 + $0x38] sm:$0xff] (!%p331_p2)  ;;  %v404_v13 = vld [vmem:[%s1327_s2 + $0x40] sm:$0xff] (!%p331_p2)  ;;  %v583_v9 = vlaneseq (!%p331_p2) }
   0x8   : > { %992 = vmatpush3.bf16.msra.mxu1 (!%p331_p2), %v991_v4  ;;  %v405_v14 = vld [vmem:[%s1327_s2 + $0x48] sm:$0xff] (!%p331_p2)  ;;  %v1000_v15 = vpack.c.bf16 (!%p331_p2), %v403_v12, %v402_v11  ;;  %v406_v17 = vld [vmem:[%s1327_s2 + $0x50] sm:$0xff] (!%p331_p2)  ;;  %v407_v18 = vld [vmem:[%s1327_s2 + $0x58] sm:$0xff] (!%p331_p2) }
   0x9   : > { %993 = vmatprep.subr.bf16.mxu1 (!%p331_p2), %v1069_v3  ;;  %v1003_v16 = vpack.c.bf16 (!%p331_p2), %v405_v14, %v404_v13  ;;  %v1006_v19 = vpack.c.bf16 (!%p331_p2), %v407_v18, %v406_v17  ;;  %v408_v20 = vld [vmem:[%s1327_s2 + $0x60] sm:$0xff] (!%p331_p2)  ;;  %v409_v21 = vld [vmem:[%s1327_s2 + $0x68] sm:$0xff] (!%p331_p2)  ;;  %v410_v23 = vld [vmem:[%s1327_s2 + $0x70] sm:$0xff] (!%p331_p2) }
   0xa   : > { %v1009_v22 = vpack.c.bf16 (!%p331_p2), %v409_v21, %v408_v20  ;;  %v411_v24 = vld [vmem:[%s1327_s2 + $0x78] sm:$0xff] (!%p331_p2)  ;;  %v484_v26 = vld [vmem:[%s1329_s4] sm:$0xff] (!%p331_p2)  ;;  %v485_v27 = vld [vmem:[%s1329_s4 + $0x8] sm:$0xff] (!%p331_p2) }
   0xb   : > { %v1012_v25 = vpack.c.bf16 (!%p331_p2), %v411_v24, %v410_v23  ;;  %v1015_v29 = vpack.c.bf16 (!%p331_p2), %v485_v27, %v484_v26  ;;  %v486_v30 = vld [vmem:[%s1329_s4 + $0x10] sm:$0xff] (!%p331_p2)  ;;  %v487_v31 = vld [vmem:[%s1329_s4 + $0x18] sm:$0xff] (!%p331_p2)  ;;  %v488_v33 = vld [vmem:[%s1329_s4 + $0x20] sm:$0xff] (!%p331_p2) }
   0xc   : > { %995 = vmatpush3.bf16.msra.mxu1 (!%p331_p2), %v994_v7  ;;  %v1018_v32 = vpack.c.bf16 (!%p331_p2), %v487_v31, %v486_v30  ;;  %v489_v34 = vld [vmem:[%s1329_s4 + $0x28] sm:$0xff] (!%p331_p2)  ;;  %v490_v36 = vld [vmem:[%s1329_s4 + $0x30] sm:$0xff] (!%p331_p2)  ;;  %v491_v37 = vld [vmem:[%s1329_s4 + $0x38] sm:$0xff] (!%p331_p2) }
   0xd   : > { %996 = vmatprep.subr.bf16.mxu1 %v1069_v3  ;;  %s1337_s14 = smov (!%p376_p3, %s816_s14), 1  ;;  %v1021_v35 = vpack.c.bf16 %v489_v34, %v488_v33  ;;  %v1024_v38 = vpack.c.bf16 %v491_v37, %v490_v36  ;;  %v492_v39 = vld [vmem:[%s1329_s4 + $0x40] sm:$0xff]  ;;  %v493_v40 = vld [vmem:[%s1329_s4 + $0x48] sm:$0xff]  ;;  %v494_v42 = vld [vmem:[%s1329_s4 + $0x50] sm:$0xff] }
   0xe   : > { %s383_s11 = scalar_lea.vmem %s1326_s1, %s1337_s14  ;;  %v1027_v41 = vpack.c.bf16 %v493_v40, %v492_v39  ;;  %v495_v43 = vld [vmem:[%s1329_s4 + $0x58] sm:$0xff]  ;;  %v496_v45 = vld [vmem:[%s1329_s4 + $0x60] sm:$0xff]  ;;  %v497_v46 = vld [vmem:[%s1329_s4 + $0x68] sm:$0xff]  ;;  %s1302_s30 = sshll.u32 %s1337_s14, 3 }
   0xf   : > { %v395_v28 = vld [vmem:[%s383_s11] sm:$0x1]  ;;  %v1030_v44 = vpack.c.bf16 %v495_v43, %v494_v42  ;;  %v1033_v47 = vpack.c.bf16 %v497_v46, %v496_v45  ;;  %v498_v48 = vld [vmem:[%s1329_s4 + $0x70] sm:$0xff]  ;;  %v499_v49 = vld [vmem:[%s1329_s4 + $0x78] sm:$0xff]  ;;  %s380_s15 = scalar_lea.vmem %s1325_s0, %s1302_s30  ;;  %s388_s17 = scalar_lea.vmem %s1334_s9, %s1302_s30 }
  0x10   : > { %998 = vmatpush3.bf16.msra.mxu1 %v997_v10  ;;  %v1036_v50 = vpack.c.bf16 %v499_v49, %v498_v48  ;;  %v412_v51 = vld [vmem:[%s1328_s3] sm:$0x1]  ;;  %v1050_v57 = vld [vmem:[%s1331_s6 + $0x8] sm:$0xff]   ;;  %v1051_v58 = vld [vmem:[%s1331_s6 + $0x10] sm:$0xff]   ;;  %v584_v10 = vshrl.u32 %v583_v9, 7  ;;  %s393_s24 = scalar_lea.vmem %s1335_s10, %s1302_s30 }
  0x11   : > { %999 = vmatprep.subr.bf16.mxu1 %v1069_v3  ;;  %v1049_v56 = vld [vmem:[%s1331_s6] sm:$0xff]   ;;  %v1052_v59 = vld [vmem:[%s1331_s6 + $0x18] sm:$0xff]   ;;  %v1054_v61 = vld [vmem:[%s1331_s6 + $0x28] sm:$0xff]  }
  0x12   : > { %971 = vmatpush3.bf16.msra.mxu0 %v1049_v56  ;;  %v1053_v60 = vld [vmem:[%s1331_s6 + $0x20] sm:$0xff]   ;;  %v1055_v62 = vld [vmem:[%s1331_s6 + $0x30] sm:$0xff]   ;;  %v1056_v63 = vld [vmem:[%s1331_s6 + $0x38] sm:$0xff]   ;;  %v585_v12 = vsub.s32 0, %v584_v10 }
  0x13   : > { %972 = vmatprep.subr.bf16.mxu0 %v1071_v6  ;;  %v500_v0 = vld [vmem:[%s1330_s5] sm:$0x1] }
  0x14   : > { %1001 = vmatpush3.bf16.msra.mxu1 %v1000_v15  ;;  %v578_v15 = vld [vmem:[%s380_s15] sm:$0xf] }
  0x15   : > { %1002 = vmatprep.subr.bf16.mxu1 %v1069_v3  ;;  %v837_v21 = vld [vmem:[%s1332_s7] ss:$0 sm:$0xff] }
  0x16   : > { %973 = vmatpush3.bf16.msra.mxu0 %v1050_v57  ;;  %v838_v24 = vld [vmem:[%s1333_s8] ss:$0 sm:$0xff] }
  0x17   : > { %974 = vmatprep.subr.bf16.mxu0 %v1071_v6 }
  0x18   : > { %1004 = vmatpush3.bf16.msra.mxu1 %v1003_v16  ;;  %v579_v16 = vld [vmem:[%s380_s15 + $0x4] sm:$0xf] }
  0x19   : > { %1005 = vmatprep.subr.bf16.mxu1 %v1069_v3 }
  0x1a   : > { %975 = vmatpush3.bf16.msra.mxu0 %v1051_v58 }
  0x1b   : > { %976 = vmatprep.subr.bf16.mxu0 %v1071_v6 }
  0x1c   : > { %1007 = vmatpush3.bf16.msra.mxu1 %v1006_v19 }
  0x1d   : > { %1008 = vmatprep.subr.bf16.mxu1 %v1069_v3 }
  0x1e   : > { %977 = vmatpush3.bf16.msra.mxu0 %v1052_v59 }
  0x1f   : > { %978 = vmatprep.subr.bf16.mxu0 %v1071_v6 }
  0x20   : > { %1010 = vmatpush3.bf16.msra.mxu1 %v1009_v22  ;;  %v849_v22 = vld [vmem:[%s388_s17] sm:$0xff]  }
  0x21   : > { %1011 = vmatprep.subr.bf16.mxu1 %v1069_v3  ;;  %v850_v26 = vunpack.c.l.bf16 %v849_v22  ;;  %v851_v31 = vunpack.c.h.bf16 %v849_v22 }
  0x22   : > { %979 = vmatpush3.bf16.msra.mxu0 %v1053_v60 }
  0x23   : > { %980 = vmatprep.subr.bf16.mxu0 %v1071_v6 }
  0x24   : > { %1013 = vmatpush3.bf16.msra.mxu1 %v1012_v25 }
  0x25   : > { %1014 = vmatprep.subr.bf16.mxu1 %v1069_v3 }
  0x26   : > { %981 = vmatpush3.bf16.msra.mxu0 %v1054_v61 }
  0x27   : > { %933 = vmatmul.mubr.f32.vlgmr.msra.gmra.mrb[0].mxu1 %v395_v28  ;;  %982 = vmatprep.subr.bf16.mxu0 %v1071_v6 }
  0x28   : > { %1016 = vmatpush3.bf16.msra.mxu1 %v1015_v29  ;;  %967 = vmatprep.mubr.msk.f32.mxu1 %vm1070_vm0, %v1071_v6 }
  0x29   : > { %1017 = vmatprep.subr.bf16.mxu1 %v1069_v3 }
  0x2a   : > { %983 = vmatpush3.bf16.msra.mxu0 %v1055_v62 }
  0x2b   : > { %984 = vmatprep.subr.bf16.mxu0 %v1071_v6 }
  0x2c   : > { %1019 = vmatpush3.bf16.msra.mxu1 %v1018_v32 }
  0x2d   : > { %1020 = vmatprep.subr.bf16.mxu1 %v1069_v3 }
  0x2e   : > { %985 = vmatpush3.bf16.msra.mxu0 %v1056_v63 }
  0x30   : > { %1022 = vmatpush3.bf16.msra.mxu1 %v1021_v35 }
  0x31   : > { %1023 = vmatprep.subr.bf16.mxu1 %v1069_v3 }
  0x34   : > { %1025 = vmatpush3.bf16.msra.mxu1 %v1024_v38 }
  0x35   : > { %1026 = vmatprep.subr.bf16.mxu1 %v1069_v3 }
  0x38   : > { %1028 = vmatpush3.bf16.msra.mxu1 %v1027_v41 }
  0x39   : > { %1029 = vmatprep.subr.bf16.mxu1 %v1069_v3 }
  0x3c   : > { %1031 = vmatpush3.bf16.msra.mxu1 %v1030_v44 }
  0x3d   : > { %1032 = vmatprep.subr.bf16.mxu1 %v1069_v3 }
  0x40   : > { %1034 = vmatpush3.bf16.msra.mxu1 %v1033_v47 }
  0x41   : > { %1035 = vmatprep.subr.bf16.mxu1 %v1069_v3 }
  0x44   : > { %1037 = vmatpush3.bf16.msra.mxu1 %v1036_v50 }
  0xfa   : > { %v479_v52 = vpop.f32.mrb[0].mxu1 }
  0xfb   : > { %v480_v53 = vadd.f32 %v479_v52, %v412_v51  ;;  %v934_v54 = vpop.f32.mrb[1].mxu1 }
  0xfd   : > { %v483_v55 = vmax.f32 %v480_v53, 0.0 }
  0xff   : > { %968 = vmatmul.mubr.f32.vlgmr.msra.gmra.mrb[2].mxu1 %v483_v55 }
 0x1d2   : > { %v567_v1 = vpop.f32.mrb[2].mxu1 }
 0x1d3   : > { %v568_v2 = vadd.f32 %v567_v1, %v500_v0  ;;  %v969_v3 = vpop.f32.mrb[3].mxu1 }
 0x1d5   : > { %v571_v4 = vsub.f32 0.0, %v568_v2 }
 0x1d7   : > { %v572_v5 = vmul.f32 1.442695, %v571_v4 }
 0x1d9   : > { %1057 = vpow2.f32 %v572_v5 }
 0x1e3   : > { %v1058_v7 = vpop.eup %1057 }
 0x1e4   : > { %v574_v8 = vadd.f32 1.0, %v1058_v7 }
 0x1e6   : > { %1059 = vrcp.f32 %v574_v8 }
 0x1f0   : > { %v1060_v11 = vpop.eup %1059 }
 0x1f1   : > { %v577_v6 = vpack.c.bf16 %v1060_v11, %v1060_v11 }
 0x1f3   : > { %v581_v13 = vpack.i.b16 %v577_v6, %v577_v6 }
 0x1f5   : > { %v586_v14 = vrot.slane %v581_v13, %v585_v12 }
 0x1f7   : > { %v827_v17 = vcombine.low %v586_v14, %v586_v14 }
 0x1f9   : > { %v591_v18 = vmul.bf16 %v827_v17, %v578_v15  ;;  %v592_v19 = vmul.bf16 %v827_v17, %v579_v16 }
 0x1fb   : > { %v828_v20 = vcombine.low %v591_v18, %v592_v19 }
 0x1fd   : > { %987 = vmatmul.mubr.bf16.vlgmr.msra.gmra.mrb[0].mxu0 %v828_v20 }
 0x2d0   : > { %v697_v23 = vpop.f32.mrb[0].mxu0 }
 0x2d1   : > { %v711_v25 = vmul.f32 %v837_v21, %v697_v23  ;;  %v988_v27 = vpop.f32.mrb[1].mxu0 }
 0x2d2   : > { %v700_v28 = vpop.f32.mrb[2].mxu0 }
 0x2d3   : > { %v720_v29 = vadd.f32 %v838_v24, %v711_v25  ;;  %v712_v30 = vmul.f32 %v837_v21, %v700_v28  ;;  %v989_v32 = vpop.f32.mrb[3].mxu0 }
 0x2d5   : > { %v726_v33 = vadd.f32 %v850_v26, %v720_v29  ;;  %v721_v34 = vadd.f32 %v838_v24, %v712_v30 }
 0x2d7   : > { %v727_v35 = vadd.f32 %v851_v31, %v721_v34  ;;  %v728_v36 = vmax.f32 %v726_v33, 0.0 }
 0x2d9   : > { %v729_v37 = vmax.f32 %v727_v35, 0.0 }
 0x2db   : > { %v855_v38 = vpack.c.bf16 %v729_v37, %v728_v36 }
 0x2dd   : > { %856 = vst [vmem:[%s393_s24] sm:$0xff] %v855_v38  }
 0x2de PF: > { %s20_s13 = sadd.s32 1, %s1067_s13  }
 0x2df   : > { %p17_p4 = scmp.ge.s32.totalorder %s20_s13, 4  }
 0x2e1   :  { %19 = sbr.rel (!%p17_p4) target bundleno = 1 (0x1), region = 96 }

// kernel: _lambda_.19
= control target key start
LH: loop header
LB: loop body
LE: loop exit
PB: predicated region body
PF: predicated region fallthrough
CT: control target
= control target key end

     0   :  { %8 = vsyncpa [#allocation3], 0  ;;  %s771_s0 = inlined_call_operand.vmem [shape: bf16[2,4,256], index: 0, kind: input, shape index: {}]   ;;  %s772_s1 = inlined_call_operand.vmem [shape: bf16[256,128], index: 1, kind: input, shape index: {}]   ;;  %s773_s2 = inlined_call_operand.vmem [shape: f32[1,128], index: 2, kind: input, shape index: {}]   ;;  %s774_s3 = inlined_call_operand.hbm [shape: f32[2,1,128], index: 3, kind: output, shape index: {}]  }
   0x1   :  { %10 = vsyncpa [#allocation3 + $0x1], 0  ;;  %s620_s12 = smov 0   ;;  %s622_s13 = smov 0  }
   0x2   :  { %s624_s14 = smov 0   ;;  %s626_s15 = smov 0  }
   0x3 LB: > { %s641_s16 = sadd.s32 4294967295, %s597_s15   ;;  %s432_s17 = sadd.s32 4294967294, %s597_s15   ;;  %s597_s15 = sphi %s626_s15, %s780_s15   ;;  %s593_s14 = sphi %s624_s14, %s779_s14   ;;  %s589_s13 = sphi %s622_s13, %s778_s13   ;;  %s585_s12 = sphi %s620_s12, %s777_s12  }
   0x4   : > { %s645_s18 = sadd.s32 1, %s597_s15   ;;  %s91_s19 = sadd.s32 1, %s593_s14 }
   0x5   : > { %s88_s20 = ssub.s32 %s597_s15, %s645_s18  ;;  %p101_p0 = scmp.ne.s32.totalorder %s593_s14, %s589_s13 }
   0x6   : > { %p89_p1 = scmp.eq.s32.totalorder %s88_s20, 0  ;;  %p102_p2 = scmp.eq.s32.totalorder %s641_s16, 1 }
   0x7   : > { %p107_p3 = scmp.ne.s32.totalorder %s589_s13, %s585_s12  ;;  %p108_p4 = scmp.eq.s32.totalorder %s432_s17, 1 }
   0x8   : > { %s656_s21 = scalar_select %p89_p1, %s593_s14, %s91_s19  }
   0x9   : > { %p658_p5 = por %p102_p2, %p101_p0  ;;  %p662_p6 = por %p108_p4, %p107_p3 }
   0xa   : > { %p435_p7 = scmp.ge.s32.totalorder %s597_s15, 1  ;;  %p140_p8 = scmp.lt.s32.totalorder %s597_s15, 3 }
   0xc   : > { %p141_p9 = pnand %p435_p7, %p140_p8 }
   0xd   : > { %v519_v0 = vld [vmem:[%s772_s1 + $0x40] sm:$0xff] (!%p141_p9)   ;;  %v521_v2 = vld [vmem:[%s772_s1 + $0x48] sm:$0xff] (!%p141_p9)   ;;  %p163_p10 = scmp.lt.s32.totalorder (!%p141_p9), %s641_s16, 1  ;;  %v523_v4 = vld [vmem:[%s772_s1 + $0x50] sm:$0xff] (!%p141_p9)   ;;  %vm174_vm0 = vcmask (!%p141_p9), 1043456   ;;  %s161_s25 = sand.u32 (!%p141_p9), 1, %s589_s13  }
   0xe   : > { %144 = sbr.rel (%p141_p9) target bundleno = 279 (0x117), region = 32  ;;  %v520_v1 = vld [vmem:[%s772_s1] sm:$0xff] (!%p141_p9)   ;;  %458 = vmatprep.subr.bf16.mxu0 (!%p141_p9), %v519_v0  ;;  %v522_v3 = vld [vmem:[%s772_s1 + $0x8] sm:$0xff] (!%p141_p9)   ;;  %v524_v5 = vld [vmem:[%s772_s1 + $0x10] sm:$0xff] (!%p141_p9)   ;;  %s162_s29 = scalar_lea.vmem (!%p141_p9), [#allocation2], %s161_s25 }
   0xf   : > { %459 = vmatpush3.bf16.msra.mxu0 (!%p141_p9), %v520_v1  ;;  %v525_v6 = vld [vmem:[%s772_s1 + $0x58] sm:$0xff] (!%p141_p9)   ;;  %v527_v8 = vld [vmem:[%s772_s1 + $0x60] sm:$0xff] (!%p141_p9)   ;;  %v529_v10 = vld [vmem:[%s772_s1 + $0x68] sm:$0xff] (!%p141_p9)   ;;  %s377_s30 = sshll.u32 (!%p141_p9), %s162_s29, 4  ;;  %s731_s30 = int_to_ptr.vmem [resolvable:$true] %s377_s30 }
  0x10   : > { %460 = vmatprep.subr.bf16.mxu0 (!%p141_p9), %v521_v2  ;;  %v526_v7 = vld [vmem:[%s772_s1 + $0x18] sm:$0xff] (!%p141_p9)   ;;  %v528_v9 = vld [vmem:[%s772_s1 + $0x20] sm:$0xff] (!%p141_p9)   ;;  %v530_v13 = vld [vmem:[%s772_s1 + $0x28] sm:$0xff] (!%p141_p9)   ;;  %s535_s8 = scalar_lea.vmem (!%p141_p9), %s731_s30, 16 }
  0x11   : > { %v531_v16 = vld [vmem:[%s772_s1 + $0x70] sm:$0xff] (!%p141_p9)   ;;  %v533_v22 = vld [vmem:[%s772_s1 + $0x78] sm:$0xff] (!%p141_p9)   ;;  %v226_v38 = vld [vmem:[%s773_s2] sm:$0x1] (!%p141_p9)  ;;  %p536_p11 = scmp.ne.s32.totalorder (!%p141_p9), %s731_s30, %s535_s8 }
  0x12   : > { %v532_v21 = vld [vmem:[%s772_s1 + $0x30] sm:$0xff] (!%p141_p9)   ;;  %v534_v27 = vld [vmem:[%s772_s1 + $0x38] sm:$0xff] (!%p141_p9)  }
  0x13   : > { %461 = vmatpush3.bf16.msra.mxu0 (!%p141_p9), %v522_v3  ;;  %p537_p12 = pnand (!%p141_p9), %p536_p11, %p658_p5 }
  0x14   : > { %462 = vmatprep.subr.bf16.mxu0 (!%p141_p9), %v523_v4 }
  0x15   : > { %s164_s7 = scalar_select %p163_p10, %s641_s16, 1 }
  0x16   : > { %p538_p13 = pneg %p537_p12 }
  0x17   : > { %s457_s17 = sshll.u32 %s164_s7, 2  ;;  %463 = vmatpush3.bf16.msra.mxu0 %v524_v5  ;;  %s365_s7 = scalar_lea.sflag [#allocation3], %s161_s25 }
  0x18   : > { %464 = vmatprep.subr.bf16.mxu0 %v525_v6  ;;  %s167_s28 = scalar_lea.vmem %s771_s0, %s457_s17 }
  0x19   : > { %v169_v11 = vld [vmem:[%s167_s28] sm:$0xf]  ;;  %s454_s28 = sshll.u32 %s641_s16, 4  ;;  %s599_s16 = smov [#allocation2]  }
  0x1a   : > { %v170_v12 = vunpack.c.l.bf16 %v169_v11  ;;  %s729_s6 = scalar_lea.hbm %s774_s3, %s454_s28  ;;  %s539_s9 = sshll.u32 %s599_s16, 4  ;;  %s540_s9 = int_to_ptr.vmem [resolvable:$false] %s539_s9 }
  0x1b   : > { %465 = vmatpush3.bf16.msra.mxu0 %v526_v7  ;;  %s541_s10 = scalar_lea.vmem %s540_s9, 32  ;;  %p542_p0 = scmp.lt.s32.totalorder %s731_s30, %s540_s9 }
  0x1c   : > { %466 = vmatprep.subr.bf16.mxu0 %v527_v8  ;;  %v172_v14 = vcombine.high %v170_v12, %v170_v12  ;;  %v175_v15 = vsel %vm174_vm0, %v170_v12, 0.0  ;;  %p543_p1 = scmp.lt.s32.totalorder %s541_s10, %s535_s8 }
  0x1d   : > { %v176_v17 = vrot.slane %v175_v15, 4 }
  0x1e   : > { %v182_v18 = vsel %vm174_vm0, %v172_v14, 0.0  ;;  %p544_p2 = por %p543_p1, %p542_p0 }
  0x1f   : > { %467 = vmatpush3.bf16.msra.mxu0 %v528_v9  ;;  %v183_v19 = vrot.slane %v182_v18, 4  ;;  %v177_v20 = vadd.f32 %v176_v17, %v175_v15 }
  0x20   : > { %468 = vmatprep.subr.bf16.mxu0 %v529_v10  ;;  %p545_p3 = pnand %p544_p2, %p538_p13 }
  0x21   : > { %v184_v23 = vadd.f32 %v183_v19, %v182_v18  ;;  %v178_v24 = vrot.slane %v177_v20, 2 }
  0x23   : > { %469 = vmatpush3.bf16.msra.mxu0 %v530_v13  ;;  %v185_v25 = vrot.slane %v184_v23, 2  ;;  %v179_v26 = vadd.f32 %v178_v24, %v177_v20 }
  0x24   : > { %470 = vmatprep.subr.bf16.mxu0 %v531_v16 }
  0x25   : > { %v186_v28 = vadd.f32 %v185_v25, %v184_v23  ;;  %v180_v29 = vrot.slane %v179_v26, 1 }
  0x27   : > { %471 = vmatpush3.bf16.msra.mxu0 %v532_v21  ;;  %v187_v30 = vrot.slane %v186_v28, 1  ;;  %v181_v31 = vadd.f32 %v180_v29, %v179_v26 }
  0x28   : > { %472 = vmatprep.subr.bf16.mxu0 %v533_v22 }
  0x29   : > { %v188_v32 = vadd.f32 %v187_v30, %v186_v28  ;;  %v190_v33 = vmul.f32 0.25, %v181_v31 }
  0x2b   : > { %473 = vmatpush3.bf16.msra.mxu0 %v534_v27  ;;  %v191_v34 = vmul.f32 0.25, %v188_v32  ;;  %v192_v35 = vpack.c.bf16 %v190_v33, %v190_v33 }
  0x2d   : > { %v193_v36 = vpack.c.bf16 %v191_v34, %v191_v34 }
  0x2f   : > { %355 = vmatprep.mubr.bf16.mxu0 %v193_v36 }
  0x30   : > { %356 = vmatmul.mubr.bf16.vlgmr.msra.gmra.mrb[0].mxu0 %v192_v35 }
 0x103   : > { %v474_v37 = vpop.f32.mrb[0].mxu0 }
 0x104   : > { %v475_v39 = vpop.f32.mrb[1].mxu0 }
 0x105   : > { %v476_v40 = vadd.f32 %v475_v39, %v474_v37  ;;  %v477_v41 = vpop.f32.mrb[2].mxu0 }
 0x106   : > { %v478_v42 = vpop.f32.mrb[3].mxu0 }
 0x107   : > { %v358_v43 = vadd.f32 %v476_v40, %v226_v38 }
 0x109   : > { %363 = vst [vmem:[%s162_s29] sm:$0x1] %v358_v43 }
 0x10a   : > { %548 = shalt.err (!%p545_p3)
}
 0x10b   : > { %s549_s11 = scalar_lea.hbm %s729_s6, 16  ;;  %s553_s20 = scalar_lea.hbm %s774_s3, 32 }
 0x10c   : > { %p550_p4 = scmp.ne.s32.totalorder %s729_s6, %s549_s11  ;;  %p554_p9 = scmp.lt.u32.totalorder %s729_s6, %s774_s3 }
 0x10d   : > { %p555_p10 = scmp.lt.u32.totalorder %s553_s20, %s549_s11  ;;  %p557_p12 = scmp.lt.u32.totalorder %s549_s11, %s729_s6 }
 0x10e   : > { %p551_p7 = pnand %p550_p4, %p658_p5 }
 0x10f   : > { %p556_p11 = por %p555_p10, %p554_p9 }
 0x110   : > { %p552_p8 = pneg %p551_p7 }
 0x111   : > { %p558_p13 = por %p557_p12, %p556_p11 }
 0x113   : > { %p559_p0 = pnand %p558_p13, %p552_p8 }
 0x115   : > { %562 = shalt.err (!%p559_p0)
}
 0x116   : > { %480 = dma.vmem_to_hbm [thread:$0]  (%p658_p5), %s731_s30, 16, %s729_s6, %s365_s7  }
 0x117 PF: > { %p486_p1 = scmp.ge.s32.totalorder %s597_s15, 2  ;;  %s389_s26 = sand.u32 1, %s585_s12  }
 0x118   : > { %s390_s27 = scalar_lea.sflag [#allocation3], %s389_s26 }
 0x119   : > { %p483_p2 = pnand %p486_p1, %p662_p6 }
 0x11b   : > { %580 = dma.done.wait (!%p483_p2), %s390_s27, 16  }
 0x11c   : > { %582 = vsyncadd (!%p483_p2), %s390_s27, 4294967280  ;;  %p13_p3 = scmp.ge.s32.totalorder %s645_s18, 4   ;;  %s777_s12 = smov %s589_s13 }
 0x11d   : > { %s778_s13 = smov %s593_s14  ;;  %s779_s14 = smov %s656_s21 }
 0x11e   : > { %s780_s15 = smov %s645_s18  ;;  %15 = sbr.rel (!%p13_p3) target bundleno = 3 (0x3), region = 67 }
 0x125   :  { %394 = vsyncpa [#allocation3], 1 }
 0x126   :  { %396 = vsyncpa [#allocation3 + $0x1], 1 }

// kernel: _lambda_.18
= control target key start
LH: loop header
LB: loop body
LE: loop exit
PB: predicated region body
PF: predicated region fallthrough
CT: control target
= control target key end

     0   :  { %s1619_s25 = smov 0   ;;  %s2035_s0 = inlined_call_operand.vmem [shape: bf16[2,4,256], index: 0, kind: input, shape index: {}]   ;;  %s2036_s1 = inlined_call_operand.vmem [shape: f32[2,1,256], index: 1, kind: input, shape index: {}]   ;;  %s2037_s2 = inlined_call_operand.vmem [shape: f32[256,128], index: 2, kind: input, shape index: {}]   ;;  %s2038_s3 = inlined_call_operand.vmem [shape: f32[1,128], index: 3, kind: input, shape index: {}]   ;;  %s2039_s4 = inlined_call_operand.vmem [shape: f32[128,256], index: 4, kind: input, shape index: {}]   ;;  %s2040_s5 = inlined_call_operand.vmem [shape: f32[1,256], index: 5, kind: input, shape index: {}]   ;;  %s2041_s6 = inlined_call_operand.vmem [shape: bf16[256,256], index: 6, kind: input, shape index: {}]   ;;  %s2042_s7 = inlined_call_operand.vmem [shape: f32[1,256], index: 7, kind: input, shape index: {}, may-alias: {7,11}]   ;;  %s2043_s8 = inlined_call_operand.vmem [shape: f32[1,256], index: 8, kind: input, shape index: {}, may-alias: {8,12}]   ;;  %s2044_s9 = inlined_call_operand.vmem [shape: bf16[2,4,128], index: 9, kind: input, shape index: {}]   ;;  %s2045_s10 = inlined_call_operand.vmem [shape: bf16[128,256], index: 10, kind: input, shape index: {}]   ;;  %s2046_s11 = inlined_call_operand.vmem [shape: f32[1,256], index: 11, kind: input, shape index: {}, may-alias: {7,11}]   ;;  %s2047_s12 = inlined_call_operand.vmem [shape: f32[1,256], index: 12, kind: input, shape index: {}, may-alias: {8,12}]   ;;  %s2048_s13 = inlined_call_operand.vmem [shape: bf16[2,4,256], index: 13, kind: output, shape index: {}]  }
   0x1 LB: > { %s1283_s26 = sadd.s32 4294967295, %s1544_s25   ;;  %p1287_p0 = scmp.ge.s32.totalorder %s1544_s25, 1  ;;  %s1544_s25 = sphi %s1619_s25, %s23_s25  }
   0x2   : > { %p405_p1 = scmp.lt.s32.totalorder %s1544_s25, 3 }
   0x4   : > { %p406_p2 = pnand %p1287_p0, %p405_p1 }
   0x5   : > { %v493_v0 = vld [vmem:[%s2037_s2 + $0x80] sm:$0xff] (!%p406_p2)  ;;  %v494_v1 = vld [vmem:[%s2037_s2 + $0x88] sm:$0xff] (!%p406_p2)  ;;  %p457_p3 = scmp.lt.s32.totalorder (!%p406_p2), %s1283_s26, 1  ;;  %v511_v3 = vlaneseq (!%p406_p2)  ;;  %v495_v6 = vld [vmem:[%s2037_s2 + $0x90] sm:$0xff] (!%p406_p2) }
   0x6   : > { %409 = sbr.rel (%p406_p2) target bundleno = 743 (0x2e7), region = 72  ;;  %v477_v2 = vld [vmem:[%s2037_s2] sm:$0xff] (!%p406_p2)  ;;  %v1383_v4 = vpack.c.bf16 (!%p406_p2), %v494_v1, %v493_v0  ;;  %v478_v5 = vld [vmem:[%s2037_s2 + $0x8] sm:$0xff] (!%p406_p2)  ;;  %v496_v7 = vld [vmem:[%s2037_s2 + $0x98] sm:$0xff] (!%p406_p2) }
   0x7   : > { %v1385_v8 = vpack.c.bf16 (!%p406_p2), %v478_v5, %v477_v2  ;;  %v1387_v9 = vpack.c.bf16 (!%p406_p2), %v496_v7, %v495_v6  ;;  %v479_v10 = vld [vmem:[%s2037_s2 + $0x10] sm:$0xff] (!%p406_p2)  ;;  %v480_v11 = vld [vmem:[%s2037_s2 + $0x18] sm:$0xff] (!%p406_p2)  ;;  %v497_v12 = vld [vmem:[%s2037_s2 + $0xa0] sm:$0xff] (!%p406_p2)  ;;  %v1659_v14 = vshrl.u32 (!%p406_p2), %v511_v3, 7 }
   0x8   : > { %1384 = vmatprep.subr.bf16.mxu0 (!%p406_p2), %v1383_v4  ;;  %v498_v13 = vld [vmem:[%s2037_s2 + $0xa8] sm:$0xff] (!%p406_p2)  ;;  %v1389_v15 = vpack.c.bf16 (!%p406_p2), %v480_v11, %v479_v10  ;;  %v481_v17 = vld [vmem:[%s2037_s2 + $0x20] sm:$0xff] (!%p406_p2)  ;;  %v499_v19 = vld [vmem:[%s2037_s2 + $0xb0] sm:$0xff] (!%p406_p2) }
   0x9   : > { %1386 = vmatpush3.bf16.msra.mxu0 (!%p406_p2), %v1385_v8  ;;  %v1391_v16 = vpack.c.bf16 (!%p406_p2), %v498_v13, %v497_v12  ;;  %v482_v18 = vld [vmem:[%s2037_s2 + $0x28] sm:$0xff] (!%p406_p2)  ;;  %v500_v20 = vld [vmem:[%s2037_s2 + $0xb8] sm:$0xff] (!%p406_p2)  ;;  %v1680_v21 = vsub.s32 (!%p406_p2), 1, %v1659_v14  ;;  %v483_v24 = vld [vmem:[%s2037_s2 + $0x30] sm:$0xff] (!%p406_p2) }
   0xa   : > { %1388 = vmatprep.subr.bf16.mxu0 (!%p406_p2), %v1387_v9  ;;  %v1393_v22 = vpack.c.bf16 (!%p406_p2), %v482_v18, %v481_v17  ;;  %v1395_v23 = vpack.c.bf16 (!%p406_p2), %v500_v20, %v499_v19  ;;  %v484_v25 = vld [vmem:[%s2037_s2 + $0x38] sm:$0xff] (!%p406_p2)  ;;  %v501_v26 = vld [vmem:[%s2037_s2 + $0xc0] sm:$0xff] (!%p406_p2)  ;;  %v502_v27 = vld [vmem:[%s2037_s2 + $0xc8] sm:$0xff] (!%p406_p2) }
   0xb   : > { %v485_v29 = vld [vmem:[%s2037_s2 + $0x40] sm:$0xff] (!%p406_p2)  ;;  %v486_v30 = vld [vmem:[%s2037_s2 + $0x48] sm:$0xff] (!%p406_p2)  ;;  %v595_v33 = vld [vmem:[%s2039_s4 + $0x18] sm:$0xff] (!%p406_p2)  ;;  %v1397_v34 = vpack.c.bf16 (!%p406_p2), %v484_v25, %v483_v24  ;;  %v1399_v40 = vpack.c.bf16 (!%p406_p2), %v502_v27, %v501_v26 }
   0xc   : > { %v593_v32 = vld [vmem:[%s2039_s4 + $0x8] sm:$0xff] (!%p406_p2)  ;;  %v503_v35 = vld [vmem:[%s2037_s2 + $0xd0] sm:$0xff] (!%p406_p2)  ;;  %v592_v37 = vld [vmem:[%s2039_s4] sm:$0xff] (!%p406_p2)  ;;  %v1401_v51 = vpack.c.bf16 (!%p406_p2), %v486_v30, %v485_v29 }
   0xd   : > { %s2050_s26 = smov (!%p457_p3, %s1283_s26), 1  ;;  %1390 = vmatpush3.bf16.msra.mxu0 %v1389_v15  ;;  %v1415_v36 = vpack.c.bf16 %v595_v33, %v593_v32  ;;  %v594_v38 = vld [vmem:[%s2039_s4 + $0x10] sm:$0xff]  ;;  %v597_v39 = vld [vmem:[%s2039_s4 + $0x28] sm:$0xff]  ;;  %v599_v42 = vld [vmem:[%s2039_s4 + $0x38] sm:$0xff] }
   0xe   : > { %s1290_s15 = sshll.u32 %s2050_s26, 1  ;;  %1392 = vmatprep.subr.bf16.mxu0 %v1391_v16  ;;  %v1417_v41 = vpack.c.bf16 %v594_v38, %v592_v37  ;;  %v596_v43 = vld [vmem:[%s2039_s4 + $0x20] sm:$0xff]  ;;  %v598_v44 = vld [vmem:[%s2039_s4 + $0x30] sm:$0xff]  ;;  %v504_v45 = vld [vmem:[%s2037_s2 + $0xd8] sm:$0xff]  ;;  %v1419_v46 = vpack.c.bf16 %v599_v42, %v597_v39 }
   0xf   : > { %s465_s28 = scalar_lea.vmem %s2036_s1, %s1290_s15  ;;  %1416 = vmatprep.subr.bf16.mxu1 %v1415_v36  ;;  %v601_v47 = vld [vmem:[%s2039_s4 + $0x48] sm:$0xff]  ;;  %v603_v48 = vld [vmem:[%s2039_s4 + $0x58] sm:$0xff]  ;;  %v487_v49 = vld [vmem:[%s2037_s2 + $0x50] sm:$0xff]  ;;  %v1421_v50 = vpack.c.bf16 %v598_v44, %v596_v43  ;;  %v1403_v56 = vpack.c.bf16 %v504_v45, %v503_v35 }
  0x10   : > { %v1694_v28 = vld [vmem:[%s465_s28] sm:$0x3]  ;;  %1418 = vmatpush1.bf16.msra.mxu1 %v1417_v41  ;;  %v488_v52 = vld [vmem:[%s2037_s2 + $0x58] sm:$0xff]  ;;  %v1423_v53 = vpack.c.bf16 %v603_v48, %v601_v47  ;;  %v602_v55 = vld [vmem:[%s2039_s4 + $0x50] sm:$0xff]  ;;  %v1546_v41 = vmov 0.0   ;;  %s469_s28 = scalar_lea.vmem %s2044_s9, %s1290_s15  ;;  %s1346_s15 = sshll.u32 %s2050_s26, 2 }
  0x11   : > { %v518_v31 = vrot.slane %v1694_v28, %v1680_v21  ;;  %1394 = vmatpush3.bf16.msra.mxu0 %v1393_v22  ;;  %1420 = vmatprep.subr.bf16.mxu1 %v1419_v46  ;;  %v600_v54 = vld [vmem:[%s2039_s4 + $0x40] sm:$0xff]  ;;  %v605_v58 = vld [vmem:[%s2039_s4 + $0x68] sm:$0xff]  ;;  %v607_v59 = vld [vmem:[%s2039_s4 + $0x78] sm:$0xff]  ;;  %v1405_v4 = vpack.c.bf16 %v488_v52, %v487_v49  ;;  %s461_s22 = scalar_lea.vmem %s2035_s0, %s1346_s15  ;;  %s474_s19 = scalar_lea.vmem %s2048_s13, %s1346_s15 }
  0x12   : > { %1396 = vmatprep.subr.bf16.mxu0 %v1395_v23  ;;  %v505_v57 = vld [vmem:[%s2037_s2 + $0xe0] sm:$0xff]  ;;  %v506_v60 = vld [vmem:[%s2037_s2 + $0xe8] sm:$0xff]  ;;  %v606_v62 = vld [vmem:[%s2039_s4 + $0x70] sm:$0xff]  ;;  %v1425_v1 = vpack.c.bf16 %v602_v55, %v600_v54  ;;  %v1427_v7 = vpack.c.bf16 %v607_v59, %v605_v58  ;;  %v1813_v23 = vsub.s32 0, %v1659_v14  ;;  %700 = vmatprep.mubr.f32.mxu1 %v1546_v41 }
  0x13   : > { %585 = vmatprep.mubr.f32.mxu0 %v518_v31  ;;  %v604_v61 = vld [vmem:[%s2039_s4 + $0x60] sm:$0xff]  ;;  %v490_v0 = vld [vmem:[%s2037_s2 + $0x68] sm:$0xff]  ;;  %v611_v3 = vld [vmem:[%s2039_s4 + $0x98] sm:$0xff]  ;;  %v1407_v8 = vpack.c.bf16 %v506_v60, %v505_v57 }
  0x14   : > { %v489_v63 = vld [vmem:[%s2037_s2 + $0x60] sm:$0xff]  ;;  %1422 = vmatpush1.bf16.msra.mxu1 %v1421_v50  ;;  %v609_v2 = vld [vmem:[%s2039_s4 + $0x88] sm:$0xff]  ;;  %v507_v5 = vld [vmem:[%s2037_s2 + $0xf0] sm:$0xff]  ;;  %v1429_v13 = vpack.c.bf16 %v606_v62, %v604_v61  ;;  %v514_v27 = vrot.slane %v1694_v28, %v1813_v23 }
  0x15   : > { %1398 = vmatpush3.bf16.msra.mxu0 %v1397_v34  ;;  %v508_v6 = vld [vmem:[%s2037_s2 + $0xf8] sm:$0xff]  ;;  %1424 = vmatprep.subr.bf16.mxu1 %v1423_v53  ;;  %v608_v9 = vld [vmem:[%s2039_s4 + $0x80] sm:$0xff]  ;;  %v610_v10 = vld [vmem:[%s2039_s4 + $0x90] sm:$0xff]  ;;  %v1409_v17 = vpack.c.bf16 %v490_v0, %v489_v63  ;;  %v1431_v18 = vpack.c.bf16 %v611_v3, %v609_v2 }
  0x16   : > { %1400 = vmatprep.subr.bf16.mxu0 %v1399_v40  ;;  %v491_v11 = vld [vmem:[%s2037_s2 + $0x70] sm:$0xff]  ;;  %v492_v12 = vld [vmem:[%s2037_s2 + $0x78] sm:$0xff]  ;;  %v613_v15 = vld [vmem:[%s2039_s4 + $0xa8] sm:$0xff]  ;;  %v1411_v19 = vpack.c.bf16 %v508_v6, %v507_v5  ;;  %v1433_v24 = vpack.c.bf16 %v610_v10, %v608_v9 }
  0x17   : > { %v615_v16 = vld [vmem:[%s2039_s4 + $0xb8] sm:$0xff]  ;;  %v612_v20 = vld [vmem:[%s2039_s4 + $0xa0] sm:$0xff]  ;;  %v614_v22 = vld [vmem:[%s2039_s4 + $0xb0] sm:$0xff]  ;;  %v1413_v25 = vpack.c.bf16 %v492_v12, %v491_v11 }
  0x18   : > { %1426 = vmatpush1.bf16.msra.mxu1 %v1425_v1  ;;  %v1435_v26 = vpack.c.bf16 %v615_v16, %v613_v15  ;;  %v1437_v29 = vpack.c.bf16 %v614_v22, %v612_v20  ;;  %v617_v30 = vld [vmem:[%s2039_s4 + $0xc8] sm:$0xff]  ;;  %v619_v31 = vld [vmem:[%s2039_s4 + $0xd8] sm:$0xff]  ;;  %v616_v33 = vld [vmem:[%s2039_s4 + $0xc0] sm:$0xff] }
  0x19   : > { %1402 = vmatpush3.bf16.msra.mxu0 %v1401_v51  ;;  %1428 = vmatprep.subr.bf16.mxu1 %v1427_v7  ;;  %v1439_v32 = vpack.c.bf16 %v619_v31, %v617_v30  ;;  %v618_v28 = vld [vmem:[%s2039_s4 + $0xd0] sm:$0xff]  ;;  %v621_v35 = vld [vmem:[%s2039_s4 + $0xe8] sm:$0xff]  ;;  %v623_v36 = vld [vmem:[%s2039_s4 + $0xf8] sm:$0xff] }
  0x1a   : > { %1404 = vmatprep.subr.bf16.mxu0 %v1403_v56  ;;  %v1441_v34 = vpack.c.bf16 %v618_v28, %v616_v33  ;;  %v1443_v37 = vpack.c.bf16 %v623_v36, %v621_v35  ;;  %v620_v38 = vld [vmem:[%s2039_s4 + $0xe0] sm:$0xff]  ;;  %v622_v39 = vld [vmem:[%s2039_s4 + $0xf0] sm:$0xff] }
  0x1b   : > { %v1445_v40 = vpack.c.bf16 %v622_v39, %v620_v38  ;;  %v1458_v42 = vld [vmem:[%s2041_s6] ss:$8 sps:$4 sm:$0xff]   ;;  %v1460_v43 = vld [vmem:[%s2041_s6 + $0x4] ss:$8 sps:$4 sm:$0xff]   ;;  %v1463_v44 = vld [vmem:[%s2041_s6 + $0x14] ss:$8 sps:$4 sm:$0xff]  }
  0x1c   : > { %1430 = vmatpush1.bf16.msra.mxu1 %v1429_v13  ;;  %v1461_v45 = vld [vmem:[%s2041_s6 + $0x10] ss:$8 sps:$4 sm:$0xff]   ;;  %v1466_v46 = vld [vmem:[%s2041_s6 + $0x24] ss:$8 sps:$4 sm:$0xff]   ;;  %v1464_v47 = vld [vmem:[%s2041_s6 + $0x20] ss:$8 sps:$4 sm:$0xff]  }
  0x1d   : > { %1406 = vmatpush3.bf16.msra.mxu0 %v1405_v4  ;;  %1432 = vmatprep.subr.bf16.mxu1 %v1431_v18  ;;  %v1469_v48 = vld [vmem:[%s2041_s6 + $0x34] ss:$8 sps:$4 sm:$0xff]   ;;  %v1467_v49 = vld [vmem:[%s2041_s6 + $0x30] ss:$8 sps:$4 sm:$0xff]   ;;  %v509_v51 = vld [vmem:[%s2038_s3] sm:$0x1] }
  0x1e   : > { %1408 = vmatprep.subr.bf16.mxu0 %v1407_v8  ;;  %v1472_v56 = vld [vmem:[%s2041_s6 + $0x44] ss:$8 sps:$4 sm:$0xff]   ;;  %v1470_v57 = vld [vmem:[%s2041_s6 + $0x40] ss:$8 sps:$4 sm:$0xff]   ;;  %v1475_v58 = vld [vmem:[%s2041_s6 + $0x54] ss:$8 sps:$4 sm:$0xff]  }
  0x1f   : > { %v1473_v59 = vld [vmem:[%s2041_s6 + $0x50] ss:$8 sps:$4 sm:$0xff]   ;;  %v1478_v60 = vld [vmem:[%s2041_s6 + $0x64] ss:$8 sps:$4 sm:$0xff]   ;;  %v1476_v61 = vld [vmem:[%s2041_s6 + $0x60] ss:$8 sps:$4 sm:$0xff]  }
  0x20   : > { %1434 = vmatpush1.bf16.msra.mxu1 %v1433_v24  ;;  %v1481_v62 = vld [vmem:[%s2041_s6 + $0x74] ss:$8 sps:$4 sm:$0xff]   ;;  %v1479_v63 = vld [vmem:[%s2041_s6 + $0x70] ss:$8 sps:$4 sm:$0xff]   ;;  %v1484_v0 = vld [vmem:[%s2045_s10 + $0x4] ss:$8 sps:$4 sm:$0xff]  }
  0x21   : > { %1410 = vmatpush3.bf16.msra.mxu0 %v1409_v17  ;;  %1436 = vmatprep.subr.bf16.mxu1 %v1435_v26  ;;  %v1482_v1 = vld [vmem:[%s2045_s10] ss:$8 sps:$4 sm:$0xff]   ;;  %v1487_v2 = vld [vmem:[%s2041_s6 + $0x84] ss:$8 sps:$4 sm:$0xff]   ;;  %v1490_v4 = vld [vmem:[%s2045_s10 + $0x14] ss:$8 sps:$4 sm:$0xff]  }
  0x22   : > { %1412 = vmatprep.subr.bf16.mxu0 %v1411_v19  ;;  %v1485_v3 = vld [vmem:[%s2041_s6 + $0x80] ss:$8 sps:$4 sm:$0xff]   ;;  %v1488_v5 = vld [vmem:[%s2045_s10 + $0x10] ss:$8 sps:$4 sm:$0xff]   ;;  %v1493_v6 = vld [vmem:[%s2041_s6 + $0x94] ss:$8 sps:$4 sm:$0xff]  }
  0x23   : > { %v1491_v7 = vld [vmem:[%s2041_s6 + $0x90] ss:$8 sps:$4 sm:$0xff]   ;;  %v1496_v8 = vld [vmem:[%s2045_s10 + $0x24] ss:$8 sps:$4 sm:$0xff]   ;;  %v1494_v9 = vld [vmem:[%s2045_s10 + $0x20] ss:$8 sps:$4 sm:$0xff]  }
  0x24   : > { %1438 = vmatpush1.bf16.msra.mxu1 %v1437_v29  ;;  %v1499_v10 = vld [vmem:[%s2041_s6 + $0xa4] ss:$8 sps:$4 sm:$0xff]   ;;  %v1497_v11 = vld [vmem:[%s2041_s6 + $0xa0] ss:$8 sps:$4 sm:$0xff]   ;;  %v1502_v12 = vld [vmem:[%s2045_s10 + $0x34] ss:$8 sps:$4 sm:$0xff]  }
  0x25   : > { %1414 = vmatpush3.bf16.msra.mxu0 %v1413_v25  ;;  %1440 = vmatprep.subr.bf16.mxu1 %v1439_v32  ;;  %v1500_v13 = vld [vmem:[%s2045_s10 + $0x30] ss:$8 sps:$4 sm:$0xff]   ;;  %v1505_v15 = vld [vmem:[%s2041_s6 + $0xb4] ss:$8 sps:$4 sm:$0xff]   ;;  %v1508_v17 = vld [vmem:[%s2045_s10 + $0x44] ss:$8 sps:$4 sm:$0xff]  }
  0x26   : > { %951 = vmatprep.subr.bf16.mxu0 %v1460_v43  ;;  %v1503_v16 = vld [vmem:[%s2041_s6 + $0xb0] ss:$8 sps:$4 sm:$0xff]   ;;  %v1506_v18 = vld [vmem:[%s2045_s10 + $0x40] ss:$8 sps:$4 sm:$0xff]   ;;  %v1511_v19 = vld [vmem:[%s2041_s6 + $0xc4] ss:$8 sps:$4 sm:$0xff]  }
  0x27   : > { %v1509_v20 = vld [vmem:[%s2041_s6 + $0xc0] ss:$8 sps:$4 sm:$0xff]   ;;  %v1514_v22 = vld [vmem:[%s2045_s10 + $0x54] ss:$8 sps:$4 sm:$0xff]   ;;  %v1512_v24 = vld [vmem:[%s2045_s10 + $0x50] ss:$8 sps:$4 sm:$0xff]  }
  0x28   : > { %586 = vmatmul.mubr.f32.vlgmr.msra.gmra.mrb[0].mxu0 %v514_v27  ;;  %1442 = vmatpush1.bf16.msra.mxu1 %v1441_v34  ;;  %v1517_v25 = vld [vmem:[%s2041_s6 + $0xd4] ss:$8 sps:$4 sm:$0xff]   ;;  %v1515_v26 = vld [vmem:[%s2041_s6 + $0xd0] ss:$8 sps:$4 sm:$0xff]   ;;  %v1518_v27 = vld [vmem:[%s2045_s10 + $0x60] ss:$8 sps:$4 sm:$0xff]  }
  0x29   : > { %1444 = vmatprep.subr.bf16.mxu1 %v1443_v37  ;;  %952 = vmatpush1.bf16.msra.mxu0 %v1458_v42  ;;  %v1520_v29 = vld [vmem:[%s2045_s10 + $0x64] ss:$8 sps:$4 sm:$0xff]   ;;  %v1521_v31 = vld [vmem:[%s2041_s6 + $0xe0] ss:$8 sps:$4 sm:$0xff]   ;;  %v1526_v32 = vld [vmem:[%s2045_s10 + $0x74] ss:$8 sps:$4 sm:$0xff]  }
  0x2a   : > { %953 = vmatprep.subr.bf16.mxu0 %v1463_v44  ;;  %v1523_v30 = vld [vmem:[%s2041_s6 + $0xe4] ss:$8 sps:$4 sm:$0xff]   ;;  %v1524_v33 = vld [vmem:[%s2045_s10 + $0x70] ss:$8 sps:$4 sm:$0xff]   ;;  %v1529_v28 = vld [vmem:[%s2041_s6 + $0xf4] ss:$8 sps:$4 sm:$0xff]  }
  0x2b   : > { %v1547_v34 = vmov 0   ;;  %v1527_v35 = vld [vmem:[%s2041_s6 + $0xf0] ss:$8 sps:$4 sm:$0xff]   ;;  %v1020_v36 = vld [vmem:[%s469_s28] sm:$0x3] }
  0x2c   : > { %1446 = vmatpush1.bf16.msra.mxu1 %v1445_v40  ;;  %v624_v37 = vld [vmem:[%s2040_s5] sm:$0x3] }
  0x2d   : > { %954 = vmatpush1.bf16.msra.mxu0 %v1461_v45  ;;  %1117 = vmatprep.subr.bf16.mxu1 %v1484_v0  ;;  %v629_v38 = vrot.slane %v624_v37, %v1813_v23  ;;  %v633_v39 = vrot.slane %v624_v37, %v1680_v21 }
  0x2e   : > { %955 = vmatprep.subr.bf16.mxu0 %v1466_v46 }
  0x31   : > { %956 = vmatpush1.bf16.msra.mxu0 %v1464_v47 }
  0x32   : > { %957 = vmatprep.subr.bf16.mxu0 %v1469_v48 }
  0x35   : > { %958 = vmatpush1.bf16.msra.mxu0 %v1467_v49 }
  0x36   : > { %959 = vmatprep.subr.bf16.mxu0 %v1472_v56 }
  0x39   : > { %960 = vmatpush1.bf16.msra.mxu0 %v1470_v57 }
  0x3a   : > { %961 = vmatprep.subr.bf16.mxu0 %v1475_v58 }
  0x3d   : > { %962 = vmatpush1.bf16.msra.mxu0 %v1473_v59 }
  0x3e   : > { %963 = vmatprep.subr.bf16.mxu0 %v1478_v60 }
  0x41   : > { %964 = vmatpush1.bf16.msra.mxu0 %v1476_v61 }
  0x42   : > { %965 = vmatprep.subr.bf16.mxu0 %v1481_v62 }
  0x45   : > { %966 = vmatpush1.bf16.msra.mxu0 %v1479_v63 }
  0x46   : > { %967 = vmatprep.subr.bf16.mxu0 %v1487_v2 }
  0x49   : > { %968 = vmatpush1.bf16.msra.mxu0 %v1485_v3 }
  0x4a   : > { %969 = vmatprep.subr.bf16.mxu0 %v1493_v6 }
  0x4d   : > { %970 = vmatpush1.bf16.msra.mxu0 %v1491_v7 }
  0x4e   : > { %971 = vmatprep.subr.bf16.mxu0 %v1499_v10  ;;  %v1158_v10 = vld [vmem:[%s2046_s11] sm:$0x3] }
  0x51   : > { %972 = vmatpush1.bf16.msra.mxu0 %v1497_v11  ;;  %v1163_v11 = vrot.slane %v1158_v10, %v1813_v23 }
  0x52   : > { %973 = vmatprep.subr.bf16.mxu0 %v1505_v15  ;;  %v1006_v15 = vld [vmem:[%s2043_s8] sm:$0x3] }
  0x55   : > { %974 = vmatpush1.bf16.msra.mxu0 %v1503_v16 }
  0x56   : > { %975 = vmatprep.subr.bf16.mxu0 %v1511_v19 }
  0x59   : > { %976 = vmatpush1.bf16.msra.mxu0 %v1509_v20 }
  0x5a   : > { %977 = vmatprep.subr.bf16.mxu0 %v1517_v25 }
  0x5d   : > { %978 = vmatpush1.bf16.msra.mxu0 %v1515_v26  ;;  %v1015_v26 = vrot.slane %v1006_v15, %v1680_v21 }
  0x5e   : > { %979 = vmatprep.subr.bf16.mxu0 %v1523_v30 }
  0x61   : > { %980 = vmatpush1.bf16.msra.mxu0 %v1521_v31 }
  0x62   : > { %981 = vmatprep.subr.bf16.mxu0 %v1529_v28 }
  0x65   : > { %982 = vmatpush1.bf16.msra.mxu0 %v1527_v35 }
  0xfb   : > { %v1380_v50 = vpop.f32.mrb[0].mxu0 }
  0xfc   : > { %v1381_v52 = vpop.f32.mrb[1].mxu0 }
  0xfd   : > { %v1382_v53 = vadd.f32 %v1381_v52, %v1380_v50  ;;  %v1548_v52 = vmov 1983009808  }
  0xff   : > { %v588_v54 = vadd.f32 %v1382_v53, %v509_v51  ;;  %v740_v53 = vunpack.c.l.s4 %v1548_v52 }
 0x101   : > { %v591_v55 = vmax.f32 %v588_v54, 0.0  ;;  %v741_v58 = vunpack.c.0.s8 %v740_v53 }
 0x103   : > { %701 = vmatmul.mubr.f32.vlgmr.msra.gmra.mrb[0].mxu1 %v591_v55  ;;  %v744_v63 = vsub.s32 %v741_v58, %v1659_v14  ;;  %v1172_v14 = vld [vmem:[%s2047_s12] sm:$0x3] }
 0x104   : > { %1118 = vmatpush1.bf16.msra.mxu1 %v1482_v1  ;;  %1149 = vmatprep.mubr.bf16.mxu1 %v1547_v34  ;;  %v721_v1 = vld [vmem:[%s461_s22] sm:$0xf]  ;;  %v1181_v20 = vrot.slane %v1172_v14, %v1680_v21 }
 0x105   : > { %1119 = vmatprep.subr.bf16.mxu1 %v1490_v4 }
 0x108   : > { %1120 = vmatpush1.bf16.msra.mxu1 %v1488_v5 }
 0x109   : > { %1121 = vmatprep.subr.bf16.mxu1 %v1496_v8 }
 0x10c   : > { %1122 = vmatpush1.bf16.msra.mxu1 %v1494_v9 }
 0x10d   : > { %1123 = vmatprep.subr.bf16.mxu1 %v1502_v12  ;;  %v1167_v12 = vrot.slane %v1158_v10, %v1680_v21 }
 0x110   : > { %1124 = vmatpush1.bf16.msra.mxu1 %v1500_v13  ;;  %v992_v13 = vld [vmem:[%s2042_s7] sm:$0x3] }
 0x111   : > { %1125 = vmatprep.subr.bf16.mxu1 %v1508_v17  ;;  %v1177_v17 = vrot.slane %v1172_v14, %v1813_v23 }
 0x114   : > { %1126 = vmatpush1.bf16.msra.mxu1 %v1506_v18  ;;  %v997_v18 = vrot.slane %v992_v13, %v1813_v23 }
 0x115   : > { %1127 = vmatprep.subr.bf16.mxu1 %v1514_v22  ;;  %v1001_v22 = vrot.slane %v992_v13, %v1680_v21 }
 0x118   : > { %1128 = vmatpush1.bf16.msra.mxu1 %v1512_v24  ;;  %v1011_v24 = vrot.slane %v1006_v15, %v1813_v23 }
 0x119   : > { %1129 = vmatprep.subr.bf16.mxu1 %v1520_v29 }
 0x11c   : > { %1130 = vmatpush1.bf16.msra.mxu1 %v1518_v27 }
 0x11d   : > { %1131 = vmatprep.subr.bf16.mxu1 %v1526_v32 }
 0x120   : > { %1132 = vmatpush1.bf16.msra.mxu1 %v1524_v33 }
 0x123   : > { %1150 = vmatmul.mubr.bf16.vlgmr.msra.gmra.mrb[4].mxu1 %v1020_v36 }
 0x1d6   : > { %v702_v40 = vpop.f32.mrb[0].mxu1 }
 0x1d7   : > { %v703_v41 = vadd.f32 %v702_v40, %v629_v38  ;;  %v704_v42 = vpop.f32.mrb[1].mxu1 }
 0x1d8   : > { %v705_v43 = vadd.f32 %v704_v42, %v633_v39 }
 0x1d9   : > { %v707_v44 = vsub.f32 0.0, %v703_v41 }
 0x1da   : > { %v708_v45 = vsub.f32 0.0, %v705_v43 }
 0x1db   : > { %v709_v46 = vmul.f32 1.442695, %v707_v44 }
 0x1dc   : > { %v711_v47 = vmul.f32 1.442695, %v708_v45 }
 0x1dd   : > { %1530 = vpow2.f32 %v709_v46 }
 0x1de   : > { %1532 = vpow2.f32 %v711_v47 }
 0x1e7   : > { %v1531_v48 = vpop.eup %1530 }
 0x1e8   : > { %v1533_v49 = vpop.eup %1532  ;;  %v713_v50 = vadd.f32 1.0, %v1531_v48 }
 0x1e9   : > { %v714_v51 = vadd.f32 1.0, %v1533_v49 }
 0x1ea   : > { %1534 = vrcp.f32 %v713_v50 }
 0x1eb   : > { %1536 = vrcp.f32 %v714_v51 }
 0x1f4   : > { %v1535_v54 = vpop.eup %1534 }
 0x1f5   : > { %v1537_v55 = vpop.eup %1536  ;;  %v719_v56 = vpack.c.bf16 %v1535_v54, %v1535_v54 }
 0x1f6   : > { %v720_v57 = vpack.c.bf16 %v1537_v55, %v1537_v55  ;;  %v1151_v6 = vpop.f32.mrb[4].mxu1 }
 0x1f7   : > { %v723_v59 = vpack.i.b16 %v719_v56, %v719_v56  ;;  %v1153_v7 = vpop.f32.mrb[5].mxu1  ;;  %v1170_v16 = vmul.f32 %v1163_v11, %v1151_v6 }
 0x1f8   : > { %v730_v60 = vpack.i.b16 %v720_v57, %v720_v57  ;;  %v1155_v8 = vpop.f32.mrb[6].mxu1  ;;  %v1171_v19 = vmul.f32 %v1167_v12, %v1153_v7 }
 0x1f9   : > { %v728_v61 = vrot.slane %v723_v59, %v1813_v23  ;;  %v1156_v9 = vpop.f32.mrb[7].mxu1  ;;  %v1184_v27 = vadd.f32 %v1177_v17, %v1170_v16 }
 0x1fa   : > { %v735_v62 = vrot.slane %v730_v60, %v1813_v23  ;;  %v1185_v31 = vadd.f32 %v1181_v20, %v1171_v19 }
 0x1fc   : > { %v738_v0 = vcombine.low %v728_v61, %v735_v62 }
 0x1fe   : > { %v745_v2 = vrot.slane %v738_v0, %v744_v63 }
 0x200   : > { %v747_v3 = vmul.bf16 %v745_v2, %v721_v1 }
 0x202   : > { %v787_v4 = vrot.slane %v747_v3, %v744_v63 }
 0x204   : > { %v788_v5 = vcombine.high %v787_v4, %v787_v4 }
 0x206   : > { %983 = vmatprep.mubr.bf16.mxu0 %v788_v5 }
 0x207   : > { %984 = vmatmul.mubr.bf16.vlgmr.msra.gmra.mrb[4].mxu0 %v787_v4 }
 0x2da   : > { %v985_v25 = vpop.f32.mrb[4].mxu0 }
 0x2db   : > { %v1004_v29 = vmul.f32 %v997_v18, %v985_v25  ;;  %v987_v30 = vpop.f32.mrb[5].mxu0 }
 0x2dc   : > { %v1005_v32 = vmul.f32 %v1001_v22, %v987_v30  ;;  %v989_v33 = vpop.f32.mrb[6].mxu0 }
 0x2dd   : > { %v1018_v28 = vadd.f32 %v1011_v24, %v1004_v29  ;;  %v990_v34 = vpop.f32.mrb[7].mxu0 }
 0x2de   : > { %v1019_v35 = vadd.f32 %v1015_v26, %v1005_v32 }
 0x2df   : > { %v1186_v36 = vadd.f32 %v1184_v27, %v1018_v28 }
 0x2e0   : > { %v1187_v37 = vadd.f32 %v1185_v31, %v1019_v35 }
 0x2e1   : > { %v1188_v38 = vmax.f32 %v1186_v36, 0.0 }
 0x2e2   : > { %v1189_v39 = vmax.f32 %v1187_v37, 0.0 }
 0x2e4   : > { %v1342_v23 = vpack.c.bf16 %v1189_v39, %v1188_v38 }
 0x2e6   : > { %1343 = vst.sshfl [vmem:[%s474_s19] sm:$0x33 pattern:$0x76325410] %v1342_v23 }
 0x2e7 PF: > { %s23_s25 = sadd.s32 1, %s1544_s25  }
 0x2e8   : > { %p20_p4 = scmp.ge.s32.totalorder %s23_s25, 4  }
 0x2ea   :  { %22 = sbr.rel (!%p20_p4) target bundleno = 1 (0x1), region = 108 }

// kernel: _lambda_.17
= control target key start
LH: loop header
LB: loop body
LE: loop exit
PB: predicated region body
PF: predicated region fallthrough
CT: control target
= control target key end

     0   :  { %s4891_s30 = smov 0   ;;  %s5728_s0 = inlined_call_operand.vmem [shape: bf16[2,4,2,128], index: 0, kind: input, shape index: {}]   ;;  %s5729_s1 = inlined_call_operand.vmem [shape: bf16[2,4,2,128], index: 1, kind: input, shape index: {}]   ;;  %s5730_s2 = inlined_call_operand.vmem [shape: bf16[128,256], index: 2, kind: input, shape index: {}]   ;;  %s5731_s3 = inlined_call_operand.vmem [shape: f32[1,256], index: 3, kind: input, shape index: {}, may-alias: {3,6}]   ;;  %s5732_s4 = inlined_call_operand.vmem [shape: f32[1,256], index: 4, kind: input, shape index: {}, may-alias: {4,7}]   ;;  %s5733_s5 = inlined_call_operand.vmem [shape: bf16[2,9,128,128], index: 5, kind: input, shape index: {}]   ;;  %s5734_s6 = inlined_call_operand.vmem [shape: f32[1,256], index: 6, kind: input, shape index: {}, may-alias: {3,6}]   ;;  %s5735_s7 = inlined_call_operand.vmem [shape: f32[1,256], index: 7, kind: input, shape index: {}, may-alias: {4,7}]   ;;  %s5736_s8 = inlined_call_operand.vmem [shape: bf16[2,4,256], index: 8, kind: output, shape index: {0}]   ;;  %s5737_s9 = inlined_call_operand.vmem [shape: f32[2,1,256], index: 9, kind: output, shape index: {1}]  }
   0x1 LB: > { %s3586_s10 = sadd.s32 4294967295, %s4834_s30   ;;  %p3590_p0 = scmp.ge.s32.totalorder %s4834_s30, 1  ;;  %s4834_s30 = sphi %s4891_s30, %s20_s30  }
   0x2   : > { %p298_p1 = scmp.lt.s32.totalorder %s4834_s30, 3 }
   0x4   : > { %p299_p2 = pnand %p3590_p0, %p298_p1 }
   0x5   : > { %v4660_v0 = vld [vmem:[%s5730_s2 + $0x4] ss:$8 sps:$4 sm:$0xff] (!%p299_p2)   ;;  %p341_p3 = scmp.lt.s32.totalorder (!%p299_p2), %s3586_s10, 1  ;;  %v4662_v1 = vld [vmem:[%s5730_s2] ss:$8 sps:$4 sm:$0xff] (!%p299_p2)   ;;  %v4836_v2 = vmov (!%p299_p2), 0   ;;  %v388_v9 = vlaneseq (!%p299_p2) }
   0x6   : > { %302 = sbr.rel (%p299_p2) target bundleno = 766 (0x2fe), region = 52  ;;  %520 = vmatprep.mubr.bf16.mxu0 (!%p299_p2), %v4836_v2  ;;  %648 = vmatprep.mubr.bf16.mxu1 (!%p299_p2), %v4836_v2  ;;  %v4663_v3 = vld [vmem:[%s5730_s2 + $0x14] ss:$8 sps:$4 sm:$0xff] (!%p299_p2)   ;;  %v4665_v4 = vld [vmem:[%s5730_s2 + $0x10] ss:$8 sps:$4 sm:$0xff] (!%p299_p2)   ;;  %v4837_v6 = vmov (!%p299_p2), 0.0  }
   0x7   : > { %488 = vmatprep.subr.bf16.mxu0 (!%p299_p2), %v4660_v0  ;;  %616 = vmatprep.subr.bf16.mxu1 (!%p299_p2), %v4660_v0  ;;  %v4666_v5 = vld [vmem:[%s5730_s2 + $0x24] ss:$8 sps:$4 sm:$0xff] (!%p299_p2)   ;;  %683 = vst [vmem:[#allocation2] sm:$0x77] (!%p299_p2), %v4837_v6  ;;  %684 = vst [vmem:[#allocation2 + $0x8] sm:$0x77] (!%p299_p2), %v4837_v6 }
   0x8   : > { %489 = vmatpush1.bf16.msra.mxu0 (!%p299_p2), %v4662_v1  ;;  %617 = vmatpush1.bf16.msra.mxu1 (!%p299_p2), %v4662_v1  ;;  %685 = vst [vmem:[#allocation2 + $0x10] sm:$0x77] (!%p299_p2), %v4837_v6  ;;  %686 = vst [vmem:[#allocation2 + $0x18] sm:$0x77] (!%p299_p2), %v4837_v6  ;;  %v4668_v7 = vld [vmem:[%s5730_s2 + $0x20] ss:$8 sps:$4 sm:$0xff] (!%p299_p2)  }
   0x9   : > { %490 = vmatprep.subr.bf16.mxu0 (!%p299_p2), %v4663_v3  ;;  %618 = vmatprep.subr.bf16.mxu1 (!%p299_p2), %v4663_v3  ;;  %687 = vst [vmem:[#allocation2 + $0x20] sm:$0x77] (!%p299_p2), %v4837_v6  ;;  %689 = vst [vmem:[#allocation3] sm:$0xf] (!%p299_p2), %v4837_v6  ;;  %v4669_v8 = vld [vmem:[%s5730_s2 + $0x34] ss:$8 sps:$4 sm:$0xff] (!%p299_p2)  }
   0xa   : > { %690 = vst [vmem:[#allocation3 + $0x4] sm:$0xf] (!%p299_p2), %v4837_v6  ;;  %691 = vst [vmem:[#allocation3 + $0x8] sm:$0xf] (!%p299_p2), %v4837_v6  ;;  %v4838_v10 = vmov (!%p299_p2), 1966171168  }
   0xb   : > { %692 = vst [vmem:[#allocation3 + $0xc] sm:$0xf] (!%p299_p2), %v4837_v6  ;;  %693 = vst [vmem:[#allocation3 + $0x10] sm:$0xf] (!%p299_p2), %v4837_v6  ;;  %v386_v11 = vunpack.c.l.s4 (!%p299_p2), %v4838_v10  ;;  %v4671_v12 = vld [vmem:[%s5730_s2 + $0x30] ss:$8 sps:$4 sm:$0xff] (!%p299_p2)  }
   0xc   : > { %491 = vmatpush1.bf16.msra.mxu0 (!%p299_p2), %v4665_v4  ;;  %619 = vmatpush1.bf16.msra.mxu1 (!%p299_p2), %v4665_v4  ;;  %v4672_v13 = vld [vmem:[%s5730_s2 + $0x44] ss:$8 sps:$4 sm:$0xff] (!%p299_p2)   ;;  %v4950_v14 = vshrl.u32 (!%p299_p2), %v388_v9, 7  ;;  %v4674_v15 = vld [vmem:[%s5730_s2 + $0x40] ss:$8 sps:$4 sm:$0xff] (!%p299_p2)   ;;  %v4688_v48 = vld [vmem:[%s5733_s5 + $0x50] sm:$0xff] (!%p299_p2)  }
   0xd   : > { %s5741_s10 = smov (!%p341_p3, %s3586_s10), 1  ;;  %492 = vmatprep.subr.bf16.mxu0 %v4666_v5  ;;  %620 = vmatprep.subr.bf16.mxu1 %v4666_v5  ;;  %v387_v20 = vunpack.c.0.s8 %v386_v11  ;;  %v4675_v23 = vld [vmem:[%s5730_s2 + $0x54] ss:$8 sps:$4 sm:$0xff]   ;;  %v4677_v26 = vld [vmem:[%s5730_s2 + $0x50] ss:$8 sps:$4 sm:$0xff]   ;;  %v4684_v42 = vld [vmem:[%s5733_s5 + $0x40] sm:$0xff]  }
   0xe   : > { %s4930_s23 = sshll.u32 %s5741_s10, 2  ;;  %v4678_v28 = vld [vmem:[%s5730_s2 + $0x64] ss:$8 sps:$4 sm:$0xff]   ;;  %v4680_v33 = vld [vmem:[%s5730_s2 + $0x60] ss:$8 sps:$4 sm:$0xff]   ;;  %v4689_v49 = vld [vmem:[%s5733_s5 + $0x290] sm:$0xff]  }
   0xf   : > { %s344_s28 = scalar_lea.vmem %s5728_s0, %s4930_s23  ;;  %s348_s12 = scalar_lea.vmem %s5729_s1, %s4930_s23  ;;  %v4962_v27 = vsub.s32 %v387_v20, %v4950_v14  ;;  %v4681_v34 = vld [vmem:[%s5730_s2 + $0x74] ss:$8 sps:$4 sm:$0xff]   ;;  %v4683_v39 = vld [vmem:[%s5730_s2 + $0x70] ss:$8 sps:$4 sm:$0xff]   ;;  %v4685_v43 = vld [vmem:[%s5733_s5 + $0x280] sm:$0xff]   ;;  %vm4839_vm0 = vmmov 0  }
  0x10   : > { %493 = vmatpush1.bf16.msra.mxu0 %v4668_v7  ;;  %621 = vmatpush1.bf16.msra.mxu1 %v4668_v7  ;;  %v359_v16 = vld [vmem:[%s344_s28] sm:$0x1]  ;;  %v360_v17 = vld [vmem:[%s344_s28 + $0x1] sm:$0x1]  ;;  %v361_v18 = vld [vmem:[%s344_s28 + $0x2] sm:$0x1] }
  0x11   : > { %494 = vmatprep.subr.bf16.mxu0 %v4669_v8  ;;  %622 = vmatprep.subr.bf16.mxu1 %v4669_v8  ;;  %v362_v19 = vld [vmem:[%s344_s28 + $0x3] sm:$0x1]  ;;  %v583_v21 = vld [vmem:[%s348_s12] sm:$0x1]  ;;  %v584_v22 = vld [vmem:[%s348_s12 + $0x1] sm:$0x1]  ;;  %v383_v29 = vcombine.low %v359_v16, %v360_v17  ;;  %s353_s28 = scalar_lea.vmem %s5736_s8, %s4930_s23 }
  0x12   : > { %v585_v24 = vld [vmem:[%s348_s12 + $0x2] sm:$0x1]  ;;  %v586_v25 = vld [vmem:[%s348_s12 + $0x3] sm:$0x1]  ;;  %v384_v30 = vcombine.low %v361_v18, %v362_v19  ;;  %v591_v31 = vcombine.low %v583_v21, %v584_v22  ;;  %v4686_v46 = vld [vmem:[%s5733_s5 + $0x48] sm:$0xff]   ;;  %v533_v60 = vsub.s32 0, %v4950_v14 }
  0x13   : > { %v592_v32 = vcombine.low %v585_v24, %v586_v25  ;;  %v391_v35 = vrot.slane %v383_v29, %v4962_v27  ;;  %v4687_v47 = vld [vmem:[%s5733_s5 + $0x288] sm:$0xff]   ;;  %v4690_v50 = vld [vmem:[%s5733_s5 + $0x58] sm:$0xff]   ;;  %v4692_v52 = vld [vmem:[%s5733_s5 + $0x60] sm:$0xff]   ;;  %v537_v62 = vsub.s32 1, %v4950_v14  ;;  %v4840_v2 = vmov 1983009808  }
  0x14   : > { %495 = vmatpush1.bf16.msra.mxu0 %v4671_v12  ;;  %623 = vmatpush1.bf16.msra.mxu1 %v4671_v12  ;;  %v398_v36 = vrot.slane %v384_v30, %v4962_v27  ;;  %v599_v37 = vrot.slane %v591_v31, %v4962_v27  ;;  %v4691_v51 = vld [vmem:[%s5733_s5 + $0x298] sm:$0xff]   ;;  %v4693_v53 = vld [vmem:[%s5733_s5 + $0x2a0] sm:$0xff]   ;;  %v4694_v54 = vld [vmem:[%s5733_s5 + $0x68] sm:$0xff]   ;;  %v564_v3 = vunpack.c.l.s4 %v4840_v2  ;;  %vm1044_vm1 = vsmask.f32 256  ;;  %s3595_s29 = sshll.u32 %s5741_s10, 1 }
  0x15   : > { %496 = vmatprep.subr.bf16.mxu0 %v4672_v13  ;;  %624 = vmatprep.subr.bf16.mxu1 %v4672_v13  ;;  %v606_v38 = vrot.slane %v592_v32, %v4962_v27  ;;  %v4695_v55 = vld [vmem:[%s5733_s5 + $0x2a8] sm:$0xff]   ;;  %v4696_v56 = vld [vmem:[%s5733_s5 + $0x70] sm:$0xff]   ;;  %v4698_v58 = vld [vmem:[%s5733_s5 + $0x78] sm:$0xff]   ;;  %vm1045_vm2 = vsmask.f32 1284  ;;  %s357_s12 = scalar_lea.vmem %s5737_s9, %s3595_s29 }
  0x16   : > { %v399_v40 = vcombine.low %v391_v35, %v398_v36  ;;  %v4697_v57 = vld [vmem:[%s5733_s5 + $0x2b0] sm:$0xff]   ;;  %v4699_v59 = vld [vmem:[%s5733_s5 + $0x2b8] sm:$0xff]   ;;  %v529_v61 = vld [vmem:[%s5731_s3] sm:$0x3]  ;;  %v565_v16 = vunpack.c.0.s8 %v564_v3  ;;  %vm1047_vm4 = vsmask.f32 2312 }
  0x17   : > { %v607_v41 = vcombine.low %v599_v37, %v606_v38  ;;  %v543_v63 = vld [vmem:[%s5732_s4] sm:$0x3]  ;;  %v534_v0 = vrot.slane %v529_v61, %v533_v60  ;;  %v538_v1 = vrot.slane %v529_v61, %v537_v62  ;;  %v4705_v2 = vld [vmem:[%s5733_s5 + $0x250] sm:$0xff]   ;;  %v4706_v3 = vld [vmem:[%s5733_s5 + $0x18] sm:$0xff]   ;;  %vm1049_vm6 = vsmask.f32 3340 }
  0x18   : > { %497 = vmatpush1.bf16.msra.mxu0 %v4674_v15  ;;  %625 = vmatpush1.bf16.msra.mxu1 %v4674_v15  ;;  %v406_v44 = vrot.slane %v399_v40, %v4962_v27  ;;  %v548_v4 = vrot.slane %v543_v63, %v533_v60  ;;  %v552_v7 = vrot.slane %v543_v63, %v537_v62  ;;  %v4701_v60 = vld [vmem:[%s5733_s5 + $0x240] sm:$0xff]   ;;  %v4702_v63 = vld [vmem:[%s5733_s5 + $0x8] sm:$0xff]   ;;  %vm1046_vm3 = vmor %vm1044_vm1, %vm1045_vm2  ;;  %vm1051_vm8 = vsmask.f32 4368 }
  0x19   : > { %498 = vmatprep.subr.bf16.mxu0 %v4675_v23  ;;  %626 = vmatprep.subr.bf16.mxu1 %v4675_v23  ;;  %v614_v45 = vrot.slane %v607_v41, %v4962_v27  ;;  %v568_v30 = vsub.s32 %v565_v16, %v4950_v14  ;;  %vm1048_vm5 = vmor %vm1046_vm3, %vm1047_vm4  ;;  %vm1053_vm10 = vsmask.f32 5396  ;;  %vm1055_vm12 = vsmask.f32 6424 }
  0x1a   : > { %vm1050_vm7 = vmor %vm1048_vm5, %vm1049_vm6  ;;  %vm1057_vm13 = vsmask.f32 7452  ;;  %vm3474_vm1 = vcmp.lt.s32.totalorder %v388_v9, 128 }
  0x1b   : > { %vm1052_vm9 = vmor %vm1050_vm7, %vm1051_vm8 }
  0x1c   : > { %499 = vmatpush1.bf16.msra.mxu0 %v4677_v26  ;;  %627 = vmatpush1.bf16.msra.mxu1 %v4677_v26  ;;  %vm1054_vm11 = vmor %vm1052_vm9, %vm1053_vm10 }
  0x1d   : > { %500 = vmatprep.subr.bf16.mxu0 %v4678_v28  ;;  %628 = vmatprep.subr.bf16.mxu1 %v4678_v28  ;;  %vm1056_vm14 = vmor %vm1054_vm11, %vm1055_vm12 }
  0x1e   : > { %vm5200_vm15 = vmor %vm1056_vm14, %vm1057_vm13 }
  0x20   : > { %501 = vmatpush1.bf16.msra.mxu0 %v4680_v33  ;;  %629 = vmatpush1.bf16.msra.mxu1 %v4680_v33 }
  0x21   : > { %502 = vmatprep.subr.bf16.mxu0 %v4681_v34  ;;  %630 = vmatprep.subr.bf16.mxu1 %v4681_v34 }
  0x24   : > { %503 = vmatpush1.bf16.msra.mxu0 %v4683_v39  ;;  %631 = vmatpush1.bf16.msra.mxu1 %v4683_v39 }
  0x25   : > { %4223 = vmatprep.subr.bf16.mxu0 %v4837_v6  ;;  %4403 = vmatprep.subr.bf16.mxu1 %v4837_v6 }
  0x27   : > { %521 = vmatmul.mubr.bf16.vlgmr.msra.gmra.mrb[0].mxu0 %v406_v44  ;;  %649 = vmatmul.mubr.bf16.vlgmr.msra.gmra.mrb[0].mxu1 %v614_v45 }
  0x28   : > { %4224 = vmatpush3.bf16.msra.mxu0 %v4684_v42  ;;  %4404 = vmatpush3.bf16.msra.mxu1 %v4685_v43 }
  0x29   : > { %4225 = vmatprep.subr.bf16.mxu0 %v4837_v6  ;;  %4405 = vmatprep.subr.bf16.mxu1 %v4837_v6 }
  0x2a   : > { %4239 = vmatprep.mubr.msk.bf16.mxu0 %vm4839_vm0, %v4837_v6  ;;  %4419 = vmatprep.mubr.msk.bf16.mxu1 %vm4839_vm0, %v4837_v6 }
  0x2c   : > { %4226 = vmatpush3.bf16.msra.mxu0 %v4686_v46  ;;  %4406 = vmatpush3.bf16.msra.mxu1 %v4687_v47 }
  0x2d   : > { %4227 = vmatprep.subr.bf16.mxu0 %v4837_v6  ;;  %4407 = vmatprep.subr.bf16.mxu1 %v4837_v6 }
  0x30   : > { %4228 = vmatpush3.bf16.msra.mxu0 %v4688_v48  ;;  %4408 = vmatpush3.bf16.msra.mxu1 %v4689_v49 }
  0x31   : > { %4229 = vmatprep.subr.bf16.mxu0 %v4837_v6  ;;  %4409 = vmatprep.subr.bf16.mxu1 %v4837_v6 }
  0x34   : > { %4230 = vmatpush3.bf16.msra.mxu0 %v4690_v50  ;;  %4410 = vmatpush3.bf16.msra.mxu1 %v4691_v51  ;;  %v761_v51 = vld [vmem:[#allocation3] sm:$0x3] }
  0x35   : > { %4231 = vmatprep.subr.bf16.mxu0 %v4837_v6  ;;  %4411 = vmatprep.subr.bf16.mxu1 %v4837_v6 }
  0x38   : > { %4232 = vmatpush3.bf16.msra.mxu0 %v4692_v52  ;;  %4412 = vmatpush3.bf16.msra.mxu1 %v4693_v53  ;;  %v2130_v52 = vld [vmem:[#allocation3 + $0x2] sm:$0x3] }
  0x39   : > { %4233 = vmatprep.subr.bf16.mxu0 %v4837_v6  ;;  %4413 = vmatprep.subr.bf16.mxu1 %v4837_v6 }
  0x3c   : > { %4234 = vmatpush3.bf16.msra.mxu0 %v4694_v54  ;;  %4414 = vmatpush3.bf16.msra.mxu1 %v4695_v55 }
  0x3d   : > { %4235 = vmatprep.subr.bf16.mxu0 %v4837_v6  ;;  %4415 = vmatprep.subr.bf16.mxu1 %v4837_v6 }
  0x40   : > { %4236 = vmatpush3.bf16.msra.mxu0 %v4696_v56  ;;  %4416 = vmatpush3.bf16.msra.mxu1 %v4697_v57 }
  0x41   : > { %4237 = vmatprep.subr.bf16.mxu0 %v4837_v6  ;;  %4417 = vmatprep.subr.bf16.mxu1 %v4837_v6 }
  0x44   : > { %4238 = vmatpush3.bf16.msra.mxu0 %v4698_v58  ;;  %4418 = vmatpush3.bf16.msra.mxu1 %v4699_v59  ;;  %v4700_v59 = vld [vmem:[%s5733_s5] sm:$0xff]  }
  0x45   : > { %4243 = vmatprep.subr.bf16.mxu0 %v4837_v6  ;;  %4423 = vmatprep.subr.bf16.mxu1 %v4837_v6 }
  0xfa   : > { %v522_v5 = vpop.f32.mrb[0].mxu0  ;;  %v650_v8 = vpop.f32.mrb[0].mxu1 }
  0xfb   : > { %v541_v10 = vmul.f32 %v534_v0, %v522_v5  ;;  %v524_v11 = vpop.f32.mrb[1].mxu0  ;;  %v657_v12 = vmul.f32 %v650_v8, %v534_v0  ;;  %v652_v13 = vpop.f32.mrb[1].mxu1  ;;  %v4703_v0 = vld [vmem:[%s5733_s5 + $0x248] sm:$0xff]   ;;  %v4708_v5 = vld [vmem:[%s5733_s5 + $0x20] sm:$0xff]  }
  0xfc   : > { %v542_v15 = vmul.f32 %v538_v1, %v524_v11  ;;  %v526_v17 = vpop.f32.mrb[2].mxu0  ;;  %v658_v18 = vmul.f32 %v652_v13, %v538_v1  ;;  %v654_v19 = vpop.f32.mrb[2].mxu1  ;;  %v4704_v1 = vld [vmem:[%s5733_s5 + $0x10] sm:$0xff]   ;;  %v4710_v8 = vld [vmem:[%s5733_s5 + $0x28] sm:$0xff]   ;;  %v741_v11 = vld [vmem:[#allocation2] sm:$0x3] }
  0xfd   : > { %v555_v20 = vadd.f32 %v548_v4, %v541_v10  ;;  %v527_v21 = vpop.f32.mrb[3].mxu0  ;;  %v659_v22 = vadd.f32 %v657_v12, %v548_v4  ;;  %v655_v23 = vpop.f32.mrb[3].mxu1  ;;  %v4707_v4 = vld [vmem:[%s5733_s5 + $0x258] sm:$0xff]   ;;  %v4711_v10 = vld [vmem:[%s5733_s5 + $0x268] sm:$0xff]   ;;  %v2109_v13 = vld [vmem:[#allocation2 + $0x4] sm:$0x3] }
  0xfe   : > { %v556_v24 = vadd.f32 %v552_v7, %v542_v15  ;;  %v660_v25 = vadd.f32 %v658_v18, %v552_v7  ;;  %v4709_v7 = vld [vmem:[%s5733_s5 + $0x260] sm:$0xff]   ;;  %v4712_v18 = vld [vmem:[%s5733_s5 + $0x30] sm:$0xff]   ;;  %v4715_v23 = vld [vmem:[%s5733_s5 + $0x278] sm:$0xff]  }
  0xff   : > { %v557_v26 = vmax.f32 %v555_v20, 0.0  ;;  %v661_v28 = vmax.f32 %v659_v22, 0.0  ;;  %v4713_v19 = vld [vmem:[%s5733_s5 + $0x270] sm:$0xff]   ;;  %v4714_v22 = vld [vmem:[%s5733_s5 + $0x38] sm:$0xff]  }
 0x100   : > { %v558_v29 = vmax.f32 %v556_v24, 0.0  ;;  %v662_v31 = vmax.f32 %v660_v25, 0.0  ;;  %v994_v24 = vld [vmem:[#allocation2] sm:$0x6]  ;;  %v2363_v25 = vld [vmem:[#allocation2 + $0x4] sm:$0x6] }
 0x102   : > { %v561_v32 = vcombine.low %v557_v26, %v558_v29  ;;  %v562_v33 = vcombine.high %v557_v26, %v558_v29  ;;  %v665_v34 = vcombine.low %v661_v28, %v662_v31  ;;  %v666_v35 = vcombine.high %v661_v28, %v662_v31  ;;  %v4716_v31 = vld [vmem:[%s5733_s5 + $0x80] sm:$0xff]  }
 0x104   : > { %v569_v36 = vrot.slane %v561_v32, %v568_v30  ;;  %v576_v37 = vrot.slane %v562_v33, %v568_v30  ;;  %3612 = vst.sshfl [vmem:[#allocation3 + $0x4] sm:$0x33 pattern:$0x76325410] %v561_v32  ;;  %v673_v38 = vrot.slane %v665_v34, %v568_v30  ;;  %v680_v39 = vrot.slane %v666_v35, %v568_v30  ;;  %v4717_v32 = vld [vmem:[%s5733_s5 + $0x2c0] sm:$0xff]  }
 0x105   : > { %3613 = vst.sshfl [vmem:[#allocation3 + $0xc] sm:$0x33 pattern:$0x76325410] %v562_v33  ;;  %v996_v33 = vpack.c.bf16 %v994_v24, %v994_v24  ;;  %v2365_v34 = vpack.c.bf16 %v2363_v25, %v2363_v25 }
 0x106   : > { %v577_v40 = vcombine.high %v569_v36, %v569_v36  ;;  %v578_v41 = vcombine.high %v576_v37, %v576_v37  ;;  %v681_v42 = vcombine.high %v673_v38, %v673_v38  ;;  %v682_v43 = vcombine.high %v680_v39, %v680_v39  ;;  %v4718_v37 = vld [vmem:[%s5733_s5 + $0x88] sm:$0xff]  }
 0x107   : > { %v701_v44 = vrot.slane %v673_v38, %v568_v30  ;;  %v715_v45 = vrot.slane %v680_v39, %v568_v30  ;;  %v4719_v38 = vld [vmem:[%s5733_s5 + $0x2c8] sm:$0xff]   ;;  %v1006_v39 = vrot.slane %v996_v33, %v4962_v27  ;;  %v4740_v33 = vld [vmem:[%s5733_s5 + $0xe0] sm:$0xff]  }
 0x108   : > { %738 = vst [vmem:[#allocation3 + $0x8] sm:$0xf] %v577_v40  ;;  %740 = vst [vmem:[#allocation3 + $0x10] sm:$0xf] %v578_v41  ;;  %v708_v14 = vrot.slane %v681_v42, %v568_v30  ;;  %v722_v46 = vrot.slane %v682_v43, %v568_v30  ;;  %v2375_v40 = vrot.slane %v2365_v34, %v4962_v27  ;;  %v4720_v43 = vld [vmem:[%s5733_s5 + $0x90] sm:$0xff]   ;;  %v4741_v34 = vld [vmem:[%s5733_s5 + $0x320] sm:$0xff]  }
 0x109   : > { %v723_v47 = vrot.slane %v701_v44, 7  ;;  %v725_v48 = vrot.slane %v715_v45, 7  ;;  %v4721_v44 = vld [vmem:[%s5733_s5 + $0x2d0] sm:$0xff]   ;;  %v1007_v45 = vcombine.high %v1006_v39, %v1006_v39 }
 0x10a   : > { %v724_v49 = vrot.slane %v708_v14, 7  ;;  %v726_v50 = vrot.slane %v722_v46, 7  ;;  %v2376_v14 = vcombine.high %v2375_v40, %v2375_v40 }
 0x10b   : > { %732 = vst [vmem:[#allocation2 + $0x8] sm:$0x66] %v723_v47  ;;  %734 = vst [vmem:[#allocation2 + $0x18] sm:$0x66] %v725_v48  ;;  %v4722_v48 = vld [vmem:[%s5733_s5 + $0x98] sm:$0xff]  }
 0x10c   : > { %733 = vst [vmem:[#allocation2 + $0x10] sm:$0x66] %v724_v49  ;;  %735 = vst [vmem:[#allocation2 + $0x20] sm:$0x66] %v726_v50  ;;  %v4723_v49 = vld [vmem:[%s5733_s5 + $0x2d8] sm:$0xff]   ;;  %v1014_v50 = vrot.slane %v1006_v39, %v4962_v27 }
 0x10f   : > { %v762_v53 = vld [vmem:[#allocation3 + $0x8] sm:$0x3]  ;;  %v2131_v54 = vld [vmem:[#allocation3 + $0xa] sm:$0x3] }
 0x110   : > { %v3630_v55 = vpack.c.bf16 %v762_v53, %v761_v51  ;;  %v3860_v56 = vpack.c.bf16 %v2131_v54, %v2130_v52  ;;  %v1021_v51 = vrot.slane %v1007_v45, %v4962_v27  ;;  %v2383_v52 = vrot.slane %v2375_v40, %v4962_v27  ;;  %v4746_v45 = vld [vmem:[%s5733_s5 + $0xf8] sm:$0xff]  }
 0x111   : > { %v2390_v53 = vrot.slane %v2376_v14, %v4962_v27  ;;  %v4747_v14 = vld [vmem:[%s5733_s5 + $0x338] sm:$0xff]  }
 0x112   : > { %v791_v57 = vrot.slane %v3630_v55, %v4962_v27  ;;  %v2160_v58 = vrot.slane %v3860_v56, %v4962_v27  ;;  %v2553_v39 = vld [vmem:[#allocation2 + $0xc] sm:$0x3]  ;;  %v2554_v40 = vld [vmem:[#allocation2 + $0x1c] sm:$0x3] }
 0x113   : > { %v742_v12 = vld [vmem:[#allocation2 + $0x10] sm:$0x3]  ;;  %v2110_v15 = vld [vmem:[#allocation2 + $0x14] sm:$0x3] }
 0x114   : > { %v798_v61 = vrot.slane %v791_v57, %v4962_v27  ;;  %v2167_v62 = vrot.slane %v2160_v58, %v4962_v27  ;;  %v3639_v16 = vpack.c.bf16 %v742_v12, %v741_v11  ;;  %v3869_v17 = vpack.c.bf16 %v2110_v15, %v2109_v13  ;;  %v995_v29 = vld [vmem:[#allocation2 + $0x10] sm:$0x6]  ;;  %v2364_v30 = vld [vmem:[#allocation2 + $0x14] sm:$0x6]  ;;  %v4724_v58 = vld [vmem:[%s5733_s5 + $0xa0] sm:$0xff]  }
 0x115   : > { %v997_v35 = vpack.c.bf16 %v995_v29, %v995_v29  ;;  %v2366_v36 = vpack.c.bf16 %v2364_v30, %v2364_v30  ;;  %v4728_v13 = vld [vmem:[%s5733_s5 + $0xb0] sm:$0xff]  }
 0x116   : > { %4240 = vmatmul.mubr.bf16.vlgmr.msra.gmra.mrb[4].mxu0 %v798_v61  ;;  %4420 = vmatmul.mubr.bf16.vlgmr.msra.gmra.mrb[4].mxu1 %v2167_v62  ;;  %v897_v20 = vrot.slane %v3639_v16, %v4962_v27  ;;  %v2266_v21 = vrot.slane %v3869_v17, %v4962_v27  ;;  %v1065_v61 = vshll.u32 %v1021_v51, 16  ;;  %v2414_v62 = vshrl.u32 %v2383_v52, 16  ;;  %v4729_v15 = vld [vmem:[%s5733_s5 + $0x2f0] sm:$0xff]   ;;  %v4750_v52 = vld [vmem:[%s5733_s5 + $0x108] sm:$0xff]  }
 0x117   : > { %4244 = vmatpush3.bf16.msra.mxu0 %v4700_v59  ;;  %4424 = vmatpush3.bf16.msra.mxu1 %v4701_v60  ;;  %v1028_v41 = vrot.slane %v997_v35, %v4962_v27  ;;  %v2397_v42 = vrot.slane %v2366_v36, %v4962_v27  ;;  %v4725_v59 = vld [vmem:[%s5733_s5 + $0x2e0] sm:$0xff]   ;;  %v1060_v60 = vshrl.u32 %v1014_v50, 16  ;;  %v4736_v29 = vld [vmem:[%s5733_s5 + $0xd0] sm:$0xff]   ;;  %v4742_v35 = vld [vmem:[%s5733_s5 + $0xe8] sm:$0xff]  }
 0x118   : > { %4245 = vmatprep.subr.bf16.mxu0 %v4837_v6  ;;  %4425 = vmatprep.subr.bf16.mxu1 %v4837_v6  ;;  %v904_v26 = vrot.slane %v897_v20, %v4962_v27  ;;  %v2273_v28 = vrot.slane %v2266_v21, %v4962_v27  ;;  %v4737_v30 = vld [vmem:[%s5733_s5 + $0x310] sm:$0xff]   ;;  %v4743_v36 = vld [vmem:[%s5733_s5 + $0x328] sm:$0xff]  }
 0x119   : > { %4259 = vmatprep.mubr.msk.bf16.mxu0 %vm4839_vm0, %v4837_v6  ;;  %4439 = vmatprep.mubr.msk.bf16.mxu1 %vm4839_vm0, %v4837_v6  ;;  %v1029_v46 = vcombine.high %v1028_v41, %v1028_v41  ;;  %v2398_v47 = vcombine.high %v2397_v42, %v2397_v42  ;;  %v1036_v54 = vrot.slane %v1028_v41, %v4962_v27  ;;  %v4744_v41 = vld [vmem:[%s5733_s5 + $0xf0] sm:$0xff]  }
 0x11a   : > { %v2405_v56 = vrot.slane %v2397_v42, %v4962_v27  ;;  %v4745_v42 = vld [vmem:[%s5733_s5 + $0x330] sm:$0xff]  }
 0x11b   : > { %4246 = vmatpush3.bf16.msra.mxu0 %v4702_v63  ;;  %4426 = vmatpush3.bf16.msra.mxu1 %v4703_v0  ;;  %v1043_v55 = vrot.slane %v1029_v46, %v4962_v27  ;;  %v2412_v57 = vrot.slane %v2398_v47, %v4962_v27  ;;  %v2419_v63 = vshll.u32 %v2390_v53, 16  ;;  %v1069_v0 = vshrl.u32 %v1036_v54, 16  ;;  %v4751_v53 = vld [vmem:[%s5733_s5 + $0x348] sm:$0xff]   ;;  %v4752_v54 = vld [vmem:[%s5733_s5 + $0x110] sm:$0xff]  }
 0x11c   : > { %4247 = vmatprep.subr.bf16.mxu0 %v4837_v6  ;;  %4427 = vmatprep.subr.bf16.mxu1 %v4837_v6 }
 0x11d   : > { %v2421_v11 = vsel %vm5200_vm15, %v2414_v62, %v2419_v63  ;;  %v1327_v62 = vld [vmem:[#allocation3 + $0x4] sm:$0x3]  ;;  %v1328_v63 = vld [vmem:[#allocation3 + $0xc] sm:$0x3] }
 0x11f   : > { %4248 = vmatpush3.bf16.msra.mxu0 %v4704_v1  ;;  %4428 = vmatpush3.bf16.msra.mxu1 %v4705_v2  ;;  %v1074_v1 = vshll.u32 %v1043_v55, 16  ;;  %v2423_v2 = vshrl.u32 %v2405_v56, 16  ;;  %v4753_v55 = vld [vmem:[%s5733_s5 + $0x350] sm:$0xff]   ;;  %v4754_v56 = vld [vmem:[%s5733_s5 + $0x118] sm:$0xff]  }
 0x120   : > { %4249 = vmatprep.subr.bf16.mxu0 %v4837_v6  ;;  %4429 = vmatprep.subr.bf16.mxu1 %v4837_v6 }
 0x123   : > { %4250 = vmatpush3.bf16.msra.mxu0 %v4706_v3  ;;  %4430 = vmatpush3.bf16.msra.mxu1 %v4707_v4  ;;  %v2428_v3 = vshll.u32 %v2412_v57, 16  ;;  %v4726_v4 = vld [vmem:[%s5733_s5 + $0xa8] sm:$0xff]   ;;  %v4755_v57 = vld [vmem:[%s5733_s5 + $0x358] sm:$0xff]  }
 0x124   : > { %4251 = vmatprep.subr.bf16.mxu0 %v4837_v6  ;;  %4431 = vmatprep.subr.bf16.mxu1 %v4837_v6 }
 0x125   : > { %v2430_v12 = vsel %vm5200_vm15, %v2423_v2, %v2428_v3  ;;  %v4760_v2 = vld [vmem:[%s5733_s5 + $0x130] sm:$0xff]  }
 0x126   : > { %v2448_v17 = vcombine.low %v2421_v11, %v2430_v12  ;;  %v4761_v3 = vld [vmem:[%s5733_s5 + $0x370] sm:$0xff]  }
 0x127   : > { %4252 = vmatpush3.bf16.msra.mxu0 %v4708_v5  ;;  %4432 = vmatpush3.bf16.msra.mxu1 %v4709_v7  ;;  %v4727_v5 = vld [vmem:[%s5733_s5 + $0x2e8] sm:$0xff]   ;;  %v4826_v7 = vld [vmem:[%s5733_s5 + $0x238] sm:$0xff]  }
 0x128   : > { %4253 = vmatprep.subr.bf16.mxu0 %v4837_v6  ;;  %4433 = vmatprep.subr.bf16.mxu1 %v4837_v6  ;;  %v2455_v21 = vrot.slane %v2448_v17, %v4962_v27  ;;  %v2810_v17 = vld [vmem:[#allocation2 + $0x1c] sm:$0x6] }
 0x12a   : > { %v2462_v25 = vrot.slane %v2455_v21, %v4962_v27 }
 0x12b   : > { %4254 = vmatpush3.bf16.msra.mxu0 %v4710_v8  ;;  %4434 = vmatpush3.bf16.msra.mxu1 %v4711_v10  ;;  %v1067_v8 = vsel %vm5200_vm15, %v1060_v60, %v1065_v61  ;;  %v1076_v10 = vsel %vm5200_vm15, %v1069_v0, %v1074_v1  ;;  %v4758_v60 = vld [vmem:[%s5733_s5 + $0x128] sm:$0xff]   ;;  %v2681_v0 = vld [vmem:[#allocation3 + $0x6] sm:$0x3]  ;;  %v2682_v1 = vld [vmem:[#allocation3 + $0xe] sm:$0x3] }
 0x12c   : > { %4255 = vmatprep.subr.bf16.mxu0 %v4837_v6  ;;  %4435 = vmatprep.subr.bf16.mxu1 %v4837_v6  ;;  %v1094_v16 = vcombine.low %v1067_v8, %v1076_v10  ;;  %v4759_v61 = vld [vmem:[%s5733_s5 + $0x368] sm:$0xff]   ;;  %v4762_v8 = vld [vmem:[%s5733_s5 + $0x138] sm:$0xff]  }
 0x12d   : > { %v4763_v10 = vld [vmem:[%s5733_s5 + $0x378] sm:$0xff]  }
 0x12e   : > { %v1101_v20 = vrot.slane %v1094_v16, %v4962_v27  ;;  %v2809_v16 = vld [vmem:[#allocation2 + $0xc] sm:$0x6] }
 0x12f   : > { %4256 = vmatpush3.bf16.msra.mxu0 %v4712_v18  ;;  %4436 = vmatpush3.bf16.msra.mxu1 %v4713_v19  ;;  %v4730_v18 = vld [vmem:[%s5733_s5 + $0xb8] sm:$0xff]  }
 0x130   : > { %4257 = vmatprep.subr.bf16.mxu0 %v4837_v6  ;;  %4437 = vmatprep.subr.bf16.mxu1 %v4837_v6  ;;  %v4731_v19 = vld [vmem:[%s5733_s5 + $0x2f8] sm:$0xff]   ;;  %v1108_v24 = vrot.slane %v1101_v20, %v4962_v27  ;;  %v4765_v20 = vld [vmem:[%s5733_s5 + $0x380] sm:$0xff]  }
 0x133   : > { %4258 = vmatpush3.bf16.msra.mxu0 %v4714_v22  ;;  %4438 = vmatpush3.bf16.msra.mxu1 %v4715_v23  ;;  %v4732_v22 = vld [vmem:[%s5733_s5 + $0xc0] sm:$0xff]  }
 0x134   : > { %4263 = vmatprep.subr.bf16.mxu0 %v4837_v6  ;;  %4443 = vmatprep.subr.bf16.mxu1 %v4837_v6  ;;  %v4733_v23 = vld [vmem:[%s5733_s5 + $0x300] sm:$0xff]  }
 0x136   : > { %4260 = vmatmul.mubr.bf16.vlgmr.msra.gmra.mrb[4].mxu0 %v904_v26  ;;  %4440 = vmatmul.mubr.bf16.vlgmr.msra.gmra.mrb[4].mxu1 %v2273_v28  ;;  %v4734_v26 = vld [vmem:[%s5733_s5 + $0xc8] sm:$0xff]  }
 0x137   : > { %4264 = vmatpush3.bf16.msra.mxu0 %v4716_v31  ;;  %4444 = vmatpush3.bf16.msra.mxu1 %v4717_v32  ;;  %v4735_v28 = vld [vmem:[%s5733_s5 + $0x308] sm:$0xff]   ;;  %v4738_v31 = vld [vmem:[%s5733_s5 + $0xd8] sm:$0xff]  }
 0x138   : > { %4265 = vmatprep.subr.bf16.mxu0 %v4837_v6  ;;  %4445 = vmatprep.subr.bf16.mxu1 %v4837_v6  ;;  %v4739_v32 = vld [vmem:[%s5733_s5 + $0x318] sm:$0xff]  }
 0x139   : > { %4279 = vmatprep.mubr.msk.bf16.mxu0 %vm4839_vm0, %v4837_v6  ;;  %4459 = vmatprep.mubr.msk.bf16.mxu1 %vm4839_vm0, %v4837_v6 }
 0x13b   : > { %4266 = vmatpush3.bf16.msra.mxu0 %v4718_v37  ;;  %4446 = vmatpush3.bf16.msra.mxu1 %v4719_v38  ;;  %v1199_v37 = vld [vmem:[#allocation2 + $0x8] sm:$0x3]  ;;  %v1200_v38 = vld [vmem:[#allocation2 + $0x18] sm:$0x3] }
 0x13c   : > { %4267 = vmatprep.subr.bf16.mxu0 %v4837_v6  ;;  %4447 = vmatprep.subr.bf16.mxu1 %v4837_v6 }
 0x13f   : > { %4268 = vmatpush3.bf16.msra.mxu0 %v4720_v43  ;;  %4448 = vmatpush3.bf16.msra.mxu1 %v4721_v44  ;;  %v3690_v43 = vpack.c.bf16 %v1200_v38, %v1199_v37  ;;  %v3920_v44 = vpack.c.bf16 %v2554_v40, %v2553_v39  ;;  %v4770_v39 = vld [vmem:[%s5733_s5 + $0x158] sm:$0xff]  }
 0x140   : > { %4269 = vmatprep.subr.bf16.mxu0 %v4837_v6  ;;  %4449 = vmatprep.subr.bf16.mxu1 %v4837_v6  ;;  %v4771_v40 = vld [vmem:[%s5733_s5 + $0x398] sm:$0xff]  }
 0x141   : > { %v1229_v46 = vrot.slane %v3690_v43, %v4962_v27  ;;  %v2583_v47 = vrot.slane %v3920_v44, %v4962_v27 }
 0x143   : > { %4270 = vmatpush3.bf16.msra.mxu0 %v4722_v48  ;;  %4450 = vmatpush3.bf16.msra.mxu1 %v4723_v49  ;;  %v4748_v48 = vld [vmem:[%s5733_s5 + $0x100] sm:$0xff]   ;;  %v1236_v50 = vrot.slane %v1229_v46, %v4962_v27  ;;  %v2590_v51 = vrot.slane %v2583_v47, %v4962_v27 }
 0x144   : > { %4271 = vmatprep.subr.bf16.mxu0 %v4837_v6  ;;  %4451 = vmatprep.subr.bf16.mxu1 %v4837_v6  ;;  %v4749_v49 = vld [vmem:[%s5733_s5 + $0x340] sm:$0xff]  }
 0x147   : > { %4272 = vmatpush3.bf16.msra.mxu0 %v4724_v58  ;;  %4452 = vmatpush3.bf16.msra.mxu1 %v4725_v59  ;;  %v4756_v58 = vld [vmem:[%s5733_s5 + $0x120] sm:$0xff]  }
 0x148   : > { %4273 = vmatprep.subr.bf16.mxu0 %v4837_v6  ;;  %4453 = vmatprep.subr.bf16.mxu1 %v4837_v6  ;;  %v4757_v59 = vld [vmem:[%s5733_s5 + $0x360] sm:$0xff]  }
 0x14b   : > { %4274 = vmatpush3.bf16.msra.mxu0 %v4726_v4  ;;  %4454 = vmatpush3.bf16.msra.mxu1 %v4727_v5  ;;  %v3715_v4 = vpack.c.bf16 %v1328_v63, %v1327_v62  ;;  %v3945_v5 = vpack.c.bf16 %v2682_v1, %v2681_v0  ;;  %v4776_v0 = vld [vmem:[%s5733_s5 + $0x170] sm:$0xff]  }
 0x14c   : > { %4275 = vmatprep.subr.bf16.mxu0 %v4837_v6  ;;  %4455 = vmatprep.subr.bf16.mxu1 %v4837_v6  ;;  %v4777_v1 = vld [vmem:[%s5733_s5 + $0x3b0] sm:$0xff]  }
 0x14d   : > { %v1357_v11 = vrot.slane %v3715_v4, %v4962_v27  ;;  %v2711_v12 = vrot.slane %v3945_v5, %v4962_v27  ;;  %v4778_v4 = vld [vmem:[%s5733_s5 + $0x178] sm:$0xff]  }
 0x14e   : > { %v4779_v5 = vld [vmem:[%s5733_s5 + $0x3b8] sm:$0xff]  }
 0x14f   : > { %4276 = vmatpush3.bf16.msra.mxu0 %v4728_v13  ;;  %4456 = vmatpush3.bf16.msra.mxu1 %v4729_v15  ;;  %v1455_v13 = vld [vmem:[#allocation2 + $0x8] sm:$0x6]  ;;  %v1456_v15 = vld [vmem:[#allocation2 + $0x18] sm:$0x6]  ;;  %v2718_v21 = vrot.slane %v2711_v12, %v4962_v27  ;;  %v4781_v12 = vld [vmem:[%s5733_s5 + $0x3c0] sm:$0xff]  }
 0x150   : > { %4277 = vmatprep.subr.bf16.mxu0 %v4837_v6  ;;  %4457 = vmatprep.subr.bf16.mxu1 %v4837_v6 }
 0x153   : > { %4278 = vmatpush3.bf16.msra.mxu0 %v4730_v18  ;;  %4458 = vmatpush3.bf16.msra.mxu1 %v4731_v19  ;;  %v1364_v18 = vrot.slane %v1357_v11, %v4962_v27  ;;  %v4764_v19 = vld [vmem:[%s5733_s5 + $0x140] sm:$0xff]  }
 0x154   : > { %4283 = vmatprep.subr.bf16.mxu0 %v4837_v6  ;;  %4463 = vmatprep.subr.bf16.mxu1 %v4837_v6  ;;  %v4780_v11 = vld [vmem:[%s5733_s5 + $0x180] sm:$0xff]  }
 0x156   : > { %4280 = vmatmul.mubr.bf16.vlgmr.msra.gmra.mrb[4].mxu0 %v1108_v24  ;;  %4460 = vmatmul.mubr.bf16.vlgmr.msra.gmra.mrb[4].mxu1 %v2462_v25  ;;  %v2811_v24 = vpack.c.bf16 %v2809_v16, %v2809_v16  ;;  %v2812_v25 = vpack.c.bf16 %v2810_v17, %v2810_v17  ;;  %v4782_v16 = vld [vmem:[%s5733_s5 + $0x188] sm:$0xff]  }
 0x157   : > { %4284 = vmatpush3.bf16.msra.mxu0 %v4732_v22  ;;  %4464 = vmatpush3.bf16.msra.mxu1 %v4733_v23  ;;  %v1457_v22 = vpack.c.bf16 %v1455_v13, %v1455_v13  ;;  %v1458_v23 = vpack.c.bf16 %v1456_v15, %v1456_v15  ;;  %v4783_v17 = vld [vmem:[%s5733_s5 + $0x3c8] sm:$0xff]  }
 0x158   : > { %4285 = vmatprep.subr.bf16.mxu0 %v4837_v6  ;;  %4465 = vmatprep.subr.bf16.mxu1 %v4837_v6 }
 0x159   : > { %4299 = vmatprep.mubr.msk.bf16.mxu0 %vm4839_vm0, %v4837_v6  ;;  %4479 = vmatprep.mubr.msk.bf16.mxu1 %vm4839_vm0, %v4837_v6 }
 0x15b   : > { %4286 = vmatpush3.bf16.msra.mxu0 %v4734_v26  ;;  %4466 = vmatpush3.bf16.msra.mxu1 %v4735_v28  ;;  %v4766_v26 = vld [vmem:[%s5733_s5 + $0x148] sm:$0xff]  }
 0x15c   : > { %4287 = vmatprep.subr.bf16.mxu0 %v4837_v6  ;;  %4467 = vmatprep.subr.bf16.mxu1 %v4837_v6  ;;  %v4767_v28 = vld [vmem:[%s5733_s5 + $0x388] sm:$0xff]  }
 0x15f   : > { %4288 = vmatpush3.bf16.msra.mxu0 %v4736_v29  ;;  %4468 = vmatpush3.bf16.msra.mxu1 %v4737_v30  ;;  %v1467_v29 = vrot.slane %v1457_v22, %v4962_v27  ;;  %v1489_v30 = vrot.slane %v1458_v23, %v4962_v27  ;;  %v4788_v22 = vld [vmem:[%s5733_s5 + $0x1a0] sm:$0xff]  }
 0x160   : > { %4289 = vmatprep.subr.bf16.mxu0 %v4837_v6  ;;  %4469 = vmatprep.subr.bf16.mxu1 %v4837_v6  ;;  %v4789_v23 = vld [vmem:[%s5733_s5 + $0x3e0] sm:$0xff]  }
 0x161   : > { %v1497_v43 = vrot.slane %v1489_v30, %v4962_v27 }
 0x163   : > { %4290 = vmatpush3.bf16.msra.mxu0 %v4738_v31  ;;  %4470 = vmatpush3.bf16.msra.mxu1 %v4739_v32  ;;  %v2821_v31 = vrot.slane %v2811_v24, %v4962_v27  ;;  %v2843_v32 = vrot.slane %v2812_v25, %v4962_v27  ;;  %v4790_v24 = vld [vmem:[%s5733_s5 + $0x1a8] sm:$0xff]  }
 0x164   : > { %4291 = vmatprep.subr.bf16.mxu0 %v4837_v6  ;;  %4471 = vmatprep.subr.bf16.mxu1 %v4837_v6  ;;  %v4791_v25 = vld [vmem:[%s5733_s5 + $0x3e8] sm:$0xff]  }
 0x165   : > { %v2822_v37 = vcombine.high %v2821_v31, %v2821_v31  ;;  %v2844_v38 = vcombine.high %v2843_v32, %v2843_v32  ;;  %v2851_v46 = vrot.slane %v2843_v32, %v4962_v27  ;;  %v4793_v32 = vld [vmem:[%s5733_s5 + $0x3f0] sm:$0xff]  }
 0x167   : > { %4292 = vmatpush3.bf16.msra.mxu0 %v4740_v33  ;;  %4472 = vmatpush3.bf16.msra.mxu1 %v4741_v34  ;;  %v4768_v33 = vld [vmem:[%s5733_s5 + $0x150] sm:$0xff]   ;;  %v2858_v47 = vrot.slane %v2844_v38, %v4962_v27 }
 0x168   : > { %4293 = vmatprep.subr.bf16.mxu0 %v4837_v6  ;;  %4473 = vmatprep.subr.bf16.mxu1 %v4837_v6  ;;  %v4769_v34 = vld [vmem:[%s5733_s5 + $0x390] sm:$0xff]  }
 0x16b   : > { %4294 = vmatpush3.bf16.msra.mxu0 %v4742_v35  ;;  %4474 = vmatpush3.bf16.msra.mxu1 %v4743_v36  ;;  %v1468_v35 = vcombine.high %v1467_v29, %v1467_v29  ;;  %v1490_v36 = vcombine.high %v1489_v30, %v1489_v30  ;;  %v3000_v30 = vld [vmem:[#allocation2 + $0x24] sm:$0x3] }
 0x16c   : > { %4295 = vmatprep.subr.bf16.mxu0 %v4837_v6  ;;  %4475 = vmatprep.subr.bf16.mxu1 %v4837_v6 }
 0x16d   : > { %v1504_v44 = vrot.slane %v1490_v36, %v4962_v27  ;;  %v4795_v36 = vld [vmem:[%s5733_s5 + $0x3f8] sm:$0xff]  }
 0x16f   : > { %4296 = vmatpush3.bf16.msra.mxu0 %v4744_v41  ;;  %4476 = vmatpush3.bf16.msra.mxu1 %v4745_v42  ;;  %v1475_v41 = vrot.slane %v1467_v29, %v4962_v27  ;;  %v1482_v42 = vrot.slane %v1468_v35, %v4962_v27  ;;  %v2999_v29 = vld [vmem:[#allocation2 + $0x14] sm:$0x3]  ;;  %v4794_v35 = vld [vmem:[%s5733_s5 + $0x1b8] sm:$0xff]  }
 0x170   : > { %4297 = vmatprep.subr.bf16.mxu0 %v4837_v6  ;;  %4477 = vmatprep.subr.bf16.mxu1 %v4837_v6 }
 0x173   : > { %4298 = vmatpush3.bf16.msra.mxu0 %v4746_v45  ;;  %4478 = vmatpush3.bf16.msra.mxu1 %v4747_v14  ;;  %v2829_v45 = vrot.slane %v2821_v31, %v4962_v27  ;;  %v2836_v14 = vrot.slane %v2822_v37, %v4962_v27  ;;  %v4792_v31 = vld [vmem:[%s5733_s5 + $0x1b0] sm:$0xff]  }
 0x174   : > { %4303 = vmatprep.subr.bf16.mxu0 %v4837_v6  ;;  %4483 = vmatprep.subr.bf16.mxu1 %v4837_v6 }
 0x176   : > { %4300 = vmatmul.mubr.bf16.vlgmr.msra.gmra.mrb[4].mxu0 %v1236_v50  ;;  %4480 = vmatmul.mubr.bf16.vlgmr.msra.gmra.mrb[4].mxu1 %v2590_v51  ;;  %v1506_v50 = vshrl.u32 %v1475_v41, 16  ;;  %v1511_v51 = vshll.u32 %v1482_v42, 16 }
 0x177   : > { %4304 = vmatpush3.bf16.msra.mxu0 %v4748_v48  ;;  %4484 = vmatpush3.bf16.msra.mxu1 %v4749_v49  ;;  %v4772_v48 = vld [vmem:[%s5733_s5 + $0x160] sm:$0xff]  }
 0x178   : > { %4305 = vmatprep.subr.bf16.mxu0 %v4837_v6  ;;  %4485 = vmatprep.subr.bf16.mxu1 %v4837_v6  ;;  %v4773_v49 = vld [vmem:[%s5733_s5 + $0x3a0] sm:$0xff]  }
 0x179   : > { %4319 = vmatprep.mubr.msk.bf16.mxu0 %vm4839_vm0, %v4837_v6  ;;  %4499 = vmatprep.mubr.msk.bf16.mxu1 %vm4839_vm0, %v4837_v6 }
 0x17b   : > { %4306 = vmatpush3.bf16.msra.mxu0 %v4750_v52  ;;  %4486 = vmatpush3.bf16.msra.mxu1 %v4751_v53  ;;  %v1515_v52 = vshrl.u32 %v1497_v43, 16  ;;  %v1520_v53 = vshll.u32 %v1504_v44, 16  ;;  %v4798_v43 = vld [vmem:[%s5733_s5 + $0x1c8] sm:$0xff]  }
 0x17c   : > { %4307 = vmatprep.subr.bf16.mxu0 %v4837_v6  ;;  %4487 = vmatprep.subr.bf16.mxu1 %v4837_v6  ;;  %v4799_v44 = vld [vmem:[%s5733_s5 + $0x408] sm:$0xff]  }
 0x17f   : > { %4308 = vmatpush3.bf16.msra.mxu0 %v4752_v54  ;;  %4488 = vmatpush3.bf16.msra.mxu1 %v4753_v55  ;;  %v2860_v54 = vshrl.u32 %v2829_v45, 16  ;;  %v2865_v55 = vshll.u32 %v2836_v14, 16  ;;  %v4800_v45 = vld [vmem:[%s5733_s5 + $0x1d0] sm:$0xff]  }
 0x180   : > { %4309 = vmatprep.subr.bf16.mxu0 %v4837_v6  ;;  %4489 = vmatprep.subr.bf16.mxu1 %v4837_v6  ;;  %v4801_v14 = vld [vmem:[%s5733_s5 + $0x410] sm:$0xff]  }
 0x181   : > { %v2867_v62 = vsel %vm5200_vm15, %v2860_v54, %v2865_v55  ;;  %v3127_v54 = vld [vmem:[#allocation3 + $0xa] sm:$0x3]  ;;  %v3128_v55 = vld [vmem:[#allocation3 + $0x12] sm:$0x3] }
 0x183   : > { %4310 = vmatpush3.bf16.msra.mxu0 %v4754_v56  ;;  %4490 = vmatpush3.bf16.msra.mxu1 %v4755_v57  ;;  %v2869_v56 = vshrl.u32 %v2851_v46, 16  ;;  %v2874_v57 = vshll.u32 %v2858_v47, 16  ;;  %v4802_v46 = vld [vmem:[%s5733_s5 + $0x1d8] sm:$0xff]  }
 0x184   : > { %4311 = vmatprep.subr.bf16.mxu0 %v4837_v6  ;;  %4491 = vmatprep.subr.bf16.mxu1 %v4837_v6  ;;  %v4803_v47 = vld [vmem:[%s5733_s5 + $0x418] sm:$0xff]  }
 0x185   : > { %v2876_v63 = vsel %vm5200_vm15, %v2869_v56, %v2874_v57  ;;  %v4808_v56 = vld [vmem:[%s5733_s5 + $0x1f0] sm:$0xff]  }
 0x186   : > { %v4809_v57 = vld [vmem:[%s5733_s5 + $0x430] sm:$0xff]  }
 0x187   : > { %4312 = vmatpush3.bf16.msra.mxu0 %v4756_v58  ;;  %4492 = vmatpush3.bf16.msra.mxu1 %v4757_v59  ;;  %v4774_v58 = vld [vmem:[%s5733_s5 + $0x168] sm:$0xff]  }
 0x188   : > { %4313 = vmatprep.subr.bf16.mxu0 %v4837_v6  ;;  %4493 = vmatprep.subr.bf16.mxu1 %v4837_v6  ;;  %v4775_v59 = vld [vmem:[%s5733_s5 + $0x3a8] sm:$0xff]  }
 0x18b   : > { %4314 = vmatpush3.bf16.msra.mxu0 %v4758_v60  ;;  %4494 = vmatpush3.bf16.msra.mxu1 %v4759_v61  ;;  %v1513_v60 = vsel %vm5200_vm15, %v1506_v50, %v1511_v51  ;;  %v1522_v61 = vsel %vm5200_vm15, %v1515_v52, %v1520_v53  ;;  %v4806_v50 = vld [vmem:[%s5733_s5 + $0x1e8] sm:$0xff]   ;;  %v1775_v52 = vld [vmem:[#allocation3 + $0x8] sm:$0x3]  ;;  %v1776_v53 = vld [vmem:[#allocation3 + $0x10] sm:$0x3] }
 0x18c   : > { %4315 = vmatprep.subr.bf16.mxu0 %v4837_v6  ;;  %4495 = vmatprep.subr.bf16.mxu1 %v4837_v6  ;;  %v4807_v51 = vld [vmem:[%s5733_s5 + $0x428] sm:$0xff]  }
 0x18f   : > { %4316 = vmatpush3.bf16.msra.mxu0 %v4760_v2  ;;  %4496 = vmatpush3.bf16.msra.mxu1 %v4761_v3  ;;  %v1540_v2 = vcombine.low %v1513_v60, %v1522_v61  ;;  %v2894_v3 = vcombine.low %v2867_v62, %v2876_v63  ;;  %v4810_v60 = vld [vmem:[%s5733_s5 + $0x1f8] sm:$0xff]  }
 0x190   : > { %4317 = vmatprep.subr.bf16.mxu0 %v4837_v6  ;;  %4497 = vmatprep.subr.bf16.mxu1 %v4837_v6  ;;  %v4811_v61 = vld [vmem:[%s5733_s5 + $0x438] sm:$0xff]  }
 0x193   : > { %4318 = vmatpush3.bf16.msra.mxu0 %v4762_v8  ;;  %4498 = vmatpush3.bf16.msra.mxu1 %v4763_v10  ;;  %v1547_v8 = vrot.slane %v1540_v2, %v4962_v27  ;;  %v2901_v10 = vrot.slane %v2894_v3, %v4962_v27  ;;  %v3255_v2 = vld [vmem:[#allocation2 + $0x14] sm:$0x6]  ;;  %v3256_v3 = vld [vmem:[#allocation2 + $0x24] sm:$0x6] }
 0x194   : > { %4323 = vmatprep.subr.bf16.mxu0 %v4837_v6  ;;  %4503 = vmatprep.subr.bf16.mxu1 %v4837_v6 }
 0x195   : > { %v1554_v13 = vrot.slane %v1547_v8, %v4962_v27  ;;  %v2908_v15 = vrot.slane %v2901_v10, %v4962_v27  ;;  %v4813_v8 = vld [vmem:[%s5733_s5 + $0x440] sm:$0xff]  }
 0x196   : > { %4320 = vmatmul.mubr.bf16.vlgmr.msra.gmra.mrb[4].mxu0 %v1364_v18  ;;  %4500 = vmatmul.mubr.bf16.vlgmr.msra.gmra.mrb[4].mxu1 %v2718_v21  ;;  %v4784_v18 = vld [vmem:[%s5733_s5 + $0x190] sm:$0xff]   ;;  %v4787_v21 = vld [vmem:[%s5733_s5 + $0x3d8] sm:$0xff]  }
 0x197   : > { %4324 = vmatpush3.bf16.msra.mxu0 %v4764_v19  ;;  %4504 = vmatpush3.bf16.msra.mxu1 %v4765_v20  ;;  %v4785_v19 = vld [vmem:[%s5733_s5 + $0x3d0] sm:$0xff]   ;;  %v4786_v20 = vld [vmem:[%s5733_s5 + $0x198] sm:$0xff]  }
 0x198   : > { %4325 = vmatprep.subr.bf16.mxu0 %v4837_v6  ;;  %4505 = vmatprep.subr.bf16.mxu1 %v4837_v6 }
 0x199   : > { %4339 = vmatprep.mubr.msk.bf16.mxu0 %vm4839_vm0, %v4837_v6  ;;  %4519 = vmatprep.mubr.msk.bf16.mxu1 %vm4839_vm0, %v4837_v6 }
 0x19b   : > { %4326 = vmatpush3.bf16.msra.mxu0 %v4766_v26  ;;  %4506 = vmatpush3.bf16.msra.mxu1 %v4767_v28  ;;  %v1646_v26 = vld [vmem:[#allocation2 + $0x10] sm:$0x3]  ;;  %v1647_v28 = vld [vmem:[#allocation2 + $0x20] sm:$0x3] }
 0x19c   : > { %4327 = vmatprep.subr.bf16.mxu0 %v4837_v6  ;;  %4507 = vmatprep.subr.bf16.mxu1 %v4837_v6 }
 0x19f   : > { %4328 = vmatpush3.bf16.msra.mxu0 %v4768_v33  ;;  %4508 = vmatpush3.bf16.msra.mxu1 %v4769_v34  ;;  %v3766_v33 = vpack.c.bf16 %v1647_v28, %v1646_v26  ;;  %v3996_v34 = vpack.c.bf16 %v3000_v30, %v2999_v29  ;;  %v4818_v29 = vld [vmem:[%s5733_s5 + $0x218] sm:$0xff]  }
 0x1a0   : > { %4329 = vmatprep.subr.bf16.mxu0 %v4837_v6  ;;  %4509 = vmatprep.subr.bf16.mxu1 %v4837_v6  ;;  %v4819_v30 = vld [vmem:[%s5733_s5 + $0x458] sm:$0xff]  }
 0x1a1   : > { %v1676_v37 = vrot.slane %v3766_v33, %v4962_v27  ;;  %v3029_v38 = vrot.slane %v3996_v34, %v4962_v27 }
 0x1a3   : > { %4330 = vmatpush3.bf16.msra.mxu0 %v4770_v39  ;;  %4510 = vmatpush3.bf16.msra.mxu1 %v4771_v40  ;;  %v4796_v39 = vld [vmem:[%s5733_s5 + $0x1c0] sm:$0xff]   ;;  %v1683_v41 = vrot.slane %v1676_v37, %v4962_v27  ;;  %v3036_v42 = vrot.slane %v3029_v38, %v4962_v27 }
 0x1a4   : > { %4331 = vmatprep.subr.bf16.mxu0 %v4837_v6  ;;  %4511 = vmatprep.subr.bf16.mxu1 %v4837_v6  ;;  %v4797_v40 = vld [vmem:[%s5733_s5 + $0x400] sm:$0xff]  }
 0x1a7   : > { %4332 = vmatpush3.bf16.msra.mxu0 %v4772_v48  ;;  %4512 = vmatpush3.bf16.msra.mxu1 %v4773_v49  ;;  %v4804_v48 = vld [vmem:[%s5733_s5 + $0x1e0] sm:$0xff]  }
 0x1a8   : > { %4333 = vmatprep.subr.bf16.mxu0 %v4837_v6  ;;  %4513 = vmatprep.subr.bf16.mxu1 %v4837_v6  ;;  %v4805_v49 = vld [vmem:[%s5733_s5 + $0x420] sm:$0xff]  }
 0x1ab   : > { %4334 = vmatpush3.bf16.msra.mxu0 %v4774_v58  ;;  %4514 = vmatpush3.bf16.msra.mxu1 %v4775_v59  ;;  %v3791_v58 = vpack.c.bf16 %v1776_v53, %v1775_v52  ;;  %v4021_v59 = vpack.c.bf16 %v3128_v55, %v3127_v54  ;;  %v4824_v54 = vld [vmem:[%s5733_s5 + $0x230] sm:$0xff]  }
 0x1ac   : > { %4335 = vmatprep.subr.bf16.mxu0 %v4837_v6  ;;  %4515 = vmatprep.subr.bf16.mxu1 %v4837_v6  ;;  %v4825_v55 = vld [vmem:[%s5733_s5 + $0x470] sm:$0xff]  }
 0x1ad   : > { %v1805_v62 = vrot.slane %v3791_v58, %v4962_v27  ;;  %v3157_v63 = vrot.slane %v4021_v59, %v4962_v27  ;;  %v4827_v58 = vld [vmem:[%s5733_s5 + $0x478] sm:$0xff]  }
 0x1af   : > { %4336 = vmatpush3.bf16.msra.mxu0 %v4776_v0  ;;  %4516 = vmatpush3.bf16.msra.mxu1 %v4777_v1  ;;  %v1903_v0 = vld [vmem:[#allocation2 + $0x10] sm:$0x6]  ;;  %v1904_v1 = vld [vmem:[#allocation2 + $0x20] sm:$0x6]  ;;  %v3164_v10 = vrot.slane %v3157_v63, %v4962_v27  ;;  %v3826_v63 = vld [vmem:[%s5734_s6] ss:$0 sm:$0xff] }
 0x1b0   : > { %4337 = vmatprep.subr.bf16.mxu0 %v4837_v6  ;;  %4517 = vmatprep.subr.bf16.mxu1 %v4837_v6 }
 0x1b3   : > { %4338 = vmatpush3.bf16.msra.mxu0 %v4778_v4  ;;  %4518 = vmatpush3.bf16.msra.mxu1 %v4779_v5  ;;  %v1812_v4 = vrot.slane %v1805_v62, %v4962_v27  ;;  %v4812_v5 = vld [vmem:[%s5733_s5 + $0x200] sm:$0xff]  }
 0x1b4   : > { %4343 = vmatprep.subr.bf16.mxu0 %v4837_v6  ;;  %4523 = vmatprep.subr.bf16.mxu1 %v4837_v6 }
 0x1b6   : > { %4340 = vmatmul.mubr.bf16.vlgmr.msra.gmra.mrb[4].mxu0 %v1554_v13  ;;  %4520 = vmatmul.mubr.bf16.vlgmr.msra.gmra.mrb[4].mxu1 %v2908_v15  ;;  %v3257_v13 = vpack.c.bf16 %v3255_v2, %v3255_v2  ;;  %v3258_v15 = vpack.c.bf16 %v3256_v3, %v3256_v3 }
 0x1b7   : > { %4344 = vmatpush3.bf16.msra.mxu0 %v4780_v11  ;;  %4524 = vmatpush3.bf16.msra.mxu1 %v4781_v12  ;;  %v1905_v11 = vpack.c.bf16 %v1903_v0, %v1903_v0  ;;  %v1906_v12 = vpack.c.bf16 %v1904_v1, %v1904_v1  ;;  %v3827_v1 = vld [vmem:[%s5735_s7] ss:$0 sm:$0xff] }
 0x1b8   : > { %4345 = vmatprep.subr.bf16.mxu0 %v4837_v6  ;;  %4525 = vmatprep.subr.bf16.mxu1 %v4837_v6 }
 0x1b9   : > { %4359 = vmatprep.mubr.msk.bf16.mxu0 %vm4839_vm0, %v4837_v6  ;;  %4539 = vmatprep.mubr.msk.bf16.mxu1 %vm4839_vm0, %v4837_v6 }
 0x1bb   : > { %4346 = vmatpush3.bf16.msra.mxu0 %v4782_v16  ;;  %4526 = vmatpush3.bf16.msra.mxu1 %v4783_v17  ;;  %v4814_v16 = vld [vmem:[%s5733_s5 + $0x208] sm:$0xff]  }
 0x1bc   : > { %4347 = vmatprep.subr.bf16.mxu0 %v4837_v6  ;;  %4527 = vmatprep.subr.bf16.mxu1 %v4837_v6  ;;  %v4815_v17 = vld [vmem:[%s5733_s5 + $0x448] sm:$0xff]  }
 0x1bf   : > { %4348 = vmatpush3.bf16.msra.mxu0 %v4784_v18  ;;  %4528 = vmatpush3.bf16.msra.mxu1 %v4785_v19  ;;  %v1915_v18 = vrot.slane %v1905_v11, %v4962_v27  ;;  %v1937_v19 = vrot.slane %v1906_v12, %v4962_v27 }
 0x1c0   : > { %4349 = vmatprep.subr.bf16.mxu0 %v4837_v6  ;;  %4529 = vmatprep.subr.bf16.mxu1 %v4837_v6 }
 0x1c1   : > { %v1945_v33 = vrot.slane %v1937_v19, %v4962_v27 }
 0x1c3   : > { %4350 = vmatpush3.bf16.msra.mxu0 %v4786_v20  ;;  %4530 = vmatpush3.bf16.msra.mxu1 %v4787_v21  ;;  %v3267_v20 = vrot.slane %v3257_v13, %v4962_v27  ;;  %v3289_v21 = vrot.slane %v3258_v15, %v4962_v27 }
 0x1c4   : > { %4351 = vmatprep.subr.bf16.mxu0 %v4837_v6  ;;  %4531 = vmatprep.subr.bf16.mxu1 %v4837_v6 }
 0x1c5   : > { %v3268_v26 = vcombine.high %v3267_v20, %v3267_v20  ;;  %v3290_v28 = vcombine.high %v3289_v21, %v3289_v21  ;;  %v3297_v37 = vrot.slane %v3289_v21, %v4962_v27 }
 0x1c7   : > { %4352 = vmatpush3.bf16.msra.mxu0 %v4788_v22  ;;  %4532 = vmatpush3.bf16.msra.mxu1 %v4789_v23  ;;  %v4816_v22 = vld [vmem:[%s5733_s5 + $0x210] sm:$0xff]   ;;  %v3304_v38 = vrot.slane %v3290_v28, %v4962_v27 }
 0x1c8   : > { %4353 = vmatprep.subr.bf16.mxu0 %v4837_v6  ;;  %4533 = vmatprep.subr.bf16.mxu1 %v4837_v6  ;;  %v4817_v23 = vld [vmem:[%s5733_s5 + $0x450] sm:$0xff]  }
 0x1cb   : > { %4354 = vmatpush3.bf16.msra.mxu0 %v4790_v24  ;;  %4534 = vmatpush3.bf16.msra.mxu1 %v4791_v25  ;;  %v1916_v24 = vcombine.high %v1915_v18, %v1915_v18  ;;  %v1938_v25 = vcombine.high %v1937_v19, %v1937_v19 }
 0x1cc   : > { %4355 = vmatprep.subr.bf16.mxu0 %v4837_v6  ;;  %4535 = vmatprep.subr.bf16.mxu1 %v4837_v6 }
 0x1cd   : > { %v1952_v34 = vrot.slane %v1938_v25, %v4962_v27 }
 0x1cf   : > { %4356 = vmatpush3.bf16.msra.mxu0 %v4792_v31  ;;  %4536 = vmatpush3.bf16.msra.mxu1 %v4793_v32  ;;  %v1923_v31 = vrot.slane %v1915_v18, %v4962_v27  ;;  %v1930_v32 = vrot.slane %v1916_v24, %v4962_v27 }
 0x1d0   : > { %4357 = vmatprep.subr.bf16.mxu0 %v4837_v6  ;;  %4537 = vmatprep.subr.bf16.mxu1 %v4837_v6 }
 0x1d3   : > { %4358 = vmatpush3.bf16.msra.mxu0 %v4794_v35  ;;  %4538 = vmatpush3.bf16.msra.mxu1 %v4795_v36  ;;  %v3275_v35 = vrot.slane %v3267_v20, %v4962_v27  ;;  %v3282_v36 = vrot.slane %v3268_v26, %v4962_v27 }
 0x1d4   : > { %4363 = vmatprep.subr.bf16.mxu0 %v4837_v6  ;;  %4543 = vmatprep.subr.bf16.mxu1 %v4837_v6 }
 0x1d6   : > { %4360 = vmatmul.mubr.bf16.vlgmr.msra.gmra.mrb[4].mxu0 %v1683_v41  ;;  %4540 = vmatmul.mubr.bf16.vlgmr.msra.gmra.mrb[4].mxu1 %v3036_v42  ;;  %v1954_v41 = vshrl.u32 %v1923_v31, 16  ;;  %v1959_v42 = vshll.u32 %v1930_v32, 16 }
 0x1d7   : > { %4364 = vmatpush3.bf16.msra.mxu0 %v4796_v39  ;;  %4544 = vmatpush3.bf16.msra.mxu1 %v4797_v40  ;;  %v4820_v39 = vld [vmem:[%s5733_s5 + $0x220] sm:$0xff]  }
 0x1d8   : > { %4365 = vmatprep.subr.bf16.mxu0 %v4837_v6  ;;  %4545 = vmatprep.subr.bf16.mxu1 %v4837_v6  ;;  %v4821_v40 = vld [vmem:[%s5733_s5 + $0x460] sm:$0xff]  }
 0x1d9   : > { %4379 = vmatprep.mubr.msk.bf16.mxu0 %vm4839_vm0, %v4837_v6  ;;  %4559 = vmatprep.mubr.msk.bf16.mxu1 %vm4839_vm0, %v4837_v6 }
 0x1db   : > { %4366 = vmatpush3.bf16.msra.mxu0 %v4798_v43  ;;  %4546 = vmatpush3.bf16.msra.mxu1 %v4799_v44  ;;  %v1963_v43 = vshrl.u32 %v1945_v33, 16  ;;  %v1968_v44 = vshll.u32 %v1952_v34, 16 }
 0x1dc   : > { %4367 = vmatprep.subr.bf16.mxu0 %v4837_v6  ;;  %4547 = vmatprep.subr.bf16.mxu1 %v4837_v6 }
 0x1df   : > { %4368 = vmatpush3.bf16.msra.mxu0 %v4800_v45  ;;  %4548 = vmatpush3.bf16.msra.mxu1 %v4801_v14  ;;  %v3306_v45 = vshrl.u32 %v3275_v35, 16  ;;  %v3311_v14 = vshll.u32 %v3282_v36, 16 }
 0x1e0   : > { %4369 = vmatprep.subr.bf16.mxu0 %v4837_v6  ;;  %4549 = vmatprep.subr.bf16.mxu1 %v4837_v6 }
 0x1e1   : > { %v3313_v52 = vsel %vm5200_vm15, %v3306_v45, %v3311_v14 }
 0x1e3   : > { %4370 = vmatpush3.bf16.msra.mxu0 %v4802_v46  ;;  %4550 = vmatpush3.bf16.msra.mxu1 %v4803_v47  ;;  %v3315_v46 = vshrl.u32 %v3297_v37, 16  ;;  %v3320_v47 = vshll.u32 %v3304_v38, 16 }
 0x1e4   : > { %4371 = vmatprep.subr.bf16.mxu0 %v4837_v6  ;;  %4551 = vmatprep.subr.bf16.mxu1 %v4837_v6 }
 0x1e5   : > { %v3322_v53 = vsel %vm5200_vm15, %v3315_v46, %v3320_v47 }
 0x1e7   : > { %4372 = vmatpush3.bf16.msra.mxu0 %v4804_v48  ;;  %4552 = vmatpush3.bf16.msra.mxu1 %v4805_v49  ;;  %v4822_v48 = vld [vmem:[%s5733_s5 + $0x228] sm:$0xff]  }
 0x1e8   : > { %4373 = vmatprep.subr.bf16.mxu0 %v4837_v6  ;;  %4553 = vmatprep.subr.bf16.mxu1 %v4837_v6  ;;  %v4823_v49 = vld [vmem:[%s5733_s5 + $0x468] sm:$0xff]  }
 0x1eb   : > { %4374 = vmatpush3.bf16.msra.mxu0 %v4806_v50  ;;  %4554 = vmatpush3.bf16.msra.mxu1 %v4807_v51  ;;  %v1961_v50 = vsel %vm5200_vm15, %v1954_v41, %v1959_v42  ;;  %v1970_v51 = vsel %vm5200_vm15, %v1963_v43, %v1968_v44 }
 0x1ec   : > { %4375 = vmatprep.subr.bf16.mxu0 %v4837_v6  ;;  %4555 = vmatprep.subr.bf16.mxu1 %v4837_v6 }
 0x1ef   : > { %4376 = vmatpush3.bf16.msra.mxu0 %v4808_v56  ;;  %4556 = vmatpush3.bf16.msra.mxu1 %v4809_v57  ;;  %v1988_v56 = vcombine.low %v1961_v50, %v1970_v51  ;;  %v3340_v57 = vcombine.low %v3313_v52, %v3322_v53 }
 0x1f0   : > { %4377 = vmatprep.subr.bf16.mxu0 %v4837_v6  ;;  %4557 = vmatprep.subr.bf16.mxu1 %v4837_v6 }
 0x1f1   : > { %v1995_v59 = vrot.slane %v1988_v56, %v4962_v27 }
 0x1f3   : > { %4378 = vmatpush3.bf16.msra.mxu0 %v4810_v60  ;;  %4558 = vmatpush3.bf16.msra.mxu1 %v4811_v61  ;;  %v3347_v60 = vrot.slane %v3340_v57, %v4962_v27  ;;  %v2002_v61 = vrot.slane %v1995_v59, %v4962_v27 }
 0x1f4   : > { %4383 = vmatprep.subr.bf16.mxu0 %v4837_v6  ;;  %4563 = vmatprep.subr.bf16.mxu1 %v4837_v6 }
 0x1f5   : > { %v3354_v62 = vrot.slane %v3347_v60, %v4962_v27  ;;  %v4057_v27 = vld [vmem:[%s5735_s7 + $0x1] ss:$0 sm:$0xff] }
 0x1f6   : > { %4380 = vmatmul.mubr.bf16.vlgmr.msra.gmra.mrb[4].mxu0 %v1812_v4  ;;  %4560 = vmatmul.mubr.bf16.vlgmr.msra.gmra.mrb[4].mxu1 %v3164_v10 }
 0x1f7   : > { %4384 = vmatpush3.bf16.msra.mxu0 %v4812_v5  ;;  %4564 = vmatpush3.bf16.msra.mxu1 %v4813_v8 }
 0x1f8   : > { %4385 = vmatprep.subr.bf16.mxu0 %v4837_v6  ;;  %4565 = vmatprep.subr.bf16.mxu1 %v4837_v6 }
 0x1f9   : > { %4399 = vmatprep.mubr.msk.bf16.mxu0 %vm4839_vm0, %v4837_v6  ;;  %4579 = vmatprep.mubr.msk.bf16.mxu1 %vm4839_vm0, %v4837_v6  ;;  %vm3463_vm0 = vcmask 1043456  }
 0x1fb   : > { %4386 = vmatpush3.bf16.msra.mxu0 %v4814_v16  ;;  %4566 = vmatpush3.bf16.msra.mxu1 %v4815_v17 }
 0x1fc   : > { %4387 = vmatprep.subr.bf16.mxu0 %v4837_v6  ;;  %4567 = vmatprep.subr.bf16.mxu1 %v4837_v6 }
 0x1ff   : > { %4388 = vmatpush3.bf16.msra.mxu0 %v4816_v22  ;;  %4568 = vmatpush3.bf16.msra.mxu1 %v4817_v23 }
 0x200   : > { %4389 = vmatprep.subr.bf16.mxu0 %v4837_v6  ;;  %4569 = vmatprep.subr.bf16.mxu1 %v4837_v6 }
 0x203   : > { %4390 = vmatpush3.bf16.msra.mxu0 %v4818_v29  ;;  %4570 = vmatpush3.bf16.msra.mxu1 %v4819_v30 }
 0x204   : > { %4391 = vmatprep.subr.bf16.mxu0 %v4837_v6  ;;  %4571 = vmatprep.subr.bf16.mxu1 %v4837_v6 }
 0x207   : > { %4392 = vmatpush3.bf16.msra.mxu0 %v4820_v39  ;;  %4572 = vmatpush3.bf16.msra.mxu1 %v4821_v40 }
 0x208   : > { %4393 = vmatprep.subr.bf16.mxu0 %v4837_v6  ;;  %4573 = vmatprep.subr.bf16.mxu1 %v4837_v6 }
 0x20b   : > { %4394 = vmatpush3.bf16.msra.mxu0 %v4822_v48  ;;  %4574 = vmatpush3.bf16.msra.mxu1 %v4823_v49 }
 0x20c   : > { %4395 = vmatprep.subr.bf16.mxu0 %v4837_v6  ;;  %4575 = vmatprep.subr.bf16.mxu1 %v4837_v6 }
 0x20f   : > { %4396 = vmatpush3.bf16.msra.mxu0 %v4824_v54  ;;  %4576 = vmatpush3.bf16.msra.mxu1 %v4825_v55 }
 0x210   : > { %4397 = vmatprep.subr.bf16.mxu0 %v4837_v6  ;;  %4577 = vmatprep.subr.bf16.mxu1 %v4837_v6  ;;  %v4056_v6 = vld [vmem:[%s5734_s6 + $0x1] ss:$0 sm:$0xff] }
 0x213   : > { %4398 = vmatpush3.bf16.msra.mxu0 %v4826_v7  ;;  %4578 = vmatpush3.bf16.msra.mxu1 %v4827_v58 }
 0x216   : > { %4400 = vmatmul.mubr.bf16.vlgmr.msra.gmra.mrb[4].mxu0 %v2002_v61  ;;  %4580 = vmatmul.mubr.bf16.vlgmr.msra.gmra.mrb[4].mxu1 %v3354_v62 }
 0x2e9   : > { %v2086_v0 = vpop.f32.mrb[4].mxu0  ;;  %v3438_v2 = vpop.f32.mrb[4].mxu1 }
 0x2ea   : > { %v2100_v3 = vmul.f32 %v3826_v63, %v2086_v0  ;;  %v3452_v4 = vmul.f32 %v4056_v6, %v3438_v2  ;;  %v4401_v5 = vpop.f32.mrb[5].mxu0  ;;  %v4581_v8 = vpop.f32.mrb[5].mxu1 }
 0x2eb   : > { %v2089_v10 = vpop.f32.mrb[6].mxu0  ;;  %v3441_v11 = vpop.f32.mrb[6].mxu1 }
 0x2ec   : > { %v2108_v12 = vadd.f32 %v3827_v1, %v2100_v3  ;;  %v3460_v13 = vadd.f32 %v4057_v27, %v3452_v4  ;;  %v4402_v15 = vpop.f32.mrb[7].mxu0  ;;  %v4582_v16 = vpop.f32.mrb[7].mxu1 }
 0x2ee   : > { %v3461_v17 = vpack.c.bf16 %v2108_v12, %v2108_v12  ;;  %v3464_v18 = vsel %vm3463_vm0, %v2108_v12, 0.0  ;;  %v3477_v19 = vpack.c.bf16 %v3460_v13, %v3460_v13  ;;  %v3479_v20 = vsel %vm3463_vm0, %v3460_v13, 0.0 }
 0x2ef   : > { %v3465_v21 = vrot.slane %v3464_v18, 4  ;;  %v3480_v22 = vrot.slane %v3479_v20, 4 }
 0x2f0   : > { %3462 = vst [vmem:[%s353_s28] sm:$0x3] %v3461_v17  ;;  %3478 = vst [vmem:[%s353_s28 + $0x2] sm:$0x3] %v3477_v19 }
 0x2f1   : > { %v3466_v23 = vadd.f32 %v3465_v21, %v3464_v18  ;;  %v3481_v24 = vadd.f32 %v3480_v22, %v3479_v20 }
 0x2f3   : > { %v3467_v25 = vrot.slane %v3466_v23, 2  ;;  %v3482_v26 = vrot.slane %v3481_v24, 2 }
 0x2f5   : > { %v3468_v28 = vadd.f32 %v3467_v25, %v3466_v23  ;;  %v3483_v29 = vadd.f32 %v3482_v26, %v3481_v24 }
 0x2f7   : > { %v3469_v30 = vrot.slane %v3468_v28, 1  ;;  %v3484_v31 = vrot.slane %v3483_v29, 1 }
 0x2f9   : > { %v3470_v32 = vadd.f32 %v3469_v30, %v3468_v28  ;;  %v3485_v33 = vadd.f32 %v3484_v31, %v3483_v29 }
 0x2fb   : > { %v3471_v34 = vmul.f32 0.25, %v3470_v32  ;;  %v3486_v35 = vmul.f32 0.25, %v3485_v33 }
 0x2fd   : > { %3476 = vst.msk [vmem:[%s357_s12] sm:$0x1] %vm3474_vm1, %v3471_v34  ;;  %3487 = vst.msk [vmem:[%s357_s12 + $0x1] sm:$0x1] %vm3474_vm1, %v3486_v35 }
 0x2fe PF: > { %s20_s30 = sadd.s32 1, %s4834_s30  }
 0x2ff   : > { %p17_p4 = scmp.ge.s32.totalorder %s20_s30, 4  }
 0x301   :  { %19 = sbr.rel (!%p17_p4) target bundleno = 1 (0x1), region = 118 }

</bundles_post_ra>
